<compile_context>
chip_gen: v7x
topology: tpu7x:2x2x1
jax: 0.10.0
libtpu: 0.0.40
codegen_flags: <defaults>
</compile_context>

<pallas_src>
import functools

import jax
import jax.numpy as jnp
from jax.experimental import pallas as pl
from jax.experimental.pallas import tpu as pltpu


def _conv3d_bn_relu_kernel(x0_ref, x1_ref, x2_ref, w_ref, s_ref, b_ref, o_ref,
                           *scratch, ho, wo, fold_kw):
    # x{k}_ref: (1, 1, Hp, Wp, Cin) bf16 -- input depth plane d0 + k
    # w_ref:    fold_kw: (9, 3*Cin, Cout) bf16, taps ordered kd*3+kh, kw in K
    #           else:    (27, Cin, Cout) bf16, taps ordered kd*9+kh*3+kw
    # s_ref, b_ref: (1, Cout) f32 folded BatchNorm scale / bias
    # o_ref:    (1, 1, Ho, Wo, Cout) one output depth plane
    cout = w_ref.shape[-1]
    planes = (x0_ref, x1_ref, x2_ref)
    acc = jnp.zeros((ho * wo, cout), jnp.float32)

    if fold_kw:
        # Deep matmuls: pack the 3 kw taps along channels (lane axis) into a
        # ping-pong VMEM patch buffer -> 9 MXU matmuls with K = 3*Cin.
        patch_ref, = scratch
        cin = w_ref.shape[1] // 3
        for kd in range(3):
            for kh in range(3):
                slot = (kd * 3 + kh) % 2          # ping-pong to keep MXU/copies overlapped
                for kw in range(3):
                    win = planes[kd][0, 0, pl.ds(kh, ho), pl.ds(kw, wo), :]
                    patch_ref[slot, :, pl.ds(kw * cin, cin)] = win.reshape(ho * wo, cin)
                acc = acc + jnp.dot(
                    patch_ref[slot], w_ref[kd * 3 + kh],
                    preferred_element_type=jnp.float32)
    else:
        # Cin not lane-aligned (e.g. 64): keep 27 shallow K=Cin matmuls.
        # TODO(synk): lane-pack the kw taps for the 64-channel stages as well.
        cin = w_ref.shape[1]
        for kd in range(3):
            for kh in range(3):
                for kw in range(3):
                    win = planes[kd][0, 0, pl.ds(kh, ho), pl.ds(kw, wo), :]
                    acc = acc + jnp.dot(
                        win.reshape(ho * wo, cin), w_ref[kd * 9 + kh * 3 + kw],
                        preferred_element_type=jnp.float32)

    # Folded BN + ReLU epilogue in f32, then a single plane store.
    # (Cout=64 < 128 lanes -> masked stores; epilogue is small vs. the matmuls.)
    out = jnp.maximum(acc * s_ref[0] + b_ref[0], 0.0)
    o_ref[0, 0] = out.reshape(ho, wo, cout).astype(o_ref.dtype)


def conv3d_bn_relu(x, w, scale, bias, *, stride_d, pad, out_dtype=jnp.bfloat16):
    """Fused ZeroPad3d + Conv3d(3x3x3, stride=(stride_d,1,1), no bias) + BN + ReLU.

    x: (N, D, H, W, Cin) channels-last
    w: (3, 3, 3, Cin, Cout)   (kd, kh, kw, Cin, Cout)
    pad: (pad_d, pad_h, pad_w) symmetric zero padding (skipped if all zero).
    Compute is bf16 on the MXU with f32 accumulation; BN/ReLU applied in f32.
    Returns (N, Do, Ho, Wo, Cout) in `out_dtype`.
    """
    pd, ph, pw = pad
    x = x.astype(jnp.bfloat16)
    if pd or ph or pw:
        # TODO(synk): fuse the H/W zero-pad of stages 2/3 into the producing
        # kernel's out_spec to drop these full-volume HBM round trips too.
        x = jnp.pad(x, ((0, 0), (pd, pd), (ph, ph), (pw, pw), (0, 0)))

    n, dp, hp, wp, cin = x.shape
    cout = w.shape[-1]
    ho, wo = hp - 2, wp - 2
    do = (dp - 3) // stride_d + 1

    fold_kw = (cin % 128 == 0)
    if fold_kw:
        # (kd,kh,kw,Cin,Cout) -> (kd*3+kh, kw*Cin+ci, Cout): kw folded into K.
        wk = w.reshape(9, 3 * cin, cout).astype(jnp.bfloat16)
        scratch_shapes = [pltpu.VMEM((2, ho * wo, 3 * cin), jnp.bfloat16)]
    else:
        wk = w.reshape(27, cin, cout).astype(jnp.bfloat16)
        scratch_shapes = []
    s = scale.reshape(1, cout).astype(jnp.float32)
    b = bias.reshape(1, cout).astype(jnp.float32)

    def plane_spec(kd):
        # 3-deep depth window per grid step, streamed as three depth planes of
        # the same HBM array (block size 1 along D => element offsets allowed).
        return pl.BlockSpec(
            (1, 1, hp, wp, cin),
            lambda i, j, kd=kd: (i, j * stride_d + kd, 0, 0, 0),
        )

    # Explicit per-stage VMEM budget (bf16, double-buffered) with headroom so the
    # pipeline stays resident on v7x (64 MiB) and v5e (16 MiB default scoped).
    # TODO(synk): add an H-tile grid axis (with halo) for real VoxelNet grids
    # where a full (3, Hp, Wp, Cin) depth window no longer fits in VMEM.
    out_itemsize = jnp.dtype(out_dtype).itemsize
    vmem_need = (
        3 * hp * wp * cin * 2 * 2            # 3 bf16 input planes, double-buffered
        + wk.size * 2 * 2                    # bf16 folded weights, double-buffered
        + 2 * cout * 4 * 2                   # scale / bias
        + ho * wo * cout * out_itemsize * 2  # output plane, double-buffered
        + (2 * ho * wo * 3 * cin * 2 if fold_kw else 0)   # ping-pong patch scratch
    )
    vmem_limit = int(min(max(4 * vmem_need, 8 * 1024 * 1024), 48 * 1024 * 1024))

    kernel = functools.partial(_conv3d_bn_relu_kernel, ho=ho, wo=wo, fold_kw=fold_kw)

    return pl.pallas_call(
        kernel,
        out_shape=jax.ShapeDtypeStruct((n, do, ho, wo, cout), out_dtype),
        grid=(n, do),
        in_specs=[
            plane_spec(0),
            plane_spec(1),
            plane_spec(2),
            pl.BlockSpec(wk.shape, lambda i, j: (0, 0, 0)),
            pl.BlockSpec((1, cout), lambda i, j: (0, 0)),
            pl.BlockSpec((1, cout), lambda i, j: (0, 0)),
        ],
        out_specs=pl.BlockSpec((1, 1, ho, wo, cout), lambda i, j: (i, j, 0, 0, 0)),
        scratch_shapes=scratch_shapes,
        compiler_params=pltpu.CompilerParams(
            dimension_semantics=("parallel", "parallel"),
            vmem_limit_bytes=vmem_limit,
        ),
    )(x, x, x, wk, s, b)


class MiddleExtractorPallas:
    """JAX/Pallas re-implementation of MiddleExtractor(use_norm=True).

    middle_conv = [ZeroPad3d(1), Conv3d(Cin,64,3,stride=(2,1,1)), BN, ReLU,
                   ZeroPad3d([1,1,1,1,0,0]), Conv3d(64,64,3,stride=1), BN, ReLU,
                   ZeroPad3d(1), Conv3d(64,64,3,stride=(2,1,1)), BN, ReLU]
    BatchNorm uses inference (running-stats) semantics, folded into a per-channel
    scale/bias.  Weight layout here is (kd,kh,kw,Cin,Cout); PyTorch checkpoints
    (Cout,Cin,kd,kh,kw) must be transposed when porting real weights.
    """

    def __init__(self, output_shape, use_norm=True, num_input_features=128,
                 num_filters_down1=(64,), num_filters_down2=(64, 64),
                 name="MiddleExtractor", key=None):
        del use_norm, num_filters_down1, num_filters_down2  # mirrors torch defaults
        self.name = name
        self.voxel_output_shape = list(output_shape)
        if key is None:
            key = jax.random.PRNGKey(0)

        cins = [num_input_features, 64, 64]
        couts = [64, 64, 64]
        eps = 1e-3
        self.params = []
        for ci, co in zip(cins, couts):
            key, kw_, kg, kb, km, kv = jax.random.split(key, 6)
            w = jax.random.normal(kw_, (3, 3, 3, ci, co), jnp.float32) * 0.02
            gamma = 1.0 + 0.1 * jax.random.normal(kg, (co,), jnp.float32)
            beta = 0.1 * jax.random.normal(kb, (co,), jnp.float32)
            mean = 0.1 * jax.random.normal(km, (co,), jnp.float32)
            var = 1.0 + 0.1 * jnp.abs(jax.random.normal(kv, (co,), jnp.float32))
            scale = gamma / jnp.sqrt(var + eps)
            bias = beta - mean * scale
            self.params.append((w, scale, bias))

        # (stride_d, (pad_d, pad_h, pad_w)) per conv stage.  Stage 1's
        # ZeroPad3d(1) is fused into the scatter below, hence pad=(0,0,0) here.
        self.layer_cfg = [(2, (0, 0, 0)), (1, (0, 1, 1)), (2, (1, 1, 1))]

    def __call__(self, voxel_features, coors, batch_size):
        D, H, W, C = self.voxel_output_shape[1:5]
        # scatter_nd fused with the first ZeroPad3d(1): scatter straight into a
        # (+1,+1,+1)-offset pre-padded bf16 channels-last buffer.
        dense = jnp.zeros((batch_size, D + 2, H + 2, W + 2, C), jnp.bfloat16)
        dense = dense.at[
            coors[:, 0], coors[:, 1] + 1, coors[:, 2] + 1, coors[:, 3] + 1
        ].set(voxel_features.astype(jnp.bfloat16))
        # PyTorch permutes to NCDHW here; we stay NDHWC (see layout comment).

        x = dense
        n_stages = len(self.params)
        for idx, ((w, scale, bias), (sd, pad)) in enumerate(
                zip(self.params, self.layer_cfg)):
            out_dtype = jnp.float32 if idx == n_stages - 1 else jnp.bfloat16
            x = conv3d_bn_relu(x, w, scale, bias, stride_d=sd, pad=pad,
                               out_dtype=out_dtype)

        # Back to PyTorch output convention: NCDHW -> (N, C*D, H, W).
        # TODO(synk): fold this small relayout into stage 3's out_spec if the
        # downstream RPN cannot consume channels-last directly.
        n, d, h, w_, c = x.shape
        x = jnp.transpose(x, (0, 4, 1, 2, 3))  # (N, C, D, H, W)
        return x.reshape(n, c * d, h, w_)


if __name__ == "__main__":
    key = jax.random.PRNGKey(0)
    k_coor, k_feat, k_param = jax.random.split(key, 3)

    # Small but shape-consistent problem: dense voxel grid (B, D, H, W, C)
    B, D, H, W, C = 2, 12, 16, 16, 128
    output_shape = [B, D, H, W, C]

    num_voxels = 64
    flat = jax.random.choice(k_coor, B * D * H * W, (num_voxels,), replace=False)
    coors = jnp.stack(jnp.unravel_index(flat, (B, D, H, W)), axis=-1).astype(jnp.int32)
    voxel_features = jax.random.normal(k_feat, (num_voxels, C), jnp.float32)

    model = MiddleExtractorPallas(output_shape, num_input_features=C, key=k_param)
    out = model(voxel_features, coors, B)
    jax.block_until_ready(out)

    # Expected final shape: (B, 64 * D_final, H, W) = (2, 128, 16, 16) for D=12
    assert out.shape == (B, 64 * 2, H, W), out.shape
    assert out.dtype == jnp.float32, out.dtype
    print("KERNEL_OK")
</pallas_src>

<mosaic_0001>
module attributes {stable_mosaic.version = 11 : i64} {
  func.func @_conv3d_bn_relu_kernel(%arg0: i32, %arg1: i32, %arg2: memref<1x1x18x18x128xbf16, #tpu.memory_space<vmem>>, %arg3: memref<1x1x18x18x128xbf16, #tpu.memory_space<vmem>>, %arg4: memref<1x1x18x18x128xbf16, #tpu.memory_space<vmem>>, %arg5: memref<9x384x64xbf16, #tpu.memory_space<vmem>>, %arg6: memref<1x64xf32, #tpu.memory_space<vmem>>, %arg7: memref<1x64xf32, #tpu.memory_space<vmem>>, %arg8: memref<1x1x16x16x64xbf16, #tpu.memory_space<vmem>>, %arg9: memref<2x256x384xbf16, #tpu.memory_space<vmem>>) attributes {dimension_semantics = [#tpu.dimension_semantics<parallel>, #tpu.dimension_semantics<parallel>], iteration_bounds = array<i64: 2, 6>, scalar_prefetch = 0 : i64, scratch_operands = 1 : i64, tpu.core_type = #tpu.core_type<tc>, window_params = [{transform_indices = @transform_0, window_bounds = array<i64: 1, 1, 18, 18, 128>}, {transform_indices = @transform_1, window_bounds = array<i64: 1, 1, 18, 18, 128>}, {transform_indices = @transform_2, window_bounds = array<i64: 1, 1, 18, 18, 128>}, {pipeline_mode = #tpu.pipeline_mode<synchronous>, transform_indices = @transform_3, window_bounds = array<i64: 9, 384, 64>}, {pipeline_mode = #tpu.pipeline_mode<synchronous>, transform_indices = @transform_4, window_bounds = array<i64: 1, 64>}, {pipeline_mode = #tpu.pipeline_mode<synchronous>, transform_indices = @transform_5, window_bounds = array<i64: 1, 64>}, {transform_indices = @transform_6, window_bounds = array<i64: 1, 1, 16, 16, 64>}]} {
    %cst = arith.constant 0.000000e+00 : f32
    %0 = vector.broadcast %cst : f32 to vector<256x64xf32>
    %c0 = arith.constant 0 : index
    %c0_0 = arith.constant 0 : index
    %c0_1 = arith.constant 0 : index
    %c0_2 = arith.constant 0 : index
    %c0_3 = arith.constant 0 : index
    %1 = vector.load %arg2[%c0, %c0_0, %c0_1, %c0_2, %c0_3] : memref<1x1x18x18x128xbf16, #tpu.memory_space<vmem>>, vector<1x1x16x16x128xbf16>
    %2 = vector.shape_cast %1 : vector<1x1x16x16x128xbf16> to vector<16x16x128xbf16>
    %3 = vector.shape_cast %2 : vector<16x16x128xbf16> to vector<256x128xbf16>
    %c0_4 = arith.constant 0 : index
    %c0_5 = arith.constant 0 : index
    %c0_6 = arith.constant 0 : index
    %4 = vector.load %arg9[%c0_4, %c0_5, %c0_6] : memref<2x256x384xbf16, #tpu.memory_space<vmem>>, vector<1x256x128xbf16>
    %5 = vector.shape_cast %4 : vector<1x256x128xbf16> to vector<256x128xbf16>
    %6 = vector.shape_cast %3 : vector<256x128xbf16> to vector<1x256x128xbf16>
    tpu.vector_store %arg9[%c0_4, %c0_5, %c0_6], %6 {strides = array<i32>} : memref<2x256x384xbf16, #tpu.memory_space<vmem>>, vector<1x256x128xbf16>,
    %c0_7 = arith.constant 0 : index
    %c0_8 = arith.constant 0 : index
    %c0_9 = arith.constant 0 : index
    %c1 = arith.constant 1 : index
    %c0_10 = arith.constant 0 : index
    %7 = vector.load %arg2[%c0_7, %c0_8, %c0_9, %c1, %c0_10] : memref<1x1x18x18x128xbf16, #tpu.memory_space<vmem>>, vector<1x1x16x16x128xbf16>
    %8 = vector.shape_cast %7 : vector<1x1x16x16x128xbf16> to vector<16x16x128xbf16>
    %9 = vector.shape_cast %8 : vector<16x16x128xbf16> to vector<256x128xbf16>
    %c0_11 = arith.constant 0 : index
    %c0_12 = arith.constant 0 : index
    %c128 = arith.constant 128 : index
    %10 = vector.load %arg9[%c0_11, %c0_12, %c128] : memref<2x256x384xbf16, #tpu.memory_space<vmem>>, vector<1x256x128xbf16>
    %11 = vector.shape_cast %10 : vector<1x256x128xbf16> to vector<256x128xbf16>
    %12 = vector.shape_cast %9 : vector<256x128xbf16> to vector<1x256x128xbf16>
    tpu.vector_store %arg9[%c0_11, %c0_12, %c128], %12 {strides = array<i32>} : memref<2x256x384xbf16, #tpu.memory_space<vmem>>, vector<1x256x128xbf16>,
    %c0_13 = arith.constant 0 : index
    %c0_14 = arith.constant 0 : index
    %c0_15 = arith.constant 0 : index
    %c2 = arith.constant 2 : index
    %c0_16 = arith.constant 0 : index
    %13 = vector.load %arg2[%c0_13, %c0_14, %c0_15, %c2, %c0_16] : memref<1x1x18x18x128xbf16, #tpu.memory_space<vmem>>, vector<1x1x16x16x128xbf16>
    %14 = vector.shape_cast %13 : vector<1x1x16x16x128xbf16> to vector<16x16x128xbf16>
    %15 = vector.shape_cast %14 : vector<16x16x128xbf16> to vector<256x128xbf16>
    %c0_17 = arith.constant 0 : index
    %c0_18 = arith.constant 0 : index
    %c256 = arith.constant 256 : index
    %16 = vector.load %arg9[%c0_17, %c0_18, %c256] : memref<2x256x384xbf16, #tpu.memory_space<vmem>>, vector<1x256x128xbf16>
    %17 = vector.shape_cast %16 : vector<1x256x128xbf16> to vector<256x128xbf16>
    %18 = vector.shape_cast %15 : vector<256x128xbf16> to vector<1x256x128xbf16>
    tpu.vector_store %arg9[%c0_17, %c0_18, %c256], %18 {strides = array<i32>} : memref<2x256x384xbf16, #tpu.memory_space<vmem>>, vector<1x256x128xbf16>,
    %c0_19 = arith.constant 0 : index
    %c0_20 = arith.constant 0 : index
    %c0_21 = arith.constant 0 : index
    %19 = vector.load %arg9[%c0_19, %c0_20, %c0_21] : memref<2x256x384xbf16, #tpu.memory_space<vmem>>, vector<1x256x384xbf16>
    %20 = vector.shape_cast %19 : vector<1x256x384xbf16> to vector<256x384xbf16>
    %c0_22 = arith.constant 0 : index
    %c0_23 = arith.constant 0 : index
    %c0_24 = arith.constant 0 : index
    %21 = vector.load %arg5[%c0_22, %c0_23, %c0_24] : memref<9x384x64xbf16, #tpu.memory_space<vmem>>, vector<1x384x64xbf16>
    %22 = vector.shape_cast %21 : vector<1x384x64xbf16> to vector<384x64xbf16>
    %cst_25 = arith.constant dense<0.000000e+00> : vector<256x64xf32>
    %23 = tpu.matmul %20, %22, %cst_25 {dimension_numbers = #tpu.dot_dimension_numbers<[1], [0], [0], [1], [0, 0, 1, 1], [], []>} : vector<256x384xbf16>, vector<384x64xbf16>, vector<256x64xf32> -> vector<256x64xf32>
    %24 = arith.addf %0, %23 : vector<256x64xf32>
    %c0_26 = arith.constant 0 : index
    %c0_27 = arith.constant 0 : index
    %c1_28 = arith.constant 1 : index
    %c0_29 = arith.constant 0 : index
    %c0_30 = arith.constant 0 : index
    %25 = vector.load %arg2[%c0_26, %c0_27, %c1_28, %c0_29, %c0_30] : memref<1x1x18x18x128xbf16, #tpu.memory_space<vmem>>, vector<1x1x16x16x128xbf16>
    %26 = vector.shape_cast %25 : vector<1x1x16x16x128xbf16> to vector<16x16x128xbf16>
    %27 = vector.shape_cast %26 : vector<16x16x128xbf16> to vector<256x128xbf16>
    %c1_31 = arith.constant 1 : index
    %c0_32 = arith.constant 0 : index
    %c0_33 = arith.constant 0 : index
    %28 = vector.load %arg9[%c1_31, %c0_32, %c0_33] : memref<2x256x384xbf16, #tpu.memory_space<vmem>>, vector<1x256x128xbf16>
    %29 = vector.shape_cast %28 : vector<1x256x128xbf16> to vector<256x128xbf16>
    %30 = vector.shape_cast %27 : vector<256x128xbf16> to vector<1x256x128xbf16>
    tpu.vector_store %arg9[%c1_31, %c0_32, %c0_33], %30 {strides = array<i32>} : memref<2x256x384xbf16, #tpu.memory_space<vmem>>, vector<1x256x128xbf16>,
    %c0_34 = arith.constant 0 : index
    %c0_35 = arith.constant 0 : index
    %c1_36 = arith.constant 1 : index
    %c1_37 = arith.constant 1 : index
    %c0_38 = arith.constant 0 : index
    %31 = vector.load %arg2[%c0_34, %c0_35, %c1_36, %c1_37, %c0_38] : memref<1x1x18x18x128xbf16, #tpu.memory_space<vmem>>, vector<1x1x16x16x128xbf16>
    %32 = vector.shape_cast %31 : vector<1x1x16x16x128xbf16> to vector<16x16x128xbf16>
    %33 = vector.shape_cast %32 : vector<16x16x128xbf16> to vector<256x128xbf16>
    %c1_39 = arith.constant 1 : index
    %c0_40 = arith.constant 0 : index
    %c128_41 = arith.constant 128 : index
    %34 = vector.load %arg9[%c1_39, %c0_40, %c128_41] : memref<2x256x384xbf16, #tpu.memory_space<vmem>>, vector<1x256x128xbf16>
    %35 = vector.shape_cast %34 : vector<1x256x128xbf16> to vector<256x128xbf16>
    %36 = vector.shape_cast %33 : vector<256x128xbf16> to vector<1x256x128xbf16>
    tpu.vector_store %arg9[%c1_39, %c0_40, %c128_41], %36 {strides = array<i32>} : memref<2x256x384xbf16, #tpu.memory_space<vmem>>, vector<1x256x128xbf16>,
    %c0_42 = arith.constant 0 : index
    %c0_43 = arith.constant 0 : index
    %c1_44 = arith.constant 1 : index
    %c2_45 = arith.constant 2 : index
    %c0_46 = arith.constant 0 : index
    %37 = vector.load %arg2[%c0_42, %c0_43, %c1_44, %c2_45, %c0_46] : memref<1x1x18x18x128xbf16, #tpu.memory_space<vmem>>, vector<1x1x16x16x128xbf16>
    %38 = vector.shape_cast %37 : vector<1x1x16x16x128xbf16> to vector<16x16x128xbf16>
    %39 = vector.shape_cast %38 : vector<16x16x128xbf16> to vector<256x128xbf16>
    %c1_47 = arith.constant 1 : index
    %c0_48 = arith.constant 0 : index
    %c256_49 = arith.constant 256 : index
    %40 = vector.load %arg9[%c1_47, %c0_48, %c256_49] : memref<2x256x384xbf16, #tpu.memory_space<vmem>>, vector<1x256x128xbf16>
    %41 = vector.shape_cast %40 : vector<1x256x128xbf16> to vector<256x128xbf16>
    %42 = vector.shape_cast %39 : vector<256x128xbf16> to vector<1x256x128xbf16>
    tpu.vector_store %arg9[%c1_47, %c0_48, %c256_49], %42 {strides = array<i32>} : memref<2x256x384xbf16, #tpu.memory_space<vmem>>, vector<1x256x128xbf16>,
    %c1_50 = arith.constant 1 : index
    %c0_51 = arith.constant 0 : index
    %c0_52 = arith.constant 0 : index
    %43 = vector.load %arg9[%c1_50, %c0_51, %c0_52] : memref<2x256x384xbf16, #tpu.memory_space<vmem>>, vector<1x256x384xbf16>
    %44 = vector.shape_cast %43 : vector<1x256x384xbf16> to vector<256x384xbf16>
    %c1_53 = arith.constant 1 : index
    %c0_54 = arith.constant 0 : index
    %c0_55 = arith.constant 0 : index
    %45 = vector.load %arg5[%c1_53, %c0_54, %c0_55] : memref<9x384x64xbf16, #tpu.memory_space<vmem>>, vector<1x384x64xbf16>
    %46 = vector.shape_cast %45 : vector<1x384x64xbf16> to vector<384x64xbf16>
    %cst_56 = arith.constant dense<0.000000e+00> : vector<256x64xf32>
    %47 = tpu.matmul %44, %46, %cst_56 {dimension_numbers = #tpu.dot_dimension_numbers<[1], [0], [0], [1], [0, 0, 1, 1], [], []>} : vector<256x384xbf16>, vector<384x64xbf16>, vector<256x64xf32> -> vector<256x64xf32>
    %48 = arith.addf %24, %47 : vector<256x64xf32>
    %c0_57 = arith.constant 0 : index
    %c0_58 = arith.constant 0 : index
    %c2_59 = arith.constant 2 : index
    %c0_60 = arith.constant 0 : index
    %c0_61 = arith.constant 0 : index
    %49 = vector.load %arg2[%c0_57, %c0_58, %c2_59, %c0_60, %c0_61] : memref<1x1x18x18x128xbf16, #tpu.memory_space<vmem>>, vector<1x1x16x16x128xbf16>
    %50 = vector.shape_cast %49 : vector<1x1x16x16x128xbf16> to vector<16x16x128xbf16>
    %51 = vector.shape_cast %50 : vector<16x16x128xbf16> to vector<256x128xbf16>
    %c0_62 = arith.constant 0 : index
    %c0_63 = arith.constant 0 : index
    %c0_64 = arith.constant 0 : index
    %52 = vector.load %arg9[%c0_62, %c0_63, %c0_64] : memref<2x256x384xbf16, #tpu.memory_space<vmem>>, vector<1x256x128xbf16>
    %53 = vector.shape_cast %52 : vector<1x256x128xbf16> to vector<256x128xbf16>
    %54 = vector.shape_cast %51 : vector<256x128xbf16> to vector<1x256x128xbf16>
    tpu.vector_store %arg9[%c0_62, %c0_63, %c0_64], %54 {strides = array<i32>} : memref<2x256x384xbf16, #tpu.memory_space<vmem>>, vector<1x256x128xbf16>,
    %c0_65 = arith.constant 0 : index
    %c0_66 = arith.constant 0 : index
    %c2_67 = arith.constant 2 : index
    %c1_68 = arith.constant 1 : index
    %c0_69 = arith.constant 0 : index
    %55 = vector.load %arg2[%c0_65, %c0_66, %c2_67, %c1_68, %c0_69] : memref<1x1x18x18x128xbf16, #tpu.memory_space<vmem>>, vector<1x1x16x16x128xbf16>
    %56 = vector.shape_cast %55 : vector<1x1x16x16x128xbf16> to vector<16x16x128xbf16>
    %57 = vector.shape_cast %56 : vector<16x16x128xbf16> to vector<256x128xbf16>
    %c0_70 = arith.constant 0 : index
    %c0_71 = arith.constant 0 : index
    %c128_72 = arith.constant 128 : index
    %58 = vector.load %arg9[%c0_70, %c0_71, %c128_72] : memref<2x256x384xbf16, #tpu.memory_space<vmem>>, vector<1x256x128xbf16>
    %59 = vector.shape_cast %58 : vector<1x256x128xbf16> to vector<256x128xbf16>
    %60 = vector.shape_cast %57 : vector<256x128xbf16> to vector<1x256x128xbf16>
    tpu.vector_store %arg9[%c0_70, %c0_71, %c128_72], %60 {strides = array<i32>} : memref<2x256x384xbf16, #tpu.memory_space<vmem>>, vector<1x256x128xbf16>,
    %c0_73 = arith.constant 0 : index
    %c0_74 = arith.constant 0 : index
    %c2_75 = arith.constant 2 : index
    %c2_76 = arith.constant 2 : index
    %c0_77 = arith.constant 0 : index
    %61 = vector.load %arg2[%c0_73, %c0_74, %c2_75, %c2_76, %c0_77] : memref<1x1x18x18x128xbf16, #tpu.memory_space<vmem>>, vector<1x1x16x16x128xbf16>
    %62 = vector.shape_cast %61 : vector<1x1x16x16x128xbf16> to vector<16x16x128xbf16>
    %63 = vector.shape_cast %62 : vector<16x16x128xbf16> to vector<256x128xbf16>
    %c0_78 = arith.constant 0 : index
    %c0_79 = arith.constant 0 : index
    %c256_80 = arith.constant 256 : index
    %64 = vector.load %arg9[%c0_78, %c0_79, %c256_80] : memref<2x256x384xbf16, #tpu.memory_space<vmem>>, vector<1x256x128xbf16>
    %65 = vector.shape_cast %64 : vector<1x256x128xbf16> to vector<256x128xbf16>
    %66 = vector.shape_cast %63 : vector<256x128xbf16> to vector<1x256x128xbf16>
    tpu.vector_store %arg9[%c0_78, %c0_79, %c256_80], %66 {strides = array<i32>} : memref<2x256x384xbf16, #tpu.memory_space<vmem>>, vector<1x256x128xbf16>,
    %c0_81 = arith.constant 0 : index
    %c0_82 = arith.constant 0 : index
    %c0_83 = arith.constant 0 : index
    %67 = vector.load %arg9[%c0_81, %c0_82, %c0_83] : memref<2x256x384xbf16, #tpu.memory_space<vmem>>, vector<1x256x384xbf16>
    %68 = vector.shape_cast %67 : vector<1x256x384xbf16> to vector<256x384xbf16>
    %c2_84 = arith.constant 2 : index
    %c0_85 = arith.constant 0 : index
    %c0_86 = arith.constant 0 : index
    %69 = vector.load %arg5[%c2_84, %c0_85, %c0_86] : memref<9x384x64xbf16, #tpu.memory_space<vmem>>, vector<1x384x64xbf16>
    %70 = vector.shape_cast %69 : vector<1x384x64xbf16> to vector<384x64xbf16>
    %cst_87 = arith.constant dense<0.000000e+00> : vector<256x64xf32>
    %71 = tpu.matmul %68, %70, %cst_87 {dimension_numbers = #tpu.dot_dimension_numbers<[1], [0], [0], [1], [0, 0, 1, 1], [], []>} : vector<256x384xbf16>, vector<384x64xbf16>, vector<256x64xf32> -> vector<256x64xf32>
    %72 = arith.addf %48, %71 : vector<256x64xf32>
    %c0_88 = arith.constant 0 : index
    %c0_89 = arith.constant 0 : index
    %c0_90 = arith.constant 0 : index
    %c0_91 = arith.constant 0 : index
    %c0_92 = arith.constant 0 : index
    %73 = vector.load %arg3[%c0_88, %c0_89, %c0_90, %c0_91, %c0_92] : memref<1x1x18x18x128xbf16, #tpu.memory_space<vmem>>, vector<1x1x16x16x128xbf16>
    %74 = vector.shape_cast %73 : vector<1x1x16x16x128xbf16> to vector<16x16x128xbf16>
    %75 = vector.shape_cast %74 : vector<16x16x128xbf16> to vector<256x128xbf16>
    %c1_93 = arith.constant 1 : index
    %c0_94 = arith.constant 0 : index
    %c0_95 = arith.constant 0 : index
    %76 = vector.load %arg9[%c1_93, %c0_94, %c0_95] : memref<2x256x384xbf16, #tpu.memory_space<vmem>>, vector<1x256x128xbf16>
    %77 = vector.shape_cast %76 : vector<1x256x128xbf16> to vector<256x128xbf16>
    %78 = vector.shape_cast %75 : vector<256x128xbf16> to vector<1x256x128xbf16>
    tpu.vector_store %arg9[%c1_93, %c0_94, %c0_95], %78 {strides = array<i32>} : memref<2x256x384xbf16, #tpu.memory_space<vmem>>, vector<1x256x128xbf16>,
    %c0_96 = arith.constant 0 : index
    %c0_97 = arith.constant 0 : index
    %c0_98 = arith.constant 0 : index
    %c1_99 = arith.constant 1 : index
    %c0_100 = arith.constant 0 : index
    %79 = vector.load %arg3[%c0_96, %c0_97, %c0_98, %c1_99, %c0_100] : memref<1x1x18x18x128xbf16, #tpu.memory_space<vmem>>, vector<1x1x16x16x128xbf16>
    %80 = vector.shape_cast %79 : vector<1x1x16x16x128xbf16> to vector<16x16x128xbf16>
    %81 = vector.shape_cast %80 : vector<16x16x128xbf16> to vector<256x128xbf16>
    %c1_101 = arith.constant 1 : index
    %c0_102 = arith.constant 0 : index
    %c128_103 = arith.constant 128 : index
    %82 = vector.load %arg9[%c1_101, %c0_102, %c128_103] : memref<2x256x384xbf16, #tpu.memory_space<vmem>>, vector<1x256x128xbf16>
    %83 = vector.shape_cast %82 : vector<1x256x128xbf16> to vector<256x128xbf16>
    %84 = vector.shape_cast %81 : vector<256x128xbf16> to vector<1x256x128xbf16>
    tpu.vector_store %arg9[%c1_101, %c0_102, %c128_103], %84 {strides = array<i32>} : memref<2x256x384xbf16, #tpu.memory_space<vmem>>, vector<1x256x128xbf16>,
    %c0_104 = arith.constant 0 : index
    %c0_105 = arith.constant 0 : index
    %c0_106 = arith.constant 0 : index
    %c2_107 = arith.constant 2 : index
    %c0_108 = arith.constant 0 : index
    %85 = vector.load %arg3[%c0_104, %c0_105, %c0_106, %c2_107, %c0_108] : memref<1x1x18x18x128xbf16, #tpu.memory_space<vmem>>, vector<1x1x16x16x128xbf16>
    %86 = vector.shape_cast %85 : vector<1x1x16x16x128xbf16> to vector<16x16x128xbf16>
    %87 = vector.shape_cast %86 : vector<16x16x128xbf16> to vector<256x128xbf16>
    %c1_109 = arith.constant 1 : index
    %c0_110 = arith.constant 0 : index
    %c256_111 = arith.constant 256 : index
    %88 = vector.load %arg9[%c1_109, %c0_110, %c256_111] : memref<2x256x384xbf16, #tpu.memory_space<vmem>>, vector<1x256x128xbf16>
    %89 = vector.shape_cast %88 : vector<1x256x128xbf16> to vector<256x128xbf16>
    %90 = vector.shape_cast %87 : vector<256x128xbf16> to vector<1x256x128xbf16>
    tpu.vector_store %arg9[%c1_109, %c0_110, %c256_111], %90 {strides = array<i32>} : memref<2x256x384xbf16, #tpu.memory_space<vmem>>, vector<1x256x128xbf16>,
    %c1_112 = arith.constant 1 : index
    %c0_113 = arith.constant 0 : index
    %c0_114 = arith.constant 0 : index
    %91 = vector.load %arg9[%c1_112, %c0_113, %c0_114] : memref<2x256x384xbf16, #tpu.memory_space<vmem>>, vector<1x256x384xbf16>
    %92 = vector.shape_cast %91 : vector<1x256x384xbf16> to vector<256x384xbf16>
    %c3 = arith.constant 3 : index
    %c0_115 = arith.constant 0 : index
    %c0_116 = arith.constant 0 : index
    %93 = vector.load %arg5[%c3, %c0_115, %c0_116] : memref<9x384x64xbf16, #tpu.memory_space<vmem>>, vector<1x384x64xbf16>
    %94 = vector.shape_cast %93 : vector<1x384x64xbf16> to vector<384x64xbf16>
    %cst_117 = arith.constant dense<0.000000e+00> : vector<256x64xf32>
    %95 = tpu.matmul %92, %94, %cst_117 {dimension_numbers = #tpu.dot_dimension_numbers<[1], [0], [0], [1], [0, 0, 1, 1], [], []>} : vector<256x384xbf16>, vector<384x64xbf16>, vector<256x64xf32> -> vector<256x64xf32>
    %96 = arith.addf %72, %95 : vector<256x64xf32>
    %c0_118 = arith.constant 0 : index
    %c0_119 = arith.constant 0 : index
    %c1_120 = arith.constant 1 : index
    %c0_121 = arith.constant 0 : index
    %c0_122 = arith.constant 0 : index
    %97 = vector.load %arg3[%c0_118, %c0_119, %c1_120, %c0_121, %c0_122] : memref<1x1x18x18x128xbf16, #tpu.memory_space<vmem>>, vector<1x1x16x16x128xbf16>
    %98 = vector.shape_cast %97 : vector<1x1x16x16x128xbf16> to vector<16x16x128xbf16>
    %99 = vector.shape_cast %98 : vector<16x16x128xbf16> to vector<256x128xbf16>
    %c0_123 = arith.constant 0 : index
    %c0_124 = arith.constant 0 : index
    %c0_125 = arith.constant 0 : index
    %100 = vector.load %arg9[%c0_123, %c0_124, %c0_125] : memref<2x256x384xbf16, #tpu.memory_space<vmem>>, vector<1x256x128xbf16>
    %101 = vector.shape_cast %100 : vector<1x256x128xbf16> to vector<256x128xbf16>
    %102 = vector.shape_cast %99 : vector<256x128xbf16> to vector<1x256x128xbf16>
    tpu.vector_store %arg9[%c0_123, %c0_124, %c0_125], %102 {strides = array<i32>} : memref<2x256x384xbf16, #tpu.memory_space<vmem>>, vector<1x256x128xbf16>,
    %c0_126 = arith.constant 0 : index
    %c0_127 = arith.constant 0 : index
    %c1_128 = arith.constant 1 : index
    %c1_129 = arith.constant 1 : index
    %c0_130 = arith.constant 0 : index
    %103 = vector.load %arg3[%c0_126, %c0_127, %c1_128, %c1_129, %c0_130] : memref<1x1x18x18x128xbf16, #tpu.memory_space<vmem>>, vector<1x1x16x16x128xbf16>
    %104 = vector.shape_cast %103 : vector<1x1x16x16x128xbf16> to vector<16x16x128xbf16>
    %105 = vector.shape_cast %104 : vector<16x16x128xbf16> to vector<256x128xbf16>
    %c0_131 = arith.constant 0 : index
    %c0_132 = arith.constant 0 : index
    %c128_133 = arith.constant 128 : index
    %106 = vector.load %arg9[%c0_131, %c0_132, %c128_133] : memref<2x256x384xbf16, #tpu.memory_space<vmem>>, vector<1x256x128xbf16>
    %107 = vector.shape_cast %106 : vector<1x256x128xbf16> to vector<256x128xbf16>
    %108 = vector.shape_cast %105 : vector<256x128xbf16> to vector<1x256x128xbf16>
    tpu.vector_store %arg9[%c0_131, %c0_132, %c128_133], %108 {strides = array<i32>} : memref<2x256x384xbf16, #tpu.memory_space<vmem>>, vector<1x256x128xbf16>,
    %c0_134 = arith.constant 0 : index
    %c0_135 = arith.constant 0 : index
    %c1_136 = arith.constant 1 : index
    %c2_137 = arith.constant 2 : index
    %c0_138 = arith.constant 0 : index
    %109 = vector.load %arg3[%c0_134, %c0_135, %c1_136, %c2_137, %c0_138] : memref<1x1x18x18x128xbf16, #tpu.memory_space<vmem>>, vector<1x1x16x16x128xbf16>
    %110 = vector.shape_cast %109 : vector<1x1x16x16x128xbf16> to vector<16x16x128xbf16>
    %111 = vector.shape_cast %110 : vector<16x16x128xbf16> to vector<256x128xbf16>
    %c0_139 = arith.constant 0 : index
    %c0_140 = arith.constant 0 : index
    %c256_141 = arith.constant 256 : index
    %112 = vector.load %arg9[%c0_139, %c0_140, %c256_141] : memref<2x256x384xbf16, #tpu.memory_space<vmem>>, vector<1x256x128xbf16>
    %113 = vector.shape_cast %112 : vector<1x256x128xbf16> to vector<256x128xbf16>
    %114 = vector.shape_cast %111 : vector<256x128xbf16> to vector<1x256x128xbf16>
    tpu.vector_store %arg9[%c0_139, %c0_140, %c256_141], %114 {strides = array<i32>} : memref<2x256x384xbf16, #tpu.memory_space<vmem>>, vector<1x256x128xbf16>,
    %c0_142 = arith.constant 0 : index
    %c0_143 = arith.constant 0 : index
    %c0_144 = arith.constant 0 : index
    %115 = vector.load %arg9[%c0_142, %c0_143, %c0_144] : memref<2x256x384xbf16, #tpu.memory_space<vmem>>, vector<1x256x384xbf16>
    %116 = vector.shape_cast %115 : vector<1x256x384xbf16> to vector<256x384xbf16>
    %c4 = arith.constant 4 : index
    %c0_145 = arith.constant 0 : index
    %c0_146 = arith.constant 0 : index
    %117 = vector.load %arg5[%c4, %c0_145, %c0_146] : memref<9x384x64xbf16, #tpu.memory_space<vmem>>, vector<1x384x64xbf16>
    %118 = vector.shape_cast %117 : vector<1x384x64xbf16> to vector<384x64xbf16>
    %cst_147 = arith.constant dense<0.000000e+00> : vector<256x64xf32>
    %119 = tpu.matmul %116, %118, %cst_147 {dimension_numbers = #tpu.dot_dimension_numbers<[1], [0], [0], [1], [0, 0, 1, 1], [], []>} : vector<256x384xbf16>, vector<384x64xbf16>, vector<256x64xf32> -> vector<256x64xf32>
    %120 = arith.addf %96, %119 : vector<256x64xf32>
    %c0_148 = arith.constant 0 : index
    %c0_149 = arith.constant 0 : index
    %c2_150 = arith.constant 2 : index
    %c0_151 = arith.constant 0 : index
    %c0_152 = arith.constant 0 : index
    %121 = vector.load %arg3[%c0_148, %c0_149, %c2_150, %c0_151, %c0_152] : memref<1x1x18x18x128xbf16, #tpu.memory_space<vmem>>, vector<1x1x16x16x128xbf16>
    %122 = vector.shape_cast %121 : vector<1x1x16x16x128xbf16> to vector<16x16x128xbf16>
    %123 = vector.shape_cast %122 : vector<16x16x128xbf16> to vector<256x128xbf16>
    %c1_153 = arith.constant 1 : index
    %c0_154 = arith.constant 0 : index
    %c0_155 = arith.constant 0 : index
    %124 = vector.load %arg9[%c1_153, %c0_154, %c0_155] : memref<2x256x384xbf16, #tpu.memory_space<vmem>>, vector<1x256x128xbf16>
    %125 = vector.shape_cast %124 : vector<1x256x128xbf16> to vector<256x128xbf16>
    %126 = vector.shape_cast %123 : vector<256x128xbf16> to vector<1x256x128xbf16>
    tpu.vector_store %arg9[%c1_153, %c0_154, %c0_155], %126 {strides = array<i32>} : memref<2x256x384xbf16, #tpu.memory_space<vmem>>, vector<1x256x128xbf16>,
    %c0_156 = arith.constant 0 : index
    %c0_157 = arith.constant 0 : index
    %c2_158 = arith.constant 2 : index
    %c1_159 = arith.constant 1 : index
    %c0_160 = arith.constant 0 : index
    %127 = vector.load %arg3[%c0_156, %c0_157, %c2_158, %c1_159, %c0_160] : memref<1x1x18x18x128xbf16, #tpu.memory_space<vmem>>, vector<1x1x16x16x128xbf16>
    %128 = vector.shape_cast %127 : vector<1x1x16x16x128xbf16> to vector<16x16x128xbf16>
    %129 = vector.shape_cast %128 : vector<16x16x128xbf16> to vector<256x128xbf16>
    %c1_161 = arith.constant 1 : index
    %c0_162 = arith.constant 0 : index
    %c128_163 = arith.constant 128 : index
    %130 = vector.load %arg9[%c1_161, %c0_162, %c128_163] : memref<2x256x384xbf16, #tpu.memory_space<vmem>>, vector<1x256x128xbf16>
    %131 = vector.shape_cast %130 : vector<1x256x128xbf16> to vector<256x128xbf16>
    %132 = vector.shape_cast %129 : vector<256x128xbf16> to vector<1x256x128xbf16>
    tpu.vector_store %arg9[%c1_161, %c0_162, %c128_163], %132 {strides = array<i32>} : memref<2x256x384xbf16, #tpu.memory_space<vmem>>, vector<1x256x128xbf16>,
    %c0_164 = arith.constant 0 : index
    %c0_165 = arith.constant 0 : index
    %c2_166 = arith.constant 2 : index
    %c2_167 = arith.constant 2 : index
    %c0_168 = arith.constant 0 : index
    %133 = vector.load %arg3[%c0_164, %c0_165, %c2_166, %c2_167, %c0_168] : memref<1x1x18x18x128xbf16, #tpu.memory_space<vmem>>, vector<1x1x16x16x128xbf16>
    %134 = vector.shape_cast %133 : vector<1x1x16x16x128xbf16> to vector<16x16x128xbf16>
    %135 = vector.shape_cast %134 : vector<16x16x128xbf16> to vector<256x128xbf16>
    %c1_169 = arith.constant 1 : index
    %c0_170 = arith.constant 0 : index
    %c256_171 = arith.constant 256 : index
    %136 = vector.load %arg9[%c1_169, %c0_170, %c256_171] : memref<2x256x384xbf16, #tpu.memory_space<vmem>>, vector<1x256x128xbf16>
    %137 = vector.shape_cast %136 : vector<1x256x128xbf16> to vector<256x128xbf16>
    %138 = vector.shape_cast %135 : vector<256x128xbf16> to vector<1x256x128xbf16>
    tpu.vector_store %arg9[%c1_169, %c0_170, %c256_171], %138 {strides = array<i32>} : memref<2x256x384xbf16, #tpu.memory_space<vmem>>, vector<1x256x128xbf16>,
    %c1_172 = arith.constant 1 : index
    %c0_173 = arith.constant 0 : index
    %c0_174 = arith.constant 0 : index
    %139 = vector.load %arg9[%c1_172, %c0_173, %c0_174] : memref<2x256x384xbf16, #tpu.memory_space<vmem>>, vector<1x256x384xbf16>
    %140 = vector.shape_cast %139 : vector<1x256x384xbf16> to vector<256x384xbf16>
    %c5 = arith.constant 5 : index
    %c0_175 = arith.constant 0 : index
    %c0_176 = arith.constant 0 : index
    %141 = vector.load %arg5[%c5, %c0_175, %c0_176] : memref<9x384x64xbf16, #tpu.memory_space<vmem>>, vector<1x384x64xbf16>
    %142 = vector.shape_cast %141 : vector<1x384x64xbf16> to vector<384x64xbf16>
    %cst_177 = arith.constant dense<0.000000e+00> : vector<256x64xf32>
    %143 = tpu.matmul %140, %142, %cst_177 {dimension_numbers = #tpu.dot_dimension_numbers<[1], [0], [0], [1], [0, 0, 1, 1], [], []>} : vector<256x384xbf16>, vector<384x64xbf16>, vector<256x64xf32> -> vector<256x64xf32>
    %144 = arith.addf %120, %143 : vector<256x64xf32>
    %c0_178 = arith.constant 0 : index
    %c0_179 = arith.constant 0 : index
    %c0_180 = arith.constant 0 : index
    %c0_181 = arith.constant 0 : index
    %c0_182 = arith.constant 0 : index
    %145 = vector.load %arg4[%c0_178, %c0_179, %c0_180, %c0_181, %c0_182] : memref<1x1x18x18x128xbf16, #tpu.memory_space<vmem>>, vector<1x1x16x16x128xbf16>
    %146 = vector.shape_cast %145 : vector<1x1x16x16x128xbf16> to vector<16x16x128xbf16>
    %147 = vector.shape_cast %146 : vector<16x16x128xbf16> to vector<256x128xbf16>
    %c0_183 = arith.constant 0 : index
    %c0_184 = arith.constant 0 : index
    %c0_185 = arith.constant 0 : index
    %148 = vector.load %arg9[%c0_183, %c0_184, %c0_185] : memref<2x256x384xbf16, #tpu.memory_space<vmem>>, vector<1x256x128xbf16>
    %149 = vector.shape_cast %148 : vector<1x256x128xbf16> to vector<256x128xbf16>
    %150 = vector.shape_cast %147 : vector<256x128xbf16> to vector<1x256x128xbf16>
    tpu.vector_store %arg9[%c0_183, %c0_184, %c0_185], %150 {strides = array<i32>} : memref<2x256x384xbf16, #tpu.memory_space<vmem>>, vector<1x256x128xbf16>,
    %c0_186 = arith.constant 0 : index
    %c0_187 = arith.constant 0 : index
    %c0_188 = arith.constant 0 : index
    %c1_189 = arith.constant 1 : index
    %c0_190 = arith.constant 0 : index
    %151 = vector.load %arg4[%c0_186, %c0_187, %c0_188, %c1_189, %c0_190] : memref<1x1x18x18x128xbf16, #tpu.memory_space<vmem>>, vector<1x1x16x16x128xbf16>
    %152 = vector.shape_cast %151 : vector<1x1x16x16x128xbf16> to vector<16x16x128xbf16>
    %153 = vector.shape_cast %152 : vector<16x16x128xbf16> to vector<256x128xbf16>
    %c0_191 = arith.constant 0 : index
    %c0_192 = arith.constant 0 : index
    %c128_193 = arith.constant 128 : index
    %154 = vector.load %arg9[%c0_191, %c0_192, %c128_193] : memref<2x256x384xbf16, #tpu.memory_space<vmem>>, vector<1x256x128xbf16>
    %155 = vector.shape_cast %154 : vector<1x256x128xbf16> to vector<256x128xbf16>
    %156 = vector.shape_cast %153 : vector<256x128xbf16> to vector<1x256x128xbf16>
    tpu.vector_store %arg9[%c0_191, %c0_192, %c128_193], %156 {strides = array<i32>} : memref<2x256x384xbf16, #tpu.memory_space<vmem>>, vector<1x256x128xbf16>,
    %c0_194 = arith.constant 0 : index
    %c0_195 = arith.constant 0 : index
    %c0_196 = arith.constant 0 : index
    %c2_197 = arith.constant 2 : index
    %c0_198 = arith.constant 0 : index
    %157 = vector.load %arg4[%c0_194, %c0_195, %c0_196, %c2_197, %c0_198] : memref<1x1x18x18x128xbf16, #tpu.memory_space<vmem>>, vector<1x1x16x16x128xbf16>
    %158 = vector.shape_cast %157 : vector<1x1x16x16x128xbf16> to vector<16x16x128xbf16>
    %159 = vector.shape_cast %158 : vector<16x16x128xbf16> to vector<256x128xbf16>
    %c0_199 = arith.constant 0 : index
    %c0_200 = arith.constant 0 : index
    %c256_201 = arith.constant 256 : index
    %160 = vector.load %arg9[%c0_199, %c0_200, %c256_201] : memref<2x256x384xbf16, #tpu.memory_space<vmem>>, vector<1x256x128xbf16>
    %161 = vector.shape_cast %160 : vector<1x256x128xbf16> to vector<256x128xbf16>
    %162 = vector.shape_cast %159 : vector<256x128xbf16> to vector<1x256x128xbf16>
    tpu.vector_store %arg9[%c0_199, %c0_200, %c256_201], %162 {strides = array<i32>} : memref<2x256x384xbf16, #tpu.memory_space<vmem>>, vector<1x256x128xbf16>,
    %c0_202 = arith.constant 0 : index
    %c0_203 = arith.constant 0 : index
    %c0_204 = arith.constant 0 : index
    %163 = vector.load %arg9[%c0_202, %c0_203, %c0_204] : memref<2x256x384xbf16, #tpu.memory_space<vmem>>, vector<1x256x384xbf16>
    %164 = vector.shape_cast %163 : vector<1x256x384xbf16> to vector<256x384xbf16>
    %c6 = arith.constant 6 : index
    %c0_205 = arith.constant 0 : index
    %c0_206 = arith.constant 0 : index
    %165 = vector.load %arg5[%c6, %c0_205, %c0_206] : memref<9x384x64xbf16, #tpu.memory_space<vmem>>, vector<1x384x64xbf16>
    %166 = vector.shape_cast %165 : vector<1x384x64xbf16> to vector<384x64xbf16>
    %cst_207 = arith.constant dense<0.000000e+00> : vector<256x64xf32>
    %167 = tpu.matmul %164, %166, %cst_207 {dimension_numbers = #tpu.dot_dimension_numbers<[1], [0], [0], [1], [0, 0, 1, 1], [], []>} : vector<256x384xbf16>, vector<384x64xbf16>, vector<256x64xf32> -> vector<256x64xf32>
    %168 = arith.addf %144, %167 : vector<256x64xf32>
    %c0_208 = arith.constant 0 : index
    %c0_209 = arith.constant 0 : index
    %c1_210 = arith.constant 1 : index
    %c0_211 = arith.constant 0 : index
    %c0_212 = arith.constant 0 : index
    %169 = vector.load %arg4[%c0_208, %c0_209, %c1_210, %c0_211, %c0_212] : memref<1x1x18x18x128xbf16, #tpu.memory_space<vmem>>, vector<1x1x16x16x128xbf16>
    %170 = vector.shape_cast %169 : vector<1x1x16x16x128xbf16> to vector<16x16x128xbf16>
    %171 = vector.shape_cast %170 : vector<16x16x128xbf16> to vector<256x128xbf16>
    %c1_213 = arith.constant 1 : index
    %c0_214 = arith.constant 0 : index
    %c0_215 = arith.constant 0 : index
    %172 = vector.load %arg9[%c1_213, %c0_214, %c0_215] : memref<2x256x384xbf16, #tpu.memory_space<vmem>>, vector<1x256x128xbf16>
    %173 = vector.shape_cast %172 : vector<1x256x128xbf16> to vector<256x128xbf16>
    %174 = vector.shape_cast %171 : vector<256x128xbf16> to vector<1x256x128xbf16>
    tpu.vector_store %arg9[%c1_213, %c0_214, %c0_215], %174 {strides = array<i32>} : memref<2x256x384xbf16, #tpu.memory_space<vmem>>, vector<1x256x128xbf16>,
    %c0_216 = arith.constant 0 : index
    %c0_217 = arith.constant 0 : index
    %c1_218 = arith.constant 1 : index
    %c1_219 = arith.constant 1 : index
    %c0_220 = arith.constant 0 : index
    %175 = vector.load %arg4[%c0_216, %c0_217, %c1_218, %c1_219, %c0_220] : memref<1x1x18x18x128xbf16, #tpu.memory_space<vmem>>, vector<1x1x16x16x128xbf16>
    %176 = vector.shape_cast %175 : vector<1x1x16x16x128xbf16> to vector<16x16x128xbf16>
    %177 = vector.shape_cast %176 : vector<16x16x128xbf16> to vector<256x128xbf16>
    %c1_221 = arith.constant 1 : index
    %c0_222 = arith.constant 0 : index
    %c128_223 = arith.constant 128 : index
    %178 = vector.load %arg9[%c1_221, %c0_222, %c128_223] : memref<2x256x384xbf16, #tpu.memory_space<vmem>>, vector<1x256x128xbf16>
    %179 = vector.shape_cast %178 : vector<1x256x128xbf16> to vector<256x128xbf16>
    %180 = vector.shape_cast %177 : vector<256x128xbf16> to vector<1x256x128xbf16>
    tpu.vector_store %arg9[%c1_221, %c0_222, %c128_223], %180 {strides = array<i32>} : memref<2x256x384xbf16, #tpu.memory_space<vmem>>, vector<1x256x128xbf16>,
    %c0_224 = arith.constant 0 : index
    %c0_225 = arith.constant 0 : index
    %c1_226 = arith.constant 1 : index
    %c2_227 = arith.constant 2 : index
    %c0_228 = arith.constant 0 : index
    %181 = vector.load %arg4[%c0_224, %c0_225, %c1_226, %c2_227, %c0_228] : memref<1x1x18x18x128xbf16, #tpu.memory_space<vmem>>, vector<1x1x16x16x128xbf16>
    %182 = vector.shape_cast %181 : vector<1x1x16x16x128xbf16> to vector<16x16x128xbf16>
    %183 = vector.shape_cast %182 : vector<16x16x128xbf16> to vector<256x128xbf16>
    %c1_229 = arith.constant 1 : index
    %c0_230 = arith.constant 0 : index
    %c256_231 = arith.constant 256 : index
    %184 = vector.load %arg9[%c1_229, %c0_230, %c256_231] : memref<2x256x384xbf16, #tpu.memory_space<vmem>>, vector<1x256x128xbf16>
    %185 = vector.shape_cast %184 : vector<1x256x128xbf16> to vector<256x128xbf16>
    %186 = vector.shape_cast %183 : vector<256x128xbf16> to vector<1x256x128xbf16>
    tpu.vector_store %arg9[%c1_229, %c0_230, %c256_231], %186 {strides = array<i32>} : memref<2x256x384xbf16, #tpu.memory_space<vmem>>, vector<1x256x128xbf16>,
    %c1_232 = arith.constant 1 : index
    %c0_233 = arith.constant 0 : index
    %c0_234 = arith.constant 0 : index
    %187 = vector.load %arg9[%c1_232, %c0_233, %c0_234] : memref<2x256x384xbf16, #tpu.memory_space<vmem>>, vector<1x256x384xbf16>
    %188 = vector.shape_cast %187 : vector<1x256x384xbf16> to vector<256x384xbf16>
    %c7 = arith.constant 7 : index
    %c0_235 = arith.constant 0 : index
    %c0_236 = arith.constant 0 : index
    %189 = vector.load %arg5[%c7, %c0_235, %c0_236] : memref<9x384x64xbf16, #tpu.memory_space<vmem>>, vector<1x384x64xbf16>
    %190 = vector.shape_cast %189 : vector<1x384x64xbf16> to vector<384x64xbf16>
    %cst_237 = arith.constant dense<0.000000e+00> : vector<256x64xf32>
    %191 = tpu.matmul %188, %190, %cst_237 {dimension_numbers = #tpu.dot_dimension_numbers<[1], [0], [0], [1], [0, 0, 1, 1], [], []>} : vector<256x384xbf16>, vector<384x64xbf16>, vector<256x64xf32> -> vector<256x64xf32>
    %192 = arith.addf %168, %191 : vector<256x64xf32>
    %c0_238 = arith.constant 0 : index
    %c0_239 = arith.constant 0 : index
    %c2_240 = arith.constant 2 : index
    %c0_241 = arith.constant 0 : index
    %c0_242 = arith.constant 0 : index
    %193 = vector.load %arg4[%c0_238, %c0_239, %c2_240, %c0_241, %c0_242] : memref<1x1x18x18x128xbf16, #tpu.memory_space<vmem>>, vector<1x1x16x16x128xbf16>
    %194 = vector.shape_cast %193 : vector<1x1x16x16x128xbf16> to vector<16x16x128xbf16>
    %195 = vector.shape_cast %194 : vector<16x16x128xbf16> to vector<256x128xbf16>
    %c0_243 = arith.constant 0 : index
    %c0_244 = arith.constant 0 : index
    %c0_245 = arith.constant 0 : index
    %196 = vector.load %arg9[%c0_243, %c0_244, %c0_245] : memref<2x256x384xbf16, #tpu.memory_space<vmem>>, vector<1x256x128xbf16>
    %197 = vector.shape_cast %196 : vector<1x256x128xbf16> to vector<256x128xbf16>
    %198 = vector.shape_cast %195 : vector<256x128xbf16> to vector<1x256x128xbf16>
    tpu.vector_store %arg9[%c0_243, %c0_244, %c0_245], %198 {strides = array<i32>} : memref<2x256x384xbf16, #tpu.memory_space<vmem>>, vector<1x256x128xbf16>,
    %c0_246 = arith.constant 0 : index
    %c0_247 = arith.constant 0 : index
    %c2_248 = arith.constant 2 : index
    %c1_249 = arith.constant 1 : index
    %c0_250 = arith.constant 0 : index
    %199 = vector.load %arg4[%c0_246, %c0_247, %c2_248, %c1_249, %c0_250] : memref<1x1x18x18x128xbf16, #tpu.memory_space<vmem>>, vector<1x1x16x16x128xbf16>
    %200 = vector.shape_cast %199 : vector<1x1x16x16x128xbf16> to vector<16x16x128xbf16>
    %201 = vector.shape_cast %200 : vector<16x16x128xbf16> to vector<256x128xbf16>
    %c0_251 = arith.constant 0 : index
    %c0_252 = arith.constant 0 : index
    %c128_253 = arith.constant 128 : index
    %202 = vector.load %arg9[%c0_251, %c0_252, %c128_253] : memref<2x256x384xbf16, #tpu.memory_space<vmem>>, vector<1x256x128xbf16>
    %203 = vector.shape_cast %202 : vector<1x256x128xbf16> to vector<256x128xbf16>
    %204 = vector.shape_cast %201 : vector<256x128xbf16> to vector<1x256x128xbf16>
    tpu.vector_store %arg9[%c0_251, %c0_252, %c128_253], %204 {strides = array<i32>} : memref<2x256x384xbf16, #tpu.memory_space<vmem>>, vector<1x256x128xbf16>,
    %c0_254 = arith.constant 0 : index
    %c0_255 = arith.constant 0 : index
    %c2_256 = arith.constant 2 : index
    %c2_257 = arith.constant 2 : index
    %c0_258 = arith.constant 0 : index
    %205 = vector.load %arg4[%c0_254, %c0_255, %c2_256, %c2_257, %c0_258] : memref<1x1x18x18x128xbf16, #tpu.memory_space<vmem>>, vector<1x1x16x16x128xbf16>
    %206 = vector.shape_cast %205 : vector<1x1x16x16x128xbf16> to vector<16x16x128xbf16>
    %207 = vector.shape_cast %206 : vector<16x16x128xbf16> to vector<256x128xbf16>
    %c0_259 = arith.constant 0 : index
    %c0_260 = arith.constant 0 : index
    %c256_261 = arith.constant 256 : index
    %208 = vector.load %arg9[%c0_259, %c0_260, %c256_261] : memref<2x256x384xbf16, #tpu.memory_space<vmem>>, vector<1x256x128xbf16>
    %209 = vector.shape_cast %208 : vector<1x256x128xbf16> to vector<256x128xbf16>
    %210 = vector.shape_cast %207 : vector<256x128xbf16> to vector<1x256x128xbf16>
    tpu.vector_store %arg9[%c0_259, %c0_260, %c256_261], %210 {strides = array<i32>} : memref<2x256x384xbf16, #tpu.memory_space<vmem>>, vector<1x256x128xbf16>,
    %c0_262 = arith.constant 0 : index
    %c0_263 = arith.constant 0 : index
    %c0_264 = arith.constant 0 : index
    %211 = vector.load %arg9[%c0_262, %c0_263, %c0_264] : memref<2x256x384xbf16, #tpu.memory_space<vmem>>, vector<1x256x384xbf16>
    %212 = vector.shape_cast %211 : vector<1x256x384xbf16> to vector<256x384xbf16>
    %c8 = arith.constant 8 : index
    %c0_265 = arith.constant 0 : index
    %c0_266 = arith.constant 0 : index
    %213 = vector.load %arg5[%c8, %c0_265, %c0_266] : memref<9x384x64xbf16, #tpu.memory_space<vmem>>, vector<1x384x64xbf16>
    %214 = vector.shape_cast %213 : vector<1x384x64xbf16> to vector<384x64xbf16>
    %cst_267 = arith.constant dense<0.000000e+00> : vector<256x64xf32>
    %215 = tpu.matmul %212, %214, %cst_267 {dimension_numbers = #tpu.dot_dimension_numbers<[1], [0], [0], [1], [0, 0, 1, 1], [], []>} : vector<256x384xbf16>, vector<384x64xbf16>, vector<256x64xf32> -> vector<256x64xf32>
    %216 = arith.addf %192, %215 : vector<256x64xf32>
    %c0_268 = arith.constant 0 : index
    %c0_269 = arith.constant 0 : index
    %217 = vector.load %arg6[%c0_268, %c0_269] : memref<1x64xf32, #tpu.memory_space<vmem>>, vector<1x64xf32>
    %218 = vector.shape_cast %217 : vector<1x64xf32> to vector<64xf32>
    %219 = vector.shape_cast %218 : vector<64xf32> to vector<1x64xf32>
    %220 = vector.broadcast %219 : vector<1x64xf32> to vector<256x64xf32>
    %221 = arith.mulf %216, %220 : vector<256x64xf32>
    %c0_270 = arith.constant 0 : index
    %c0_271 = arith.constant 0 : index
    %222 = vector.load %arg7[%c0_270, %c0_271] : memref<1x64xf32, #tpu.memory_space<vmem>>, vector<1x64xf32>
    %223 = vector.shape_cast %222 : vector<1x64xf32> to vector<64xf32>
    %224 = vector.shape_cast %223 : vector<64xf32> to vector<1x64xf32>
    %225 = vector.broadcast %224 : vector<1x64xf32> to vector<256x64xf32>
    %226 = arith.addf %221, %225 : vector<256x64xf32>
    %cst_272 = arith.constant 0.000000e+00 : f32
    %227 = vector.broadcast %cst_272 : f32 to vector<256x64xf32>
    %228 = arith.maximumf %226, %227 : vector<256x64xf32>
    %229 = vector.shape_cast %228 : vector<256x64xf32> to vector<16x16x64xf32>
    %230 = arith.truncf %229 : vector<16x16x64xf32> to vector<16x16x64xbf16>
    %c0_273 = arith.constant 0 : index
    %c0_274 = arith.constant 0 : index
    %c0_275 = arith.constant 0 : index
    %c0_276 = arith.constant 0 : index
    %c0_277 = arith.constant 0 : index
    %231 = vector.load %arg8[%c0_273, %c0_274, %c0_275, %c0_276, %c0_277] : memref<1x1x16x16x64xbf16, #tpu.memory_space<vmem>>, vector<1x1x16x16x64xbf16>
    %232 = vector.shape_cast %231 : vector<1x1x16x16x64xbf16> to vector<16x16x64xbf16>
    %233 = vector.shape_cast %230 : vector<16x16x64xbf16> to vector<1x1x16x16x64xbf16>
    tpu.vector_store %arg8[%c0_273, %c0_274, %c0_275, %c0_276, %c0_277], %233 {strides = array<i32>} : memref<1x1x16x16x64xbf16, #tpu.memory_space<vmem>>, vector<1x1x16x16x64xbf16>,
    return
  }
  func.func @transform_0(%arg0: i32, %arg1: i32) -> (i32, i32, i32, i32, i32) {
    %c2_i32 = arith.constant 2 : i32
    %0 = arith.muli %arg1, %c2_i32 : i32
    %c0_i32 = arith.constant 0 : i32
    %1 = arith.addi %0, %c0_i32 : i32
    %c0_i32_0 = arith.constant 0 : i32
    %c0_i32_1 = arith.constant 0 : i32
    %c0_i32_2 = arith.constant 0 : i32
    %c0_i32_3 = arith.constant 0 : i32
    return %arg0, %1, %c0_i32_0, %c0_i32_1, %c0_i32_2 : i32, i32, i32, i32, i32
  }
  func.func @transform_1(%arg0: i32, %arg1: i32) -> (i32, i32, i32, i32, i32) {
    %c2_i32 = arith.constant 2 : i32
    %0 = arith.muli %arg1, %c2_i32 : i32
    %c1_i32 = arith.constant 1 : i32
    %1 = arith.addi %0, %c1_i32 : i32
    %c0_i32 = arith.constant 0 : i32
    %c0_i32_0 = arith.constant 0 : i32
    %c0_i32_1 = arith.constant 0 : i32
    %c0_i32_2 = arith.constant 0 : i32
    return %arg0, %1, %c0_i32, %c0_i32_0, %c0_i32_1 : i32, i32, i32, i32, i32
  }
  func.func @transform_2(%arg0: i32, %arg1: i32) -> (i32, i32, i32, i32, i32) {
    %c2_i32 = arith.constant 2 : i32
    %0 = arith.muli %arg1, %c2_i32 : i32
    %c2_i32_0 = arith.constant 2 : i32
    %1 = arith.addi %0, %c2_i32_0 : i32
    %c0_i32 = arith.constant 0 : i32
    %c0_i32_1 = arith.constant 0 : i32
    %c0_i32_2 = arith.constant 0 : i32
    %c0_i32_3 = arith.constant 0 : i32
    return %arg0, %1, %c0_i32, %c0_i32_1, %c0_i32_2 : i32, i32, i32, i32, i32
  }
  func.func @transform_3(%arg0: i32, %arg1: i32) -> (i32, i32, i32) {
    %c0_i32 = arith.constant 0 : i32
    %c0_i32_0 = arith.constant 0 : i32
    %c0_i32_1 = arith.constant 0 : i32
    %c0_i32_2 = arith.constant 0 : i32
    return %c0_i32, %c0_i32_0, %c0_i32_1 : i32, i32, i32
  }
  func.func @transform_4(%arg0: i32, %arg1: i32) -> (i32, i32) {
    %c0_i32 = arith.constant 0 : i32
    %c0_i32_0 = arith.constant 0 : i32
    %c0_i32_1 = arith.constant 0 : i32
    return %c0_i32, %c0_i32_0 : i32, i32
  }
  func.func @transform_5(%arg0: i32, %arg1: i32) -> (i32, i32) {
    %c0_i32 = arith.constant 0 : i32
    %c0_i32_0 = arith.constant 0 : i32
    %c0_i32_1 = arith.constant 0 : i32
    return %c0_i32, %c0_i32_0 : i32, i32
  }
  func.func @transform_6(%arg0: i32, %arg1: i32) -> (i32, i32, i32, i32, i32) {
    %c0_i32 = arith.constant 0 : i32
    %c0_i32_0 = arith.constant 0 : i32
    %c0_i32_1 = arith.constant 0 : i32
    %c0_i32_2 = arith.constant 0 : i32
    return %arg0, %arg1, %c0_i32, %c0_i32_0, %c0_i32_1 : i32, i32, i32, i32, i32
  }
}

</mosaic_0001>

<bundles_post_ra>
// kernel: tpu_custom_call.1
= control target key start
LH: loop header
LB: loop body
LE: loop exit
PB: predicated region body
PF: predicated region fallthrough
CT: control target
= control target key end

     0   :  { %11 = vsyncpa [#allocation4], 0  ;;  %s23356_s0 = inlined_call_operand.vmem [shape: bf16[2,14,18,18,128], index: 0, kind: input, shape index: {}]   ;;  %s23357_s1 = inlined_call_operand.vmem [shape: bf16[2,14,18,18,128], index: 1, kind: input, shape index: {}]   ;;  %s23358_s2 = inlined_call_operand.vmem [shape: bf16[2,14,18,18,128], index: 2, kind: input, shape index: {}]   ;;  %s23359_s3 = inlined_call_operand.vmem [shape: bf16[9,384,64], index: 3, kind: input, shape index: {}]   ;;  %s23360_s4 = inlined_call_operand.vmem [shape: f32[1,64], index: 4, kind: input, shape index: {}]   ;;  %s23361_s5 = inlined_call_operand.vmem [shape: f32[1,64], index: 5, kind: input, shape index: {}]   ;;  %s23362_s6 = inlined_call_operand.hbm [shape: bf16[2,6,16,16,64], index: 6, kind: output, shape index: {}]  }
   0x1   :  { %13 = vsyncpa [#allocation4 + $0x1], 0  ;;  %s19416_s21 = smov 0   ;;  %s19418_s22 = smov 0  }
   0x2   :  { %s19420_s23 = smov 0   ;;  %s19422_s24 = smov 0  }
   0x3   :  { %s19424_s25 = smov 0   ;;  %s19426_s26 = smov 0  }
   0x4   :  { %s19428_s27 = smov 0   ;;  %s19430_s28 = smov 0  }
   0x5 LB: > { %23368 = sst [smem:[#allocation6_spill]] %s19372_s27  ;;  %s14595_s29 = sadd.s32 4294967295, %s19376_s28   ;;  %s19376_s28 = sphi %s19430_s28, %s19_s28   ;;  %s19372_s27 = sphi %s19428_s27, %s23414_s27   ;;  %s19368_s26 = sphi %s19426_s26, %s23419_s26   ;;  %s19364_s25 = sphi %s19424_s25, %s23412_s25   ;;  %s19360_s24 = sphi %s19422_s24, %s23418_s24   ;;  %s19356_s23 = sphi %s19420_s23, %s23417_s23   ;;  %s19352_s22 = sphi %s19418_s22, %s23416_s22   ;;  %s19348_s21 = sphi %s19416_s21, %s23415_s21  }
   0x6   : > { %s14596_s30 = sadd.s32 4294967294, %s19376_s28   ;;  %s28_s7 = sadd.s32 1, %s19368_s26 }
   0x7   : > { %p29_p0 = scmp.ge.s32.totalorder %s28_s7, 6  ;;  %s31_s8 = sadd.s32 1, %s19372_s27 }
   0x8   : > { %p207_p1 = scmp.ne.s32.totalorder %s19356_s23, %s19352_s22  ;;  %p208_p2 = scmp.eq.s32.totalorder %s14595_s29, 11 }
   0x9   : > { %s23421_s7 = smov (%p29_p0, %s28_s7), 0  ;;  %s23423_s8 = smov (!%p29_p0, %s31_s8), %s19372_s27 }
   0xa   : > { %23369 = sst [smem:[#allocation7_spill]] %s23421_s7  ;;  %s193_s9 = ssub.s32 %s19368_s26, %s23421_s7 }
   0xb   : > { %p19467_p3 = por %p208_p2, %p207_p1  ;;  %p33_p4 = scmp.ge.s32.totalorder %s23423_s8, 2 }
   0xc   : > { %p213_p5 = scmp.ne.s32.totalorder %s19352_s22, %s19348_s21  ;;  %p214_p6 = scmp.eq.s32.totalorder %s14596_s30, 11 }
   0xd   : > { %p14605_p7 = scmp.ge.s32.totalorder %s19376_s28, 1  ;;  %s23425_s8 = smov (%p33_p4, %s23423_s8), 0 }
   0xe   : > { %23371 = sst [smem:[#allocation8_spill]] %s23425_s8  ;;  %p19476_p8 = por %p214_p6, %p213_p5 }
   0xf   : > { %p287_p9 = scmp.lt.s32.totalorder %s19376_s28, 13  ;;  %s192_s12 = ssub.s32 %s19372_s27, %s23425_s8 }
  0x10   : > { %s197_s13 = sadd.s32 1, %s19356_s23  ;;  %s194_s14 = sor.u32 %s193_s9, %s192_s12 }
  0x11   : > { %p288_p10 = pnand %p14605_p7, %p287_p9  ;;  %p195_p11 = scmp.eq.s32.totalorder %s194_s14, 0 }
  0x13   : > { %s19485_s15 = scalar_select %p195_p11, %s19356_s23, %s197_s13  }
  0x14   : > { %291 = sbr.rel (%p288_p10) target bundleno = 1280 (0x500), region = 44 }
  0x1b   : > { %v18922_v0 = vld [vmem:[%s23359_s3 + $0x100] sm:$0xff]   ;;  %s19491_s18 = sshll.u32 %s19360_s24, 1  ;;  %p345_p12 = scmp.lt.s32.totalorder %s19364_s25, 1  ;;  %v18924_v2 = vld [vmem:[%s23359_s3 + $0x108] sm:$0xff]   ;;  %v18926_v4 = vld [vmem:[%s23359_s3 + $0x110] sm:$0xff]   ;;  %vm1137_vm3 = vcmask 1042432  }
  0x1c   : > { %v18923_v1 = vld [vmem:[%s23359_s3 + $0xc0] sm:$0xff]   ;;  %16628 = vmatprep.subr.bf16.mxu0 %v18922_v0  ;;  %18284 = vmatprep.subr.bf16.mxu1 %v18922_v0  ;;  %p347_p13 = scmp.lt.s32.totalorder %s19491_s18, 13  ;;  %v18925_v3 = vld [vmem:[%s23359_s3 + $0xc8] sm:$0xff]   ;;  %v18927_v5 = vld [vmem:[%s23359_s3 + $0xd0] sm:$0xff]   ;;  %vm574_vm0 = vsmask.f32 3328 }
  0x1d   : > { %16629 = vmatpush3.bf16.msra.mxu0 %v18923_v1  ;;  %18292 = vmatpush3.bf16.msra.mxu1 %v18923_v1  ;;  %s346_s13 = scalar_select %p345_p12, %s19364_s25, 1  ;;  %v18928_v6 = vld [vmem:[%s23359_s3 + $0x118] sm:$0xff]   ;;  %v18930_v8 = vld [vmem:[%s23359_s3 + $0x120] sm:$0xff]   ;;  %v18932_v10 = vld [vmem:[%s23359_s3 + $0x128] sm:$0xff]   ;;  %vm575_vm1 = vsmask.f32 7440 }
  0x1e   : > { %16630 = vmatprep.subr.bf16.mxu0 %v18924_v2  ;;  %18285 = vmatprep.subr.bf16.mxu1 %v18924_v2  ;;  %s348_s17 = scalar_select %p347_p13, %s19491_s18, 13  ;;  %v18929_v7 = vld [vmem:[%s23359_s3 + $0xd8] sm:$0xff]   ;;  %v18931_v9 = vld [vmem:[%s23359_s3 + $0xe0] sm:$0xff]   ;;  %v18933_v12 = vld [vmem:[%s23359_s3 + $0xe8] sm:$0xff]   ;;  %vm1138_vm4 = vcmask 1046532   ;;  %vm14419_vm6 = vcmask 519168  }
  0x1f   : > { %s19509_s19 = smul.u32 756, %s346_s13  ;;  %v18934_v17 = vld [vmem:[%s23359_s3 + $0x130] sm:$0xff]   ;;  %vm19552_vm2 = vmor %vm574_vm0, %vm575_vm1  ;;  %v18936_v43 = vld [vmem:[%s23359_s3 + $0x138] sm:$0xff]   ;;  %s356_s30 = sadd.s32 1, %s19491_s18 }
  0x20   : > { %s18844_s20 = smul.u32 54, %s348_s17  ;;  %v18935_v30 = vld [vmem:[%s23359_s3 + $0xf0] sm:$0xff]   ;;  %v18937_v49 = vld [vmem:[%s23359_s3 + $0xf8] sm:$0xff]   ;;  %v18940_v54 = vld [vmem:[%s23359_s3 + $0x140] sm:$0xff]   ;;  %p20264_p0 = scmp.lt.s32.totalorder %s356_s30, 13 }
  0x21   : > { %16631 = vmatpush3.bf16.msra.mxu0 %v18925_v3  ;;  %18293 = vmatpush3.bf16.msra.mxu1 %v18925_v3  ;;  %v18941_v55 = vld [vmem:[%s23359_s3 + $0x1c0] sm:$0xff]   ;;  %vm19670_vm5 = vmor %vm1137_vm3, %vm1138_vm4  ;;  %s19378_s9 = smov [#allocation3]  }
  0x22   : > { %16632 = vmatprep.subr.bf16.mxu0 %v18926_v4  ;;  %18286 = vmatprep.subr.bf16.mxu1 %v18926_v4  ;;  %s351_s8 = sadd.s32 %s19509_s19, %s18844_s20  ;;  %v18942_v63 = vld [vmem:[%s23359_s3 + $0x180] sm:$0xff]   ;;  %s23427_s30 = smov (!%p20264_p0, %s356_s30), 13 }
  0x23   : > { %s14608_s14 = sshll.u32 %s351_s8, 2  ;;  %s18846_s12 = smul.u32 54, %s23427_s30 }
  0x24   : > { %s19527_s27 = scalar_lea.vmem %s23356_s0, %s14608_s14  ;;  %s369_s8 = sadd.s32 2, %s19491_s18 }
  0x25   : > { %16633 = vmatpush3.bf16.msra.mxu0 %v18927_v5  ;;  %18294 = vmatpush3.bf16.msra.mxu1 %v18927_v5  ;;  %v14725_v11 = vld [vmem:[%s19527_s27 + $0xc] sm:$0xf]  ;;  %v14726_v13 = vld [vmem:[%s19527_s27 + $0x10] sm:$0xf]  ;;  %v14727_v14 = vld [vmem:[%s19527_s27 + $0x14] sm:$0x1]  ;;  %s363_s7 = sadd.s32 %s18846_s12, %s19509_s19 }
  0x26   : > { %16634 = vmatprep.subr.bf16.mxu0 %v18928_v6  ;;  %18287 = vmatprep.subr.bf16.mxu1 %v18928_v6  ;;  %v1623_v15 = vshrl.u32 %v14725_v11, 16  ;;  %v1626_v16 = vshll.u32 %v14725_v11, 16  ;;  %v1632_v18 = vshll.u32 %v14726_v13, 16  ;;  %v1636_v19 = vshrl.u32 %v14726_v13, 16  ;;  %v14761_v21 = vld [vmem:[%s19527_s27 + $0x9c] sm:$0xf] }
  0x27   : > { %v1642_v20 = vshll.u32 %v14727_v14, 16  ;;  %v14762_v24 = vld [vmem:[%s19527_s27 + $0xa0] sm:$0xf]  ;;  %v14763_v25 = vld [vmem:[%s19527_s27 + $0xa4] sm:$0x1]  ;;  %v1911_v29 = vshrl.u32 %v14761_v21, 16 }
  0x28   : > { %v1625_v22 = vrot.slane %v1623_v15, 4  ;;  %v1628_v23 = vrot.slane %v1626_v16, 5  ;;  %v1634_v26 = vrot.slane %v1632_v18, 5  ;;  %v1638_v27 = vrot.slane %v1636_v19, 4  ;;  %v18938_v56 = vld [vmem:[%s19527_s27 + $0xc] sm:$0xff]   ;;  %v18939_v57 = vld [vmem:[%s19527_s27 + $0x9c] sm:$0xff]  }
  0x29   : > { %16635 = vmatpush3.bf16.msra.mxu0 %v18929_v7  ;;  %18295 = vmatpush3.bf16.msra.mxu1 %v18929_v7  ;;  %v1644_v28 = vrot.slane %v1642_v20, 5  ;;  %v1914_v32 = vshll.u32 %v14761_v21, 16  ;;  %v1920_v33 = vshll.u32 %v14762_v24, 16  ;;  %v1924_v34 = vshrl.u32 %v14762_v24, 16  ;;  %v14728_v58 = vld [vmem:[%s19527_s27 + $0x18] sm:$0xf] }
  0x2a   : > { %16636 = vmatprep.subr.bf16.mxu0 %v18930_v8  ;;  %18288 = vmatprep.subr.bf16.mxu1 %v18930_v8  ;;  %v1629_v31 = vor.u32 %v1628_v23, %v1625_v22  ;;  %v1639_v36 = vor.u32 %v1638_v27, %v1634_v26  ;;  %v1913_v37 = vrot.slane %v1911_v29, 4  ;;  %v1930_v38 = vshll.u32 %v14763_v25, 16  ;;  %v14729_v59 = vld [vmem:[%s19527_s27 + $0x1c] sm:$0xf]  ;;  %v14730_v60 = vld [vmem:[%s19527_s27 + $0x20] sm:$0x1] }
  0x2b   : > { %v1916_v40 = vrot.slane %v1914_v32, 5  ;;  %v1922_v41 = vrot.slane %v1920_v33, 5  ;;  %v1926_v42 = vrot.slane %v1924_v34, 4  ;;  %v1647_v0 = vshrl.u32 %v14728_v58, 16  ;;  %v14764_v2 = vld [vmem:[%s19527_s27 + $0xa8] sm:$0xf] }
  0x2c   : > { %v1630_v39 = vrot.slane %v1629_v31, 4  ;;  %v1640_v44 = vrot.slane %v1639_v36, 4  ;;  %v1932_v45 = vrot.slane %v1930_v38, 5  ;;  %v1650_v1 = vshll.u32 %v14728_v58, 16  ;;  %v14765_v3 = vld [vmem:[%s19527_s27 + $0xac] sm:$0xf] }
  0x2d   : > { %16637 = vmatpush3.bf16.msra.mxu0 %v18931_v9  ;;  %18296 = vmatpush3.bf16.msra.mxu1 %v18931_v9  ;;  %v1917_v47 = vor.u32 %v1916_v40, %v1913_v37  ;;  %v1927_v48 = vor.u32 %v1926_v42, %v1922_v41  ;;  %v18943_v5 = vld [vmem:[%s23359_s3 + $0x148] sm:$0xff]   ;;  %v1656_v6 = vshll.u32 %v14729_v59, 16  ;;  %v1660_v7 = vshrl.u32 %v14729_v59, 16  ;;  %v14766_v9 = vld [vmem:[%s19527_s27 + $0xb0] sm:$0x1]  ;;  %s14610_s16 = sshll.u32 %s363_s7, 2 }
  0x2e   : > { %16638 = vmatprep.subr.bf16.mxu0 %v18932_v10  ;;  %18289 = vmatprep.subr.bf16.mxu1 %v18932_v10  ;;  %v1635_v46 = vsel %vm19552_vm2, %v1630_v39, %v1634_v26  ;;  %v1645_v50 = vsel %vm19552_vm2, %v1640_v44, %v1644_v28  ;;  %v1666_v8 = vshll.u32 %v14730_v60, 16  ;;  %v1649_v10 = vrot.slane %v1647_v0, 4  ;;  %v18946_v31 = vld [vmem:[%s23359_s3 + $0x150] sm:$0xff]   ;;  %v18948_v32 = vld [vmem:[%s23359_s3 + $0x1c8] sm:$0xff]   ;;  %v18947_v39 = vld [vmem:[%s23359_s3 + $0x158] sm:$0xff]   ;;  %s20303_s30 = scalar_lea.vmem %s23357_s1, %s14610_s16  ;;  %p372_p1 = scmp.lt.s32.totalorder %s369_s8, 13 }
  0x2f   : > { %v14773_v51 = vcombine.low %v1635_v46, %v1645_v50  ;;  %v1918_v52 = vrot.slane %v1917_v47, 4  ;;  %v1928_v53 = vrot.slane %v1927_v48, 4  ;;  %v1652_v11 = vrot.slane %v1650_v1, 5  ;;  %v18949_v37 = vld [vmem:[%s23359_s3 + $0x188] sm:$0xff]   ;;  %v14731_v40 = vld [vmem:[%s19527_s27 + $0x24] sm:$0xf] }
  0x30   : > { %v1938_v13 = vshll.u32 %v14764_v2, 16  ;;  %v1658_v14 = vrot.slane %v1656_v6, 5  ;;  %v1662_v15 = vrot.slane %v1660_v7, 4  ;;  %v1668_v16 = vrot.slane %v1666_v8, 5  ;;  %v18945_v44 = vld [vmem:[%s19527_s27 + $0xa8] sm:$0xff]   ;;  %v18952_v8 = vld [vmem:[%s23359_s3 + $0x160] sm:$0xff]  }
  0x31   : > { %16639 = vmatpush3.bf16.msra.mxu0 %v18933_v12  ;;  %18297 = vmatpush3.bf16.msra.mxu1 %v18933_v12  ;;  %v1923_v61 = vsel %vm19552_vm2, %v1918_v52, %v1922_v41  ;;  %v1933_v62 = vsel %vm19552_vm2, %v1928_v53, %v1932_v45  ;;  %v1935_v12 = vshrl.u32 %v14764_v2, 16  ;;  %v1653_v18 = vor.u32 %v1652_v11, %v1649_v10  ;;  %v14732_v45 = vld [vmem:[%s19527_s27 + $0x28] sm:$0xf]  ;;  %v14733_v46 = vld [vmem:[%s19527_s27 + $0x2c] sm:$0x1]  ;;  %s23429_s8 = smov (!%p372_p1, %s369_s8), 13 }
  0x32   : > { %16640 = vmatprep.subr.bf16.mxu0 %v18934_v17  ;;  %18290 = vmatprep.subr.bf16.mxu1 %v18934_v17  ;;  %v14785_v4 = vcombine.low %v1923_v61, %v1933_v62  ;;  %v1944_v17 = vshll.u32 %v14765_v3, 16  ;;  %v1940_v20 = vrot.slane %v1938_v13, 5  ;;  %v1948_v21 = vshrl.u32 %v14765_v3, 16  ;;  %v14767_v52 = vld [vmem:[%s19527_s27 + $0xb4] sm:$0xf]  ;;  %s18847_s18 = smul.u32 54, %s23429_s8 }
  0x33   : > { %2647 = vmatprep.mubr.bf16.mxu0 %v14773_v51  ;;  %v1937_v19 = vrot.slane %v1935_v12, 4  ;;  %v1663_v22 = vor.u32 %v1662_v15, %v1658_v14  ;;  %v1954_v24 = vshll.u32 %v14766_v9, 16  ;;  %v1654_v25 = vrot.slane %v1653_v18, 4  ;;  %v18950_v12 = vld [vmem:[%s19527_s27 + $0x24] sm:$0xff]   ;;  %s341_s20 = sand.u32 1, %s19352_s22   ;;  %s16592_s14 = sshll.u32 %s19360_s24, 5 }
  0x34   : > { %2743 = vmatprep.mubr.bf16.mxu1 %v14785_v4  ;;  %v1946_v23 = vrot.slane %v1944_v17, 5  ;;  %v1950_v27 = vrot.slane %v1948_v21, 4  ;;  %v1671_v47 = vshrl.u32 %v14731_v40, 16  ;;  %v1674_v48 = vshll.u32 %v14731_v40, 16  ;;  %v18953_v15 = vld [vmem:[%s23359_s3 + $0x168] sm:$0xff]   ;;  %s376_s16 = sadd.s32 %s18847_s18, %s19509_s19  ;;  %s14606_s12 = sshll.u32 %s341_s20, 7 }
  0x35   : > { %16641 = vmatpush3.bf16.msra.mxu0 %v18935_v30  ;;  %18298 = vmatpush3.bf16.msra.mxu1 %v18935_v30  ;;  %v1941_v26 = vor.u32 %v1940_v20, %v1937_v19  ;;  %v1664_v28 = vrot.slane %v1663_v22, 4  ;;  %v1956_v29 = vrot.slane %v1954_v24, 5  ;;  %v18944_v30 = vld [vmem:[%s19527_s27 + $0x18] sm:$0xff]   ;;  %v1659_v33 = vsel %vm19552_vm2, %v1654_v25, %v1658_v14  ;;  %v14734_v19 = vld [vmem:[%s19527_s27 + $0x30] sm:$0xf]  ;;  %s14612_s17 = sshll.u32 %s376_s16, 2 }
  0x36   : > { %16642 = vmatprep.subr.bf16.mxu0 %v18936_v43  ;;  %18291 = vmatprep.subr.bf16.mxu1 %v18936_v43  ;;  %v1951_v36 = vor.u32 %v1950_v27, %v1946_v23  ;;  %v1684_v50 = vshrl.u32 %v14732_v45, 16  ;;  %v1690_v51 = vshll.u32 %v14733_v46, 16  ;;  %v1676_v59 = vrot.slane %v1674_v48, 5  ;;  %v14735_v20 = vld [vmem:[%s19527_s27 + $0x34] sm:$0xf]  ;;  %s21403_s19 = scalar_lea.vmem %s23358_s2, %s14612_s17  ;;  %s23131_s7 = scalar_lea.vmem [#allocation3], %s14606_s12 }
  0x37   : > { %v1942_v34 = vrot.slane %v1941_v26, 4  ;;  %v1669_v38 = vsel %vm19552_vm2, %v1664_v28, %v1668_v16  ;;  %v1962_v0 = vshll.u32 %v14767_v52, 16  ;;  %v14736_v21 = vld [vmem:[%s19527_s27 + $0x38] sm:$0x1]  ;;  %v1695_v24 = vshrl.u32 %v14734_v19, 16  ;;  %s18848_s18 = smul.u32 192, %s19364_s25 }
  0x38   : > { %v14774_v41 = vcombine.low %v1659_v33, %v1669_v38  ;;  %v1952_v43 = vrot.slane %v1951_v36, 4  ;;  %v1686_v61 = vrot.slane %v1684_v50, 4  ;;  %v1692_v62 = vrot.slane %v1690_v51, 5  ;;  %v14770_v26 = vld [vmem:[%s19527_s27 + $0xc0] sm:$0xf]  ;;  %v18951_v33 = vld [vmem:[%s19527_s27 + $0xb4] sm:$0xff]  }
  0x39   : > { %16643 = vmatpush3.bf16.msra.mxu0 %v18937_v49  ;;  %18299 = vmatpush3.bf16.msra.mxu1 %v18937_v49  ;;  %v1947_v42 = vsel %vm19552_vm2, %v1942_v34, %v1946_v23  ;;  %v1680_v49 = vshll.u32 %v14732_v45, 16  ;;  %v1964_v6 = vrot.slane %v1962_v0, 5  ;;  %v1698_v25 = vshll.u32 %v14734_v19, 16  ;;  %v18958_v0 = vld [vmem:[%s23359_s3 + $0x190] sm:$0xff]   ;;  %s14465_s13 = sadd.s32 %s18848_s18, %s16592_s14  ;;  %s14468_s25 = sshll.u32 %s23131_s7, 4  ;;  %s23296_s25 = int_to_ptr.vmem [resolvable:$true] %s14468_s25 }
  0x3a   : > { %17852 = vmatprep.subr.bf16.mxu1 %v18940_v54  ;;  %16900 = vmatprep.subr.bf16.mxu0 %v18941_v55  ;;  %v1957_v53 = vsel %vm19552_vm2, %v1952_v43, %v1956_v29  ;;  %v14768_v55 = vld [vmem:[%s19527_s27 + $0xb8] sm:$0xf]  ;;  %v1704_v28 = vshll.u32 %v14735_v20, 16  ;;  %v1708_v29 = vshrl.u32 %v14735_v20, 16  ;;  %v1697_v34 = vrot.slane %v1695_v24, 4  ;;  %v18956_v43 = vld [vmem:[%s23359_s3 + $0x170] sm:$0xff]  }
  0x3b   : > { %v14786_v58 = vcombine.low %v1947_v42, %v1957_v53  ;;  %v1682_v60 = vrot.slane %v1680_v49, 5  ;;  %v1968_v1 = vshll.u32 %v14768_v55, 16  ;;  %v1972_v4 = vshrl.u32 %v14768_v55, 16  ;;  %s16593_s24 = sshll.u32 %s14465_s13, 6  ;;  %s19286_s8 = sshll.u32 %s19378_s9, 4  ;;  %s19287_s8 = int_to_ptr.vmem [resolvable:$false] %s19286_s8 }
  0x3c   : > { %2648 = vmatmul.mubr.bf16.vlgmr.msra.gmra.mrb[0].mxu0 %v18938_v56  ;;  %2744 = vmatmul.mubr.bf16.vlgmr.msra.gmra.mrb[0].mxu1 %v18939_v57  ;;  %v14769_v56 = vld [vmem:[%s19527_s27 + $0xbc] sm:$0x1]  ;;  %v1959_v57 = vshrl.u32 %v14767_v52, 16  ;;  %v1700_v36 = vrot.slane %v1698_v25, 5  ;;  %v1983_v38 = vshrl.u32 %v14770_v26, 16  ;;  %v1706_v40 = vrot.slane %v1704_v28, 5  ;;  %s23294_s29 = scalar_lea.hbm %s23362_s6, %s16593_s24  ;;  %p19289_p6 = scmp.lt.s32.totalorder %s23296_s25, %s19287_s8 }
  0x3d   : > { %17853 = vmatpush3.bf16.msra.mxu1 %v18940_v54  ;;  %16901 = vmatpush3.bf16.msra.mxu0 %v18942_v63  ;;  %v1673_v54 = vrot.slane %v1671_v47, 4  ;;  %v1687_v3 = vor.u32 %v1686_v61, %v1682_v60  ;;  %v1970_v7 = vrot.slane %v1968_v1, 5  ;;  %v1974_v11 = vrot.slane %v1972_v4, 4  ;;  %v18957_v52 = vld [vmem:[%s23359_s3 + $0x1d0] sm:$0xff]   ;;  %v14737_v4 = vld [vmem:[%s19527_s27 + $0x3c] sm:$0xf] }
  0x3e   : > { %17854 = vmatprep.subr.bf16.mxu1 %v18943_v5  ;;  %16902 = vmatprep.subr.bf16.mxu0 %v18948_v32  ;;  %v1961_v63 = vrot.slane %v1959_v57, 4  ;;  %v1701_v45 = vor.u32 %v1700_v36, %v1697_v34  ;;  %v1985_v46 = vrot.slane %v1983_v38, 4  ;;  %v1986_v47 = vshll.u32 %v14770_v26, 16  ;;  %v14794_v34 = vld [vmem:[%s19527_s27 + $0x20] sm:$0x1] }
  0x3f   : > { %2655 = vmatprep.mubr.bf16.mxu0 %v14774_v41  ;;  %2751 = vmatprep.mubr.bf16.mxu1 %v14786_v58  ;;  %v1677_v2 = vor.u32 %v1676_v59, %v1673_v54  ;;  %v1688_v10 = vrot.slane %v1687_v3, 4  ;;  %v1975_v18 = vor.u32 %v1974_v11, %v1970_v7  ;;  %v1710_v41 = vrot.slane %v1708_v29, 4  ;;  %v18954_v58 = vld [vmem:[%s19527_s27 + $0x30] sm:$0xff]   ;;  %v18959_v3 = vld [vmem:[%s23359_s3 + $0x178] sm:$0xff]  }
  0x40   : > { %v1965_v13 = vor.u32 %v1964_v6, %v1961_v63  ;;  %v1702_v53 = vrot.slane %v1701_v45, 4  ;;  %v1988_v54 = vrot.slane %v1986_v47, 5  ;;  %v23375_v25 = vmov 0 }
  0x41   : > { %17855 = vmatpush3.bf16.msra.mxu1 %v18943_v5  ;;  %16903 = vmatpush3.bf16.msra.mxu0 %v18949_v37  ;;  %v1978_v5 = vshll.u32 %v14769_v56, 16  ;;  %v1678_v9 = vrot.slane %v1677_v2, 4  ;;  %v1693_v17 = vsel %vm19552_vm2, %v1688_v10, %v1692_v62  ;;  %v1976_v27 = vrot.slane %v1975_v18, 4  ;;  %v14772_v37 = vld [vmem:[%s19527_s27 + $0xc8] sm:$0x1] }
  0x42   : > { %17856 = vmatprep.subr.bf16.mxu1 %v18946_v31  ;;  %v1966_v23 = vrot.slane %v1965_v13, 4  ;;  %v1711_v48 = vor.u32 %v1710_v41, %v1706_v40  ;;  %v2002_v51 = vshll.u32 %v14772_v37, 16  ;;  %v1707_v59 = vsel %vm19552_vm2, %v1702_v53, %v1706_v40  ;;  %16904 = vmatprep.subr.bf16.mxu0 %v18957_v52  ;;  %v18962_v37 = vld [vmem:[%s23359_s3 + $0x1d8] sm:$0xff]  }
  0x43   : > { %v1980_v14 = vrot.slane %v1978_v5, 5  ;;  %v1683_v16 = vsel %vm19552_vm2, %v1678_v9, %v1682_v60  ;;  %v1989_v60 = vor.u32 %v1988_v54, %v1985_v46  ;;  %v14738_v5 = vld [vmem:[%s19527_s27 + $0x40] sm:$0xf]  ;;  %v1722_v9 = vshll.u32 %v14737_v4, 16  ;;  %v14740_v54 = vld [vmem:[%s19527_s27 + $0x48] sm:$0xf] }
  0x44   : > { %2656 = vmatmul.mubr.bf16.gmra.mrb[4].mxu0 %v18944_v30  ;;  %2752 = vmatmul.mubr.bf16.gmra.mrb[4].mxu1 %v18945_v44  ;;  %v14775_v22 = vcombine.low %v1683_v16, %v1693_v17  ;;  %v1714_v30 = vshll.u32 %v14736_v21, 16  ;;  %v1971_v32 = vsel %vm19552_vm2, %v1966_v23, %v1970_v7  ;;  %v1712_v55 = vrot.slane %v1711_v48, 4  ;;  %v14739_v7 = vld [vmem:[%s19527_s27 + $0x44] sm:$0x1]  ;;  %v14791_v21 = vld [vmem:[%s19527_s27 + $0x14] sm:$0x1] }
  0x45   : > { %17857 = vmatpush3.bf16.msra.mxu1 %v18946_v31  ;;  %v14771_v31 = vld [vmem:[%s19527_s27 + $0xc4] sm:$0xf]  ;;  %v2004_v63 = vrot.slane %v2002_v51, 5  ;;  %v1990_v2 = vrot.slane %v1989_v60, 4  ;;  %16905 = vmatpush3.bf16.msra.mxu0 %v18958_v0  ;;  %v1728_v10 = vshll.u32 %v14738_v5, 16  ;;  %v1738_v13 = vshll.u32 %v14739_v7, 16 }
  0x46   : > { %17858 = vmatprep.subr.bf16.mxu1 %v18947_v39  ;;  %2663 = vmatprep.mubr.bf16.mxu0 %v14775_v22  ;;  %v1716_v42 = vrot.slane %v1714_v30, 5  ;;  %v1992_v49 = vshll.u32 %v14771_v31, 16  ;;  %v1996_v50 = vshrl.u32 %v14771_v31, 16  ;;  %v18955_v17 = vld [vmem:[%s19527_s27 + $0xc0] sm:$0xff]   ;;  %v1724_v19 = vrot.slane %v1722_v9, 5 }
  0x47   : > { %v1730_v20 = vrot.slane %v1728_v10, 5  ;;  %v1740_v24 = vrot.slane %v1738_v13, 5  ;;  %v23376_v25 = vsel %vm19670_vm5, 4294967295, %v23375_v25  ;;  %v2187_v30 = vrot.slane %v14791_v21, 5  ;;  %v14792_v31 = vld [vmem:[%s19527_s27 + $0x18] sm:$0xe]  ;;  %16906 = vmatprep.subr.bf16.mxu0 %v18962_v37 }
  0x48   : > { %v1994_v56 = vrot.slane %v1992_v49, 5  ;;  %v1998_v57 = vrot.slane %v1996_v50, 4  ;;  %v1717_v61 = vsel %vm19552_vm2, %v1712_v55, %v1716_v42  ;;  %23377 = vst [vmem:[#allocation9_spill] sm:$0xff] %v23376_v25  ;;  %v14838_v36 = vrot.slane %v14792_v31, 9  ;;  %v18964_v49 = vld [vmem:[%s23359_s3 + $0x198] sm:$0xff]  }
  0x49   : > { %17859 = vmatpush3.bf16.msra.mxu1 %v18947_v39  ;;  %v1981_v39 = vsel %vm19552_vm2, %v1976_v27, %v1980_v14  ;;  %v14776_v1 = vcombine.low %v1707_v59, %v1717_v61  ;;  %v14789_v14 = vld [vmem:[%s19527_s27 + $0xc] sm:$0xe]  ;;  %v18961_v27 = vld [vmem:[%s23359_s3 + $0x40] sm:$0xff]   ;;  %16907 = vmatpush3.bf16.msra.mxu0 %v18964_v49  ;;  %v1743_v59 = vshrl.u32 %v14740_v54, 16  ;;  %v1746_v60 = vshll.u32 %v14740_v54, 16 }
  0x4a   : > { %17860 = vmatprep.subr.bf16.mxu1 %v18952_v8  ;;  %v14787_v44 = vcombine.low %v1971_v32, %v1981_v39  ;;  %v1999_v62 = vor.u32 %v1998_v57, %v1994_v56  ;;  %v1995_v11 = vsel %vm19552_vm2, %v1990_v2, %v1994_v56  ;;  %v14837_v26 = vrot.slane %v14789_v14, 9  ;;  %v14741_v55 = vld [vmem:[%s19527_s27 + $0x4c] sm:$0xf]  ;;  %v14742_v56 = vld [vmem:[%s19527_s27 + $0x50] sm:$0x1] }
  0x4b   : > { %v1752_v61 = vshll.u32 %v14741_v55, 16  ;;  %v1762_v0 = vshll.u32 %v14742_v56, 16  ;;  %v14797_v2 = vld [vmem:[%s19527_s27 + $0x2c] sm:$0x1]  ;;  %v14799_v13 = vld [vmem:[%s19527_s27 + $0x34] sm:$0xf] }
  0x4c   : > { %2664 = vmatmul.mubr.bf16.gmra.mrb[8].mxu0 %v18950_v12  ;;  %2759 = vmatprep.mubr.bf16.mxu1 %v14787_v44  ;;  %v2000_v6 = vrot.slane %v1999_v62, 4  ;;  %v1732_v12 = vshrl.u32 %v14738_v5, 16  ;;  %v2194_v44 = vrot.slane %v14794_v34, 5  ;;  %v14795_v62 = vld [vmem:[%s19527_s27 + $0x24] sm:$0xe]  ;;  %v2201_v10 = vrot.slane %v14797_v2, 5 }
  0x4d   : > { %17861 = vmatpush3.bf16.msra.mxu1 %v18952_v8  ;;  %v1719_v8 = vshrl.u32 %v14737_v4, 16  ;;  %2671 = vmatprep.mubr.bf16.mxu0 %v14776_v1  ;;  %v14796_v1 = vld [vmem:[%s19527_s27 + $0x28] sm:$0xf]  ;;  %v1748_v4 = vrot.slane %v1746_v60, 5  ;;  %v1754_v5 = vrot.slane %v1752_v61, 5  ;;  %v18971_v61 = vld [vmem:[%s23359_s3 + $0x50] sm:$0xff]  }
  0x4e   : > { %17862 = vmatprep.subr.bf16.mxu1 %v18953_v15  ;;  %2760 = vmatmul.mubr.bf16.gmra.mrb[8].mxu1 %v18951_v33  ;;  %v2005_v16 = vsel %vm19552_vm2, %v2000_v6, %v2004_v63  ;;  %v1734_v23 = vrot.slane %v1732_v12, 4  ;;  %v14793_v33 = vld [vmem:[%s19527_s27 + $0x1c] sm:$0xf]  ;;  %v1756_v63 = vshrl.u32 %v14741_v55, 16  ;;  %v14839_v6 = vrot.slane %v14795_v62, 9 }
  0x4f   : > { %v1721_v18 = vrot.slane %v1719_v8, 4  ;;  %v14788_v22 = vcombine.low %v1995_v11, %v2005_v16  ;;  %v2191_v41 = vrot.slane %v14793_v33, 5  ;;  %v1764_v8 = vrot.slane %v1762_v0, 5  ;;  %v14798_v12 = vld [vmem:[%s19527_s27 + $0x30] sm:$0xe] }
  0x50   : > { %v1735_v32 = vor.u32 %v1734_v23, %v1730_v20  ;;  %v1758_v7 = vrot.slane %v1756_v63, 4  ;;  %v2198_v9 = vrot.slane %v14796_v1, 5  ;;  %v14800_v14 = vld [vmem:[%s19527_s27 + $0x38] sm:$0x1]  ;;  %v14745_v34 = vld [vmem:[%s19527_s27 + $0x5c] sm:$0x1] }
  0x51   : > { %17863 = vmatpush3.bf16.msra.mxu1 %v18953_v15  ;;  %v14790_v15 = vld [vmem:[%s19527_s27 + $0x10] sm:$0xf]  ;;  %v1725_v28 = vor.u32 %v1724_v19, %v1721_v18  ;;  %2767 = vmatprep.mubr.bf16.mxu1 %v14788_v22  ;;  %v2192_v47 = vsel %vm19670_vm5, %v14838_v36, %v2191_v41  ;;  %v2193_v48 = vrot.slane %v2191_v41, 4  ;;  %v14840_v18 = vrot.slane %v14798_v12, 9  ;;  %v18966_v22 = vld [vmem:[%s23359_s3 + $0x48] sm:$0xff]   ;;  %v18969_v41 = vld [vmem:[%s23359_s3 + $0x1e0] sm:$0xff]  }
  0x52   : > { %17864 = vmatprep.subr.bf16.mxu1 %v18956_v43  ;;  %v2184_v29 = vrot.slane %v14790_v15, 5  ;;  %v1736_v42 = vrot.slane %v1735_v32, 4  ;;  %v1759_v15 = vor.u32 %v1758_v7, %v1754_v5  ;;  %v2199_v16 = vsel %vm19670_vm5, %v14839_v6, %v2198_v9  ;;  %v14744_v33 = vld [vmem:[%s19527_s27 + $0x58] sm:$0xf]  ;;  %16908 = vmatprep.subr.bf16.mxu0 %v18969_v41  ;;  %v14805_v60 = vld [vmem:[%s19527_s27 + $0x4c] sm:$0xf] }
  0x53   : > { %v1726_v38 = vrot.slane %v1725_v28, 4  ;;  %v2195_v53 = vsel %vm19670_vm5, %v2193_v48, %v2194_v44  ;;  %v2208_v21 = vrot.slane %v14800_v14, 5  ;;  %v1780_v44 = vshrl.u32 %v14744_v33, 16  ;;  %v14806_v1 = vld [vmem:[%s19527_s27 + $0x50] sm:$0x1]  ;;  %v18974_v14 = vld [vmem:[%s23359_s3 + $0x58] sm:$0xff]  }
  0x54   : > { %2672 = vmatmul.mubr.bf16.gmra.mrb[12].mxu0 %v18954_v58  ;;  %v2185_v39 = vsel %vm19670_vm5, %v14837_v26, %v2184_v29  ;;  %v2186_v40 = vrot.slane %v2184_v29, 4  ;;  %v1741_v50 = vsel %vm19552_vm2, %v1736_v42, %v1740_v24  ;;  %v14854_v57 = vcombine.low %v2192_v47, %v2195_v53  ;;  %v18963_v58 = vld [vmem:[%s23359_s3] sm:$0xff]   ;;  %v18967_v26 = vld [vmem:[%s23359_s3 + $0x8] sm:$0xff]   ;;  %v18972_v6 = vld [vmem:[%s23359_s3 + $0x10] sm:$0xff]  }
  0x55   : > { %17865 = vmatpush3.bf16.msra.mxu1 %v18956_v43  ;;  %v18960_v43 = vld [vmem:[%s19527_s27 + $0x3c] sm:$0xff]   ;;  %v1731_v45 = vsel %vm19552_vm2, %v1726_v38, %v1730_v20  ;;  %v2205_v20 = vrot.slane %v14799_v13, 5  ;;  %v1760_v23 = vrot.slane %v1759_v15, 4  ;;  %v14803_v47 = vld [vmem:[%s19527_s27 + $0x44] sm:$0x1]  ;;  %v1782_v53 = vrot.slane %v1780_v44, 4 }
  0x56   : > { %17866 = vmatprep.subr.bf16.mxu1 %v18959_v3  ;;  %2768 = vmatmul.mubr.bf16.gmra.mrb[12].mxu1 %v18955_v17  ;;  %v2188_v46 = vsel %vm19670_vm5, %v2186_v40, %v2187_v30  ;;  %v14777_v52 = vcombine.low %v1731_v45, %v1741_v50  ;;  %v2200_v17 = vrot.slane %v2198_v9, 4  ;;  %v18965_v30 = vld [vmem:[%s19527_s27 + $0x48] sm:$0xff]   ;;  %v14801_v40 = vld [vmem:[%s19527_s27 + $0x3c] sm:$0xe]  ;;  %v1786_v45 = vshll.u32 %v14745_v34, 16  ;;  %v18968_v9 = vld [vmem:[%s19527_s27 + $0x54] sm:$0xff]  }
  0x57   : > { %v14853_v51 = vcombine.low %v2185_v39, %v2188_v46  ;;  %v2206_v31 = vsel %vm19670_vm5, %v14840_v18, %v2205_v20  ;;  %v2207_v32 = vrot.slane %v2205_v20, 4  ;;  %v1765_v36 = vsel %vm19552_vm2, %v1760_v23, %v1764_v8  ;;  %v14802_v46 = vld [vmem:[%s19527_s27 + $0x40] sm:$0xf]  ;;  %v14748_v20 = vld [vmem:[%s19527_s27 + $0x68] sm:$0x1] }
  0x58   : > { %2679 = vmatprep.mubr.bf16.mxu0 %v14777_v52  ;;  %v2202_v24 = vsel %vm19670_vm5, %v2200_v17, %v2201_v10  ;;  %v1776_v39 = vshll.u32 %v14744_v33, 16  ;;  %v18970_v52 = vld [vmem:[%s23359_s3 + $0x1a0] sm:$0xff]   ;;  %v1788_v54 = vrot.slane %v1786_v45, 5  ;;  %v14841_v55 = vrot.slane %v14801_v40, 9  ;;  %v14809_v33 = vld [vmem:[%s19527_s27 + $0x5c] sm:$0x1] }
  0x59   : > { %17867 = vmatpush3.bf16.msra.mxu1 %v18959_v3  ;;  %17868 = vmatprep.mubr.bf16.mxu1 %v14853_v51  ;;  %v1745_v3 = vrot.slane %v1743_v59, 4  ;;  %v14855_v29 = vcombine.low %v2199_v16, %v2202_v24  ;;  %v2212_v56 = vrot.slane %v14802_v46, 5  ;;  %v14804_v59 = vld [vmem:[%s19527_s27 + $0x48] sm:$0xe]  ;;  %v14746_v16 = vld [vmem:[%s19527_s27 + $0x60] sm:$0xf] }
  0x5a   : > { %16764 = vmatprep.subr.bf16.mxu1 %v18961_v27  ;;  %v14743_v27 = vld [vmem:[%s19527_s27 + $0x54] sm:$0xf]  ;;  %v1778_v51 = vrot.slane %v1776_v39, 5  ;;  %v14842_v2 = vrot.slane %v14804_v59, 9  ;;  %16909 = vmatpush3.bf16.msra.mxu0 %v18970_v52  ;;  %v2229_v41 = vrot.slane %v14809_v33, 5  ;;  %v18977_v52 = vld [vmem:[%s23359_s3 + $0x1a8] sm:$0xff]  }
  0x5b   : > { %v1749_v11 = vor.u32 %v1748_v4, %v1745_v3  ;;  %v1767_v37 = vshrl.u32 %v14743_v27, 16  ;;  %v1770_v38 = vshll.u32 %v14743_v27, 16  ;;  %v2213_v63 = vsel %vm19670_vm5, %v14841_v55, %v2212_v56  ;;  %v14811_v44 = vld [vmem:[%s19527_s27 + $0x64] sm:$0xf]  ;;  %v14812_v45 = vld [vmem:[%s19527_s27 + $0x68] sm:$0x1] }
  0x5c   : > { %2680 = vmatmul.mubr.bf16.gmra.mrb[16].mxu0 %v18960_v43  ;;  %v2209_v43 = vsel %vm19670_vm5, %v2207_v32, %v2208_v21  ;;  %v1783_v62 = vor.u32 %v1782_v53, %v1778_v51  ;;  %v2214_v0 = vrot.slane %v2212_v56, 4  ;;  %v2219_v4 = vrot.slane %v14805_v60, 5  ;;  %v14808_v32 = vld [vmem:[%s19527_s27 + $0x58] sm:$0xf]  ;;  %v18980_v33 = vld [vmem:[%s23359_s3 + $0x20] sm:$0xff]  }
  0x5d   : > { %v1750_v19 = vrot.slane %v1749_v11, 4  ;;  %v14856_v48 = vcombine.low %v2206_v31, %v2209_v43  ;;  %v1769_v49 = vrot.slane %v1767_v37, 4  ;;  %v1772_v50 = vrot.slane %v1770_v38, 5 }
  0x5e   : > { %17869 = vmatmul.mubr.bf16.vlgmr.msra.gmra.mrb[16].mxu1 %v14854_v57  ;;  %v1784_v7 = vrot.slane %v1783_v62, 4  ;;  %v2220_v12 = vsel %vm19670_vm5, %v14842_v2, %v2219_v4  ;;  %v2221_v13 = vrot.slane %v2219_v4, 4  ;;  %v1791_v21 = vshrl.u32 %v14746_v16, 16  ;;  %v14751_v2 = vld [vmem:[%s19527_s27 + $0x74] sm:$0x1] }
  0x5f   : > { %16765 = vmatpush3.bf16.msra.mxu1 %v18963_v58  ;;  %v1755_v28 = vsel %vm19552_vm2, %v1750_v19, %v1754_v5  ;;  %17872 = vmatprep.mubr.bf16.mxu1 %v14855_v29  ;;  %v1773_v57 = vor.u32 %v1772_v50, %v1769_v49  ;;  %v2215_v58 = vrot.slane %v14803_v47, 5  ;;  %v2222_v5 = vrot.slane %v14806_v1, 5  ;;  %v14747_v19 = vld [vmem:[%s19527_s27 + $0x64] sm:$0xf]  ;;  %v18975_v29 = vld [vmem:[%s23359_s3 + $0x1e8] sm:$0xff]   ;;  %v18976_v47 = vld [vmem:[%s23359_s3 + $0x18] sm:$0xff]  }
  0x60   : > { %16766 = vmatprep.subr.bf16.mxu1 %v18966_v22  ;;  %v14778_v42 = vcombine.low %v1755_v28, %v1765_v36  ;;  %v1789_v15 = vsel %vm19552_vm2, %v1784_v7, %v1788_v54  ;;  %v1794_v22 = vshll.u32 %v14746_v16, 16  ;;  %v1800_v24 = vshll.u32 %v14747_v19, 16  ;;  %v14807_v28 = vld [vmem:[%s19527_s27 + $0x54] sm:$0xe]  ;;  %16910 = vmatprep.subr.bf16.mxu0 %v18975_v29  ;;  %v14750_v1 = vld [vmem:[%s19527_s27 + $0x70] sm:$0xf] }
  0x61   : > { %v1774_v3 = vrot.slane %v1773_v57, 4  ;;  %v2216_v8 = vsel %vm19670_vm5, %v2214_v0, %v2215_v58  ;;  %v2223_v18 = vsel %vm19670_vm5, %v2221_v13, %v2222_v5  ;;  %v1810_v27 = vshll.u32 %v14748_v20, 16  ;;  %v18973_v57 = vld [vmem:[%s19527_s27 + $0x60] sm:$0xff]   ;;  %16911 = vmatpush3.bf16.msra.mxu0 %v18977_v52  ;;  %v14749_v0 = vld [vmem:[%s19527_s27 + $0x6c] sm:$0xf] }
  0x62   : > { %2687 = vmatprep.mubr.bf16.mxu0 %v14778_v42  ;;  %v14857_v11 = vcombine.low %v2213_v63, %v2216_v8  ;;  %v14858_v23 = vcombine.low %v2220_v12, %v2223_v18  ;;  %v1796_v31 = vrot.slane %v1794_v22, 5  ;;  %v1802_v34 = vrot.slane %v1800_v24, 5  ;;  %v14810_v42 = vld [vmem:[%s19527_s27 + $0x60] sm:$0xe]  ;;  %v14813_v7 = vld [vmem:[%s19527_s27 + $0x6c] sm:$0xe] }
  0x63   : > { %16767 = vmatpush3.bf16.msra.mxu1 %v18967_v26  ;;  %v1779_v10 = vsel %vm19552_vm2, %v1774_v3, %v1778_v51  ;;  %v1804_v26 = vshrl.u32 %v14747_v19, 16  ;;  %v1812_v37 = vrot.slane %v1810_v27, 5  ;;  %v14843_v38 = vrot.slane %v14807_v28, 9  ;;  %v18979_v8 = vld [vmem:[%s23359_s3 + $0x60] sm:$0xff]   ;;  %v14815_v12 = vld [vmem:[%s19527_s27 + $0x74] sm:$0x1] }
  0x64   : > { %2688 = vmatmul.mubr.bf16.gmra.mrb[20].mxu0 %v18965_v30  ;;  %16768 = vmatprep.subr.bf16.mxu1 %v18971_v61  ;;  %v14779_v17 = vcombine.low %v1779_v10, %v1789_v15  ;;  %v1793_v30 = vrot.slane %v1791_v21, 4  ;;  %v2226_v40 = vrot.slane %v14808_v32, 5  ;;  %v14844_v46 = vrot.slane %v14810_v42, 9  ;;  %v14816_v22 = vld [vmem:[%s19527_s27 + $0x78] sm:$0xe] }
  0x65   : > { %v1806_v36 = vrot.slane %v1804_v26, 4  ;;  %v2233_v51 = vrot.slane %v14811_v44, 5  ;;  %v2236_v54 = vrot.slane %v14812_v45, 5  ;;  %v1815_v4 = vshrl.u32 %v14749_v0, 16  ;;  %v14818_v24 = vld [vmem:[%s19527_s27 + $0x80] sm:$0x1] }
  0x66   : > { %17873 = vmatmul.mubr.bf16.gmra.mrb[20].mxu1 %v14856_v48  ;;  %2695 = vmatprep.mubr.bf16.mxu0 %v14779_v17  ;;  %v1797_v39 = vor.u32 %v1796_v31, %v1793_v30  ;;  %v2227_v49 = vsel %vm19670_vm5, %v14843_v38, %v2226_v40  ;;  %v2228_v50 = vrot.slane %v2226_v40, 4  ;;  %v1818_v5 = vshll.u32 %v14749_v0, 16  ;;  %v14752_v38 = vld [vmem:[%s19527_s27 + $0x78] sm:$0xf]  ;;  %v14754_v44 = vld [vmem:[%s19527_s27 + $0x80] sm:$0x1] }
  0x67   : > { %16769 = vmatpush3.bf16.msra.mxu1 %v18972_v6  ;;  %17876 = vmatprep.mubr.bf16.mxu1 %v14857_v11  ;;  %v1807_v43 = vor.u32 %v1806_v36, %v1802_v34  ;;  %v2234_v58 = vsel %vm19670_vm5, %v14844_v46, %v2233_v51  ;;  %v2235_v59 = vrot.slane %v2233_v51, 4  ;;  %v1824_v6 = vshll.u32 %v14750_v1, 16  ;;  %v14814_v11 = vld [vmem:[%s19527_s27 + $0x70] sm:$0xf] }
  0x68   : > { %16770 = vmatprep.subr.bf16.mxu1 %v18974_v14  ;;  %v1798_v48 = vrot.slane %v1797_v39, 4  ;;  %v2230_v56 = vsel %vm19670_vm5, %v2228_v50, %v2229_v41  ;;  %v1834_v10 = vshll.u32 %v14751_v2, 16  ;;  %v1817_v13 = vrot.slane %v1815_v4, 4  ;;  %v18982_v45 = vld [vmem:[%s23359_s3 + $0x1f0] sm:$0xff]   ;;  %v14819_v50 = vld [vmem:[%s19527_s27 + $0x84] sm:$0xe] }
  0x69   : > { %v1808_v53 = vrot.slane %v1807_v43, 4  ;;  %v14859_v61 = vcombine.low %v2227_v49, %v2230_v56  ;;  %v2237_v63 = vsel %vm19670_vm5, %v2235_v59, %v2236_v54  ;;  %v1820_v14 = vrot.slane %v1818_v5, 5  ;;  %v14753_v43 = vld [vmem:[%s19527_s27 + $0x7c] sm:$0xf]  ;;  %v18983_v51 = vld [vmem:[%s23359_s3 + $0x1b0] sm:$0xff]   ;;  %16912 = vmatprep.subr.bf16.mxu0 %v18982_v45 }
  0x6a   : > { %v1803_v55 = vsel %vm19552_vm2, %v1798_v48, %v1802_v34  ;;  %v14860_v3 = vcombine.low %v2234_v58, %v2237_v63  ;;  %v1826_v15 = vrot.slane %v1824_v6, 5  ;;  %v14845_v16 = vrot.slane %v14813_v7, 9  ;;  %v14820_v56 = vld [vmem:[%s19527_s27 + $0x88] sm:$0xf]  ;;  %16913 = vmatpush3.bf16.msra.mxu0 %v18983_v51  ;;  %v14822_v5 = vld [vmem:[%s19527_s27 + $0x90] sm:$0xe] }
  0x6b   : > { %16771 = vmatpush3.bf16.msra.mxu1 %v18976_v47  ;;  %v1813_v60 = vsel %vm19552_vm2, %v1808_v53, %v1812_v37  ;;  %v1836_v18 = vrot.slane %v1834_v10, 5  ;;  %v2240_v19 = vrot.slane %v14814_v11, 5  ;;  %v2243_v20 = vrot.slane %v14815_v12, 5  ;;  %v18978_v37 = vld [vmem:[%s19527_s27 + $0x6c] sm:$0xff]   ;;  %v14823_v6 = vld [vmem:[%s19527_s27 + $0x94] sm:$0xf] }
  0x6c   : > { %2696 = vmatmul.mubr.bf16.gmra.mrb[24].mxu0 %v18968_v9  ;;  %v14780_v62 = vcombine.low %v1803_v55, %v1813_v60  ;;  %v1828_v9 = vshrl.u32 %v14750_v1, 16  ;;  %16772 = vmatprep.subr.bf16.mxu1 %v18979_v8  ;;  %v1821_v21 = vor.u32 %v1820_v14, %v1817_v13  ;;  %v14846_v29 = vrot.slane %v14816_v22, 9  ;;  %v18985_v7 = vld [vmem:[%s23359_s3 + $0x28] sm:$0xff]   ;;  %v14824_v11 = vld [vmem:[%s19527_s27 + $0x98] sm:$0x1] }
  0x6d   : > { %v2241_v27 = vsel %vm19670_vm5, %v14845_v16, %v2240_v19  ;;  %v2242_v28 = vrot.slane %v2240_v19, 4  ;;  %v2250_v32 = vrot.slane %v14818_v24, 5  ;;  %v1839_v47 = vshrl.u32 %v14752_v38, 16  ;;  %v18987_v19 = vld [vmem:[%s23359_s3 + $0x70] sm:$0xff]   ;;  %v18988_v24 = vld [vmem:[%s23359_s3 + $0x1f8] sm:$0xff]  }
  0x6e   : > { %17877 = vmatmul.mubr.bf16.gmra.mrb[24].mxu1 %v14858_v23  ;;  %2703 = vmatprep.mubr.bf16.mxu0 %v14780_v62  ;;  %v1830_v17 = vrot.slane %v1828_v9, 4  ;;  %v14817_v23 = vld [vmem:[%s19527_s27 + $0x7c] sm:$0xf]  ;;  %v1822_v30 = vrot.slane %v1821_v21, 4  ;;  %v1842_v48 = vshll.u32 %v14752_v38, 16  ;;  %v1848_v49 = vshll.u32 %v14753_v43, 16 }
  0x6f   : > { %17880 = vmatprep.mubr.bf16.mxu1 %v14859_v61  ;;  %v2247_v31 = vrot.slane %v14817_v23, 5  ;;  %v2244_v36 = vsel %vm19670_vm5, %v2242_v28, %v2243_v20  ;;  %16773 = vmatpush3.bf16.msra.mxu1 %v18980_v33  ;;  %v1852_v54 = vshrl.u32 %v14753_v43, 16  ;;  %v1858_v55 = vshll.u32 %v14754_v44, 16  ;;  %v18984_v62 = vld [vmem:[%s23359_s3 + $0x68] sm:$0xff]   ;;  %v14826_v43 = vld [vmem:[%s19527_s27 + $0xa0] sm:$0xf] }
  0x70   : > { %v1831_v26 = vor.u32 %v1830_v17, %v1826_v15  ;;  %v1827_v39 = vsel %vm19552_vm2, %v1822_v30, %v1826_v15  ;;  %v14861_v40 = vcombine.low %v2241_v27, %v2244_v36  ;;  %v1841_v59 = vrot.slane %v1839_v47, 4  ;;  %16774 = vmatprep.subr.bf16.mxu1 %v18984_v62  ;;  %v14755_v27 = vld [vmem:[%s19527_s27 + $0x84] sm:$0xf]  ;;  %v14756_v30 = vld [vmem:[%s19527_s27 + $0x88] sm:$0xf]  ;;  %16914 = vmatprep.subr.bf16.mxu0 %v18988_v24 }
  0x71   : > { %v2248_v41 = vsel %vm19670_vm5, %v14846_v29, %v2247_v31  ;;  %v2249_v42 = vrot.slane %v2247_v31, 4  ;;  %v1844_v60 = vrot.slane %v1842_v48, 5  ;;  %v1850_v61 = vrot.slane %v1848_v49, 5  ;;  %v14757_v31 = vld [vmem:[%s19527_s27 + $0x8c] sm:$0x1] }
  0x72   : > { %v1832_v34 = vrot.slane %v1831_v26, 4  ;;  %v1854_v63 = vrot.slane %v1852_v54, 4  ;;  %v1860_v0 = vrot.slane %v1858_v55, 5  ;;  %v14847_v1 = vrot.slane %v14819_v50, 9  ;;  %v14827_v44 = vld [vmem:[%s19527_s27 + $0xa4] sm:$0x1] }
  0x73   : > { %v2251_v53 = vsel %vm19670_vm5, %v2249_v42, %v2250_v32  ;;  %v2254_v2 = vrot.slane %v14820_v56, 5  ;;  %v14848_v12 = vrot.slane %v14822_v5, 9  ;;  %v2261_v14 = vrot.slane %v14823_v6, 5  ;;  %16775 = vmatpush3.bf16.msra.mxu1 %v18985_v7  ;;  %v14829_v54 = vld [vmem:[%s19527_s27 + $0xac] sm:$0xf]  ;;  %v18992_v5 = vld [vmem:[%s23359_s3 + $0x78] sm:$0xff]  }
  0x74   : > { %2704 = vmatmul.mubr.bf16.gmra.mrb[28].mxu0 %v18973_v57  ;;  %v1837_v46 = vsel %vm19552_vm2, %v1832_v34, %v1836_v18  ;;  %v14821_v57 = vld [vmem:[%s19527_s27 + $0x8c] sm:$0x1]  ;;  %v14862_v58 = vcombine.low %v2248_v41, %v2251_v53  ;;  %v1855_v8 = vor.u32 %v1854_v63, %v1850_v61  ;;  %v2264_v15 = vrot.slane %v14824_v11, 5  ;;  %v18981_v18 = vld [vmem:[%s19527_s27 + $0x78] sm:$0xff]   ;;  %16776 = vmatprep.subr.bf16.mxu1 %v18987_v19  ;;  %v14830_v55 = vld [vmem:[%s19527_s27 + $0xb0] sm:$0x1] }
  0x75   : > { %v14781_v52 = vcombine.low %v1827_v39, %v1837_v46  ;;  %v2257_v4 = vrot.slane %v14821_v57, 5  ;;  %v2255_v9 = vsel %vm19670_vm5, %v14847_v1, %v2254_v2  ;;  %v2256_v10 = vrot.slane %v2254_v2, 4  ;;  %v14825_v39 = vld [vmem:[%s19527_s27 + $0x9c] sm:$0xe]  ;;  %v18986_v63 = vld [vmem:[%s19527_s27 + $0x84] sm:$0xff]  }
  0x76   : > { %17881 = vmatmul.mubr.bf16.gmra.mrb[28].mxu1 %v14860_v3  ;;  %v1845_v3 = vor.u32 %v1844_v60, %v1841_v59  ;;  %v1856_v16 = vrot.slane %v1855_v8, 4  ;;  %v2262_v22 = vsel %vm19670_vm5, %v14848_v12, %v2261_v14  ;;  %v2263_v23 = vrot.slane %v2261_v14, 4  ;;  %v18990_v57 = vld [vmem:[%s23359_s3 + $0x1b8] sm:$0xff]   ;;  %v14759_v11 = vld [vmem:[%s19527_s27 + $0x94] sm:$0xf] }
  0x77   : > { %17884 = vmatprep.mubr.bf16.mxu1 %v14861_v40  ;;  %2711 = vmatprep.mubr.bf16.mxu0 %v14781_v52  ;;  %v2258_v17 = vsel %vm19670_vm5, %v2256_v10, %v2257_v4  ;;  %v1863_v32 = vshrl.u32 %v14755_v27, 16  ;;  %v1866_v33 = vshll.u32 %v14755_v27, 16  ;;  %v1872_v36 = vshll.u32 %v14756_v30, 16  ;;  %v18989_v40 = vld [vmem:[%s23359_s3 + $0x30] sm:$0xff]   ;;  %v14828_v52 = vld [vmem:[%s19527_s27 + $0xa8] sm:$0xe] }
  0x78   : > { %v1846_v13 = vrot.slane %v1845_v3, 4  ;;  %v14863_v21 = vcombine.low %v2255_v9, %v2258_v17  ;;  %v1861_v26 = vsel %vm19552_vm2, %v1856_v16, %v1860_v0  ;;  %v2265_v29 = vsel %vm19670_vm5, %v2263_v23, %v2264_v15  ;;  %16777 = vmatpush3.bf16.msra.mxu1 %v18989_v40  ;;  %16915 = vmatpush3.bf16.msra.mxu0 %v18990_v57  ;;  %v14758_v10 = vld [vmem:[%s19527_s27 + $0x90] sm:$0xf]  ;;  %v14760_v12 = vld [vmem:[%s19527_s27 + $0x98] sm:$0x1] }
  0x79   : > { %v14864_v34 = vcombine.low %v2262_v22, %v2265_v29  ;;  %v1882_v38 = vshll.u32 %v14757_v31, 16  ;;  %v1865_v41 = vrot.slane %v1863_v32, 4  ;;  %v1868_v42 = vrot.slane %v1866_v33, 5  ;;  %16778 = vmatprep.subr.bf16.mxu1 %v18992_v5  ;;  %v14831_v17 = vld [vmem:[%s19527_s27 + $0xb4] sm:$0xe] }
  0x7a   : > { %v1851_v20 = vsel %vm19552_vm2, %v1846_v13, %v1850_v61  ;;  %v1874_v45 = vrot.slane %v1872_v36, 5  ;;  %v14849_v48 = vrot.slane %v14825_v39, 9  ;;  %v2268_v50 = vrot.slane %v14826_v43, 5  ;;  %v14833_v22 = vld [vmem:[%s19527_s27 + $0xbc] sm:$0x1] }
  0x7b   : > { %v14782_v28 = vcombine.low %v1851_v20, %v1861_v26  ;;  %v1884_v47 = vrot.slane %v1882_v38, 5  ;;  %v1869_v49 = vor.u32 %v1868_v42, %v1865_v41  ;;  %v2271_v51 = vrot.slane %v14827_v44, 5  ;;  %v14834_v33 = vld [vmem:[%s19527_s27 + $0xc0] sm:$0xe]  ;;  %v14836_v36 = vld [vmem:[%s19527_s27 + $0xc8] sm:$0x1] }
  0x7c   : > { %2712 = vmatmul.mubr.bf16.gmra.mrb[32].mxu0 %v18978_v37  ;;  %v1876_v37 = vshrl.u32 %v14756_v30, 16  ;;  %v14850_v56 = vrot.slane %v14828_v52, 9  ;;  %v2269_v59 = vsel %vm19670_vm5, %v14849_v48, %v2268_v50  ;;  %v2270_v60 = vrot.slane %v2268_v50, 4  ;;  %v528_v52 = vld [vmem:[%s19527_s27 + $0x8] sm:$0x1] }
  0x7d   : > { %2719 = vmatprep.mubr.bf16.mxu0 %v14782_v28  ;;  %v2275_v61 = vrot.slane %v14829_v54, 5  ;;  %v2278_v0 = vrot.slane %v14830_v55, 5  ;;  %v1887_v14 = vshrl.u32 %v14758_v10, 16  ;;  %v1890_v15 = vshll.u32 %v14758_v10, 16  ;;  %v18991_v55 = vld [vmem:[%s19527_s27 + $0x90] sm:$0xff]  }
  0x7e   : > { %17885 = vmatmul.mubr.bf16.gmra.mrb[32].mxu1 %v14862_v58  ;;  %v1878_v46 = vrot.slane %v1876_v37, 4  ;;  %v1870_v58 = vrot.slane %v1869_v49, 4  ;;  %v2272_v2 = vsel %vm19670_vm5, %v2270_v60, %v2271_v51  ;;  %v1896_v16 = vshll.u32 %v14759_v11, 16  ;;  %v527_v51 = vld [vmem:[%s19527_s27 + $0x4] sm:$0xf] }
  0x7f   : > { %17888 = vmatprep.mubr.bf16.mxu1 %v14863_v21  ;;  %v2276_v3 = vsel %vm19670_vm5, %v14850_v56, %v2275_v61  ;;  %v2277_v4 = vrot.slane %v2275_v61, 4  ;;  %v14865_v7 = vcombine.low %v2269_v59, %v2272_v2  ;;  %v1900_v19 = vshrl.u32 %v14759_v11, 16  ;;  %v14832_v21 = vld [vmem:[%s19527_s27 + $0xb8] sm:$0xf] }
  0x80   : > { %v1879_v53 = vor.u32 %v1878_v46, %v1874_v45  ;;  %v1875_v1 = vsel %vm19552_vm2, %v1870_v58, %v1874_v45  ;;  %v1906_v20 = vshll.u32 %v14760_v12, 16  ;;  %v1889_v23 = vrot.slane %v1887_v14, 4  ;;  %v526_v46 = vld [vmem:[%s19527_s27] sm:$0xf]  ;;  %v15013_v59 = vld [vmem:[%s19527_s27 + $0x18] sm:$0xf] }
  0x81   : > { %v2279_v9 = vsel %vm19670_vm5, %v2277_v4, %v2278_v0  ;;  %v1892_v24 = vrot.slane %v1890_v15, 5  ;;  %v1898_v26 = vrot.slane %v1896_v16, 5  ;;  %v14851_v27 = vrot.slane %v14831_v17, 9  ;;  %v15014_v0 = vld [vmem:[%s19527_s27 + $0x1c] sm:$0xf] }
  0x82   : > { %v1880_v62 = vrot.slane %v1879_v53, 4  ;;  %v14866_v13 = vcombine.low %v2276_v3, %v2279_v9  ;;  %v1902_v28 = vrot.slane %v1900_v19, 4  ;;  %v1908_v29 = vrot.slane %v1906_v20, 5  ;;  %v18996_v53 = vld [vmem:[%s23359_s3 + $0x280] sm:$0xff]  }
  0x83   : > { %v2282_v30 = vrot.slane %v14832_v21, 5  ;;  %v2285_v31 = vrot.slane %v14833_v22, 5  ;;  %v1893_v32 = vor.u32 %v1892_v24, %v1889_v23  ;;  %v14852_v40 = vrot.slane %v14834_v33, 9  ;;  %17036 = vmatprep.subr.bf16.mxu0 %v18996_v53  ;;  %v18994_v24 = vld [vmem:[%s19527_s27] sm:$0xff]  }
  0x84   : > { %2720 = vmatmul.mubr.bf16.gmra.mrb[36].mxu0 %v18981_v18  ;;  %v1885_v6 = vsel %vm19552_vm2, %v1880_v62, %v1884_v47  ;;  %v18993_v18 = vld [vmem:[%s23359_s3 + $0x38] sm:$0xff]   ;;  %v1903_v37 = vor.u32 %v1902_v28, %v1898_v26  ;;  %v2292_v43 = vrot.slane %v14836_v36, 5  ;;  %v578_v56 = vshrl.u32 %v526_v46, 16  ;;  %v529_v28 = vld [vmem:[%s19527_s27 + $0xc] sm:$0xf] }
  0x85   : > { %v14783_v8 = vcombine.low %v1875_v1, %v1885_v6  ;;  %16779 = vmatpush3.bf16.msra.mxu1 %v18993_v18  ;;  %v2283_v38 = vsel %vm19670_vm5, %v14851_v27, %v2282_v30  ;;  %v2284_v39 = vrot.slane %v2282_v30, 4  ;;  %v1894_v41 = vrot.slane %v1893_v32, 4  ;;  %v15015_v1 = vld [vmem:[%s19527_s27 + $0x20] sm:$0x1]  ;;  %v531_v32 = vld [vmem:[%s19527_s27 + $0x14] sm:$0x1] }
  0x86   : > { %17889 = vmatmul.mubr.bf16.gmra.mrb[36].mxu1 %v14864_v34  ;;  %v14835_v34 = vld [vmem:[%s19527_s27 + $0xc4] sm:$0xf]  ;;  %v1904_v44 = vrot.slane %v1903_v37, 4  ;;  %v581_v57 = vshll.u32 %v526_v46, 16  ;;  %v587_v58 = vshll.u32 %v527_v51, 16  ;;  %v591_v62 = vshrl.u32 %v527_v51, 16 }
  0x87   : > { %17892 = vmatprep.mubr.bf16.mxu1 %v14865_v7  ;;  %2727 = vmatprep.mubr.bf16.mxu0 %v14783_v8  ;;  %v2289_v42 = vrot.slane %v14835_v34, 5  ;;  %v2286_v45 = vsel %vm19670_vm5, %v2284_v39, %v2285_v31  ;;  %v1899_v47 = vsel %vm19552_vm2, %v1894_v41, %v1898_v26  ;;  %v580_v3 = vrot.slane %v578_v56, 4  ;;  %v18998_v6 = vld [vmem:[%s23359_s3 + $0x80] sm:$0xff]   ;;  %v530_v31 = vld [vmem:[%s19527_s27 + $0x10] sm:$0xf]  ;;  %v18995_v41 = vld [vmem:[%s19527_s27 + $0x18] sm:$0xff]  }
  0x88   : > { %v14867_v48 = vcombine.low %v2283_v38, %v2286_v45  ;;  %v1909_v54 = vsel %vm19552_vm2, %v1904_v44, %v1908_v29  ;;  %v583_v4 = vrot.slane %v581_v57, 5  ;;  %v589_v5 = vrot.slane %v587_v58, 5  ;;  %17900 = vmatprep.subr.bf16.mxu1 %v18998_v6  ;;  %v15016_v39 = vld [vmem:[%s19527_s27 + $0x24] sm:$0xf]  ;;  %v15017_v45 = vld [vmem:[%s19527_s27 + $0x28] sm:$0xf] }
  0x89   : > { %v2290_v49 = vsel %vm19670_vm5, %v14852_v40, %v2289_v42  ;;  %v2291_v50 = vrot.slane %v2289_v42, 4  ;;  %v14784_v60 = vcombine.low %v1899_v47, %v1909_v54  ;;  %v593_v7 = vrot.slane %v591_v62, 4  ;;  %v18997_v47 = vld [vmem:[%s23359_s3 + $0x240] sm:$0xff]   ;;  %v19003_v56 = vld [vmem:[%s23359_s3 + $0x288] sm:$0xff]  }
  0x8a   : > { %v3597_v9 = vshrl.u32 %v15013_v59, 16  ;;  %v3600_v10 = vshll.u32 %v15013_v59, 16  ;;  %v584_v11 = vor.u32 %v583_v4, %v580_v3  ;;  %v3606_v12 = vshll.u32 %v15014_v0, 16  ;;  %v532_v4 = vld [vmem:[%s19527_s27 + $0x18] sm:$0xf] }
  0x8b   : > { %v2293_v61 = vsel %vm19670_vm5, %v2291_v50, %v2292_v43  ;;  %v3616_v14 = vshll.u32 %v15015_v1, 16  ;;  %v594_v15 = vor.u32 %v593_v7, %v589_v5  ;;  %v602_v33 = vshrl.u32 %v529_v28, 16  ;;  %v15018_v50 = vld [vmem:[%s19527_s27 + $0x2c] sm:$0x1] }
  0x8c   : > { %2728 = vmatmul.mubr.bf16.gmra.mrb[40].mxu0 %v18986_v63  ;;  %v597_v63 = vshll.u32 %v528_v52, 16  ;;  %v14868_v2 = vcombine.low %v2290_v49, %v2293_v61  ;;  %v3599_v16 = vrot.slane %v3597_v9, 4  ;;  %v3602_v17 = vrot.slane %v3600_v10, 5  ;;  %v19005_v61 = vld [vmem:[%s23359_s3 + $0x88] sm:$0xff]  }
  0x8d   : > { %2735 = vmatprep.mubr.bf16.mxu0 %v14784_v60  ;;  %v585_v18 = vrot.slane %v584_v11, 4  ;;  %v3608_v19 = vrot.slane %v3606_v12, 5  ;;  %v595_v21 = vrot.slane %v594_v15, 4  ;;  %v3618_v23 = vrot.slane %v3616_v14, 5  ;;  %v19004_v9 = vld [vmem:[%s23359_s3 + $0x248] sm:$0xff]  }
  0x8e   : > { %17893 = vmatmul.mubr.bf16.gmra.mrb[40].mxu1 %v14866_v13  ;;  %v599_v8 = vrot.slane %v597_v63, 5  ;;  %v3610_v13 = vshrl.u32 %v15014_v0, 16  ;;  %v3603_v22 = vor.u32 %v3602_v17, %v3599_v16  ;;  %v605_v37 = vshll.u32 %v529_v28, 16  ;;  %v534_v12 = vld [vmem:[%s19527_s27 + $0x20] sm:$0x1] }
  0x8f   : > { %17896 = vmatprep.mubr.bf16.mxu1 %v14867_v48  ;;  %v590_v26 = vsel %vm19552_vm2, %v585_v18, %v589_v5  ;;  %v611_v38 = vshll.u32 %v530_v31, 16  ;;  %v604_v42 = vrot.slane %v602_v33, 4  ;;  %v615_v43 = vshrl.u32 %v530_v31, 16  ;;  %v15019_v15 = vld [vmem:[%s19527_s27 + $0x30] sm:$0xf] }
  0x90   : > { %v3612_v20 = vrot.slane %v3610_v13, 4  ;;  %v600_v29 = vsel %vm19552_vm2, %v595_v21, %v599_v8  ;;  %v3604_v30 = vrot.slane %v3603_v22, 4  ;;  %v621_v44 = vshll.u32 %v531_v32, 16  ;;  %v533_v8 = vld [vmem:[%s19527_s27 + $0x1c] sm:$0xf]  ;;  %v18999_v18 = vld [vmem:[%s19527_s27 + $0xc] sm:$0xff]  }
  0x91   : > { %v14629_v34 = vcombine.low %v590_v26, %v600_v29  ;;  %v607_v48 = vrot.slane %v605_v37, 5  ;;  %v613_v49 = vrot.slane %v611_v38, 5  ;;  %v3621_v51 = vshrl.u32 %v15016_v39, 16  ;;  %v15020_v21 = vld [vmem:[%s19527_s27 + $0x34] sm:$0xf]  ;;  %v19000_v29 = vld [vmem:[%s19527_s27 + $0x24] sm:$0xff]  }
  0x92   : > { %v3613_v27 = vor.u32 %v3612_v20, %v3608_v19  ;;  %v3609_v40 = vsel %vm19552_vm2, %v3604_v30, %v3608_v19  ;;  %v617_v53 = vrot.slane %v615_v43, 4  ;;  %v623_v54 = vrot.slane %v621_v44, 5 }
  0x93   : > { %v608_v57 = vor.u32 %v607_v48, %v604_v42  ;;  %v3623_v58 = vrot.slane %v3621_v51, 4  ;;  %v3630_v59 = vshll.u32 %v15017_v45, 16  ;;  %v3634_v60 = vshrl.u32 %v15017_v45, 16 }
  0x94   : > { %2736 = vmatmul.mubr.bf16.gmra.mrb[44].mxu0 %v18991_v55  ;;  %v3614_v36 = vrot.slane %v3613_v27, 4  ;;  %v3624_v55 = vshll.u32 %v15016_v39, 16  ;;  %v618_v62 = vor.u32 %v617_v53, %v613_v49  ;;  %v3640_v0 = vshll.u32 %v15018_v50, 16  ;;  %v15021_v27 = vld [vmem:[%s19527_s27 + $0x38] sm:$0x1]  ;;  %v19010_v50 = vld [vmem:[%s23359_s3 + $0x290] sm:$0xff]  }
  0x95   : > { %v609_v1 = vrot.slane %v608_v57, 4  ;;  %v3636_v3 = vrot.slane %v3634_v60, 4  ;;  %v626_v13 = vshrl.u32 %v532_v4, 16  ;;  %v629_v14 = vshll.u32 %v532_v4, 16  ;;  %v535_v57 = vld [vmem:[%s19527_s27 + $0x24] sm:$0xf] }
  0x96   : > { %17897 = vmatmul.mubr.bf16.gmra.mrb[44].mxu1 %v14868_v2  ;;  %v3619_v46 = vsel %vm19552_vm2, %v3614_v36, %v3618_v23  ;;  %v3626_v63 = vrot.slane %v3624_v55, 5  ;;  %v3632_v2 = vrot.slane %v3630_v59, 5  ;;  %v619_v5 = vrot.slane %v618_v62, 4  ;;  %v19012_v59 = vld [vmem:[%s23359_s3 + $0x90] sm:$0xff]  }
  0x97   : > { %3113 = vmatprep.mubr.bf16.mxu1 %v14629_v34  ;;  %v15061_v52 = vcombine.low %v3609_v40, %v3619_v46  ;;  %v3642_v7 = vrot.slane %v3640_v0, 5  ;;  %v614_v10 = vsel %vm19552_vm2, %v609_v1, %v613_v49  ;;  %v635_v19 = vshll.u32 %v533_v8, 16  ;;  %v19001_v49 = vld [vmem:[%s19527_s27 + $0x18] sm:$0xff]  }
  0x98   : > { %v3637_v11 = vor.u32 %v3636_v3, %v3632_v2  ;;  %v624_v16 = vsel %vm19552_vm2, %v619_v5, %v623_v54  ;;  %v639_v20 = vshrl.u32 %v533_v8, 16  ;;  %v631_v26 = vrot.slane %v629_v14, 5  ;;  %v19011_v54 = vld [vmem:[%s23359_s3 + $0x250] sm:$0xff]   ;;  %v15022_v1 = vld [vmem:[%s19527_s27 + $0x3c] sm:$0xf] }
  0x99   : > { %4621 = vmatprep.mubr.bf16.mxu0 %v15061_v52  ;;  %v14630_v22 = vcombine.low %v614_v10, %v624_v16  ;;  %v637_v30 = vrot.slane %v635_v19, 5  ;;  %v645_v32 = vshll.u32 %v534_v12, 16  ;;  %v3645_v36 = vshrl.u32 %v15019_v15, 16  ;;  %v15024_v10 = vld [vmem:[%s19527_s27 + $0x44] sm:$0x1] }
  0x9a   : > { %v3638_v23 = vrot.slane %v3637_v11, 4  ;;  %v641_v31 = vrot.slane %v639_v20, 4  ;;  %v3648_v37 = vshll.u32 %v15019_v15, 16  ;;  %v3658_v45 = vshrl.u32 %v15020_v21, 16 }
  0x9b   : > { %v647_v40 = vrot.slane %v645_v32, 5  ;;  %v3647_v43 = vrot.slane %v3645_v36, 4  ;;  %v3664_v48 = vshll.u32 %v15021_v27, 16  ;;  %v650_v0 = vshrl.u32 %v535_v57, 16 }
  0x9c   : > { %4622 = vmatmul.mubr.bf16.vlgmr.msra.gmra.mrb[48].mxu0 %v18995_v41  ;;  %v3643_v33 = vsel %vm19552_vm2, %v3638_v23, %v3642_v7  ;;  %v642_v39 = vor.u32 %v641_v31, %v637_v30  ;;  %v3654_v41 = vshll.u32 %v15020_v21, 16  ;;  %v3650_v44 = vrot.slane %v3648_v37, 5 }
  0x9d   : > { %17037 = vmatpush3.bf16.msra.mxu0 %v18997_v47  ;;  %v3660_v53 = vrot.slane %v3658_v45, 4  ;;  %v3669_v11 = vshrl.u32 %v15022_v1, 16  ;;  %v3672_v19 = vshll.u32 %v15022_v1, 16  ;;  %v19007_v1 = vld [vmem:[%s19527_s27 + $0x3c] sm:$0xff]  }
  0x9e   : > { %3114 = vmatmul.mubr.bf16.vlgmr.msra.gmra.mrb[48].mxu1 %v18994_v24  ;;  %17038 = vmatprep.subr.bf16.mxu0 %v19003_v56  ;;  %v628_v24 = vrot.slane %v626_v13, 4  ;;  %v643_v46 = vrot.slane %v642_v39, 4  ;;  %v3656_v47 = vrot.slane %v3654_v41, 5  ;;  %v3651_v52 = vor.u32 %v3650_v44, %v3647_v43  ;;  %v540_v39 = vld [vmem:[%s19527_s27 + $0x38] sm:$0x1] }
  0x9f   : > { %17901 = vmatpush3.bf16.msra.mxu1 %v18998_v6  ;;  %v3627_v6 = vor.u32 %v3626_v63, %v3623_v58  ;;  %3121 = vmatprep.mubr.bf16.mxu1 %v14630_v22  ;;  %v3666_v56 = vrot.slane %v3664_v48, 5  ;;  %v536_v58 = vld [vmem:[%s19527_s27 + $0x28] sm:$0xf]  ;;  %v537_v63 = vld [vmem:[%s19527_s27 + $0x2c] sm:$0x1] }
  0xa0   : > { %17902 = vmatprep.subr.bf16.mxu1 %v19005_v61  ;;  %v632_v34 = vor.u32 %v631_v26, %v628_v24  ;;  %v648_v55 = vsel %vm19552_vm2, %v643_v46, %v647_v40  ;;  %v3661_v62 = vor.u32 %v3660_v53, %v3656_v47  ;;  %v659_v3 = vshll.u32 %v536_v58, 16  ;;  %v15026_v48 = vld [vmem:[%s19527_s27 + $0x4c] sm:$0xf] }
  0xa1   : > { %v3628_v17 = vrot.slane %v3627_v6, 4  ;;  %17039 = vmatpush3.bf16.msra.mxu0 %v19004_v9  ;;  %v663_v4 = vshrl.u32 %v536_v58, 16  ;;  %v669_v5 = vshll.u32 %v537_v63, 16  ;;  %v15023_v6 = vld [vmem:[%s19527_s27 + $0x40] sm:$0xf]  ;;  %v652_v9 = vrot.slane %v650_v0, 4 }
  0xa2   : > { %v633_v42 = vrot.slane %v632_v34, 4  ;;  %17040 = vmatprep.subr.bf16.mxu0 %v19010_v50  ;;  %v3662_v8 = vrot.slane %v3661_v62, 4  ;;  %v661_v13 = vrot.slane %v659_v3, 5  ;;  %v3678_v20 = vshll.u32 %v15023_v6, 16  ;;  %v539_v34 = vld [vmem:[%s19527_s27 + $0x34] sm:$0xf] }
  0xa3   : > { %17903 = vmatpush3.bf16.msra.mxu1 %v19005_v61  ;;  %v3633_v28 = vsel %vm19552_vm2, %v3628_v17, %v3632_v2  ;;  %v3652_v61 = vrot.slane %v3651_v52, 4  ;;  %v653_v2 = vshll.u32 %v535_v57, 16  ;;  %v665_v14 = vrot.slane %v663_v4, 4  ;;  %v19002_v17 = vld [vmem:[%s19527_s27 + $0x30] sm:$0xff]  }
  0xa4   : > { %v15062_v38 = vcombine.low %v3633_v28, %v3643_v33  ;;  %v638_v51 = vsel %vm19552_vm2, %v633_v42, %v637_v30  ;;  %17904 = vmatprep.subr.bf16.mxu1 %v19012_v59  ;;  %v671_v15 = vrot.slane %v669_v5, 5  ;;  %v3667_v16 = vsel %vm19552_vm2, %v3662_v8, %v3666_v56  ;;  %v19006_v33 = vld [vmem:[%s19527_s27 + $0x24] sm:$0xff]   ;;  %v19017_v42 = vld [vmem:[%s23359_s3 + $0x298] sm:$0xff]  }
  0xa5   : > { %v14631_v60 = vcombine.low %v638_v51, %v648_v55  ;;  %17041 = vmatpush3.bf16.msra.mxu0 %v19011_v54  ;;  %v3657_v7 = vsel %vm19552_vm2, %v3652_v61, %v3656_v47  ;;  %v655_v12 = vrot.slane %v653_v2, 5  ;;  %v666_v23 = vor.u32 %v665_v14, %v661_v13  ;;  %v15025_v47 = vld [vmem:[%s19527_s27 + $0x48] sm:$0xf]  ;;  %v15027_v54 = vld [vmem:[%s19527_s27 + $0x50] sm:$0x1]  ;;  %v19019_v55 = vld [vmem:[%s23359_s3 + $0x98] sm:$0xff]  }
  0xa6   : > { %3122 = vmatmul.mubr.bf16.gmra.mrb[52].mxu1 %v18999_v18  ;;  %4629 = vmatprep.mubr.bf16.mxu0 %v15062_v38  ;;  %v3671_v18 = vrot.slane %v3669_v11, 4  ;;  %v15063_v21 = vcombine.low %v3657_v7, %v3667_v16  ;;  %v3682_v24 = vshrl.u32 %v15023_v6, 16  ;;  %v3674_v26 = vrot.slane %v3672_v19, 5 }
  0xa7   : > { %4630 = vmatmul.mubr.bf16.gmra.mrb[52].mxu0 %v19000_v29  ;;  %3129 = vmatprep.mubr.bf16.mxu1 %v14631_v60  ;;  %v656_v22 = vor.u32 %v655_v12, %v652_v9  ;;  %v3680_v27 = vrot.slane %v3678_v20, 5  ;;  %v3688_v28 = vshll.u32 %v15024_v10, 16  ;;  %v538_v29 = vld [vmem:[%s19527_s27 + $0x30] sm:$0xf]  ;;  %v667_v31 = vrot.slane %v666_v23, 4 }
  0xa8   : > { %17905 = vmatpush3.bf16.msra.mxu1 %v19012_v59  ;;  %4637 = vmatprep.mubr.bf16.mxu0 %v15063_v21  ;;  %v3684_v32 = vrot.slane %v3682_v24, 4  ;;  %v674_v36 = vshrl.u32 %v538_v29, 16  ;;  %v3675_v37 = vor.u32 %v3674_v26, %v3671_v18  ;;  %v677_v40 = vshll.u32 %v538_v29, 16  ;;  %v541_v18 = vld [vmem:[%s19527_s27 + $0x3c] sm:$0xf] }
  0xa9   : > { %v657_v30 = vrot.slane %v656_v22, 4  ;;  %v3690_v38 = vrot.slane %v3688_v28, 5  ;;  %v683_v41 = vshll.u32 %v539_v34, 16  ;;  %v672_v44 = vsel %vm19552_vm2, %v667_v31, %v671_v15  ;;  %17042 = vmatprep.subr.bf16.mxu0 %v19017_v42  ;;  %17906 = vmatprep.subr.bf16.mxu1 %v19019_v55  ;;  %v542_v20 = vld [vmem:[%s19527_s27 + $0x40] sm:$0xf] }
  0xaa   : > { %v3685_v45 = vor.u32 %v3684_v32, %v3680_v27  ;;  %v676_v46 = vrot.slane %v674_v36, 4  ;;  %v3676_v51 = vrot.slane %v3675_v37, 4  ;;  %v679_v52 = vrot.slane %v677_v40, 5  ;;  %v543_v21 = vld [vmem:[%s19527_s27 + $0x44] sm:$0x1]  ;;  %v19009_v37 = vld [vmem:[%s19527_s27 + $0x48] sm:$0xff]  }
  0xab   : > { %v662_v43 = vsel %vm19552_vm2, %v657_v30, %v661_v13  ;;  %v685_v53 = vrot.slane %v683_v41, 5  ;;  %v687_v57 = vshrl.u32 %v539_v34, 16  ;;  %v693_v58 = vshll.u32 %v540_v39, 16  ;;  %v15028_v28 = vld [vmem:[%s19527_s27 + $0x54] sm:$0xf] }
  0xac   : > { %v14632_v50 = vcombine.low %v662_v43, %v672_v44  ;;  %v3686_v56 = vrot.slane %v3685_v45, 4  ;;  %v3693_v59 = vshrl.u32 %v15025_v47, 16  ;;  %v3681_v60 = vsel %vm19552_vm2, %v3676_v51, %v3680_v27  ;;  %17907 = vmatpush3.bf16.msra.mxu1 %v19019_v55  ;;  %v15029_v29 = vld [vmem:[%s19527_s27 + $0x58] sm:$0xf]  ;;  %v15030_v34 = vld [vmem:[%s19527_s27 + $0x5c] sm:$0x1] }
  0xad   : > { %v680_v61 = vor.u32 %v679_v52, %v676_v46  ;;  %v3696_v62 = vshll.u32 %v15025_v47, 16  ;;  %v3702_v63 = vshll.u32 %v15026_v48, 16  ;;  %v689_v2 = vrot.slane %v687_v57, 4 }
  0xae   : > { %3130 = vmatmul.mubr.bf16.gmra.mrb[56].mxu1 %v19001_v49  ;;  %v19018_v49 = vld [vmem:[%s23359_s3 + $0x258] sm:$0xff]   ;;  %v3691_v0 = vsel %vm19552_vm2, %v3686_v56, %v3690_v38  ;;  %v695_v3 = vrot.slane %v693_v58, 5  ;;  %v3695_v4 = vrot.slane %v3693_v59, 4  ;;  %v3706_v10 = vshrl.u32 %v15026_v48, 16  ;;  %v546_v59 = vld [vmem:[%s19527_s27 + $0x50] sm:$0x1] }
  0xaf   : > { %4638 = vmatmul.mubr.bf16.gmra.mrb[56].mxu0 %v19002_v17  ;;  %3137 = vmatprep.mubr.bf16.mxu1 %v14632_v50  ;;  %v15064_v5 = vcombine.low %v3681_v60, %v3691_v0  ;;  %v681_v6 = vrot.slane %v680_v61, 4  ;;  %v3698_v7 = vrot.slane %v3696_v62, 5  ;;  %v3704_v8 = vrot.slane %v3702_v63, 5  ;;  %v19008_v17 = vld [vmem:[%s19527_s27 + $0x30] sm:$0xff]   ;;  %v19013_v62 = vld [vmem:[%s19527_s27 + $0x3c] sm:$0xff]  }
  0xb0   : > { %17043 = vmatpush3.bf16.msra.mxu0 %v19018_v49  ;;  %v690_v9 = vor.u32 %v689_v2, %v685_v53  ;;  %v3712_v11 = vshll.u32 %v15027_v54, 16  ;;  %v3708_v15 = vrot.slane %v3706_v10, 4  ;;  %v698_v22 = vshrl.u32 %v541_v18, 16  ;;  %v544_v49 = vld [vmem:[%s19527_s27 + $0x48] sm:$0xf] }
  0xb1   : > { %4645 = vmatprep.mubr.bf16.mxu0 %v15064_v5  ;;  %v3699_v12 = vor.u32 %v3698_v7, %v3695_v4  ;;  %v686_v13 = vsel %vm19552_vm2, %v681_v6, %v685_v53  ;;  %v701_v26 = vshll.u32 %v541_v18, 16  ;;  %v707_v27 = vshll.u32 %v542_v20, 16  ;;  %v545_v54 = vld [vmem:[%s19527_s27 + $0x4c] sm:$0xf]  ;;  %v15032_v6 = vld [vmem:[%s19527_s27 + $0x64] sm:$0xf] }
  0xb2   : > { %v691_v14 = vrot.slane %v690_v9, 4  ;;  %v3714_v16 = vrot.slane %v3712_v11, 5  ;;  %v3709_v24 = vor.u32 %v3708_v15, %v3704_v8  ;;  %v700_v32 = vrot.slane %v698_v22, 4  ;;  %v19024_v11 = vld [vmem:[%s23359_s3 + $0x2a0] sm:$0xff]  }
  0xb3   : > { %v3700_v19 = vrot.slane %v3699_v12, 4  ;;  %v703_v38 = vrot.slane %v701_v26, 5  ;;  %v709_v39 = vrot.slane %v707_v27, 5  ;;  %v717_v40 = vshll.u32 %v543_v21, 16  ;;  %v19025_v18 = vld [vmem:[%s23359_s3 + $0x260] sm:$0xff]   ;;  %17044 = vmatprep.subr.bf16.mxu0 %v19024_v11 }
  0xb4   : > { %v696_v23 = vsel %vm19552_vm2, %v691_v14, %v695_v3  ;;  %v3710_v36 = vrot.slane %v3709_v24, 4  ;;  %v3717_v42 = vshrl.u32 %v15028_v28, 16  ;;  %v3720_v43 = vshll.u32 %v15028_v28, 16  ;;  %v19014_v14 = vld [vmem:[%s19527_s27 + $0x54] sm:$0xff]   ;;  %17045 = vmatpush3.bf16.msra.mxu0 %v19025_v18  ;;  %v19026_v28 = vld [vmem:[%s23359_s3 + $0xa0] sm:$0xff]   ;;  %v19033_v18 = vld [vmem:[%s23359_s3 + $0xa8] sm:$0xff]  }
  0xb5   : > { %v14633_v30 = vcombine.low %v686_v13, %v696_v23  ;;  %v3705_v31 = vsel %vm19552_vm2, %v3700_v19, %v3704_v8  ;;  %v3726_v44 = vshll.u32 %v15029_v29, 16  ;;  %v704_v46 = vor.u32 %v703_v38, %v700_v32  ;;  %17908 = vmatprep.subr.bf16.mxu1 %v19026_v28 }
  0xb6   : > { %3138 = vmatmul.mubr.bf16.gmra.mrb[60].mxu1 %v19006_v33  ;;  %v711_v33 = vshrl.u32 %v542_v20, 16  ;;  %v3715_v45 = vsel %vm19552_vm2, %v3710_v36, %v3714_v16  ;;  %v719_v47 = vrot.slane %v717_v40, 5  ;;  %v3730_v48 = vshrl.u32 %v15029_v29, 16 }
  0xb7   : > { %4646 = vmatmul.mubr.bf16.gmra.mrb[60].mxu0 %v19007_v1  ;;  %3145 = vmatprep.mubr.bf16.mxu1 %v14633_v30  ;;  %v15065_v50 = vcombine.low %v3705_v31, %v3715_v45  ;;  %v3719_v52 = vrot.slane %v3717_v42, 4  ;;  %v3722_v53 = vrot.slane %v3720_v43, 5  ;;  %v705_v55 = vrot.slane %v704_v46, 4  ;;  %v15031_v1 = vld [vmem:[%s19527_s27 + $0x60] sm:$0xf]  ;;  %v19015_v43 = vld [vmem:[%s19527_s27 + $0x48] sm:$0xff]  }
  0xb8   : > { %v713_v41 = vrot.slane %v711_v33, 4  ;;  %v3728_v56 = vrot.slane %v3726_v44, 5  ;;  %v3732_v57 = vrot.slane %v3730_v48, 4  ;;  %v3736_v58 = vshll.u32 %v15030_v34, 16  ;;  %17909 = vmatpush3.bf16.msra.mxu1 %v19026_v28  ;;  %v547_v44 = vld [vmem:[%s19527_s27 + $0x54] sm:$0xf] }
  0xb9   : > { %4653 = vmatprep.mubr.bf16.mxu0 %v15065_v50  ;;  %v3723_v61 = vor.u32 %v3722_v53, %v3719_v52  ;;  %v722_v63 = vshrl.u32 %v544_v49, 16  ;;  %v725_v0 = vshll.u32 %v544_v49, 16  ;;  %v710_v2 = vsel %vm19552_vm2, %v705_v55, %v709_v39  ;;  %v548_v45 = vld [vmem:[%s19527_s27 + $0x58] sm:$0xf]  ;;  %v15034_v55 = vld [vmem:[%s19527_s27 + $0x6c] sm:$0xf]  ;;  %17910 = vmatprep.subr.bf16.mxu1 %v19033_v18 }
  0xba   : > { %v714_v51 = vor.u32 %v713_v41, %v709_v39  ;;  %v3733_v3 = vor.u32 %v3732_v57, %v3728_v56  ;;  %v3738_v4 = vrot.slane %v3736_v58, 5  ;;  %v731_v5 = vshll.u32 %v545_v54, 16  ;;  %v552_v28 = vld [vmem:[%s19527_s27 + $0x68] sm:$0x1] }
  0xbb   : > { %v3724_v8 = vrot.slane %v3723_v61, 4  ;;  %v724_v9 = vrot.slane %v722_v63, 4  ;;  %v727_v10 = vrot.slane %v725_v0, 5  ;;  %v735_v16 = vshrl.u32 %v545_v54, 16  ;;  %v15036_v61 = vld [vmem:[%s19527_s27 + $0x74] sm:$0x1] }
  0xbc   : > { %v715_v60 = vrot.slane %v714_v51, 4  ;;  %v3734_v13 = vrot.slane %v3733_v3, 4  ;;  %v733_v15 = vrot.slane %v731_v5, 5  ;;  %v741_v21 = vshll.u32 %v546_v59, 16  ;;  %v19016_v0 = vld [vmem:[%s19527_s27 + $0x60] sm:$0xff]   ;;  %v19031_v3 = vld [vmem:[%s23359_s3 + $0x2a8] sm:$0xff]   ;;  %17911 = vmatpush3.bf16.msra.mxu1 %v19033_v18 }
  0xbd   : > { %v3729_v19 = vsel %vm19552_vm2, %v3724_v8, %v3728_v56  ;;  %v728_v20 = vor.u32 %v727_v10, %v724_v9  ;;  %v3741_v22 = vshrl.u32 %v15031_v1, 16  ;;  %v737_v24 = vrot.slane %v735_v16, 4  ;;  %v15035_v56 = vld [vmem:[%s19527_s27 + $0x70] sm:$0xf]  ;;  %v19032_v8 = vld [vmem:[%s23359_s3 + $0x268] sm:$0xff]   ;;  %17046 = vmatprep.subr.bf16.mxu0 %v19031_v3 }
  0xbe   : > { %3146 = vmatmul.mubr.bf16.gmra.mrb[64].mxu1 %v19008_v17  ;;  %v720_v7 = vsel %vm19552_vm2, %v715_v60, %v719_v47  ;;  %v15033_v17 = vld [vmem:[%s19527_s27 + $0x68] sm:$0x1]  ;;  %v3739_v23 = vsel %vm19552_vm2, %v3734_v13, %v3738_v4  ;;  %v3744_v26 = vshll.u32 %v15031_v1, 16  ;;  %v3750_v27 = vshll.u32 %v15032_v6, 16  ;;  %v549_v47 = vld [vmem:[%s19527_s27 + $0x5c] sm:$0x1]  ;;  %17047 = vmatpush3.bf16.msra.mxu0 %v19032_v8 }
  0xbf   : > { %4654 = vmatmul.mubr.bf16.gmra.mrb[64].mxu0 %v19009_v37  ;;  %v14634_v12 = vcombine.low %v710_v2, %v720_v7  ;;  %v15066_v29 = vcombine.low %v3729_v19, %v3739_v23  ;;  %v729_v30 = vrot.slane %v728_v20, 4  ;;  %v743_v31 = vrot.slane %v741_v21, 5  ;;  %v551_v23 = vld [vmem:[%s19527_s27 + $0x64] sm:$0xf] }
  0xc0   : > { %v3743_v32 = vrot.slane %v3741_v22, 4  ;;  %v738_v33 = vor.u32 %v737_v24, %v733_v15  ;;  %v3746_v34 = vrot.slane %v3744_v26, 5  ;;  %v3752_v36 = vrot.slane %v3750_v27, 5  ;;  %v19020_v27 = vld [vmem:[%s19527_s27 + $0x54] sm:$0xff]  }
  0xc1   : > { %3153 = vmatprep.mubr.bf16.mxu1 %v14634_v12  ;;  %v3754_v37 = vshrl.u32 %v15032_v6, 16  ;;  %4661 = vmatprep.mubr.bf16.mxu0 %v15066_v29  ;;  %v3760_v38 = vshll.u32 %v15033_v17, 16  ;;  %v734_v39 = vsel %vm19552_vm2, %v729_v30, %v733_v15  ;;  %v746_v48 = vshrl.u32 %v547_v44, 16  ;;  %v550_v17 = vld [vmem:[%s19527_s27 + $0x60] sm:$0xf] }
  0xc2   : > { %v739_v40 = vrot.slane %v738_v33, 4  ;;  %v3747_v41 = vor.u32 %v3746_v34, %v3743_v32  ;;  %v749_v49 = vshll.u32 %v547_v44, 16  ;;  %v755_v50 = vshll.u32 %v548_v45, 16 }
  0xc3   : > { %v3756_v42 = vrot.slane %v3754_v37, 4  ;;  %v3762_v46 = vrot.slane %v3760_v38, 5  ;;  %v759_v54 = vshrl.u32 %v548_v45, 16  ;;  %v748_v58 = vrot.slane %v746_v48, 4  ;;  %v15038_v37 = vld [vmem:[%s19527_s27 + $0x7c] sm:$0xf] }
  0xc4   : > { %v744_v51 = vsel %vm19552_vm2, %v739_v40, %v743_v31  ;;  %v3748_v52 = vrot.slane %v3747_v41, 4  ;;  %v751_v59 = vrot.slane %v749_v49, 5  ;;  %v757_v60 = vrot.slane %v755_v50, 5 }
  0xc5   : > { %v3757_v53 = vor.u32 %v3756_v42, %v3752_v36  ;;  %v14635_v57 = vcombine.low %v734_v39, %v744_v51  ;;  %v761_v1 = vrot.slane %v759_v54, 4  ;;  %v765_v2 = vshll.u32 %v549_v47, 16  ;;  %v15039_v42 = vld [vmem:[%s19527_s27 + $0x80] sm:$0x1] }
  0xc6   : > { %3154 = vmatmul.mubr.bf16.gmra.mrb[68].mxu1 %v19013_v62  ;;  %v3753_v62 = vsel %vm19552_vm2, %v3748_v52, %v3752_v36  ;;  %v752_v4 = vor.u32 %v751_v59, %v748_v58  ;;  %v3765_v5 = vshrl.u32 %v15034_v55, 16  ;;  %v3768_v6 = vshll.u32 %v15034_v55, 16  ;;  %v15037_v36 = vld [vmem:[%s19527_s27 + $0x78] sm:$0xf]  ;;  %v19021_v52 = vld [vmem:[%s19527_s27 + $0x6c] sm:$0xff]  }
  0xc7   : > { %4662 = vmatmul.mubr.bf16.gmra.mrb[68].mxu0 %v19014_v14  ;;  %v3758_v63 = vrot.slane %v3757_v53, 4  ;;  %3161 = vmatprep.mubr.bf16.mxu1 %v14635_v57  ;;  %v3774_v7 = vshll.u32 %v15035_v56, 16  ;;  %v762_v10 = vor.u32 %v761_v1, %v757_v60  ;;  %v767_v11 = vrot.slane %v765_v2, 5 }
  0xc8   : > { %v3778_v12 = vshrl.u32 %v15035_v56, 16  ;;  %v753_v14 = vrot.slane %v752_v4, 4  ;;  %v3767_v15 = vrot.slane %v3765_v5, 4  ;;  %v3770_v16 = vrot.slane %v3768_v6, 5  ;;  %v19022_v5 = vld [vmem:[%s19527_s27 + $0x60] sm:$0xff]  }
  0xc9   : > { %v3763_v9 = vsel %vm19552_vm2, %v3758_v63, %v3762_v46  ;;  %v763_v19 = vrot.slane %v762_v10, 4  ;;  %v3776_v20 = vrot.slane %v3774_v7, 5  ;;  %v3784_v22 = vshll.u32 %v15036_v61, 16  ;;  %v553_v6 = vld [vmem:[%s19527_s27 + $0x6c] sm:$0xf]  ;;  %v19038_v7 = vld [vmem:[%s23359_s3 + $0x2b0] sm:$0xff]  }
  0xca   : > { %v15067_v13 = vcombine.low %v3753_v62, %v3763_v9  ;;  %v3780_v21 = vrot.slane %v3778_v12, 4  ;;  %v758_v24 = vsel %vm19552_vm2, %v753_v14, %v757_v60  ;;  %v3771_v26 = vor.u32 %v3770_v16, %v3767_v15  ;;  %v554_v9 = vld [vmem:[%s19527_s27 + $0x70] sm:$0xf]  ;;  %v555_v10 = vld [vmem:[%s19527_s27 + $0x74] sm:$0x1]  ;;  %17048 = vmatprep.subr.bf16.mxu0 %v19038_v7 }
  0xcb   : > { %v770_v29 = vshrl.u32 %v550_v17, 16  ;;  %v773_v30 = vshll.u32 %v550_v17, 16  ;;  %v768_v31 = vsel %vm19552_vm2, %v763_v19, %v767_v11  ;;  %v3786_v33 = vrot.slane %v3784_v22, 5  ;;  %v15040_v16 = vld [vmem:[%s19527_s27 + $0x84] sm:$0xf] }
  0xcc   : > { %4669 = vmatprep.mubr.bf16.mxu0 %v15067_v13  ;;  %v3781_v32 = vor.u32 %v3780_v21, %v3776_v20  ;;  %v779_v34 = vshll.u32 %v551_v23, 16  ;;  %v14636_v38 = vcombine.low %v758_v24, %v768_v31  ;;  %v3772_v39 = vrot.slane %v3771_v26, 4  ;;  %v15041_v17 = vld [vmem:[%s19527_s27 + $0x88] sm:$0xf]  ;;  %v15042_v22 = vld [vmem:[%s19527_s27 + $0x8c] sm:$0x1] }
  0xcd   : > { %v772_v40 = vrot.slane %v770_v29, 4  ;;  %v775_v41 = vrot.slane %v773_v30, 5  ;;  %v783_v45 = vshrl.u32 %v551_v23, 16  ;;  %v789_v46 = vshll.u32 %v552_v28, 16  ;;  %v19023_v24 = vld [vmem:[%s19527_s27 + $0x78] sm:$0xff]  }
  0xce   : > { %3162 = vmatmul.mubr.bf16.gmra.mrb[72].mxu1 %v19015_v43  ;;  %v3782_v43 = vrot.slane %v3781_v32, 4  ;;  %v781_v44 = vrot.slane %v779_v34, 5  ;;  %v3777_v47 = vsel %vm19552_vm2, %v3772_v39, %v3776_v20  ;;  %v3789_v49 = vshrl.u32 %v15037_v36, 16 }
  0xcf   : > { %4670 = vmatmul.mubr.bf16.gmra.mrb[72].mxu0 %v19016_v0  ;;  %3169 = vmatprep.mubr.bf16.mxu1 %v14636_v38  ;;  %v776_v48 = vor.u32 %v775_v41, %v772_v40  ;;  %v3792_v50 = vshll.u32 %v15037_v36, 16  ;;  %v785_v53 = vrot.slane %v783_v45, 4  ;;  %v791_v54 = vrot.slane %v789_v46, 5  ;;  %v556_v38 = vld [vmem:[%s19527_s27 + $0x78] sm:$0xf] }
  0xd0   : > { %v3787_v51 = vsel %vm19552_vm2, %v3782_v43, %v3786_v33  ;;  %v3798_v55 = vshll.u32 %v15038_v37, 16  ;;  %v3791_v58 = vrot.slane %v3789_v49, 4  ;;  %v3802_v62 = vshrl.u32 %v15038_v37, 16  ;;  %v557_v43 = vld [vmem:[%s19527_s27 + $0x7c] sm:$0xf] }
  0xd1   : > { %v15068_v56 = vcombine.low %v3777_v47, %v3787_v51  ;;  %v777_v57 = vrot.slane %v776_v48, 4  ;;  %v3794_v59 = vrot.slane %v3792_v50, 5  ;;  %v786_v60 = vor.u32 %v785_v53, %v781_v44  ;;  %v558_v48 = vld [vmem:[%s19527_s27 + $0x80] sm:$0x1]  ;;  %v19027_v51 = vld [vmem:[%s19527_s27 + $0x6c] sm:$0xff]  }
  0xd2   : > { %v3800_v61 = vrot.slane %v3798_v55, 5  ;;  %v3808_v63 = vshll.u32 %v15039_v42, 16  ;;  %v3804_v3 = vrot.slane %v3802_v62, 4  ;;  %v794_v11 = vshrl.u32 %v553_v6, 16  ;;  %v19039_v55 = vld [vmem:[%s23359_s3 + $0x270] sm:$0xff]  }
  0xd3   : > { %4677 = vmatprep.mubr.bf16.mxu0 %v15068_v56  ;;  %v3795_v0 = vor.u32 %v3794_v59, %v3791_v58  ;;  %v782_v1 = vsel %vm19552_vm2, %v777_v57, %v781_v44  ;;  %v787_v2 = vrot.slane %v786_v60, 4  ;;  %v797_v14 = vshll.u32 %v553_v6, 16  ;;  %v15044_v60 = vld [vmem:[%s19527_s27 + $0x94] sm:$0xf]  ;;  %17049 = vmatpush3.bf16.msra.mxu0 %v19039_v55  ;;  %v15045_v6 = vld [vmem:[%s19527_s27 + $0x98] sm:$0x1] }
  0xd4   : > { %v3810_v4 = vrot.slane %v3808_v63, 5  ;;  %v3805_v13 = vor.u32 %v3804_v3, %v3800_v61  ;;  %v803_v15 = vshll.u32 %v554_v9, 16  ;;  %v796_v20 = vrot.slane %v794_v11, 4 }
  0xd5   : > { %v3796_v8 = vrot.slane %v3795_v0, 4  ;;  %v792_v12 = vsel %vm19552_vm2, %v787_v2, %v791_v54  ;;  %v807_v21 = vshrl.u32 %v554_v9, 16  ;;  %v799_v26 = vrot.slane %v797_v14, 5  ;;  %v15043_v54 = vld [vmem:[%s19527_s27 + $0x90] sm:$0xf] }
  0xd6   : > { %3170 = vmatmul.mubr.bf16.gmra.mrb[76].mxu1 %v19020_v27  ;;  %v14637_v18 = vcombine.low %v782_v1, %v792_v12  ;;  %v3806_v23 = vrot.slane %v3805_v13, 4  ;;  %v805_v27 = vrot.slane %v803_v15, 5  ;;  %v813_v28 = vshll.u32 %v555_v10, 16  ;;  %v19040_v1 = vld [vmem:[%s23359_s3 + $0xb0] sm:$0xff]   ;;  %v19028_v12 = vld [vmem:[%s19527_s27 + $0x84] sm:$0xff]  }
  0xd7   : > { %4678 = vmatmul.mubr.bf16.gmra.mrb[76].mxu0 %v19021_v52  ;;  %v3801_v19 = vsel %vm19552_vm2, %v3796_v8, %v3800_v61  ;;  %v809_v29 = vrot.slane %v807_v21, 4  ;;  %v3813_v30 = vshrl.u32 %v15040_v16, 16  ;;  %v3816_v31 = vshll.u32 %v15040_v16, 16  ;;  %17912 = vmatprep.subr.bf16.mxu1 %v19040_v1 }
  0xd8   : > { %3177 = vmatprep.mubr.bf16.mxu1 %v14637_v18  ;;  %v3822_v32 = vshll.u32 %v15041_v17, 16  ;;  %v3811_v33 = vsel %vm19552_vm2, %v3806_v23, %v3810_v4  ;;  %v800_v34 = vor.u32 %v799_v26, %v796_v20  ;;  %v815_v36 = vrot.slane %v813_v28, 5  ;;  %17913 = vmatpush3.bf16.msra.mxu1 %v19040_v1  ;;  %v19045_v26 = vld [vmem:[%s23359_s3 + $0x2b8] sm:$0xff]  }
  0xd9   : > { %v3826_v37 = vshrl.u32 %v15041_v17, 16  ;;  %v15069_v39 = vcombine.low %v3801_v19, %v3811_v33  ;;  %v810_v40 = vor.u32 %v809_v29, %v805_v27  ;;  %v3815_v41 = vrot.slane %v3813_v30, 4  ;;  %v560_v33 = vld [vmem:[%s19527_s27 + $0x88] sm:$0xf]  ;;  %17050 = vmatprep.subr.bf16.mxu0 %v19045_v26 }
  0xda   : > { %v3818_v42 = vrot.slane %v3816_v31, 5  ;;  %v801_v44 = vrot.slane %v800_v34, 4  ;;  %v3824_v45 = vrot.slane %v3822_v32, 5  ;;  %v3832_v47 = vshll.u32 %v15042_v22, 16  ;;  %v19029_v31 = vld [vmem:[%s19527_s27 + $0x78] sm:$0xff]  }
  0xdb   : > { %v3828_v46 = vrot.slane %v3826_v37, 4  ;;  %4685 = vmatprep.mubr.bf16.mxu0 %v15069_v39  ;;  %v811_v49 = vrot.slane %v810_v40, 4  ;;  %v818_v52 = vshrl.u32 %v556_v38, 16  ;;  %v821_v53 = vshll.u32 %v556_v38, 16  ;;  %v559_v32 = vld [vmem:[%s19527_s27 + $0x84] sm:$0xf] }
  0xdc   : > { %v3819_v50 = vor.u32 %v3818_v42, %v3815_v41  ;;  %v806_v56 = vsel %vm19552_vm2, %v801_v44, %v805_v27  ;;  %v3834_v58 = vrot.slane %v3832_v47, 5  ;;  %v827_v59 = vshll.u32 %v557_v43, 16  ;;  %v15046_v44 = vld [vmem:[%s19527_s27 + $0x9c] sm:$0xf] }
  0xdd   : > { %v3829_v57 = vor.u32 %v3828_v46, %v3824_v45  ;;  %v816_v61 = vsel %vm19552_vm2, %v811_v49, %v815_v36  ;;  %v820_v63 = vrot.slane %v818_v52, 4  ;;  %v823_v0 = vrot.slane %v821_v53, 5  ;;  %v561_v36 = vld [vmem:[%s19527_s27 + $0x8c] sm:$0x1] }
  0xde   : > { %3178 = vmatmul.mubr.bf16.gmra.mrb[80].mxu1 %v19022_v5  ;;  %v3820_v62 = vrot.slane %v3819_v50, 4  ;;  %v14638_v2 = vcombine.low %v806_v56, %v816_v61  ;;  %v829_v4 = vrot.slane %v827_v59, 5  ;;  %v831_v5 = vshrl.u32 %v557_v43, 16  ;;  %v15048_v50 = vld [vmem:[%s19527_s27 + $0xa4] sm:$0x1]  ;;  %v19047_v56 = vld [vmem:[%s23359_s3 + $0xb8] sm:$0xff]  }
  0xdf   : > { %4686 = vmatmul.mubr.bf16.gmra.mrb[80].mxu0 %v19023_v24  ;;  %v3830_v3 = vrot.slane %v3829_v57, 4  ;;  %v824_v8 = vor.u32 %v823_v0, %v820_v63  ;;  %v837_v9 = vshll.u32 %v558_v48, 16  ;;  %v3837_v10 = vshrl.u32 %v15043_v54, 16  ;;  %v19030_v57 = vld [vmem:[%s19527_s27 + $0x90] sm:$0xff]   ;;  %17914 = vmatprep.subr.bf16.mxu1 %v19047_v56 }
  0xe0   : > { %v3825_v7 = vsel %vm19552_vm2, %v3820_v62, %v3824_v45  ;;  %3185 = vmatprep.mubr.bf16.mxu1 %v14638_v2  ;;  %v833_v13 = vrot.slane %v831_v5, 4  ;;  %v3840_v14 = vshll.u32 %v15043_v54, 16  ;;  %v3846_v15 = vshll.u32 %v15044_v60, 16  ;;  %v15047_v45 = vld [vmem:[%s19527_s27 + $0xa0] sm:$0xf]  ;;  %17915 = vmatpush3.bf16.msra.mxu1 %v19047_v56 }
  0xe1   : > { %v3835_v11 = vsel %vm19552_vm2, %v3830_v3, %v3834_v58  ;;  %v825_v17 = vrot.slane %v824_v8, 4  ;;  %v839_v18 = vrot.slane %v837_v9, 5  ;;  %v3839_v19 = vrot.slane %v3837_v10, 4 }
  0xe2   : > { %v15070_v16 = vcombine.low %v3825_v7, %v3835_v11  ;;  %v834_v20 = vor.u32 %v833_v13, %v829_v4  ;;  %v3842_v21 = vrot.slane %v3840_v14, 5  ;;  %v3848_v22 = vrot.slane %v3846_v15, 5  ;;  %v19034_v15 = vld [vmem:[%s19527_s27 + $0x84] sm:$0xff]  }
  0xe3   : > { %v3850_v23 = vshrl.u32 %v15044_v60, 16  ;;  %v3856_v24 = vshll.u32 %v15045_v6, 16  ;;  %v830_v27 = vsel %vm19552_vm2, %v825_v17, %v829_v4  ;;  %v842_v37 = vshrl.u32 %v559_v32, 16  ;;  %v562_v6 = vld [vmem:[%s19527_s27 + $0x90] sm:$0xf] }
  0xe4   : > { %4693 = vmatprep.mubr.bf16.mxu0 %v15070_v16  ;;  %v835_v28 = vrot.slane %v834_v20, 4  ;;  %v3843_v29 = vor.u32 %v3842_v21, %v3839_v19  ;;  %v845_v38 = vshll.u32 %v559_v32, 16  ;;  %v851_v39 = vshll.u32 %v560_v33, 16  ;;  %v564_v16 = vld [vmem:[%s19527_s27 + $0x98] sm:$0x1] }
  0xe5   : > { %v3852_v30 = vrot.slane %v3850_v23, 4  ;;  %v3858_v34 = vrot.slane %v3856_v24, 5  ;;  %v855_v43 = vshrl.u32 %v560_v33, 16  ;;  %v844_v47 = vrot.slane %v842_v37, 4  ;;  %v15049_v23 = vld [vmem:[%s19527_s27 + $0xa8] sm:$0xf] }
  0xe6   : > { %3186 = vmatmul.mubr.bf16.gmra.mrb[84].mxu1 %v19027_v51  ;;  %v840_v40 = vsel %vm19552_vm2, %v835_v28, %v839_v18  ;;  %v3844_v41 = vrot.slane %v3843_v29, 4  ;;  %v847_v48 = vrot.slane %v845_v38, 5  ;;  %v853_v49 = vrot.slane %v851_v39, 5  ;;  %v19046_v51 = vld [vmem:[%s23359_s3 + $0x278] sm:$0xff]   ;;  %v15050_v24 = vld [vmem:[%s19527_s27 + $0xac] sm:$0xf] }
  0xe7   : > { %4694 = vmatmul.mubr.bf16.gmra.mrb[84].mxu0 %v19028_v12  ;;  %v3853_v42 = vor.u32 %v3852_v30, %v3848_v22  ;;  %v14639_v46 = vcombine.low %v830_v27, %v840_v40  ;;  %v857_v54 = vrot.slane %v855_v43, 4  ;;  %v861_v55 = vshll.u32 %v561_v36, 16  ;;  %v563_v12 = vld [vmem:[%s19527_s27 + $0x94] sm:$0xf]  ;;  %v15051_v30 = vld [vmem:[%s19527_s27 + $0xb0] sm:$0x1] }
  0xe8   : > { %v3849_v52 = vsel %vm19552_vm2, %v3844_v41, %v3848_v22  ;;  %v848_v58 = vor.u32 %v847_v48, %v844_v47  ;;  %v3861_v59 = vshrl.u32 %v15046_v44, 16  ;;  %v3864_v60 = vshll.u32 %v15046_v44, 16  ;;  %17051 = vmatpush3.bf16.msra.mxu0 %v19046_v51  ;;  %v19035_v33 = vld [vmem:[%s19527_s27 + $0x9c] sm:$0xff]  }
  0xe9   : > { %v3854_v53 = vrot.slane %v3853_v42, 4  ;;  %3193 = vmatprep.mubr.bf16.mxu1 %v14639_v46  ;;  %v3870_v61 = vshll.u32 %v15047_v45, 16  ;;  %v858_v63 = vor.u32 %v857_v54, %v853_v49  ;;  %v863_v0 = vrot.slane %v861_v55, 5 }
  0xea   : > { %v3874_v1 = vshrl.u32 %v15047_v45, 16  ;;  %v849_v3 = vrot.slane %v848_v58, 4  ;;  %v3863_v4 = vrot.slane %v3861_v59, 4  ;;  %v3866_v5 = vrot.slane %v3864_v60, 5 }
  0xeb   : > { %v3859_v62 = vsel %vm19552_vm2, %v3854_v53, %v3858_v34  ;;  %v859_v8 = vrot.slane %v858_v63, 4  ;;  %v3872_v9 = vrot.slane %v3870_v61, 5  ;;  %v3880_v11 = vshll.u32 %v15048_v50, 16 }
  0xec   : > { %v15071_v2 = vcombine.low %v3849_v52, %v3859_v62  ;;  %v3876_v10 = vrot.slane %v3874_v1, 4  ;;  %v854_v13 = vsel %vm19552_vm2, %v849_v3, %v853_v49  ;;  %v3867_v14 = vor.u32 %v3866_v5, %v3863_v4  ;;  %v565_v1 = vld [vmem:[%s19527_s27 + $0x9c] sm:$0xf]  ;;  %v566_v4 = vld [vmem:[%s19527_s27 + $0xa0] sm:$0xf] }
  0xed   : > { %v866_v17 = vshrl.u32 %v562_v6, 16  ;;  %v869_v18 = vshll.u32 %v562_v6, 16  ;;  %v864_v19 = vsel %vm19552_vm2, %v859_v8, %v863_v0  ;;  %v3882_v21 = vrot.slane %v3880_v11, 5  ;;  %v19036_v0 = vld [vmem:[%s19527_s27 + $0x90] sm:$0xff]   ;;  %v567_v5 = vld [vmem:[%s19527_s27 + $0xa4] sm:$0x1] }
  0xee   : > { %3194 = vmatmul.mubr.bf16.gmra.mrb[88].mxu1 %v19029_v31  ;;  %4701 = vmatprep.mubr.bf16.mxu0 %v15071_v2  ;;  %v3877_v20 = vor.u32 %v3876_v10, %v3872_v9  ;;  %v875_v22 = vshll.u32 %v563_v12, 16  ;;  %v14640_v26 = vcombine.low %v854_v13, %v864_v19  ;;  %v3868_v27 = vrot.slane %v3867_v14, 4  ;;  %v15053_v13 = vld [vmem:[%s19527_s27 + $0xb8] sm:$0xf] }
  0xef   : > { %4702 = vmatmul.mubr.bf16.gmra.mrb[88].mxu0 %v19030_v57  ;;  %v868_v28 = vrot.slane %v866_v17, 4  ;;  %v871_v29 = vrot.slane %v869_v18, 5  ;;  %v879_v36 = vshrl.u32 %v563_v12, 16  ;;  %v885_v37 = vshll.u32 %v564_v16, 16  ;;  %v15052_v12 = vld [vmem:[%s19527_s27 + $0xb4] sm:$0xf] }
  0xf0   : > { %v3878_v32 = vrot.slane %v3877_v20, 4  ;;  %v877_v34 = vrot.slane %v875_v22, 5  ;;  %3201 = vmatprep.mubr.bf16.mxu1 %v14640_v26  ;;  %v3873_v38 = vsel %vm19552_vm2, %v3868_v27, %v3872_v9  ;;  %v3885_v40 = vshrl.u32 %v15049_v23, 16  ;;  %v15054_v18 = vld [vmem:[%s19527_s27 + $0xbc] sm:$0x1]  ;;  %v19037_v20 = vld [vmem:[%s19527_s27 + $0xa8] sm:$0xff]  }
  0xf1   : > { %v872_v39 = vor.u32 %v871_v29, %v868_v28  ;;  %v3888_v41 = vshll.u32 %v15049_v23, 16  ;;  %v881_v43 = vrot.slane %v879_v36, 4  ;;  %v887_v44 = vrot.slane %v885_v37, 5 }
  0xf2   : > { %v3883_v42 = vsel %vm19552_vm2, %v3878_v32, %v3882_v21  ;;  %v3894_v45 = vshll.u32 %v15050_v24, 16  ;;  %v3887_v49 = vrot.slane %v3885_v40, 4  ;;  %v3898_v54 = vshrl.u32 %v15050_v24, 16 }
  0xf3   : > { %v15072_v47 = vcombine.low %v3873_v38, %v3883_v42  ;;  %v873_v48 = vrot.slane %v872_v39, 4  ;;  %v3890_v50 = vrot.slane %v3888_v41, 5  ;;  %v882_v52 = vor.u32 %v881_v43, %v877_v34  ;;  %v569_v39 = vld [vmem:[%s19527_s27 + $0xac] sm:$0xf] }
  0xf4   : > { %v3896_v53 = vrot.slane %v3894_v45, 5  ;;  %v3904_v55 = vshll.u32 %v15051_v30, 16  ;;  %v3900_v62 = vrot.slane %v3898_v54, 4  ;;  %v890_v6 = vshrl.u32 %v565_v1, 16 }
  0xf5   : > { %4709 = vmatprep.mubr.bf16.mxu0 %v15072_v47  ;;  %v3891_v57 = vor.u32 %v3890_v50, %v3887_v49  ;;  %v878_v60 = vsel %vm19552_vm2, %v873_v48, %v877_v34  ;;  %v883_v61 = vrot.slane %v882_v52, 4  ;;  %v893_v10 = vshll.u32 %v565_v1, 16  ;;  %v19041_v47 = vld [vmem:[%s19527_s27 + $0x9c] sm:$0xff]  }
  0xf6   : > { %3202 = vmatmul.mubr.bf16.gmra.mrb[92].mxu1 %v19034_v15  ;;  %v3906_v63 = vrot.slane %v3904_v55, 5  ;;  %v3901_v9 = vor.u32 %v3900_v62, %v3896_v53  ;;  %v899_v11 = vshll.u32 %v566_v4, 16  ;;  %v892_v16 = vrot.slane %v890_v6, 4  ;;  %v15055_v50 = vld [vmem:[%s19527_s27 + $0xc0] sm:$0xf] }
  0xf7   : > { %4710 = vmatmul.mubr.bf16.gmra.mrb[92].mxu0 %v19035_v33  ;;  %v3892_v3 = vrot.slane %v3891_v57, 4  ;;  %v888_v8 = vsel %vm19552_vm2, %v883_v61, %v887_v44  ;;  %v903_v17 = vshrl.u32 %v566_v4, 16  ;;  %v895_v21 = vrot.slane %v893_v10, 5  ;;  %v568_v33 = vld [vmem:[%s19527_s27 + $0xa8] sm:$0xf] }
  0xf8   : > { %v14641_v14 = vcombine.low %v878_v60, %v888_v8  ;;  %v3902_v19 = vrot.slane %v3901_v9, 4  ;;  %v901_v22 = vrot.slane %v899_v11, 5  ;;  %v909_v23 = vshll.u32 %v567_v5, 16  ;;  %v570_v44 = vld [vmem:[%s19527_s27 + $0xb0] sm:$0x1] }
  0xf9   : > { %v3897_v15 = vsel %vm19552_vm2, %v3892_v3, %v3896_v53  ;;  %v905_v24 = vrot.slane %v903_v17, 4  ;;  %v3909_v26 = vshrl.u32 %v15052_v12, 16  ;;  %v3912_v27 = vshll.u32 %v15052_v12, 16  ;;  %v15057_v5 = vld [vmem:[%s19527_s27 + $0xc8] sm:$0x1] }
  0xfa   : > { %3209 = vmatprep.mubr.bf16.mxu1 %v14641_v14  ;;  %v3918_v28 = vshll.u32 %v15053_v13, 16  ;;  %v3907_v29 = vsel %vm19552_vm2, %v3902_v19, %v3906_v63  ;;  %v896_v30 = vor.u32 %v895_v21, %v892_v16  ;;  %v3922_v32 = vshrl.u32 %v15053_v13, 16 }
  0xfb   : > { %v15073_v34 = vcombine.low %v3897_v15, %v3907_v29  ;;  %v906_v36 = vor.u32 %v905_v24, %v901_v22  ;;  %v3911_v37 = vrot.slane %v3909_v26, 4  ;;  %v3914_v38 = vrot.slane %v3912_v27, 5 }
  0xfc   : > { %v897_v40 = vrot.slane %v896_v30, 4  ;;  %v3920_v41 = vrot.slane %v3918_v28, 5  ;;  %v3924_v42 = vrot.slane %v3922_v32, 4  ;;  %v3928_v43 = vshll.u32 %v15054_v18, 16 }
  0xfd   : > { %4717 = vmatprep.mubr.bf16.mxu0 %v15073_v34  ;;  %v907_v45 = vrot.slane %v906_v36, 4  ;;  %v914_v48 = vshrl.u32 %v568_v33, 16  ;;  %v917_v49 = vshll.u32 %v568_v33, 16  ;;  %v923_v55 = vshll.u32 %v569_v39, 16  ;;  %v19043_v36 = vld [vmem:[%s19527_s27 + $0xa8] sm:$0xff]  }
  0xfe   : > { %3210 = vmatmul.mubr.bf16.gmra.mrb[96].mxu1 %v19036_v0  ;;  %v902_v52 = vsel %vm19552_vm2, %v897_v40, %v901_v22  ;;  %v3925_v53 = vor.u32 %v3924_v42, %v3920_v41  ;;  %v3930_v54 = vrot.slane %v3928_v43, 5  ;;  %v927_v4 = vshrl.u32 %v569_v39, 16  ;;  %v573_v40 = vld [vmem:[%s19527_s27 + $0xbc] sm:$0x1] }
  0xff   : > { %4718 = vmatmul.mubr.bf16.gmra.mrb[96].mxu0 %v19037_v20  ;;  %v916_v61 = vrot.slane %v914_v48, 4  ;;  %v919_v62 = vrot.slane %v917_v49, 5  ;;  %v925_v3 = vrot.slane %v923_v55, 5  ;;  %v933_v9 = vshll.u32 %v570_v44, 16  ;;  %v15058_v48 = vld [vmem:[%s19527_s27 + $0xcc] sm:$0xf] }
 0x100   : > { %v3926_v1 = vrot.slane %v3925_v53, 4  ;;  %v3933_v10 = vshrl.u32 %v15055_v50, 16  ;;  %v929_v12 = vrot.slane %v927_v4, 4  ;;  %v3936_v13 = vshll.u32 %v15055_v50, 16  ;;  %v15059_v49 = vld [vmem:[%s19527_s27 + $0xd0] sm:$0xf] }
 0x101   : > { %v920_v8 = vor.u32 %v919_v62, %v916_v61  ;;  %v935_v18 = vrot.slane %v933_v9, 5  ;;  %v3952_v27 = vshll.u32 %v15057_v5, 16  ;;  %v957_v62 = vshll.u32 %v573_v40, 16 }
 0x102   : > { %v3931_v11 = vsel %vm19552_vm2, %v3926_v1, %v3930_v54  ;;  %v3935_v19 = vrot.slane %v3933_v10, 4  ;;  %v930_v21 = vor.u32 %v929_v12, %v925_v3  ;;  %v3938_v22 = vrot.slane %v3936_v13, 5  ;;  %v15060_v54 = vld [vmem:[%s19527_s27 + $0xd4] sm:$0x1] }
 0x103   : > { %v921_v17 = vrot.slane %v920_v8, 4  ;;  %v3954_v39 = vrot.slane %v3952_v27, 5  ;;  %v3957_v1 = vshrl.u32 %v15058_v48, 16  ;;  %v959_v8 = vrot.slane %v957_v62, 5  ;;  %v1043_v27 = vld [vmem:[%s19527_s27 + $0x8] sm:$0x1] }
 0x104   : > { %v931_v32 = vrot.slane %v930_v21, 4  ;;  %v3939_v33 = vor.u32 %v3938_v22, %v3935_v19  ;;  %v3970_v9 = vshrl.u32 %v15059_v49, 16  ;;  %v19048_v19 = vld [vmem:[%s19527_s27 + $0xb4] sm:$0xff]  }
 0x105   : > { %v3959_v12 = vrot.slane %v3957_v1, 4 }
 0x106   : > { %v936_v44 = vsel %vm19552_vm2, %v931_v32, %v935_v18  ;;  %v3976_v18 = vshll.u32 %v15060_v54, 16  ;;  %v1044_v32 = vld [vmem:[%s19527_s27 + $0xc] sm:$0xe] }
 0x10f   : > { %v16644_v7 = vpop.f32.mrb[0].mxu0  ;;  %v16716_v51 = vpop.f32.mrb[0].mxu1 }
 0x110   : > { %v16645_v31 = vpop.f32.mrb[1].mxu0  ;;  %v16717_v2 = vpop.f32.mrb[1].mxu1 }
 0x111   : > { %v16647_v46 = vpop.f32.mrb[2].mxu0  ;;  %v20192_v58 = vadd.f32 %v16645_v31, %v16644_v7  ;;  %v20202_v7 = vadd.f32 %v16717_v2, %v16716_v51  ;;  %v911_v31 = vrot.slane %v909_v23, 5  ;;  %v16719_v51 = vpop.f32.mrb[2].mxu1  ;;  %v19042_v2 = vld [vmem:[%s19527_s27 + $0xb4] sm:$0xff]  }
 0x112   : > { %v16648_v56 = vpop.f32.mrb[3].mxu0  ;;  %v16720_v63 = vpop.f32.mrb[3].mxu1 }
 0x113   : > { %v20194_v59 = vadd.f32 %v16648_v56, %v16647_v46  ;;  %v3915_v46 = vor.u32 %v3914_v38, %v3911_v37  ;;  %v15056_v56 = vld [vmem:[%s19527_s27 + $0xc4] sm:$0xf]  ;;  %v912_v57 = vsel %vm19552_vm2, %v907_v45, %v911_v31  ;;  %v20232_v28 = vadd.f32 %v16720_v63, %v16719_v51  ;;  %v571_v37 = vld [vmem:[%s19527_s27 + $0xb4] sm:$0xf]  ;;  %v572_v38 = vld [vmem:[%s19527_s27 + $0xb8] sm:$0xf] }
 0x114   : > { %v14642_v0 = vcombine.low %v902_v52, %v912_v57  ;;  %v3942_v14 = vshll.u32 %v15056_v56, 16  ;;  %v3946_v24 = vshrl.u32 %v15056_v56, 16  ;;  %v926_v31 = vsel %vm19552_vm2, %v921_v17, %v925_v3 }
 0x115   : > { %v3916_v60 = vrot.slane %v3915_v46, 4  ;;  %v941_v42 = vshll.u32 %v571_v37, 16  ;;  %v947_v43 = vshll.u32 %v572_v38, 16  ;;  %v3940_v45 = vrot.slane %v3939_v33, 4 }
 0x116   : > { %3217 = vmatprep.mubr.bf16.mxu1 %v14642_v0  ;;  %v3944_v23 = vrot.slane %v3942_v14, 5  ;;  %v3948_v34 = vrot.slane %v3946_v24, 4  ;;  %v14643_v50 = vcombine.low %v926_v31, %v936_v44  ;;  %v3966_v3 = vshll.u32 %v15059_v49, 16  ;;  %v1041_v14 = vld [vmem:[%s19527_s27] sm:$0xe] }
 0x117   : > { %v3921_v6 = vsel %vm19552_vm2, %v3916_v60, %v3920_v41  ;;  %v16650_v15 = vpop.f32.mrb[4].mxu0  ;;  %3218 = vmatmul.mubr.bf16.gmra.mrb[100].mxu1 %v19041_v47  ;;  %v16722_v30 = vpop.f32.mrb[4].mxu1  ;;  %v938_v41 = vshrl.u32 %v571_v37, 16  ;;  %v951_v47 = vshrl.u32 %v572_v38, 16  ;;  %v943_v52 = vrot.slane %v941_v42, 5  ;;  %v19044_v60 = vld [vmem:[%s19527_s27 + $0xc0] sm:$0xff]  }
 0x118   : > { %v15074_v16 = vcombine.low %v3921_v6, %v3931_v11  ;;  %v16651_v20 = vpop.f32.mrb[5].mxu0  ;;  %v3949_v46 = vor.u32 %v3948_v34, %v3944_v23  ;;  %v949_v53 = vrot.slane %v947_v43, 5  ;;  %v3945_v56 = vsel %vm19552_vm2, %v3940_v45, %v3944_v23  ;;  %v16723_v63 = vpop.f32.mrb[5].mxu1  ;;  %3225 = vmatprep.mubr.bf16.mxu1 %v14643_v50  ;;  %v1046_v38 = vld [vmem:[%s19527_s27 + $0x14] sm:$0x1] }
 0x119   : > { %v20230_v26 = vpop.f32.mrb[6].mxu0  ;;  %v20234_v29 = vadd.f32 %v16651_v20, %v16650_v15  ;;  %v940_v51 = vrot.slane %v938_v41, 4  ;;  %v953_v61 = vrot.slane %v951_v47, 4  ;;  %v16725_v4 = vpop.f32.mrb[6].mxu1  ;;  %v3972_v17 = vrot.slane %v3970_v9, 4 }
 0x11a   : > { %4725 = vmatprep.mubr.bf16.mxu0 %v15074_v16  ;;  %v16654_v55 = vpop.f32.mrb[7].mxu0  ;;  %v3950_v57 = vrot.slane %v3949_v46, 4  ;;  %v3968_v16 = vrot.slane %v3966_v3, 5  ;;  %v1042_v20 = vld [vmem:[%s19527_s27 + $0x4] sm:$0xf]  ;;  %v20261_v24 = vadd.f32 %v16723_v63, %v16722_v30  ;;  %v16726_v31 = vpop.f32.mrb[7].mxu1 }
 0x11b   : > { %4726 = vmatmul.mubr.bf16.gmra.mrb[100].mxu0 %v19042_v2  ;;  %v944_v0 = vor.u32 %v943_v52, %v940_v51  ;;  %v3960_v2 = vshll.u32 %v15058_v48, 16  ;;  %v954_v6 = vor.u32 %v953_v61, %v949_v53  ;;  %v20259_v23 = vadd.f32 %v16654_v55, %v20230_v26  ;;  %v1045_v26 = vld [vmem:[%s19527_s27 + $0x10] sm:$0xf]  ;;  %v19051_v46 = vld [vmem:[%s23359_s3 + $0x340] sm:$0xff]   ;;  %v1048_v9 = vld [vmem:[%s19527_s27 + $0x1c] sm:$0xf] }
 0x11c   : > { %v3955_v5 = vsel %vm19552_vm2, %v3950_v57, %v3954_v39  ;;  %v3973_v34 = vor.u32 %v3972_v17, %v3968_v16  ;;  %v14645_v37 = vrot.slane %v1041_v14, 9  ;;  %v1142_v40 = vrot.slane %v1042_v20, 5  ;;  %v19049_v48 = vld [vmem:[%s19527_s27 + $0xcc] sm:$0xff]   ;;  %17172 = vmatprep.subr.bf16.mxu0 %v19051_v46  ;;  %v19053_v61 = vld [vmem:[%s23359_s3 + $0x200] sm:$0xff]  }
 0x11d   : > { %v15075_v10 = vcombine.low %v3945_v56, %v3955_v5  ;;  %v945_v11 = vrot.slane %v944_v0, 4  ;;  %v3962_v13 = vrot.slane %v3960_v2, 5  ;;  %v955_v15 = vrot.slane %v954_v6, 4  ;;  %17948 = vmatprep.subr.bf16.mxu1 %v19053_v61 }
 0x11e   : > { %v1145_v41 = vrot.slane %v1043_v27, 5  ;;  %v3974_v42 = vrot.slane %v3973_v34, 4  ;;  %v20275_v43 = vadd.f32 %v16726_v31, %v16725_v4  ;;  %v14646_v44 = vrot.slane %v1044_v32, 9  ;;  %v1047_v4 = vld [vmem:[%s19527_s27 + $0x18] sm:$0xe]  ;;  %v19055_v27 = vld [vmem:[%s23359_s3 + $0x208] sm:$0xff]  }
 0x11f   : > { %3226 = vmatmul.mubr.bf16.gmra.mrb[104].mxu1 %v19043_v36  ;;  %4733 = vmatprep.mubr.bf16.mxu0 %v15075_v10  ;;  %v950_v21 = vsel %vm19552_vm2, %v945_v11, %v949_v53  ;;  %v3963_v22 = vor.u32 %v3962_v13, %v3959_v12  ;;  %v960_v33 = vsel %vm19552_vm2, %v955_v15, %v959_v8  ;;  %v3978_v36 = vrot.slane %v3976_v18, 5  ;;  %v16656_v54 = vpop.f32.mrb[8].mxu0  ;;  %v1049_v10 = vld [vmem:[%s19527_s27 + $0x20] sm:$0x1]  ;;  %v5088_v12 = vld [vmem:[%s20303_s30 + $0x4] sm:$0xf] }
 0x120   : > { %v14644_v30 = vcombine.low %v950_v21, %v960_v33  ;;  %v1149_v45 = vrot.slane %v1045_v26, 5  ;;  %v1143_v49 = vsel %vm19670_vm5, %v14645_v37, %v1142_v40  ;;  %v1144_v50 = vrot.slane %v1142_v40, 4  ;;  %v5087_v11 = vld [vmem:[%s20303_s30] sm:$0xf]  ;;  %v5089_v13 = vld [vmem:[%s20303_s30 + $0x8] sm:$0x1] }
 0x121   : > { %v3964_v39 = vrot.slane %v3963_v22, 4  ;;  %v1152_v51 = vrot.slane %v1046_v38, 5  ;;  %v3979_v52 = vsel %vm19552_vm2, %v3974_v42, %v3978_v36  ;;  %v16728_v62 = vpop.f32.mrb[8].mxu1  ;;  %v5139_v17 = vshll.u32 %v5087_v11, 16  ;;  %v5090_v36 = vld [vmem:[%s20303_s30 + $0xc] sm:$0xf] }
 0x122   : > { %3233 = vmatprep.mubr.bf16.mxu1 %v14644_v30  ;;  %v1151_v53 = vrot.slane %v1149_v45, 4  ;;  %v1146_v56 = vsel %vm19670_vm5, %v1144_v50, %v1145_v41  ;;  %v1150_v57 = vsel %vm19670_vm5, %v14646_v44, %v1149_v45  ;;  %v16729_v3 = vpop.f32.mrb[9].mxu1  ;;  %v5145_v18 = vshll.u32 %v5088_v12, 16  ;;  %v5092_v44 = vld [vmem:[%s20303_s30 + $0x14] sm:$0x1] }
 0x123   : > { %4734 = vmatmul.mubr.bf16.gmra.mrb[104].mxu0 %v19044_v60  ;;  %v3969_v47 = vsel %vm19552_vm2, %v3964_v39, %v3968_v16  ;;  %v16657_v60 = vpop.f32.mrb[9].mxu0  ;;  %v14661_v63 = vcombine.low %v1143_v49, %v1146_v56  ;;  %v20305_v6 = vadd.f32 %v16729_v3, %v16728_v62  ;;  %v16731_v8 = vpop.f32.mrb[10].mxu1  ;;  %v5136_v16 = vshrl.u32 %v5087_v11, 16  ;;  %v5091_v39 = vld [vmem:[%s20303_s30 + $0x10] sm:$0xf] }
 0x124   : > { %v15076_v55 = vcombine.low %v3969_v47, %v3979_v52  ;;  %v1153_v0 = vsel %vm19670_vm5, %v1151_v53, %v1152_v51  ;;  %v20297_v1 = vadd.f32 %v16657_v60, %v16656_v54  ;;  %v16659_v2 = vpop.f32.mrb[10].mxu0  ;;  %v5155_v20 = vshll.u32 %v5089_v13, 16  ;;  %v16732_v40 = vpop.f32.mrb[11].mxu1  ;;  %v1050_v47 = vld [vmem:[%s19527_s27 + $0x24] sm:$0xe] }
 0x125   : > { %v16660_v5 = vpop.f32.mrb[11].mxu0  ;;  %v14662_v14 = vcombine.low %v1150_v57, %v1153_v0  ;;  %v14647_v21 = vrot.slane %v1047_v4, 9  ;;  %v1156_v22 = vrot.slane %v1048_v9, 5  ;;  %v5138_v31 = vrot.slane %v5136_v16, 4  ;;  %v1051_v52 = vld [vmem:[%s19527_s27 + $0x28] sm:$0xf] }
 0x126   : > { %4741 = vmatprep.mubr.bf16.mxu0 %v15076_v55  ;;  %v20312_v15 = vadd.f32 %v16660_v5, %v16659_v2  ;;  %v5141_v32 = vrot.slane %v5139_v17, 5  ;;  %v5147_v33 = vrot.slane %v5145_v18, 5  ;;  %v5157_v37 = vrot.slane %v5155_v20, 5  ;;  %v19050_v55 = vld [vmem:[%s20303_s30] sm:$0xff]   ;;  %v1052_v60 = vld [vmem:[%s19527_s27 + $0x2c] sm:$0x1] }
 0x127   : > { %3234 = vmatmul.mubr.bf16.gmra.mrb[108].mxu1 %v19048_v19  ;;  %v5149_v19 = vshrl.u32 %v5088_v12, 16  ;;  %v1157_v26 = vsel %vm19670_vm5, %v14647_v21, %v1156_v22  ;;  %v1158_v38 = vrot.slane %v1156_v22, 4  ;;  %v1159_v30 = vrot.slane %v1049_v10, 5  ;;  %v19052_v12 = vld [vmem:[%s23359_s3 + $0x300] sm:$0xff]   ;;  %v1053_v22 = vld [vmem:[%s19527_s27 + $0x30] sm:$0xe] }
 0x128   : > { %17916 = vmatprep.mubr.bf16.mxu1 %v14661_v63  ;;  %v5142_v41 = vor.u32 %v5141_v32, %v5138_v31  ;;  %v5160_v45 = vshrl.u32 %v5090_v36, 16  ;;  %v5163_v46 = vshll.u32 %v5090_v36, 16  ;;  %v5169_v49 = vshll.u32 %v5091_v39, 16 }
 0x129   : > { %v5151_v34 = vrot.slane %v5149_v19, 4  ;;  %v5173_v50 = vshrl.u32 %v5091_v39, 16  ;;  %v5179_v51 = vshll.u32 %v5092_v44, 16  ;;  %v20332_v5 = vadd.f32 %v16732_v40, %v16731_v8  ;;  %v16734_v18 = vpop.f32.mrb[12].mxu1  ;;  %v1055_v39 = vld [vmem:[%s19527_s27 + $0x38] sm:$0x1] }
 0x12a   : > { %v5143_v53 = vrot.slane %v5142_v41, 4  ;;  %v5162_v57 = vrot.slane %v5160_v45, 4  ;;  %v5165_v62 = vrot.slane %v5163_v46, 5  ;;  %v5171_v63 = vrot.slane %v5169_v49, 5  ;;  %v16735_v21 = vpop.f32.mrb[13].mxu1 }
 0x12b   : > { %4742 = vmatmul.mubr.bf16.gmra.mrb[108].mxu0 %v19049_v48  ;;  %v5152_v42 = vor.u32 %v5151_v34, %v5147_v33  ;;  %v1160_v48 = vsel %vm19670_vm5, %v1158_v38, %v1159_v30  ;;  %v5175_v0 = vrot.slane %v5173_v50, 4  ;;  %v5181_v2 = vrot.slane %v5179_v51, 5  ;;  %v16737_v36 = vpop.f32.mrb[14].mxu1  ;;  %v5095_v49 = vld [vmem:[%s20303_s30 + $0x20] sm:$0x1] }
 0x12c   : > { %v14663_v56 = vcombine.low %v1157_v26, %v1160_v48  ;;  %v5148_v3 = vsel %vm19552_vm2, %v5143_v53, %v5147_v33  ;;  %v14648_v9 = vrot.slane %v1050_v47, 9  ;;  %v5166_v13 = vor.u32 %v5165_v62, %v5162_v57  ;;  %v19058_v26 = vld [vmem:[%s23359_s3 + $0x308] sm:$0xff]   ;;  %v5094_v48 = vld [vmem:[%s20303_s30 + $0x1c] sm:$0xf]  ;;  %v16738_v50 = vpop.f32.mrb[15].mxu1 }
 0x12d   : > { %v5153_v54 = vrot.slane %v5152_v42, 4  ;;  %v1163_v16 = vrot.slane %v1051_v52, 5  ;;  %v1166_v19 = vrot.slane %v1052_v60, 5  ;;  %v20351_v30 = vadd.f32 %v16735_v21, %v16734_v18  ;;  %v5093_v42 = vld [vmem:[%s20303_s30 + $0x18] sm:$0xf]  ;;  %v19054_v53 = vld [vmem:[%s20303_s30 + $0xc] sm:$0xff]  }
 0x12e   : > { %v5167_v31 = vrot.slane %v5166_v13, 4  ;;  %v14649_v40 = vrot.slane %v1053_v22, 9  ;;  %v1173_v47 = vrot.slane %v1055_v39, 5  ;;  %v1057_v57 = vld [vmem:[%s19527_s27 + $0x40] sm:$0xf]  ;;  %v5187_v62 = vshll.u32 %v5093_v42, 16 }
 0x12f   : > { %17917 = vmatmul.mubr.bf16.vlgmr.msra.gmra.mrb[16].mxu1 %v14662_v14  ;;  %v5158_v4 = vsel %vm19552_vm2, %v5153_v54, %v5157_v37  ;;  %v5176_v14 = vor.u32 %v5175_v0, %v5171_v63  ;;  %v1164_v33 = vsel %vm19670_vm5, %v14648_v9, %v1163_v16  ;;  %v1165_v34 = vrot.slane %v1163_v16, 4  ;;  %v1054_v37 = vld [vmem:[%s19527_s27 + $0x34] sm:$0xf]  ;;  %v1060_v39 = vld [vmem:[%s19527_s27 + $0x4c] sm:$0xf] }
 0x130   : > { %17949 = vmatpush3.bf16.msra.mxu1 %v19053_v61  ;;  %v16662_v61 = vpop.f32.mrb[12].mxu0  ;;  %17920 = vmatprep.mubr.bf16.mxu1 %v14663_v56  ;;  %v15245_v11 = vcombine.low %v5148_v3, %v5158_v4  ;;  %v1170_v41 = vrot.slane %v1054_v37, 5  ;;  %v5172_v44 = vsel %vm19552_vm2, %v5167_v31, %v5171_v63  ;;  %v1056_v56 = vld [vmem:[%s19527_s27 + $0x3c] sm:$0xe]  ;;  %v5193_v63 = vshll.u32 %v5094_v48, 16 }
 0x131   : > { %17950 = vmatprep.subr.bf16.mxu1 %v19055_v27  ;;  %v16663_v10 = vpop.f32.mrb[13].mxu0  ;;  %v5177_v32 = vrot.slane %v5176_v14, 4  ;;  %v1167_v46 = vsel %vm19670_vm5, %v1165_v34, %v1166_v19  ;;  %v5197_v0 = vshrl.u32 %v5094_v48, 16  ;;  %v5203_v4 = vshll.u32 %v5095_v49, 16 }
 0x132   : > { %v16665_v17 = vpop.f32.mrb[14].mxu0  ;;  %v20337_v20 = vadd.f32 %v16663_v10, %v16662_v61  ;;  %6160 = vmatprep.mubr.bf16.mxu0 %v15245_v11  ;;  %v14664_v52 = vcombine.low %v1164_v33, %v1167_v46  ;;  %v1171_v54 = vsel %vm19670_vm5, %v14649_v40, %v1170_v41  ;;  %v5184_v61 = vshrl.u32 %v5093_v42, 16  ;;  %v19059_v33 = vld [vmem:[%s23359_s3 + $0x210] sm:$0xff]   ;;  %v19056_v42 = vld [vmem:[%s20303_s30 + $0x18] sm:$0xff]  }
 0x133   : > { %v16666_v8 = vpop.f32.mrb[15].mxu0  ;;  %6161 = vmatmul.mubr.bf16.vlgmr.msra.gmra.mrb[112].mxu0 %v19050_v55  ;;  %v5182_v45 = vsel %vm19552_vm2, %v5177_v32, %v5181_v2  ;;  %v1172_v55 = vrot.slane %v1170_v41, 4  ;;  %v1058_v2 = vld [vmem:[%s19527_s27 + $0x44] sm:$0x1]  ;;  %v20371_v9 = vadd.f32 %v16738_v50, %v16737_v36  ;;  %v14650_v10 = vrot.slane %v1056_v56, 9 }
 0x134   : > { %17951 = vmatpush3.bf16.msra.mxu1 %v19055_v27  ;;  %v19057_v27 = vld [vmem:[%s23359_s3 + $0x348] sm:$0xff]   ;;  %v20349_v38 = vadd.f32 %v16666_v8, %v16665_v17  ;;  %17173 = vmatpush3.bf16.msra.mxu0 %v19052_v12  ;;  %v15246_v51 = vcombine.low %v5172_v44, %v5182_v45  ;;  %v16668_v60 = vpop.f32.mrb[16].mxu0  ;;  %v5186_v12 = vrot.slane %v5184_v61, 4  ;;  %v5189_v13 = vrot.slane %v5187_v62, 5  ;;  %v1061_v45 = vld [vmem:[%s19527_s27 + $0x50] sm:$0x1] }
 0x135   : > { %17174 = vmatprep.subr.bf16.mxu0 %v19057_v27  ;;  %v1174_v3 = vsel %vm19670_vm5, %v1172_v55, %v1173_v47  ;;  %v5195_v14 = vrot.slane %v5193_v63, 5  ;;  %v16669_v16 = vpop.f32.mrb[17].mxu0  ;;  %v5199_v17 = vrot.slane %v5197_v0, 4  ;;  %v1177_v18 = vrot.slane %v1057_v57, 5  ;;  %17952 = vmatprep.subr.bf16.mxu1 %v19059_v33  ;;  %v5096_v47 = vld [vmem:[%s20303_s30 + $0x24] sm:$0xf] }
 0x136   : > { %6168 = vmatprep.mubr.bf16.mxu0 %v15246_v51  ;;  %v14665_v11 = vcombine.low %v1171_v54, %v1174_v3  ;;  %v1180_v19 = vrot.slane %v1058_v2, 5  ;;  %v5190_v8 = vor.u32 %v5189_v13, %v5186_v12  ;;  %v20373_v21 = vadd.f32 %v16669_v16, %v16668_v60  ;;  %v16671_v34 = vpop.f32.mrb[18].mxu0  ;;  %v1062_v60 = vld [vmem:[%s19527_s27 + $0x54] sm:$0xe]  ;;  %v1063_v3 = vld [vmem:[%s19527_s27 + $0x58] sm:$0xf] }
 0x137   : > { %17921 = vmatmul.mubr.bf16.gmra.mrb[20].mxu1 %v14664_v52  ;;  %v5200_v22 = vor.u32 %v5199_v17, %v5195_v14  ;;  %v5205_v27 = vrot.slane %v5203_v4, 5  ;;  %v1178_v31 = vsel %vm19670_vm5, %v14650_v10, %v1177_v18  ;;  %v1179_v32 = vrot.slane %v1177_v18, 4  ;;  %v16672_v37 = vpop.f32.mrb[19].mxu0  ;;  %v5097_v52 = vld [vmem:[%s20303_s30 + $0x28] sm:$0xf] }
 0x138   : > { %17175 = vmatpush3.bf16.msra.mxu0 %v19058_v26  ;;  %17924 = vmatprep.mubr.bf16.mxu1 %v14665_v11  ;;  %v5191_v36 = vrot.slane %v5190_v8, 4  ;;  %v1059_v26 = vld [vmem:[%s19527_s27 + $0x48] sm:$0xe]  ;;  %v20385_v44 = vadd.f32 %v16672_v37, %v16671_v34  ;;  %v1184_v50 = vrot.slane %v1060_v39, 5  ;;  %v1187_v51 = vrot.slane %v1061_v45, 5  ;;  %v16674_v61 = vpop.f32.mrb[20].mxu0 }
 0x139   : > { %v5201_v40 = vrot.slane %v5200_v22, 4  ;;  %v1181_v41 = vsel %vm19670_vm5, %v1179_v32, %v1180_v19  ;;  %v14651_v46 = vrot.slane %v1059_v26, 9  ;;  %17953 = vmatpush3.bf16.msra.mxu1 %v19059_v33  ;;  %v5208_v55 = vshrl.u32 %v5096_v47, 16  ;;  %v1064_v4 = vld [vmem:[%s19527_s27 + $0x5c] sm:$0x1]  ;;  %v16675_v19 = vpop.f32.mrb[21].mxu0 }
 0x13a   : > { %v5196_v48 = vsel %vm19552_vm2, %v5191_v36, %v5195_v14  ;;  %v14666_v49 = vcombine.low %v1178_v31, %v1181_v41  ;;  %v5211_v56 = vshll.u32 %v5096_v47, 16  ;;  %v5217_v57 = vshll.u32 %v5097_v52, 16  ;;  %v19061_v37 = vld [vmem:[%s23359_s3 + $0x218] sm:$0xff]   ;;  %v16677_v26 = vpop.f32.mrb[22].mxu0  ;;  %v1065_v39 = vld [vmem:[%s19527_s27 + $0x60] sm:$0xe] }
 0x13b   : > { %6169 = vmatmul.mubr.bf16.gmra.mrb[116].mxu0 %v19054_v53  ;;  %v5098_v53 = vld [vmem:[%s20303_s30 + $0x2c] sm:$0x1]  ;;  %v5206_v54 = vsel %vm19552_vm2, %v5201_v40, %v5205_v27  ;;  %v1185_v63 = vsel %vm19670_vm5, %v14651_v46, %v1184_v50  ;;  %v1186_v0 = vrot.slane %v1184_v50, 4  ;;  %v5221_v2 = vshrl.u32 %v5097_v52, 16  ;;  %v16678_v41 = vpop.f32.mrb[23].mxu0  ;;  %17954 = vmatprep.subr.bf16.mxu1 %v19061_v37 }
 0x13c   : > { %v15247_v62 = vcombine.low %v5196_v48, %v5206_v54  ;;  %v5210_v10 = vrot.slane %v5208_v55, 4  ;;  %v5213_v11 = vrot.slane %v5211_v56, 5  ;;  %v5219_v12 = vrot.slane %v5217_v57, 5  ;;  %v1067_v45 = vld [vmem:[%s19527_s27 + $0x68] sm:$0x1] }
 0x13d   : > { %v5227_v13 = vshll.u32 %v5098_v53, 16  ;;  %v1188_v14 = vsel %vm19670_vm5, %v1186_v0, %v1187_v51  ;;  %v5223_v16 = vrot.slane %v5221_v2, 4  ;;  %v14652_v17 = vrot.slane %v1062_v60, 9  ;;  %v19060_v48 = vld [vmem:[%s20303_s30 + $0x24] sm:$0xff]   ;;  %v5099_v51 = vld [vmem:[%s20303_s30 + $0x30] sm:$0xf]  ;;  %17955 = vmatpush3.bf16.msra.mxu1 %v19061_v37 }
 0x13e   : > { %6176 = vmatprep.mubr.bf16.mxu0 %v15247_v62  ;;  %v1191_v18 = vrot.slane %v1063_v3, 5  ;;  %v14667_v8 = vcombine.low %v1185_v63, %v1188_v14  ;;  %v5214_v22 = vor.u32 %v5213_v11, %v5210_v10  ;;  %v1194_v31 = vrot.slane %v1064_v4, 5  ;;  %v5100_v52 = vld [vmem:[%s20303_s30 + $0x34] sm:$0xf]  ;;  %v5101_v57 = vld [vmem:[%s20303_s30 + $0x38] sm:$0x1] }
 0x13f   : > { %17925 = vmatmul.mubr.bf16.gmra.mrb[24].mxu1 %v14666_v49  ;;  %v5229_v27 = vrot.slane %v5227_v13, 5  ;;  %v5224_v32 = vor.u32 %v5223_v16, %v5219_v12  ;;  %v20404_v36 = vadd.f32 %v16675_v19, %v16674_v61  ;;  %v20415_v49 = vadd.f32 %v16678_v41, %v16677_v26  ;;  %v1068_v60 = vld [vmem:[%s19527_s27 + $0x6c] sm:$0xe]  ;;  %v1069_v2 = vld [vmem:[%s19527_s27 + $0x70] sm:$0xf]  ;;  %v16680_v41 = vpop.f32.mrb[24].mxu0 }
 0x140   : > { %v1192_v33 = vsel %vm19670_vm5, %v14652_v17, %v1191_v18  ;;  %v1193_v34 = vrot.slane %v1191_v18, 4  ;;  %17928 = vmatprep.mubr.bf16.mxu1 %v14667_v8  ;;  %v5215_v40 = vrot.slane %v5214_v22, 4  ;;  %v14653_v50 = vrot.slane %v1065_v39, 9  ;;  %v19063_v3 = vld [vmem:[%s23359_s3 + $0x350] sm:$0xff]  }
 0x141   : > { %v5225_v46 = vrot.slane %v5224_v32, 4  ;;  %v1201_v56 = vrot.slane %v1067_v45, 5  ;;  %v5232_v62 = vshrl.u32 %v5099_v51, 16  ;;  %v5235_v63 = vshll.u32 %v5099_v51, 16  ;;  %v1070_v13 = vld [vmem:[%s19527_s27 + $0x74] sm:$0x1]  ;;  %17176 = vmatprep.subr.bf16.mxu0 %v19063_v3 }
 0x142   : > { %v1195_v47 = vsel %vm19670_vm5, %v1193_v34, %v1194_v31  ;;  %v5220_v53 = vsel %vm19552_vm2, %v5215_v40, %v5219_v12  ;;  %v5241_v0 = vshll.u32 %v5100_v52, 16  ;;  %v5245_v12 = vshrl.u32 %v5100_v52, 16  ;;  %v19064_v31 = vld [vmem:[%s23359_s3 + $0x310] sm:$0xff]   ;;  %v16681_v45 = vpop.f32.mrb[25].mxu0 }
 0x143   : > { %6177 = vmatmul.mubr.bf16.gmra.mrb[120].mxu0 %v19056_v42  ;;  %v1066_v42 = vld [vmem:[%s19527_s27 + $0x64] sm:$0xf]  ;;  %v14668_v54 = vcombine.low %v1192_v33, %v1195_v47  ;;  %v5230_v61 = vsel %vm19552_vm2, %v5225_v46, %v5229_v27  ;;  %v5234_v14 = vrot.slane %v5232_v62, 4  ;;  %v5237_v16 = vrot.slane %v5235_v63, 5  ;;  %v16683_v52 = vpop.f32.mrb[26].mxu0  ;;  %v19067_v63 = vld [vmem:[%s23359_s3 + $0x228] sm:$0xff]  }
 0x144   : > { %v1198_v55 = vrot.slane %v1066_v42, 5  ;;  %v15248_v4 = vcombine.low %v5220_v53, %v5230_v61  ;;  %v5243_v17 = vrot.slane %v5241_v0, 5  ;;  %v5251_v18 = vshll.u32 %v5101_v57, 16  ;;  %17177 = vmatpush3.bf16.msra.mxu0 %v19064_v31  ;;  %v19065_v46 = vld [vmem:[%s23359_s3 + $0x220] sm:$0xff]   ;;  %v1071_v53 = vld [vmem:[%s19527_s27 + $0x78] sm:$0xe] }
 0x145   : > { %v5247_v8 = vrot.slane %v5245_v12, 4  ;;  %v14654_v22 = vrot.slane %v1068_v60, 9  ;;  %v1205_v27 = vrot.slane %v1069_v2, 5  ;;  %v5238_v33 = vor.u32 %v5237_v16, %v5234_v14  ;;  %17956 = vmatprep.subr.bf16.mxu1 %v19065_v46  ;;  %v16684_v57 = vpop.f32.mrb[27].mxu0  ;;  %v1073_v60 = vld [vmem:[%s19527_s27 + $0x80] sm:$0x1] }
 0x146   : > { %v1199_v10 = vsel %vm19670_vm5, %v14653_v50, %v1198_v55  ;;  %v1200_v11 = vrot.slane %v1198_v55, 4  ;;  %6184 = vmatprep.mubr.bf16.mxu0 %v15248_v4  ;;  %v5253_v34 = vrot.slane %v5251_v18, 5  ;;  %v1208_v37 = vrot.slane %v1070_v13, 5  ;;  %v19062_v50 = vld [vmem:[%s20303_s30 + $0x30] sm:$0xff]   ;;  %17957 = vmatpush3.bf16.msra.mxu1 %v19065_v46  ;;  %v5102_v4 = vld [vmem:[%s20303_s30 + $0x3c] sm:$0xf] }
 0x147   : > { %17929 = vmatmul.mubr.bf16.gmra.mrb[28].mxu1 %v14668_v54  ;;  %v5248_v26 = vor.u32 %v5247_v8, %v5243_v17  ;;  %v1206_v39 = vsel %vm19670_vm5, %v14654_v22, %v1205_v27  ;;  %v1207_v40 = vrot.slane %v1205_v27, 4  ;;  %v5239_v42 = vrot.slane %v5238_v33, 4  ;;  %v1072_v54 = vld [vmem:[%s19527_s27 + $0x7c] sm:$0xf]  ;;  %v5104_v16 = vld [vmem:[%s20303_s30 + $0x44] sm:$0x1]  ;;  %17958 = vmatprep.subr.bf16.mxu1 %v19067_v63 }
 0x148   : > { %v1202_v19 = vsel %vm19670_vm5, %v1200_v11, %v1201_v56  ;;  %v20445_v51 = vadd.f32 %v16681_v45, %v16680_v41  ;;  %v14655_v61 = vrot.slane %v1071_v53, 9  ;;  %v1212_v62 = vrot.slane %v1072_v54, 5  ;;  %v16686_v11 = vpop.f32.mrb[28].mxu0  ;;  %v1074_v18 = vld [vmem:[%s19527_s27 + $0x84] sm:$0xe] }
 0x149   : > { %v14669_v32 = vcombine.low %v1199_v10, %v1202_v19  ;;  %v5249_v47 = vrot.slane %v5248_v26, 4  ;;  %v5244_v55 = vsel %vm19552_vm2, %v5239_v42, %v5243_v17  ;;  %v20457_v2 = vadd.f32 %v16684_v57, %v16683_v52  ;;  %v5103_v10 = vld [vmem:[%s20303_s30 + $0x40] sm:$0xf]  ;;  %v1075_v31 = vld [vmem:[%s19527_s27 + $0x88] sm:$0xf] }
 0x14a   : > { %v1215_v3 = vrot.slane %v1073_v60, 5  ;;  %v1213_v13 = vsel %vm19670_vm5, %v14655_v61, %v1212_v62  ;;  %v1214_v14 = vrot.slane %v1212_v62, 4  ;;  %v5256_v17 = vshrl.u32 %v5102_v4, 16  ;;  %17959 = vmatpush3.bf16.msra.mxu1 %v19067_v63  ;;  %v1077_v60 = vld [vmem:[%s19527_s27 + $0x90] sm:$0xe] }
 0x14b   : > { %6185 = vmatmul.mubr.bf16.gmra.mrb[124].mxu0 %v19060_v48  ;;  %17932 = vmatprep.mubr.bf16.mxu1 %v14669_v32  ;;  %v1209_v48 = vsel %vm19670_vm5, %v1207_v40, %v1208_v37  ;;  %v5254_v0 = vsel %vm19552_vm2, %v5249_v47, %v5253_v34  ;;  %v5259_v19 = vshll.u32 %v5102_v4, 16  ;;  %v5265_v8 = vshll.u32 %v5103_v10, 16  ;;  %v1076_v34 = vld [vmem:[%s19527_s27 + $0x8c] sm:$0x1]  ;;  %v1078_v62 = vld [vmem:[%s19527_s27 + $0x94] sm:$0xf] }
 0x14c   : > { %v14670_v56 = vcombine.low %v1206_v39, %v1209_v48  ;;  %v15249_v12 = vcombine.low %v5244_v55, %v5254_v0  ;;  %v5269_v22 = vshrl.u32 %v5103_v10, 16  ;;  %v5275_v27 = vshll.u32 %v5104_v16, 16  ;;  %v16687_v39 = vpop.f32.mrb[29].mxu0  ;;  %v1079_v63 = vld [vmem:[%s19527_s27 + $0x98] sm:$0x1] }
 0x14d   : > { %v1216_v32 = vsel %vm19670_vm5, %v1214_v14, %v1215_v3  ;;  %v5258_v33 = vrot.slane %v5256_v17, 4  ;;  %v14656_v37 = vrot.slane %v1074_v18, 9  ;;  %v1219_v26 = vrot.slane %v1075_v31, 5  ;;  %v16689_v46 = vpop.f32.mrb[30].mxu0  ;;  %v5105_v14 = vld [vmem:[%s20303_s30 + $0x48] sm:$0xf] }
 0x14e   : > { %6192 = vmatprep.mubr.bf16.mxu0 %v15249_v12  ;;  %v14671_v40 = vcombine.low %v1213_v13, %v1216_v32  ;;  %v5261_v41 = vrot.slane %v5259_v19, 5  ;;  %v5267_v42 = vrot.slane %v5265_v8, 5  ;;  %v5271_v45 = vrot.slane %v5269_v22, 4  ;;  %v16690_v54 = vpop.f32.mrb[31].mxu0  ;;  %v19066_v12 = vld [vmem:[%s20303_s30 + $0x3c] sm:$0xff]  }
 0x14f   : > { %17933 = vmatmul.mubr.bf16.gmra.mrb[32].mxu1 %v14670_v56  ;;  %v5277_v47 = vrot.slane %v5275_v27, 5  ;;  %v1220_v48 = vsel %vm19670_vm5, %v14656_v37, %v1219_v26  ;;  %v1221_v52 = vrot.slane %v1219_v26, 4  ;;  %v1222_v53 = vrot.slane %v1076_v34, 5  ;;  %v5106_v17 = vld [vmem:[%s20303_s30 + $0x4c] sm:$0xf]  ;;  %v19070_v34 = vld [vmem:[%s23359_s3 + $0x318] sm:$0xff]  }
 0x150   : > { %17936 = vmatprep.mubr.bf16.mxu1 %v14671_v40  ;;  %v5272_v55 = vor.u32 %v5271_v45, %v5267_v42  ;;  %v20471_v56 = vadd.f32 %v16687_v39, %v16686_v11  ;;  %v20473_v57 = vadd.f32 %v16690_v54, %v16689_v46  ;;  %v14657_v0 = vrot.slane %v1077_v60, 9  ;;  %v19069_v11 = vld [vmem:[%s23359_s3 + $0x358] sm:$0xff]   ;;  %v5107_v18 = vld [vmem:[%s20303_s30 + $0x50] sm:$0x1] }
 0x151   : > { %v1223_v61 = vsel %vm19670_vm5, %v1221_v52, %v1222_v53  ;;  %v1226_v13 = vrot.slane %v1078_v62, 5  ;;  %v1229_v16 = vrot.slane %v1079_v63, 5  ;;  %v5280_v19 = vshrl.u32 %v5105_v14, 16  ;;  %v1080_v32 = vld [vmem:[%s19527_s27 + $0x9c] sm:$0xe]  ;;  %17178 = vmatprep.subr.bf16.mxu0 %v19069_v11  ;;  %v19071_v60 = vld [vmem:[%s23359_s3 + $0x230] sm:$0xff]  }
 0x152   : > { %v5273_v4 = vrot.slane %v5272_v55, 4  ;;  %v14672_v10 = vcombine.low %v1220_v48, %v1223_v61  ;;  %v5283_v39 = vshll.u32 %v5105_v14, 16  ;;  %v5289_v40 = vshll.u32 %v5106_v17, 16  ;;  %17179 = vmatpush3.bf16.msra.mxu0 %v19070_v34  ;;  %17960 = vmatprep.subr.bf16.mxu1 %v19071_v60 }
 0x153   : > { %6193 = vmatmul.mubr.bf16.gmra.mrb[128].mxu0 %v19062_v50  ;;  %v5262_v50 = vor.u32 %v5261_v41, %v5258_v33  ;;  %v1227_v27 = vsel %vm19670_vm5, %v14657_v0, %v1226_v13  ;;  %v1228_v31 = vrot.slane %v1226_v13, 4  ;;  %v1081_v33 = vld [vmem:[%s19527_s27 + $0xa0] sm:$0xf]  ;;  %v5282_v26 = vrot.slane %v5280_v19, 4  ;;  %v1082_v41 = vld [vmem:[%s19527_s27 + $0xa4] sm:$0x1]  ;;  %17961 = vmatpush3.bf16.msra.mxu1 %v19071_v60 }
 0x154   : > { %v5278_v22 = vsel %vm19552_vm2, %v5273_v4, %v5277_v47  ;;  %v5293_v46 = vshrl.u32 %v5106_v17, 16  ;;  %v5299_v47 = vshll.u32 %v5107_v18, 16  ;;  %v14658_v48 = vrot.slane %v1080_v32, 9  ;;  %v1083_v18 = vld [vmem:[%s19527_s27 + $0xa8] sm:$0xe] }
 0x155   : > { %v5263_v3 = vrot.slane %v5262_v50, 4  ;;  %v1230_v45 = vsel %vm19670_vm5, %v1228_v31, %v1229_v16  ;;  %v5285_v54 = vrot.slane %v5283_v39, 5  ;;  %v5291_v50 = vrot.slane %v5289_v40, 5  ;;  %v1084_v19 = vld [vmem:[%s19527_s27 + $0xac] sm:$0xf] }
 0x156   : > { %v14673_v53 = vcombine.low %v1227_v27, %v1230_v45  ;;  %v1233_v55 = vrot.slane %v1081_v33, 5  ;;  %v5295_v61 = vrot.slane %v5293_v46, 4  ;;  %v5301_v62 = vrot.slane %v5299_v47, 5  ;;  %v19068_v27 = vld [vmem:[%s20303_s30 + $0x48] sm:$0xff]   ;;  %v1085_v31 = vld [vmem:[%s19527_s27 + $0xb0] sm:$0x1] }
 0x157   : > { %v5268_v8 = vsel %vm19552_vm2, %v5263_v3, %v5267_v42  ;;  %17937 = vmatmul.mubr.bf16.gmra.mrb[36].mxu1 %v14672_v10  ;;  %v16692_v42 = vpop.f32.mrb[32].mxu0  ;;  %v1236_v63 = vrot.slane %v1082_v41, 5  ;;  %v5286_v4 = vor.u32 %v5285_v54, %v5282_v26  ;;  %v14659_v32 = vrot.slane %v1083_v18, 9  ;;  %v5108_v39 = vld [vmem:[%s20303_s30 + $0x54] sm:$0xf] }
 0x158   : > { %v15250_v37 = vcombine.low %v5268_v8, %v5278_v22  ;;  %v16693_v52 = vpop.f32.mrb[33].mxu0  ;;  %17940 = vmatprep.mubr.bf16.mxu1 %v14673_v53  ;;  %v1234_v10 = vsel %vm19670_vm5, %v14658_v48, %v1233_v55  ;;  %v1235_v13 = vrot.slane %v1233_v55, 4  ;;  %v5296_v11 = vor.u32 %v5295_v61, %v5291_v50  ;;  %v5109_v40 = vld [vmem:[%s20303_s30 + $0x58] sm:$0xf]  ;;  %v5110_v47 = vld [vmem:[%s20303_s30 + $0x5c] sm:$0x1] }
 0x159   : > { %v20504_v0 = vadd.f32 %v16693_v52, %v16692_v42  ;;  %v16695_v3 = vpop.f32.mrb[34].mxu0  ;;  %v5287_v16 = vrot.slane %v5286_v4, 4  ;;  %v1240_v33 = vrot.slane %v1084_v19, 5  ;;  %v1243_v26 = vrot.slane %v1085_v31, 5  ;;  %v1086_v52 = vld [vmem:[%s19527_s27 + $0xb4] sm:$0xe] }
 0x15a   : > { %6200 = vmatprep.mubr.bf16.mxu0 %v15250_v37  ;;  %v16696_v14 = vpop.f32.mrb[35].mxu0  ;;  %v1237_v17 = vsel %vm19670_vm5, %v1235_v13, %v1236_v63  ;;  %v5297_v8 = vrot.slane %v5296_v11, 4  ;;  %v5304_v48 = vshrl.u32 %v5108_v39, 16  ;;  %v5307_v54 = vshll.u32 %v5108_v39, 16  ;;  %v1087_v60 = vld [vmem:[%s19527_s27 + $0xb8] sm:$0xf] }
 0x15b   : > { %6201 = vmatmul.mubr.bf16.gmra.mrb[132].mxu0 %v19066_v12  ;;  %v20508_v12 = vadd.f32 %v16696_v14, %v16695_v3  ;;  %v14674_v22 = vcombine.low %v1234_v10, %v1237_v17  ;;  %v16698_v34 = vpop.f32.mrb[36].mxu0  ;;  %v5292_v37 = vsel %vm19552_vm2, %v5287_v16, %v5291_v50  ;;  %v1241_v45 = vsel %vm19670_vm5, %v14659_v32, %v1240_v33  ;;  %v19073_v61 = vld [vmem:[%s23359_s3 + $0x238] sm:$0xff]  }
 0x15c   : > { %v16699_v41 = vpop.f32.mrb[37].mxu0  ;;  %v5302_v42 = vsel %vm19552_vm2, %v5297_v8, %v5301_v62  ;;  %v1242_v46 = vrot.slane %v1240_v33, 4  ;;  %v5313_v50 = vshll.u32 %v5109_v40, 16  ;;  %v5317_v55 = vshrl.u32 %v5109_v40, 16  ;;  %v1088_v4 = vld [vmem:[%s19527_s27 + $0xbc] sm:$0x1]  ;;  %17962 = vmatprep.subr.bf16.mxu1 %v19073_v61 }
 0x15d   : > { %v15251_v53 = vcombine.low %v5292_v37, %v5302_v42  ;;  %v5306_v63 = vrot.slane %v5304_v48, 4  ;;  %v5323_v3 = vshll.u32 %v5110_v47, 16  ;;  %v14660_v10 = vrot.slane %v1086_v52, 9  ;;  %v16701_v13 = vpop.f32.mrb[38].mxu0  ;;  %17963 = vmatpush3.bf16.msra.mxu1 %v19073_v61  ;;  %v15078_v40 = vld [vmem:[%s19527_s27 + $0x1c] sm:$0xf] }
 0x15e   : > { %v1244_v62 = vsel %vm19670_vm5, %v1242_v46, %v1243_v26  ;;  %v5309_v11 = vrot.slane %v5307_v54, 5  ;;  %v5315_v16 = vrot.slane %v5313_v50, 5  ;;  %v5319_v17 = vrot.slane %v5317_v55, 4  ;;  %v16702_v18 = vpop.f32.mrb[39].mxu0  ;;  %v15077_v26 = vld [vmem:[%s19527_s27 + $0x18] sm:$0xe] }
 0x15f   : > { %17941 = vmatmul.mubr.bf16.gmra.mrb[40].mxu1 %v14674_v22  ;;  %6208 = vmatprep.mubr.bf16.mxu0 %v15251_v53  ;;  %v14675_v14 = vcombine.low %v1241_v45, %v1244_v62  ;;  %v5325_v19 = vrot.slane %v5323_v3, 5  ;;  %v1247_v8 = vrot.slane %v1087_v60, 5  ;;  %v1250_v22 = vrot.slane %v1088_v4, 5  ;;  %v15079_v42 = vld [vmem:[%s19527_s27 + $0x20] sm:$0x1]  ;;  %v19072_v46 = vld [vmem:[%s20303_s30 + $0x54] sm:$0xff]  }
 0x160   : > { %v20533_v31 = vadd.f32 %v16699_v41, %v16698_v34  ;;  %v5310_v32 = vor.u32 %v5309_v11, %v5306_v63  ;;  %v5320_v33 = vor.u32 %v5319_v17, %v5315_v16  ;;  %v20535_v37 = vadd.f32 %v16702_v18, %v16701_v13  ;;  %v5111_v52 = vld [vmem:[%s20303_s30 + $0x60] sm:$0xf]  ;;  %v5112_v54 = vld [vmem:[%s20303_s30 + $0x64] sm:$0xf]  ;;  %v5113_v50 = vld [vmem:[%s20303_s30 + $0x68] sm:$0x1] }
 0x161   : > { %17944 = vmatprep.mubr.bf16.mxu1 %v14675_v14  ;;  %v1248_v39 = vsel %vm19670_vm5, %v14660_v10, %v1247_v8  ;;  %v15125_v45 = vrot.slane %v15077_v26, 9  ;;  %v4158_v47 = vrot.slane %v15078_v40, 5  ;;  %v4161_v48 = vrot.slane %v15079_v42, 5  ;;  %v15080_v4 = vld [vmem:[%s19527_s27 + $0x24] sm:$0xe] }
 0x162   : > { %v5311_v34 = vrot.slane %v5310_v32, 4  ;;  %v5321_v41 = vrot.slane %v5320_v33, 4  ;;  %v5328_v55 = vshrl.u32 %v5111_v52, 16  ;;  %v5331_v60 = vshll.u32 %v5111_v52, 16  ;;  %v15081_v10 = vld [vmem:[%s19527_s27 + $0x28] sm:$0xf] }
 0x163   : > { %6209 = vmatmul.mubr.bf16.gmra.mrb[136].mxu0 %v19068_v27  ;;  %v1249_v27 = vrot.slane %v1247_v8, 4  ;;  %v4159_v3 = vsel %vm19670_vm5, %v15125_v45, %v4158_v47  ;;  %v15082_v13 = vld [vmem:[%s19527_s27 + $0x2c] sm:$0x1]  ;;  %v4160_v11 = vrot.slane %v4158_v47, 4  ;;  %v19075_v8 = vld [vmem:[%s23359_s3 + $0x360] sm:$0xff]   ;;  %v5347_v32 = vshll.u32 %v5113_v50, 16 }
 0x164   : > { %v5316_v61 = vsel %vm19552_vm2, %v5311_v34, %v5315_v16  ;;  %v5326_v62 = vsel %vm19552_vm2, %v5321_v41, %v5325_v19  ;;  %v5330_v17 = vrot.slane %v5328_v55, 4  ;;  %v5333_v18 = vrot.slane %v5331_v60, 5  ;;  %17180 = vmatprep.subr.bf16.mxu0 %v19075_v8  ;;  %v19076_v34 = vld [vmem:[%s23359_s3 + $0x320] sm:$0xff]  }
 0x165   : > { %v1251_v53 = vsel %vm19670_vm5, %v1249_v27, %v1250_v22  ;;  %v15252_v14 = vcombine.low %v5316_v61, %v5326_v62  ;;  %v5337_v16 = vshll.u32 %v5112_v54, 16  ;;  %v5341_v22 = vshrl.u32 %v5112_v54, 16  ;;  %17181 = vmatpush3.bf16.msra.mxu0 %v19076_v34 }
 0x166   : > { %v14676_v63 = vcombine.low %v1248_v39, %v1251_v53  ;;  %v15126_v19 = vrot.slane %v15080_v4, 9  ;;  %v4162_v33 = vsel %vm19670_vm5, %v4160_v11, %v4161_v48  ;;  %v5334_v26 = vor.u32 %v5333_v18, %v5330_v17  ;;  %v16704_v48 = vpop.f32.mrb[40].mxu0  ;;  %v19077_v53 = vld [vmem:[%s23359_s3 + $0x2c0] sm:$0xff]   ;;  %v19079_v4 = vld [vmem:[%s23359_s3 + $0x2c8] sm:$0xff]   ;;  %v15085_v17 = vld [vmem:[%s19527_s27 + $0x38] sm:$0x1] }
 0x167   : > { %6216 = vmatprep.mubr.bf16.mxu0 %v15252_v14  ;;  %v4165_v39 = vrot.slane %v15081_v10, 5  ;;  %v4168_v27 = vrot.slane %v15082_v13, 5  ;;  %v15141_v40 = vcombine.low %v4159_v3, %v4162_v33  ;;  %v5339_v42 = vrot.slane %v5337_v16, 5  ;;  %v16705_v50 = vpop.f32.mrb[41].mxu0  ;;  %17996 = vmatprep.subr.bf16.mxu1 %v19077_v53  ;;  %v15084_v3 = vld [vmem:[%s19527_s27 + $0x34] sm:$0xf] }
 0x168   : > { %17945 = vmatmul.mubr.bf16.gmra.mrb[44].mxu1 %v14676_v63  ;;  %v5343_v45 = vrot.slane %v5341_v22, 4  ;;  %v5335_v41 = vrot.slane %v5334_v26, 4  ;;  %v5349_v54 = vrot.slane %v5347_v32, 5  ;;  %v20574_v61 = vadd.f32 %v16705_v50, %v16704_v48  ;;  %v16707_v62 = vpop.f32.mrb[42].mxu0  ;;  %v15083_v63 = vld [vmem:[%s19527_s27 + $0x30] sm:$0xe] }
 0x169   : > { %v4166_v47 = vsel %vm19670_vm5, %v15126_v19, %v4165_v39  ;;  %v4167_v52 = vrot.slane %v4165_v39, 4  ;;  %17964 = vmatprep.mubr.bf16.mxu1 %v15141_v40  ;;  %v19074_v14 = vld [vmem:[%s20303_s30 + $0x60] sm:$0xff]   ;;  %v16708_v11 = vpop.f32.mrb[43].mxu0  ;;  %v15127_v18 = vrot.slane %v15083_v63, 9  ;;  %v4172_v8 = vrot.slane %v15084_v3, 5 }
 0x16a   : > { %v5340_v55 = vsel %vm19552_vm2, %v5335_v41, %v5339_v42  ;;  %v20583_v16 = vadd.f32 %v16708_v11, %v16707_v62  ;;  %v4175_v22 = vrot.slane %v15085_v17, 5  ;;  %v5114_v32 = vld [vmem:[%s20303_s30 + $0x6c] sm:$0xf]  ;;  %v5115_v19 = vld [vmem:[%s20303_s30 + $0x70] sm:$0xf]  ;;  %v16710_v33 = vpop.f32.mrb[44].mxu0 }
 0x16b   : > { %6217 = vmatmul.mubr.bf16.gmra.mrb[140].mxu0 %v19072_v46  ;;  %v5344_v46 = vor.u32 %v5343_v45, %v5339_v42  ;;  %v4169_v60 = vsel %vm19670_vm5, %v4167_v52, %v4168_v27  ;;  %v4173_v39 = vsel %vm19670_vm5, %v15127_v18, %v4172_v8  ;;  %v4174_v27 = vrot.slane %v4172_v8, 4  ;;  %v5116_v40 = vld [vmem:[%s20303_s30 + $0x74] sm:$0x1]  ;;  %v15086_v45 = vld [vmem:[%s19527_s27 + $0x3c] sm:$0xe] }
 0x16c   : > { %v15142_v13 = vcombine.low %v4166_v47, %v4169_v60  ;;  %v5352_v42 = vshrl.u32 %v5114_v32, 16  ;;  %v5355_v41 = vshll.u32 %v5114_v32, 16  ;;  %v5361_v47 = vshll.u32 %v5115_v19, 16  ;;  %v15087_v48 = vld [vmem:[%s19527_s27 + $0x40] sm:$0xf] }
 0x16d   : > { %v5345_v10 = vrot.slane %v5344_v46, 4  ;;  %v5365_v52 = vshrl.u32 %v5115_v19, 16  ;;  %v16711_v46 = vpop.f32.mrb[45].mxu0  ;;  %v4176_v50 = vsel %vm19670_vm5, %v4174_v27, %v4175_v22  ;;  %v5371_v60 = vshll.u32 %v5116_v40, 16  ;;  %v15088_v62 = vld [vmem:[%s19527_s27 + $0x44] sm:$0x1] }
 0x16e   : > { %v15128_v63 = vrot.slane %v15086_v45, 9  ;;  %v16713_v3 = vpop.f32.mrb[46].mxu0  ;;  %v4179_v18 = vrot.slane %v15087_v48, 5  ;;  %v4182_v8 = vrot.slane %v15088_v62, 5  ;;  %v20597_v22 = vadd.f32 %v16711_v46, %v16710_v33  ;;  %v15090_v40 = vld [vmem:[%s19527_s27 + $0x4c] sm:$0xf] }
 0x16f   : > { %v5350_v26 = vsel %vm19552_vm2, %v5345_v10, %v5349_v54  ;;  %v5354_v54 = vrot.slane %v5352_v42, 4  ;;  %v15143_v10 = vcombine.low %v4173_v39, %v4176_v50  ;;  %v16714_v11 = vpop.f32.mrb[47].mxu0  ;;  %v5373_v17 = vrot.slane %v5371_v60, 5  ;;  %v15089_v39 = vld [vmem:[%s19527_s27 + $0x48] sm:$0xe] }
 0x170   : > { %17965 = vmatmul.mubr.bf16.vlgmr.msra.gmra.mrb[16].mxu1 %v15142_v13  ;;  %v15253_v34 = vcombine.low %v5340_v55, %v5350_v26  ;;  %v5357_v13 = vrot.slane %v5355_v41, 5  ;;  %v5363_v55 = vrot.slane %v5361_v47, 5  ;;  %v20599_v26 = vadd.f32 %v16714_v11, %v16713_v3  ;;  %v15091_v42 = vld [vmem:[%s19527_s27 + $0x50] sm:$0x1]  ;;  %v5118_v46 = vld [vmem:[%s20303_s30 + $0x7c] sm:$0xf] }
 0x171   : > { %17997 = vmatpush3.bf16.msra.mxu1 %v19077_v53  ;;  %v5367_v53 = vrot.slane %v5365_v52, 4  ;;  %17968 = vmatprep.mubr.bf16.mxu1 %v15143_v10  ;;  %v4180_v27 = vsel %vm19670_vm5, %v15128_v63, %v4179_v18  ;;  %v15129_v45 = vrot.slane %v15089_v39, 9  ;;  %v19078_v41 = vld [vmem:[%s20303_s30 + $0x6c] sm:$0xff]   ;;  %v4186_v47 = vrot.slane %v15090_v40, 5  ;;  %v5119_v50 = vld [vmem:[%s20303_s30 + $0x80] sm:$0x1] }
 0x172   : > { %17998 = vmatprep.subr.bf16.mxu1 %v19079_v4  ;;  %6224 = vmatprep.mubr.bf16.mxu0 %v15253_v34  ;;  %v5358_v32 = vor.u32 %v5357_v13, %v5354_v54  ;;  %v4189_v52 = vrot.slane %v15091_v42, 5  ;;  %v15092_v13 = vld [vmem:[%s19527_s27 + $0x54] sm:$0xe]  ;;  %v15094_v11 = vld [vmem:[%s19527_s27 + $0x5c] sm:$0x1]  ;;  %v19081_v39 = vld [vmem:[%s23359_s3 + $0x368] sm:$0xff]  }
 0x173   : > { %6225 = vmatmul.mubr.bf16.gmra.mrb[144].mxu0 %v19074_v14  ;;  %v5368_v19 = vor.u32 %v5367_v53, %v5363_v55  ;;  %v4181_v14 = vrot.slane %v4179_v18, 4  ;;  %v4187_v10 = vsel %vm19670_vm5, %v15129_v45, %v4186_v47  ;;  %v15093_v53 = vld [vmem:[%s19527_s27 + $0x58] sm:$0xf]  ;;  %v5395_v40 = vshll.u32 %v5119_v50, 16  ;;  %17182 = vmatprep.subr.bf16.mxu0 %v19081_v39 }
 0x174   : > { %v5359_v33 = vrot.slane %v5358_v32, 4  ;;  %v4188_v32 = vrot.slane %v4186_v47, 4  ;;  %v4193_v45 = vrot.slane %v15093_v53, 5 }
 0x175   : > { %17999 = vmatpush3.bf16.msra.mxu1 %v19079_v4  ;;  %v5369_v34 = vrot.slane %v5368_v19, 4  ;;  %v5117_v4 = vld [vmem:[%s20303_s30 + $0x78] sm:$0xf]  ;;  %v4183_v48 = vsel %vm19670_vm5, %v4181_v14, %v4182_v8  ;;  %v5389_v14 = vshrl.u32 %v5118_v46, 16 }
 0x176   : > { %v5376_v54 = vshrl.u32 %v5117_v4, 16  ;;  %v5379_v60 = vshll.u32 %v5117_v4, 16  ;;  %v5364_v62 = vsel %vm19552_vm2, %v5359_v33, %v5363_v55  ;;  %v15144_v3 = vcombine.low %v4180_v27, %v4183_v48 }
 0x177   : > { %v5374_v63 = vsel %vm19552_vm2, %v5369_v34, %v5373_v17  ;;  %v5385_v55 = vshll.u32 %v5118_v46, 16  ;;  %v15130_v17 = vrot.slane %v15092_v13, 9  ;;  %v4190_v27 = vsel %vm19670_vm5, %v4188_v32, %v4189_v52  ;;  %v16780_v52 = vpop.f32.mrb[48].mxu1 }
 0x178   : > { %v15254_v18 = vcombine.low %v5364_v62, %v5374_v63  ;;  %v5378_v8 = vrot.slane %v5376_v54, 4  ;;  %v5381_v19 = vrot.slane %v5379_v60, 5  ;;  %17969 = vmatmul.mubr.bf16.gmra.mrb[20].mxu1 %v15144_v3  ;;  %v4196_v33 = vrot.slane %v15094_v11, 5  ;;  %v19082_v54 = vld [vmem:[%s23359_s3 + $0x328] sm:$0xff]   ;;  %v16916_v62 = vpop.f32.mrb[48].mxu0  ;;  %v19083_v11 = vld [vmem:[%s23359_s3 + $0x2d0] sm:$0xff]  }
 0x179   : > { %v15145_v34 = vcombine.low %v4187_v10, %v4190_v27  ;;  %v5387_v47 = vrot.slane %v5385_v55, 5  ;;  %v5391_v4 = vrot.slane %v5389_v14, 4  ;;  %v5397_v48 = vrot.slane %v5395_v40, 5  ;;  %17183 = vmatpush3.bf16.msra.mxu0 %v19082_v54  ;;  %v16917_v3 = vpop.f32.mrb[49].mxu0  ;;  %v19080_v14 = vld [vmem:[%s20303_s30 + $0x78] sm:$0xff]   ;;  %18000 = vmatprep.subr.bf16.mxu1 %v19083_v11 }
 0x17a   : > { %6232 = vmatprep.mubr.bf16.mxu0 %v15254_v18  ;;  %v5382_v42 = vor.u32 %v5381_v19, %v5378_v8  ;;  %v4194_v50 = vsel %vm19670_vm5, %v15130_v17, %v4193_v45  ;;  %v4195_v60 = vrot.slane %v4193_v45, 4  ;;  %v16918_v53 = vadd.f32 %v16917_v3, %v16916_v62  ;;  %v16919_v32 = vpop.f32.mrb[50].mxu0  ;;  %v15095_v8 = vld [vmem:[%s19527_s27 + $0x60] sm:$0xe]  ;;  %v15096_v27 = vld [vmem:[%s19527_s27 + $0x64] sm:$0xf]  ;;  %18001 = vmatpush3.bf16.msra.mxu1 %v19083_v11 }
 0x17b   : > { %6233 = vmatmul.mubr.bf16.gmra.mrb[148].mxu0 %v19078_v41  ;;  %17972 = vmatprep.mubr.bf16.mxu1 %v15145_v34  ;;  %v5392_v63 = vor.u32 %v5391_v4, %v5387_v47  ;;  %v16781_v41 = vpop.f32.mrb[49].mxu1  ;;  %v16920_v17 = vpop.f32.mrb[51].mxu0  ;;  %v15097_v4 = vld [vmem:[%s19527_s27 + $0x68] sm:$0x1]  ;;  %v4200_v54 = vrot.slane %v15096_v27, 5 }
 0x17c   : > { %v5383_v46 = vrot.slane %v5382_v42, 4  ;;  %v4197_v10 = vsel %vm19670_vm5, %v4195_v60, %v4196_v33  ;;  %v16782_v13 = vadd.f32 %v16781_v41, %v16780_v52  ;;  %v16783_v18 = vpop.f32.mrb[50].mxu1  ;;  %v15131_v42 = vrot.slane %v15095_v8, 9  ;;  %v5121_v52 = vld [vmem:[%s20303_s30 + $0x88] sm:$0xf]  ;;  %v16922_v27 = vpop.f32.mrb[52].mxu0 }
 0x17d   : > { %v5393_v39 = vrot.slane %v5392_v63, 4  ;;  %v15146_v55 = vcombine.low %v4194_v50, %v4197_v10  ;;  %v16784_v40 = vpop.f32.mrb[51].mxu1  ;;  %v16921_v34 = vadd.f32 %v16920_v17, %v16919_v32  ;;  %v4203_v60 = vrot.slane %v15097_v4, 5  ;;  %v5122_v62 = vld [vmem:[%s20303_s30 + $0x8c] sm:$0x1]  ;;  %v16923_v4 = vpop.f32.mrb[53].mxu0 }
 0x17e   : > { %v5388_v19 = vsel %vm19552_vm2, %v5383_v46, %v5387_v47  ;;  %v18309_v45 = vadd.f32 %v16782_v13, %v20192_v58  ;;  %v16785_v33 = vadd.f32 %v16784_v40, %v16783_v18  ;;  %v5120_v47 = vld [vmem:[%s20303_s30 + $0x84] sm:$0xf]  ;;  %v16786_v46 = vpop.f32.mrb[52].mxu1  ;;  %v4201_v10 = vsel %vm19670_vm5, %v15131_v42, %v4200_v54  ;;  %v15098_v13 = vld [vmem:[%s19527_s27 + $0x6c] sm:$0xe] }
 0x17f   : > { %v5398_v50 = vsel %vm19552_vm2, %v5393_v39, %v5397_v48  ;;  %v5400_v63 = vshrl.u32 %v5120_v47, 16  ;;  %v15099_v18 = vld [vmem:[%s19527_s27 + $0x70] sm:$0xf]  ;;  %v15100_v32 = vld [vmem:[%s19527_s27 + $0x74] sm:$0x1]  ;;  %v4202_v8 = vrot.slane %v4200_v54, 4 }
 0x180   : > { %17973 = vmatmul.mubr.bf16.gmra.mrb[24].mxu1 %v15146_v55  ;;  %v15255_v41 = vcombine.low %v5388_v19, %v5398_v50  ;;  %v20648_v58 = vadd.f32 %v18309_v45, %v16918_v53  ;;  %v18327_v3 = vadd.f32 %v16785_v33, %v20194_v59  ;;  %v5403_v48 = vshll.u32 %v5120_v47, 16  ;;  %v16787_v33 = vpop.f32.mrb[53].mxu1  ;;  %v19085_v54 = vld [vmem:[%s23359_s3 + $0x2d8] sm:$0xff]  }
 0x181   : > { %v5402_v40 = vrot.slane %v5400_v63, 4  ;;  %v5409_v39 = vshll.u32 %v5121_v52, 16  ;;  %v5413_v17 = vshrl.u32 %v5121_v52, 16  ;;  %v5419_v19 = vshll.u32 %v5122_v62, 16  ;;  %v16789_v62 = vpop.f32.mrb[54].mxu1  ;;  %18002 = vmatprep.subr.bf16.mxu1 %v19085_v54 }
 0x182   : > { %6240 = vmatprep.mubr.bf16.mxu0 %v15255_v41  ;;  %v20656_v55 = vadd.f32 %v18327_v3, %v16921_v34  ;;  %v15132_v53 = vrot.slane %v15098_v13, 9  ;;  %v4204_v59 = vsel %vm19670_vm5, %v4202_v8, %v4203_v60  ;;  %v5405_v11 = vrot.slane %v5403_v48, 5  ;;  %v16925_v3 = vpop.f32.mrb[54].mxu0  ;;  %v16790_v13 = vpop.f32.mrb[55].mxu1  ;;  %18003 = vmatpush3.bf16.msra.mxu1 %v19085_v54  ;;  %v15101_v48 = vld [vmem:[%s19527_s27 + $0x78] sm:$0xe] }
 0x183   : > { %6241 = vmatmul.mubr.bf16.gmra.mrb[152].mxu0 %v19080_v14  ;;  %v5411_v42 = vrot.slane %v5409_v39, 5  ;;  %v4207_v45 = vrot.slane %v15099_v18, 5  ;;  %v15147_v47 = vcombine.low %v4201_v10, %v4204_v59  ;;  %v5415_v34 = vrot.slane %v5413_v17, 4  ;;  %v5123_v59 = vld [vmem:[%s20303_s30 + $0x90] sm:$0xf] }
 0x184   : > { %v5421_v50 = vrot.slane %v5419_v19, 5  ;;  %v4210_v52 = vrot.slane %v15100_v32, 5  ;;  %v5406_v14 = vor.u32 %v5405_v11, %v5402_v40  ;;  %v16788_v41 = vadd.f32 %v16787_v33, %v16786_v46  ;;  %v16926_v32 = vpop.f32.mrb[55].mxu0  ;;  %v15102_v40 = vld [vmem:[%s19527_s27 + $0x7c] sm:$0xf]  ;;  %v19087_v46 = vld [vmem:[%s23359_s3 + $0x370] sm:$0xff]  }
 0x185   : > { %v4208_v60 = vsel %vm19670_vm5, %v15132_v53, %v4207_v45  ;;  %v4209_v63 = vrot.slane %v4207_v45, 4  ;;  %17976 = vmatprep.mubr.bf16.mxu1 %v15147_v47  ;;  %v5416_v18 = vor.u32 %v5415_v34, %v5411_v42  ;;  %v16924_v10 = vadd.f32 %v16923_v4, %v16922_v27  ;;  %v15103_v27 = vld [vmem:[%s19527_s27 + $0x80] sm:$0x1]  ;;  %v19088_v11 = vld [vmem:[%s23359_s3 + $0x330] sm:$0xff]   ;;  %v19084_v4 = vld [vmem:[%s20303_s30 + $0x84] sm:$0xff]   ;;  %17184 = vmatprep.subr.bf16.mxu0 %v19087_v46 }
 0x186   : > { %v16791_v8 = vadd.f32 %v16790_v13, %v16789_v62  ;;  %v5407_v39 = vrot.slane %v5406_v14, 4  ;;  %v18300_v19 = vadd.f32 %v16788_v41, %v20234_v29  ;;  %v16927_v53 = vadd.f32 %v16926_v32, %v16925_v3  ;;  %v5124_v34 = vld [vmem:[%s20303_s30 + $0x94] sm:$0xf]  ;;  %v15104_v41 = vld [vmem:[%s19527_s27 + $0x84] sm:$0xe]  ;;  %17185 = vmatpush3.bf16.msra.mxu0 %v19088_v11  ;;  %v16792_v11 = vpop.f32.mrb[56].mxu1 }
 0x187   : > { %v4211_v17 = vsel %vm19670_vm5, %v4209_v63, %v4210_v52  ;;  %v5417_v45 = vrot.slane %v5416_v18, 4  ;;  %v15133_v47 = vrot.slane %v15101_v48, 9  ;;  %v5125_v52 = vld [vmem:[%s20303_s30 + $0x98] sm:$0x1]  ;;  %v4214_v14 = vrot.slane %v15102_v40, 5 }
 0x188   : > { %v15148_v33 = vcombine.low %v4208_v60, %v4211_v17  ;;  %v18318_v54 = vadd.f32 %v16791_v8, %v20259_v23  ;;  %v5412_v29 = vsel %vm19552_vm2, %v5407_v39, %v5411_v42  ;;  %v20684_v62 = vadd.f32 %v18300_v19, %v16924_v10  ;;  %v15105_v3 = vld [vmem:[%s19527_s27 + $0x88] sm:$0xf]  ;;  %v15106_v8 = vld [vmem:[%s19527_s27 + $0x8c] sm:$0x1] }
 0x189   : > { %v4217_v63 = vrot.slane %v15103_v27, 5  ;;  %v5422_v60 = vsel %vm19552_vm2, %v5417_v45, %v5421_v50  ;;  %v5424_v13 = vshrl.u32 %v5123_v59, 16  ;;  %v5427_v18 = vshll.u32 %v5123_v59, 16 }
 0x18a   : > { %17977 = vmatmul.mubr.bf16.gmra.mrb[28].mxu1 %v15148_v33  ;;  %v20690_v23 = vadd.f32 %v18318_v54, %v16927_v53  ;;  %v15256_v32 = vcombine.low %v5412_v29, %v5422_v60  ;;  %v4215_v42 = vsel %vm19670_vm5, %v15133_v47, %v4214_v14  ;;  %v4216_v10 = vrot.slane %v4214_v14, 4  ;;  %v16928_v54 = vpop.f32.mrb[56].mxu0  ;;  %v16793_v47 = vpop.f32.mrb[57].mxu1 }
 0x18b   : > { %v5433_v48 = vshll.u32 %v5124_v34, 16  ;;  %v5426_v40 = vrot.slane %v5424_v13, 4  ;;  %v5429_v46 = vrot.slane %v5427_v18, 5  ;;  %v5437_v39 = vshrl.u32 %v5124_v34, 16  ;;  %v16929_v60 = vpop.f32.mrb[57].mxu0  ;;  %v16795_v18 = vpop.f32.mrb[58].mxu1 }
 0x18c   : > { %v5443_v17 = vshll.u32 %v5125_v52, 16  ;;  %6248 = vmatprep.mubr.bf16.mxu0 %v15256_v32  ;;  %v4218_v50 = vsel %vm19670_vm5, %v4216_v10, %v4217_v63  ;;  %v15134_v53 = vrot.slane %v15104_v41, 9  ;;  %v4221_v27 = vrot.slane %v15105_v3, 5  ;;  %v19089_v63 = vld [vmem:[%s23359_s3 + $0x2e0] sm:$0xff]   ;;  %v16931_v32 = vpop.f32.mrb[58].mxu0  ;;  %v16796_v10 = vpop.f32.mrb[59].mxu1 }
 0x18d   : > { %v5435_v19 = vrot.slane %v5433_v48, 5  ;;  %6249 = vmatmul.mubr.bf16.gmra.mrb[156].mxu0 %v19084_v4  ;;  %v15149_v59 = vcombine.low %v4215_v42, %v4218_v50  ;;  %v5430_v45 = vor.u32 %v5429_v46, %v5426_v40  ;;  %v5439_v33 = vrot.slane %v5437_v39, 4  ;;  %18004 = vmatprep.subr.bf16.mxu1 %v19089_v63  ;;  %v16932_v48 = vpop.f32.mrb[59].mxu0  ;;  %v15107_v40 = vld [vmem:[%s19527_s27 + $0x90] sm:$0xe] }
 0x18e   : > { %v4222_v29 = vsel %vm19670_vm5, %v15134_v53, %v4221_v27  ;;  %v4223_v14 = vrot.slane %v4221_v27, 4  ;;  %v4224_v34 = vrot.slane %v15106_v8, 5  ;;  %v16794_v52 = vadd.f32 %v16793_v47, %v16792_v11  ;;  %v15108_v46 = vld [vmem:[%s19527_s27 + $0x94] sm:$0xf]  ;;  %18005 = vmatpush3.bf16.msra.mxu1 %v19089_v63  ;;  %v15109_v11 = vld [vmem:[%s19527_s27 + $0x98] sm:$0x1] }
 0x18f   : > { %17980 = vmatprep.mubr.bf16.mxu1 %v15149_v59  ;;  %v5431_v4 = vrot.slane %v5430_v45, 4  ;;  %v5440_v41 = vor.u32 %v5439_v33, %v5435_v19  ;;  %v5445_v3 = vrot.slane %v5443_v17, 5  ;;  %v16930_v13 = vadd.f32 %v16929_v60, %v16928_v54  ;;  %v19086_v53 = vld [vmem:[%s20303_s30 + $0x90] sm:$0xff]   ;;  %v5126_v59 = vld [vmem:[%s20303_s30 + $0x9c] sm:$0xf] }
 0x190   : > { %v4225_v8 = vsel %vm19670_vm5, %v4223_v14, %v4224_v34  ;;  %v18345_v42 = vadd.f32 %v16794_v52, %v20297_v1  ;;  %v16797_v27 = vadd.f32 %v16796_v10, %v16795_v18  ;;  %v16798_v1 = vpop.f32.mrb[60].mxu1  ;;  %v16933_v33 = vadd.f32 %v16932_v48, %v16931_v32  ;;  %v5127_v14 = vld [vmem:[%s20303_s30 + $0xa0] sm:$0xf]  ;;  %v5128_v34 = vld [vmem:[%s20303_s30 + $0xa4] sm:$0x1] }
 0x191   : > { %v5436_v39 = vsel %vm19552_vm2, %v5431_v4, %v5435_v19  ;;  %v5441_v17 = vrot.slane %v5440_v41, 4  ;;  %v15150_v50 = vcombine.low %v4222_v29, %v4225_v8  ;;  %v15135_v54 = vrot.slane %v15107_v40, 9  ;;  %v15110_v63 = vld [vmem:[%s19527_s27 + $0x9c] sm:$0xe]  ;;  %v15111_v4 = vld [vmem:[%s19527_s27 + $0xa0] sm:$0xf] }
 0x192   : > { %v20712_v45 = vadd.f32 %v18345_v42, %v16930_v13  ;;  %v4228_v47 = vrot.slane %v15108_v46, 5  ;;  %v18363_v29 = vadd.f32 %v16797_v27, %v20312_v15  ;;  %v4231_v52 = vrot.slane %v15109_v11, 5  ;;  %v15112_v8 = vld [vmem:[%s19527_s27 + $0xa4] sm:$0x1]  ;;  %v19091_v11 = vld [vmem:[%s23359_s3 + $0x2e8] sm:$0xff]  }
 0x193   : > { %v5446_v19 = vsel %vm19552_vm2, %v5441_v17, %v5445_v3  ;;  %17981 = vmatmul.mubr.bf16.gmra.mrb[32].mxu1 %v15150_v50  ;;  %v5448_v60 = vshrl.u32 %v5126_v59, 16  ;;  %v5451_v32 = vshll.u32 %v5126_v59, 16  ;;  %v5457_v48 = vshll.u32 %v5127_v14, 16  ;;  %v16934_v3 = vpop.f32.mrb[60].mxu0  ;;  %18006 = vmatprep.subr.bf16.mxu1 %v19091_v11 }
 0x194   : > { %v15257_v41 = vcombine.low %v5436_v39, %v5446_v19  ;;  %v4229_v13 = vsel %vm19670_vm5, %v15135_v54, %v4228_v47  ;;  %v4230_v18 = vrot.slane %v4228_v47, 4  ;;  %v20724_v42 = vadd.f32 %v18363_v29, %v16933_v33  ;;  %v16799_v39 = vpop.f32.mrb[61].mxu1  ;;  %v16935_v27 = vpop.f32.mrb[61].mxu0  ;;  %18007 = vmatpush3.bf16.msra.mxu1 %v19091_v11  ;;  %v5130_v11 = vld [vmem:[%s20303_s30 + $0xac] sm:$0xf] }
 0x195   : > { %v5450_v10 = vrot.slane %v5448_v60, 4  ;;  %v5461_v40 = vshrl.u32 %v5127_v14, 16  ;;  %v5453_v46 = vrot.slane %v5451_v32, 5  ;;  %v5467_v17 = vshll.u32 %v5128_v34, 16  ;;  %v16801_v14 = vpop.f32.mrb[62].mxu1  ;;  %v16937_v34 = vpop.f32.mrb[62].mxu0 }
 0x196   : > { %6256 = vmatprep.mubr.bf16.mxu0 %v15257_v41  ;;  %v4232_v15 = vsel %vm19670_vm5, %v4230_v18, %v4231_v52  ;;  %v15136_v50 = vrot.slane %v15110_v63, 9  ;;  %v5459_v33 = vrot.slane %v5457_v48, 5  ;;  %v4235_v47 = vrot.slane %v15111_v4, 5  ;;  %v16802_v63 = vpop.f32.mrb[63].mxu1  ;;  %v16938_v18 = vpop.f32.mrb[63].mxu0 }
 0x197   : > { %6257 = vmatmul.mubr.bf16.gmra.mrb[160].mxu0 %v19086_v53  ;;  %v15151_v59 = vcombine.low %v4229_v13, %v4232_v15  ;;  %v5463_v54 = vrot.slane %v5461_v40, 4  ;;  %v5454_v19 = vor.u32 %v5453_v46, %v5450_v10  ;;  %v5469_v29 = vrot.slane %v5467_v17, 5  ;;  %v15113_v32 = vld [vmem:[%s19527_s27 + $0xa8] sm:$0xe]  ;;  %v15114_v10 = vld [vmem:[%s19527_s27 + $0xac] sm:$0xf] }
 0x198   : > { %v4238_v52 = vrot.slane %v15112_v8, 5  ;;  %v16800_v60 = vadd.f32 %v16799_v39, %v16798_v1  ;;  %v4236_v53 = vsel %vm19670_vm5, %v15136_v50, %v4235_v47  ;;  %v4237_v13 = vrot.slane %v4235_v47, 4  ;;  %v15115_v15 = vld [vmem:[%s19527_s27 + $0xb0] sm:$0x1]  ;;  %v5129_v46 = vld [vmem:[%s20303_s30 + $0xa8] sm:$0xf] }
 0x199   : > { %17984 = vmatprep.mubr.bf16.mxu1 %v15151_v59  ;;  %v5464_v41 = vor.u32 %v5463_v54, %v5459_v33  ;;  %v16936_v4 = vadd.f32 %v16935_v27, %v16934_v3  ;;  %v5455_v8 = vrot.slane %v5454_v19, 4  ;;  %v16803_v48 = vadd.f32 %v16802_v63, %v16801_v14  ;;  %v19090_v3 = vld [vmem:[%s20303_s30 + $0x9c] sm:$0xff]   ;;  %v5131_v19 = vld [vmem:[%s20303_s30 + $0xb0] sm:$0x1] }
 0x19a   : > { %v18336_v1 = vadd.f32 %v16800_v60, %v20337_v20  ;;  %v16939_v40 = vadd.f32 %v16938_v18, %v16937_v34  ;;  %v4239_v50 = vsel %vm19670_vm5, %v4237_v13, %v4238_v52  ;;  %v15137_v39 = vrot.slane %v15113_v32, 9  ;;  %v19093_v20 = vld [vmem:[%s23359_s3 + $0x378] sm:$0xff]   ;;  %v15116_v60 = vld [vmem:[%s19527_s27 + $0xb4] sm:$0xe] }
 0x19b   : > { %v5465_v17 = vrot.slane %v5464_v41, 4  ;;  %v4242_v27 = vrot.slane %v15114_v10, 5  ;;  %v5460_v59 = vsel %vm19552_vm2, %v5455_v8, %v5459_v33  ;;  %v15152_v54 = vcombine.low %v4236_v53, %v4239_v50  ;;  %v15117_v52 = vld [vmem:[%s19527_s27 + $0xb8] sm:$0xf]  ;;  %v15118_v18 = vld [vmem:[%s19527_s27 + $0xbc] sm:$0x1]  ;;  %17186 = vmatprep.subr.bf16.mxu0 %v19093_v20 }
 0x19c   : > { %v20747_v47 = vadd.f32 %v18336_v1, %v16936_v4  ;;  %v18354_v14 = vadd.f32 %v16803_v48, %v20349_v38  ;;  %v4245_v13 = vrot.slane %v15115_v15, 5  ;;  %v5472_v53 = vshrl.u32 %v5129_v46, 16 }
 0x19d   : > { %v5470_v34 = vsel %vm19552_vm2, %v5465_v17, %v5469_v29  ;;  %v4243_v63 = vsel %vm19670_vm5, %v15137_v39, %v4242_v27  ;;  %v4244_v41 = vrot.slane %v4242_v27, 4  ;;  %17985 = vmatmul.mubr.bf16.gmra.mrb[36].mxu1 %v15152_v54  ;;  %v5475_v4 = vshll.u32 %v5129_v46, 16  ;;  %v19094_v29 = vld [vmem:[%s23359_s3 + $0x338] sm:$0xff]   ;;  %v16804_v39 = vpop.f32.mrb[64].mxu1 }
 0x19e   : > { %v15258_v32 = vcombine.low %v5460_v59, %v5470_v34  ;;  %v20758_v33 = vadd.f32 %v18354_v14, %v16939_v40  ;;  %v5481_v10 = vshll.u32 %v5130_v11, 16  ;;  %v5485_v8 = vshrl.u32 %v5130_v11, 16  ;;  %17187 = vmatpush3.bf16.msra.mxu0 %v19094_v29  ;;  %v16940_v11 = vpop.f32.mrb[64].mxu0  ;;  %v16805_v14 = vpop.f32.mrb[65].mxu1 }
 0x19f   : > { %v4246_v38 = vsel %vm19670_vm5, %v4244_v41, %v4245_v13  ;;  %v5491_v1 = vshll.u32 %v5131_v19, 16  ;;  %v5474_v15 = vrot.slane %v5472_v53, 4  ;;  %v5477_v17 = vrot.slane %v5475_v4, 5  ;;  %v19095_v19 = vld [vmem:[%s23359_s3 + $0x2f0] sm:$0xff]   ;;  %v16941_v41 = vpop.f32.mrb[65].mxu0 }
 0x1a0   : > { %6264 = vmatprep.mubr.bf16.mxu0 %v15258_v32  ;;  %v15153_v48 = vcombine.low %v4243_v63, %v4246_v38  ;;  %v15138_v50 = vrot.slane %v15116_v60, 9  ;;  %v5483_v40 = vrot.slane %v5481_v10, 5  ;;  %v5487_v27 = vrot.slane %v5485_v8, 4  ;;  %18008 = vmatprep.subr.bf16.mxu1 %v19095_v19  ;;  %v16943_v32 = vpop.f32.mrb[66].mxu0  ;;  %v15119_v4 = vld [vmem:[%s19527_s27 + $0xc0] sm:$0xe] }
 0x1a1   : > { %6265 = vmatmul.mubr.bf16.gmra.mrb[164].mxu0 %v19090_v3  ;;  %v5493_v46 = vrot.slane %v5491_v1, 5  ;;  %v4249_v20 = vrot.slane %v15117_v52, 5  ;;  %v5478_v59 = vor.u32 %v5477_v17, %v5474_v15  ;;  %v4252_v54 = vrot.slane %v15118_v18, 5  ;;  %v16807_v52 = vpop.f32.mrb[66].mxu1  ;;  %v19097_v38 = vld [vmem:[%s23359_s3 + $0x2f8] sm:$0xff]   ;;  %v19092_v1 = vld [vmem:[%s20303_s30 + $0xa8] sm:$0xff]   ;;  %18009 = vmatpush3.bf16.msra.mxu1 %v19095_v19 }
 0x1a2   : > { %17988 = vmatprep.mubr.bf16.mxu1 %v15153_v48  ;;  %v5488_v34 = vor.u32 %v5487_v27, %v5483_v40  ;;  %v16806_v63 = vadd.f32 %v16805_v14, %v16804_v39  ;;  %v16942_v18 = vadd.f32 %v16941_v41, %v16940_v11  ;;  %v16808_v53 = vpop.f32.mrb[67].mxu1  ;;  %v16944_v15 = vpop.f32.mrb[67].mxu0  ;;  %v15120_v17 = vld [vmem:[%s19527_s27 + $0xc4] sm:$0xf]  ;;  %v5132_v11 = vld [vmem:[%s20303_s30 + $0xb4] sm:$0xf]  ;;  %18010 = vmatprep.subr.bf16.mxu1 %v19097_v38 }
 0x1a3   : > { %v4250_v3 = vsel %vm19670_vm5, %v15138_v50, %v4249_v20  ;;  %v4251_v60 = vrot.slane %v4249_v20, 4  ;;  %v5479_v13 = vrot.slane %v5478_v59, 4  ;;  %v16809_v48 = vadd.f32 %v16808_v53, %v16807_v52  ;;  %v15121_v50 = vld [vmem:[%s19527_s27 + $0xc8] sm:$0x1]  ;;  %v5133_v14 = vld [vmem:[%s20303_s30 + $0xb8] sm:$0xf] }
 0x1a4   : > { %v5489_v10 = vrot.slane %v5488_v34, 4  ;;  %v18381_v29 = vadd.f32 %v16806_v63, %v20373_v21  ;;  %v16945_v20 = vadd.f32 %v16944_v15, %v16943_v32  ;;  %v15139_v59 = vrot.slane %v15119_v4, 9  ;;  %v5134_v63 = vld [vmem:[%s20303_s30 + $0xbc] sm:$0x1]  ;;  %v15122_v41 = vld [vmem:[%s19527_s27 + $0xcc] sm:$0xe] }
 0x1a5   : > { %v4253_v8 = vsel %vm19670_vm5, %v4251_v60, %v4252_v54  ;;  %v5484_v39 = vsel %vm19552_vm2, %v5479_v13, %v5483_v40  ;;  %v16810_v54 = vpop.f32.mrb[68].mxu1  ;;  %v18399_v34 = vadd.f32 %v16809_v48, %v20385_v44  ;;  %v4256_v60 = vrot.slane %v15120_v17, 5  ;;  %v16946_v40 = vpop.f32.mrb[68].mxu0  ;;  %v15123_v53 = vld [vmem:[%s19527_s27 + $0xd0] sm:$0xf]  ;;  %18011 = vmatpush3.bf16.msra.mxu1 %v19097_v38 }
 0x1a6   : > { %v15154_v27 = vcombine.low %v4250_v3, %v4253_v8  ;;  %v5494_v21 = vsel %vm19552_vm2, %v5489_v10, %v5493_v46  ;;  %v20786_v19 = vadd.f32 %v18381_v29, %v16942_v18  ;;  %v4259_v52 = vrot.slane %v15121_v50, 5  ;;  %v16811_v4 = vpop.f32.mrb[69].mxu1  ;;  %v15124_v44 = vld [vmem:[%s19527_s27 + $0xd4] sm:$0x1]  ;;  %s23304_s27 = scalar_lea.sflag [#allocation4], %s341_s20 }
 0x1a7   : > { %v15259_v3 = vcombine.low %v5484_v39, %v5494_v21  ;;  %v5496_v13 = vshrl.u32 %v5132_v11, 16  ;;  %v5499_v32 = vshll.u32 %v5132_v11, 16  ;;  %v20792_v8 = vadd.f32 %v18399_v34, %v16945_v20  ;;  %v16947_v11 = vpop.f32.mrb[69].mxu0  ;;  %v16813_v38 = vpop.f32.mrb[70].mxu1 }
 0x1a8   : > { %17989 = vmatmul.mubr.bf16.gmra.mrb[40].mxu1 %v15154_v27  ;;  %v4257_v46 = vsel %vm19670_vm5, %v15139_v59, %v4256_v60  ;;  %v4258_v18 = vrot.slane %v4256_v60, 4  ;;  %v5505_v10 = vshll.u32 %v5133_v14, 16  ;;  %v5509_v15 = vshrl.u32 %v5133_v14, 16 }
 0x1a9   : > { %6272 = vmatprep.mubr.bf16.mxu0 %v15259_v3  ;;  %v5498_v29 = vrot.slane %v5496_v13, 4  ;;  %v5501_v48 = vrot.slane %v5499_v32, 5  ;;  %v5515_v17 = vshll.u32 %v5134_v63, 16  ;;  %v15140_v27 = vrot.slane %v15122_v41, 9  ;;  %v16949_v3 = vpop.f32.mrb[70].mxu0  ;;  %v16814_v13 = vpop.f32.mrb[71].mxu1 }
 0x1aa   : > { %6273 = vmatmul.mubr.bf16.gmra.mrb[168].mxu0 %v19092_v1  ;;  %v4260_v50 = vsel %vm19670_vm5, %v4258_v18, %v4259_v52  ;;  %v5507_v39 = vrot.slane %v5505_v10, 5  ;;  %v4263_v20 = vrot.slane %v15123_v53, 5  ;;  %v5511_v34 = vrot.slane %v5509_v15, 4  ;;  %v16950_v41 = vpop.f32.mrb[71].mxu0  ;;  %v5599_v32 = vld [vmem:[%s20303_s30] sm:$0xe] }
 0x1ab   : > { %v15155_v21 = vcombine.low %v4257_v46, %v4260_v50  ;;  %v5502_v59 = vor.u32 %v5501_v48, %v5498_v29  ;;  %v5517_v60 = vrot.slane %v5515_v17, 5  ;;  %v4266_v63 = vrot.slane %v15124_v44, 5  ;;  %v5600_v29 = vld [vmem:[%s20303_s30 + $0x4] sm:$0xf]  ;;  %v5601_v48 = vld [vmem:[%s20303_s30 + $0x8] sm:$0x1] }
 0x1ac   : > { %v4264_v14 = vsel %vm19670_vm5, %v15140_v27, %v4263_v20  ;;  %v4265_v1 = vrot.slane %v4263_v20, 4  ;;  %v16812_v52 = vadd.f32 %v16811_v4, %v16810_v54  ;;  %v5512_v46 = vor.u32 %v5511_v34, %v5507_v39  ;;  %v15413_v17 = vld [vmem:[%s20303_s30 + $0xc] sm:$0xf]  ;;  %v15414_v50 = vld [vmem:[%s20303_s30 + $0x10] sm:$0xf]  ;;  %v19099_v27 = vld [vmem:[%s23359_s3 + $0x4c0] sm:$0xff]  }
 0x1ad   : > { %17992 = vmatprep.mubr.bf16.mxu1 %v15155_v21  ;;  %v5503_v53 = vrot.slane %v5502_v59, 4  ;;  %v16948_v18 = vadd.f32 %v16947_v11, %v16946_v40  ;;  %v16815_v10 = vadd.f32 %v16814_v13, %v16813_v38  ;;  %v16951_v54 = vadd.f32 %v16950_v41, %v16949_v3  ;;  %v19096_v21 = vld [vmem:[%s20303_s30 + $0xb4] sm:$0xff]   ;;  %17444 = vmatprep.subr.bf16.mxu0 %v19099_v27  ;;  %v16816_v13 = vpop.f32.mrb[72].mxu1 }
 0x1ae   : > { %v4267_v15 = vsel %vm19670_vm5, %v4265_v1, %v4266_v63  ;;  %v18372_v44 = vadd.f32 %v16812_v52, %v20404_v36  ;;  %v15261_v4 = vrot.slane %v5599_v32, 9  ;;  %v5513_v20 = vrot.slane %v5512_v46, 4  ;;  %v15415_v34 = vld [vmem:[%s20303_s30 + $0x14] sm:$0x1]  ;;  %v5602_v36 = vld [vmem:[%s20303_s30 + $0xc] sm:$0xe] }
 0x1af   : > { %v5508_v40 = vsel %vm19552_vm2, %v5503_v53, %v5507_v39  ;;  %v15156_v11 = vcombine.low %v4264_v14, %v4267_v15  ;;  %v18390_v59 = vadd.f32 %v16815_v10, %v20415_v49  ;;  %v5697_v3 = vrot.slane %v5600_v29, 5  ;;  %v5603_v52 = vld [vmem:[%s20303_s30 + $0x10] sm:$0xf]  ;;  %v5604_v53 = vld [vmem:[%s20303_s30 + $0x14] sm:$0x1] }
 0x1b0   : > { %v20818_v38 = vadd.f32 %v18372_v44, %v16948_v18  ;;  %v5700_v1 = vrot.slane %v5601_v48, 5  ;;  %v6676_v63 = vshrl.u32 %v15413_v17, 16  ;;  %v5518_v41 = vsel %vm19552_vm2, %v5513_v20, %v5517_v60 }
 0x1b1   : > { %17993 = vmatmul.mubr.bf16.gmra.mrb[44].mxu1 %v15156_v11  ;;  %v20823_v39 = vadd.f32 %v18390_v59, %v16951_v54  ;;  %v6679_v14 = vshll.u32 %v15413_v17, 16  ;;  %v6685_v32 = vshll.u32 %v15414_v50, 16  ;;  %v15260_v49 = vcombine.low %v5508_v40, %v5518_v41  ;;  %v16952_v17 = vpop.f32.mrb[72].mxu0 }
 0x1b2   : > { %v5698_v46 = vsel %vm19670_vm5, %v15261_v4, %v5697_v3  ;;  %v5699_v18 = vrot.slane %v5697_v3, 4  ;;  %v6678_v10 = vrot.slane %v6676_v63, 4  ;;  %v6689_v15 = vshrl.u32 %v15414_v50, 16  ;;  %v16817_v4 = vpop.f32.mrb[73].mxu1  ;;  %v16953_v3 = vpop.f32.mrb[73].mxu0 }
 0x1b3   : > { %v6681_v29 = vrot.slane %v6679_v14, 5  ;;  %v6687_v48 = vrot.slane %v6685_v32, 5  ;;  %v6695_v44 = vshll.u32 %v15415_v34, 16  ;;  %6280 = vmatprep.mubr.bf16.mxu0 %v15260_v49  ;;  %v15262_v27 = vrot.slane %v5602_v36, 9  ;;  %v19101_v36 = vld [vmem:[%s23359_s3 + $0x380] sm:$0xff]   ;;  %v16819_v14 = vpop.f32.mrb[74].mxu1 }
 0x1b4   : > { %v5701_v60 = vsel %vm19670_vm5, %v5699_v18, %v5700_v1  ;;  %v5704_v54 = vrot.slane %v5603_v52, 5  ;;  %v5707_v20 = vrot.slane %v5604_v53, 5  ;;  %6281 = vmatmul.mubr.bf16.gmra.mrb[172].mxu0 %v19096_v21  ;;  %v6691_v59 = vrot.slane %v6689_v15, 4  ;;  %v16955_v32 = vpop.f32.mrb[74].mxu0  ;;  %v5605_v53 = vld [vmem:[%s20303_s30 + $0x18] sm:$0xe]  ;;  %18044 = vmatprep.subr.bf16.mxu1 %v19101_v36 }
 0x1b5   : > { %v15277_v11 = vcombine.low %v5698_v46, %v5701_v60  ;;  %v6682_v40 = vor.u32 %v6681_v29, %v6678_v10  ;;  %v16818_v34 = vadd.f32 %v16817_v4, %v16816_v13  ;;  %v16954_v41 = vadd.f32 %v16953_v3, %v16952_v17  ;;  %v16820_v46 = vpop.f32.mrb[75].mxu1  ;;  %v16956_v18 = vpop.f32.mrb[75].mxu0  ;;  %v5606_v10 = vld [vmem:[%s20303_s30 + $0x1c] sm:$0xf]  ;;  %v5607_v29 = vld [vmem:[%s20303_s30 + $0x20] sm:$0x1] }
 0x1b6   : > { %v5705_v63 = vsel %vm19670_vm5, %v15262_v27, %v5704_v54  ;;  %v5706_v50 = vrot.slane %v5704_v54, 4  ;;  %v6692_v1 = vor.u32 %v6691_v59, %v6687_v48  ;;  %v6697_v52 = vrot.slane %v6695_v44, 5  ;;  %v19098_v27 = vld [vmem:[%s20303_s30 + $0xc] sm:$0xff]   ;;  %v15416_v17 = vld [vmem:[%s20303_s30 + $0x18] sm:$0xf] }
 0x1b7   : > { %18012 = vmatprep.mubr.bf16.mxu1 %v15277_v11  ;;  %v6683_v21 = vrot.slane %v6682_v40, 4  ;;  %v18417_v13 = vadd.f32 %v16818_v34, %v20445_v51  ;;  %v16821_v54 = vadd.f32 %v16820_v46, %v16819_v14  ;;  %v16822_v11 = vpop.f32.mrb[76].mxu1  ;;  %v19100_v51 = vld [vmem:[%s23359_s3 + $0x480] sm:$0xff]   ;;  %v16957_v59 = vadd.f32 %v16956_v18, %v16955_v32  ;;  %v5609_v14 = vld [vmem:[%s20303_s30 + $0x28] sm:$0xf] }
 0x1b8   : > { %v5708_v49 = vsel %vm19670_vm5, %v5706_v50, %v5707_v20  ;;  %v6693_v44 = vrot.slane %v6692_v1, 4  ;;  %v15417_v20 = vld [vmem:[%s20303_s30 + $0x1c] sm:$0xf]  ;;  %v15263_v4 = vrot.slane %v5605_v53, 9  ;;  %v5711_v3 = vrot.slane %v5606_v10, 5 }
 0x1b9   : > { %v6688_v15 = vsel %vm19552_vm2, %v6683_v21, %v6687_v48  ;;  %v15278_v60 = vcombine.low %v5705_v63, %v5708_v49  ;;  %v20849_v40 = vadd.f32 %v18417_v13, %v16954_v41  ;;  %v15418_v50 = vld [vmem:[%s20303_s30 + $0x20] sm:$0x1]  ;;  %v5608_v48 = vld [vmem:[%s20303_s30 + $0x24] sm:$0xe]  ;;  %v18435_v34 = vadd.f32 %v16821_v54, %v20457_v2  ;;  %v5610_v49 = vld [vmem:[%s20303_s30 + $0x2c] sm:$0x1] }
 0x1ba   : > { %v6698_v63 = vsel %vm19552_vm2, %v6693_v44, %v6697_v52  ;;  %v5714_v21 = vrot.slane %v5607_v29, 5  ;;  %v6700_v1 = vshrl.u32 %v15416_v17, 16  ;;  %v5712_v41 = vsel %vm19670_vm5, %v15263_v4, %v5711_v3  ;;  %v16958_v52 = vpop.f32.mrb[76].mxu0  ;;  %v16823_v44 = vpop.f32.mrb[77].mxu1  ;;  %v19103_v2 = vld [vmem:[%s23359_s3 + $0x388] sm:$0xff]  }
 0x1bb   : > { %23379 = vst [vmem:[#allocation10_spill] sm:$0xff] %v20849_v40  ;;  %18013 = vmatmul.mubr.bf16.vlgmr.msra.gmra.mrb[16].mxu1 %v15278_v60  ;;  %v15461_v46 = vcombine.low %v6688_v15, %v6698_v63  ;;  %v5713_v32 = vrot.slane %v5711_v3, 4  ;;  %v6703_v53 = vshll.u32 %v15416_v17, 16  ;;  %v20860_v13 = vadd.f32 %v18435_v34, %v16957_v59  ;;  %v16959_v54 = vpop.f32.mrb[77].mxu0  ;;  %v16825_v3 = vpop.f32.mrb[78].mxu1 }
 0x1bc   : > { %18045 = vmatpush3.bf16.msra.mxu1 %v19101_v36  ;;  %v6702_v18 = vrot.slane %v6700_v1, 4  ;;  %v6709_v10 = vshll.u32 %v15417_v20, 16  ;;  %v6713_v40 = vshrl.u32 %v15417_v20, 16  ;;  %v6719_v15 = vshll.u32 %v15418_v50, 16  ;;  %v16826_v50 = vpop.f32.mrb[79].mxu1 }
 0x1bd   : > { %7700 = vmatprep.mubr.bf16.mxu0 %v15461_v46  ;;  %v5715_v36 = vsel %vm19670_vm5, %v5713_v32, %v5714_v21  ;;  %v6705_v29 = vrot.slane %v6703_v53, 5  ;;  %v15264_v60 = vrot.slane %v5608_v48, 9  ;;  %v5718_v20 = vrot.slane %v5609_v14, 5  ;;  %18046 = vmatprep.subr.bf16.mxu1 %v19103_v2  ;;  %v16961_v21 = vpop.f32.mrb[78].mxu0  ;;  %v5611_v48 = vld [vmem:[%s20303_s30 + $0x30] sm:$0xe] }
 0x1be   : > { %7701 = vmatmul.mubr.bf16.vlgmr.msra.gmra.mrb[176].mxu0 %v19098_v27  ;;  %v15279_v17 = vcombine.low %v5712_v41, %v5715_v36  ;;  %v6711_v59 = vrot.slane %v6709_v10, 5  ;;  %v6715_v4 = vrot.slane %v6713_v40, 4  ;;  %v6721_v34 = vrot.slane %v6719_v15, 5  ;;  %v5612_v32 = vld [vmem:[%s20303_s30 + $0x34] sm:$0xf] }
 0x1bf   : > { %17445 = vmatpush3.bf16.msra.mxu0 %v19100_v51  ;;  %v6706_v63 = vor.u32 %v6705_v29, %v6702_v18  ;;  %v5721_v1 = vrot.slane %v5610_v49, 5  ;;  %v16824_v46 = vadd.f32 %v16823_v44, %v16822_v11  ;;  %v5719_v40 = vsel %vm19670_vm5, %v15264_v60, %v5718_v20  ;;  %v16962_v51 = vpop.f32.mrb[79].mxu0  ;;  %v5613_v10 = vld [vmem:[%s20303_s30 + $0x38] sm:$0x1]  ;;  %v15419_v44 = vld [vmem:[%s20303_s30 + $0x24] sm:$0xf] }
 0x1c0   : > { %18047 = vmatpush3.bf16.msra.mxu1 %v19103_v2  ;;  %18016 = vmatprep.mubr.bf16.mxu1 %v15279_v17  ;;  %v6716_v27 = vor.u32 %v6715_v4, %v6711_v59  ;;  %v5720_v14 = vrot.slane %v5718_v20, 4  ;;  %v16960_v41 = vadd.f32 %v16959_v54, %v16958_v52  ;;  %v16827_v49 = vadd.f32 %v16826_v50, %v16825_v3  ;;  %v19102_v29 = vld [vmem:[%s20303_s30 + $0x18] sm:$0xff]   ;;  %v15420_v60 = vld [vmem:[%s20303_s30 + $0x28] sm:$0xf]  ;;  %v15421_v3 = vld [vmem:[%s20303_s30 + $0x2c] sm:$0x1] }
 0x1c1   : > { %v6707_v53 = vrot.slane %v6706_v63, 4  ;;  %v18408_v11 = vadd.f32 %v16824_v46, %v20471_v56  ;;  %v16963_v18 = vadd.f32 %v16962_v51, %v16961_v21  ;;  %v15265_v15 = vrot.slane %v5611_v48, 9  ;;  %v19105_v56 = vld [vmem:[%s23359_s3 + $0x4c8] sm:$0xff]   ;;  %v5614_v63 = vld [vmem:[%s20303_s30 + $0x3c] sm:$0xe] }
 0x1c2   : > { %v6717_v2 = vrot.slane %v6716_v27, 4  ;;  %v5722_v36 = vsel %vm19670_vm5, %v5720_v14, %v5721_v1  ;;  %v5725_v52 = vrot.slane %v5612_v32, 5  ;;  %v18426_v20 = vadd.f32 %v16827_v49, %v20473_v57  ;;  %v5615_v1 = vld [vmem:[%s20303_s30 + $0x40] sm:$0xf]  ;;  %v5616_v27 = vld [vmem:[%s20303_s30 + $0x44] sm:$0x1]  ;;  %17446 = vmatprep.subr.bf16.mxu0 %v19105_v56 }
 0x1c3   : > { %v6712_v54 = vsel %vm19552_vm2, %v6707_v53, %v6711_v59  ;;  %v15280_v17 = vcombine.low %v5719_v40, %v5722_v36  ;;  %v20883_v4 = vadd.f32 %v18408_v11, %v16960_v41  ;;  %v5728_v48 = vrot.slane %v5613_v10, 5  ;;  %v16828_v36 = vpop.f32.mrb[80].mxu1  ;;  %v16964_v56 = vpop.f32.mrb[80].mxu0 }
 0x1c4   : > { %v6722_v46 = vsel %vm19552_vm2, %v6717_v2, %v6721_v34  ;;  %v5726_v21 = vsel %vm19670_vm5, %v15265_v15, %v5725_v52  ;;  %v5727_v50 = vrot.slane %v5725_v52, 4  ;;  %v20894_v59 = vadd.f32 %v18426_v20, %v16963_v18  ;;  %v19106_v34 = vld [vmem:[%s23359_s3 + $0x488] sm:$0xff]  }
 0x1c5   : > { %v15462_v14 = vcombine.low %v6712_v54, %v6722_v46  ;;  %18017 = vmatmul.mubr.bf16.gmra.mrb[20].mxu1 %v15280_v17  ;;  %v6724_v40 = vshrl.u32 %v15419_v44, 16  ;;  %v6727_v41 = vshll.u32 %v15419_v44, 16  ;;  %v6733_v51 = vshll.u32 %v15420_v60, 16  ;;  %v16829_v54 = vpop.f32.mrb[81].mxu1  ;;  %17447 = vmatpush3.bf16.msra.mxu0 %v19106_v34 }
 0x1c6   : > { %v5729_v57 = vsel %vm19670_vm5, %v5727_v50, %v5728_v48  ;;  %v6737_v32 = vshrl.u32 %v15420_v60, 16  ;;  %v6743_v53 = vshll.u32 %v15421_v3, 16  ;;  %v15266_v2 = vrot.slane %v5614_v63, 9  ;;  %v16965_v3 = vpop.f32.mrb[81].mxu0  ;;  %v16831_v50 = vpop.f32.mrb[82].mxu1 }
 0x1c7   : > { %7708 = vmatprep.mubr.bf16.mxu0 %v15462_v14  ;;  %v15281_v11 = vcombine.low %v5726_v21, %v5729_v57  ;;  %v6726_v49 = vrot.slane %v6724_v40, 4  ;;  %v6729_v10 = vrot.slane %v6727_v41, 5  ;;  %v6735_v18 = vrot.slane %v6733_v51, 5  ;;  %v16967_v48 = vpop.f32.mrb[82].mxu0  ;;  %v16832_v41 = vpop.f32.mrb[83].mxu1 }
 0x1c8   : > { %7709 = vmatmul.mubr.bf16.gmra.mrb[180].mxu0 %v19102_v29  ;;  %v6739_v15 = vrot.slane %v6737_v32, 4  ;;  %v6745_v44 = vrot.slane %v6743_v53, 5  ;;  %v5732_v52 = vrot.slane %v5615_v1, 5  ;;  %v5735_v17 = vrot.slane %v5616_v27, 5  ;;  %v19107_v1 = vld [vmem:[%s23359_s3 + $0x390] sm:$0xff]   ;;  %v16968_v57 = vpop.f32.mrb[83].mxu0 }
 0x1c9   : > { %18020 = vmatprep.mubr.bf16.mxu1 %v15281_v11  ;;  %v6730_v60 = vor.u32 %v6729_v10, %v6726_v49  ;;  %v16830_v20 = vadd.f32 %v16829_v54, %v16828_v36  ;;  %v16966_v21 = vadd.f32 %v16965_v3, %v16964_v56  ;;  %v5617_v27 = vld [vmem:[%s20303_s30 + $0x48] sm:$0xe]  ;;  %v5618_v51 = vld [vmem:[%s20303_s30 + $0x4c] sm:$0xf]  ;;  %18048 = vmatprep.subr.bf16.mxu1 %v19107_v1  ;;  %v15422_v36 = vld [vmem:[%s20303_s30 + $0x30] sm:$0xf] }
 0x1ca   : > { %v6740_v46 = vor.u32 %v6739_v15, %v6735_v18  ;;  %v5733_v63 = vsel %vm19670_vm5, %v15266_v2, %v5732_v52  ;;  %v5734_v29 = vrot.slane %v5732_v52, 4  ;;  %v15267_v32 = vrot.slane %v5617_v27, 9  ;;  %v19104_v11 = vld [vmem:[%s20303_s30 + $0x24] sm:$0xff]   ;;  %v5619_v2 = vld [vmem:[%s20303_s30 + $0x50] sm:$0x1]  ;;  %18049 = vmatpush3.bf16.msra.mxu1 %v19107_v1 }
 0x1cb   : > { %v6731_v14 = vrot.slane %v6730_v60, 4  ;;  %v18453_v40 = vadd.f32 %v16830_v20, %v20504_v0  ;;  %v16833_v49 = vadd.f32 %v16832_v41, %v16831_v50  ;;  %v16969_v10 = vadd.f32 %v16968_v57, %v16967_v48  ;;  %v15423_v54 = vld [vmem:[%s20303_s30 + $0x34] sm:$0xf]  ;;  %v15424_v60 = vld [vmem:[%s20303_s30 + $0x38] sm:$0x1] }
 0x1cc   : > { %v6741_v53 = vrot.slane %v6740_v46, 4  ;;  %v5736_v34 = vsel %vm19670_vm5, %v5734_v29, %v5735_v17  ;;  %v5739_v56 = vrot.slane %v5618_v51, 5  ;;  %v16834_v17 = vpop.f32.mrb[84].mxu1  ;;  %v5742_v46 = vrot.slane %v5619_v2, 5  ;;  %v5620_v50 = vld [vmem:[%s20303_s30 + $0x54] sm:$0xe] }
 0x1cd   : > { %v6736_v0 = vsel %vm19552_vm2, %v6731_v14, %v6735_v18  ;;  %v15282_v15 = vcombine.low %v5733_v63, %v5736_v34  ;;  %v20916_v52 = vadd.f32 %v18453_v40, %v16966_v21  ;;  %v18471_v3 = vadd.f32 %v16833_v49, %v20508_v12  ;;  %v5621_v48 = vld [vmem:[%s20303_s30 + $0x58] sm:$0xf]  ;;  %v5622_v1 = vld [vmem:[%s20303_s30 + $0x5c] sm:$0x1]  ;;  %v16835_v49 = vpop.f32.mrb[85].mxu1 }
 0x1ce   : > { %v6746_v20 = vsel %vm19552_vm2, %v6741_v53, %v6745_v44  ;;  %v6748_v29 = vshrl.u32 %v15422_v36, 16  ;;  %v5740_v18 = vsel %vm19670_vm5, %v15267_v32, %v5739_v56  ;;  %v5741_v63 = vrot.slane %v5739_v56, 4  ;;  %v16970_v44 = vpop.f32.mrb[84].mxu0  ;;  %v19109_v32 = vld [vmem:[%s23359_s3 + $0x398] sm:$0xff]   ;;  %v16837_v56 = vpop.f32.mrb[86].mxu1 }
 0x1cf   : > { %v15463_v27 = vcombine.low %v6736_v0, %v6746_v20  ;;  %18021 = vmatmul.mubr.bf16.gmra.mrb[24].mxu1 %v15282_v15  ;;  %v6751_v21 = vshll.u32 %v15422_v36, 16  ;;  %v20928_v14 = vadd.f32 %v18471_v3, %v16969_v10  ;;  %v6757_v41 = vshll.u32 %v15423_v54, 16  ;;  %v16971_v2 = vpop.f32.mrb[85].mxu0  ;;  %18050 = vmatprep.subr.bf16.mxu1 %v19109_v32 }
 0x1d0   : > { %v6750_v40 = vrot.slane %v6748_v29, 4  ;;  %v6761_v57 = vshrl.u32 %v15423_v54, 16  ;;  %v5743_v12 = vsel %vm19670_vm5, %v5741_v63, %v5742_v46  ;;  %v6767_v53 = vshll.u32 %v15424_v60, 16  ;;  %v16973_v60 = vpop.f32.mrb[86].mxu0  ;;  %v16838_v29 = vpop.f32.mrb[87].mxu1  ;;  %18051 = vmatpush3.bf16.msra.mxu1 %v19109_v32 }
 0x1d1   : > { %7716 = vmatprep.mubr.bf16.mxu0 %v15463_v27  ;;  %v6753_v51 = vrot.slane %v6751_v21, 5  ;;  %v15268_v34 = vrot.slane %v5620_v50, 9  ;;  %v15283_v10 = vcombine.low %v5740_v18, %v5743_v12  ;;  %v6759_v36 = vrot.slane %v6757_v41, 5  ;;  %v16974_v18 = vpop.f32.mrb[87].mxu0  ;;  %v5623_v63 = vld [vmem:[%s20303_s30 + $0x60] sm:$0xe] }
 0x1d2   : > { %7717 = vmatmul.mubr.bf16.gmra.mrb[184].mxu0 %v19104_v11  ;;  %v6763_v0 = vrot.slane %v6761_v57, 4  ;;  %v5746_v15 = vrot.slane %v5621_v48, 5  ;;  %v6769_v20 = vrot.slane %v6767_v53, 5  ;;  %v5749_v3 = vrot.slane %v5622_v1, 5  ;;  %v5624_v21 = vld [vmem:[%s20303_s30 + $0x64] sm:$0xf] }
 0x1d3   : > { %v6754_v54 = vor.u32 %v6753_v51, %v6750_v40  ;;  %v16836_v46 = vadd.f32 %v16835_v49, %v16834_v17  ;;  %18024 = vmatprep.mubr.bf16.mxu1 %v15283_v10  ;;  %v16972_v48 = vadd.f32 %v16971_v2, %v16970_v44  ;;  %v16839_v40 = vadd.f32 %v16838_v29, %v16837_v56  ;;  %v5625_v57 = vld [vmem:[%s20303_s30 + $0x68] sm:$0x1]  ;;  %v15425_v12 = vld [vmem:[%s20303_s30 + $0x3c] sm:$0xf]  ;;  %v19108_v44 = vld [vmem:[%s20303_s30 + $0x30] sm:$0xff]  }
 0x1d4   : > { %v6764_v50 = vor.u32 %v6763_v0, %v6759_v36  ;;  %v5747_v11 = vsel %vm19670_vm5, %v15268_v34, %v5746_v15  ;;  %v5748_v27 = vrot.slane %v5746_v15, 4  ;;  %v16975_v41 = vadd.f32 %v16974_v18, %v16973_v60  ;;  %v15426_v2 = vld [vmem:[%s20303_s30 + $0x40] sm:$0xf]  ;;  %v15427_v56 = vld [vmem:[%s20303_s30 + $0x44] sm:$0x1] }
 0x1d5   : > { %v6755_v1 = vrot.slane %v6754_v54, 4  ;;  %v18444_v17 = vadd.f32 %v16836_v46, %v20533_v31  ;;  %v15269_v34 = vrot.slane %v5623_v63, 9  ;;  %v5753_v49 = vrot.slane %v5624_v21, 5  ;;  %v19111_v31 = vld [vmem:[%s23359_s3 + $0x4d0] sm:$0xff]   ;;  %v5626_v54 = vld [vmem:[%s20303_s30 + $0x6c] sm:$0xe] }
 0x1d6   : > { %v6765_v51 = vrot.slane %v6764_v50, 4  ;;  %v5750_v53 = vsel %vm19670_vm5, %v5748_v27, %v5749_v3  ;;  %v18462_v15 = vadd.f32 %v16839_v40, %v20535_v37  ;;  %v5627_v3 = vld [vmem:[%s20303_s30 + $0x70] sm:$0xf]  ;;  %v5756_v50 = vrot.slane %v5625_v57, 5  ;;  %v5628_v27 = vld [vmem:[%s20303_s30 + $0x74] sm:$0x1]  ;;  %17448 = vmatprep.subr.bf16.mxu0 %v19111_v31 }
 0x1d7   : > { %v6760_v32 = vsel %vm19552_vm2, %v6755_v1, %v6759_v36  ;;  %v15284_v10 = vcombine.low %v5747_v11, %v5750_v53  ;;  %v20951_v0 = vadd.f32 %v18444_v17, %v16972_v48  ;;  %v5754_v60 = vsel %vm19670_vm5, %v15269_v34, %v5753_v49  ;;  %v16840_v53 = vpop.f32.mrb[88].mxu1 }
 0x1d8   : > { %v6770_v46 = vsel %vm19552_vm2, %v6765_v51, %v6769_v20  ;;  %v5755_v29 = vrot.slane %v5753_v49, 4  ;;  %v20962_v36 = vadd.f32 %v18462_v15, %v16975_v41  ;;  %v6772_v11 = vshrl.u32 %v15425_v12, 16  ;;  %v19112_v20 = vld [vmem:[%s23359_s3 + $0x490] sm:$0xff]   ;;  %v19113_v15 = vld [vmem:[%s23359_s3 + $0x3a0] sm:$0xff]  }
 0x1d9   : > { %v15464_v18 = vcombine.low %v6760_v32, %v6770_v46  ;;  %18025 = vmatmul.mubr.bf16.gmra.mrb[28].mxu1 %v15284_v10  ;;  %v6775_v48 = vshll.u32 %v15425_v12, 16  ;;  %v6781_v63 = vshll.u32 %v15426_v2, 16  ;;  %v6785_v21 = vshrl.u32 %v15426_v2, 16  ;;  %17449 = vmatpush3.bf16.msra.mxu0 %v19112_v20  ;;  %v16976_v2 = vpop.f32.mrb[88].mxu0  ;;  %v16841_v10 = vpop.f32.mrb[89].mxu1 }
 0x1da   : > { %v5757_v37 = vsel %vm19670_vm5, %v5755_v29, %v5756_v50  ;;  %v6791_v1 = vshll.u32 %v15427_v56, 16  ;;  %v6774_v40 = vrot.slane %v6772_v11, 4  ;;  %v15270_v51 = vrot.slane %v5626_v54, 9  ;;  %18052 = vmatprep.subr.bf16.mxu1 %v19113_v15  ;;  %v5629_v11 = vld [vmem:[%s20303_s30 + $0x78] sm:$0xe] }
 0x1db   : > { %7724 = vmatprep.mubr.bf16.mxu0 %v15464_v18  ;;  %v15285_v17 = vcombine.low %v5754_v60, %v5757_v37  ;;  %v6777_v57 = vrot.slane %v6775_v48, 5  ;;  %v6783_v41 = vrot.slane %v6781_v63, 5  ;;  %v6787_v34 = vrot.slane %v6785_v21, 4  ;;  %v16977_v60 = vpop.f32.mrb[89].mxu0  ;;  %v19115_v48 = vld [vmem:[%s23359_s3 + $0x3a8] sm:$0xff]   ;;  %v19110_v21 = vld [vmem:[%s20303_s30 + $0x3c] sm:$0xff]   ;;  %18053 = vmatpush3.bf16.msra.mxu1 %v19113_v15 }
 0x1dc   : > { %7725 = vmatmul.mubr.bf16.gmra.mrb[188].mxu0 %v19108_v44  ;;  %v6793_v12 = vrot.slane %v6791_v1, 5  ;;  %v5760_v49 = vrot.slane %v5627_v3, 5  ;;  %v5763_v32 = vrot.slane %v5628_v27, 5  ;;  %v16842_v46 = vadd.f32 %v16841_v10, %v16840_v53  ;;  %v16843_v3 = vpop.f32.mrb[90].mxu1  ;;  %v16979_v27 = vpop.f32.mrb[90].mxu0  ;;  %18054 = vmatprep.subr.bf16.mxu1 %v19115_v48 }
 0x1dd   : > { %18028 = vmatprep.mubr.bf16.mxu1 %v15285_v17  ;;  %v6778_v31 = vor.u32 %v6777_v57, %v6774_v40  ;;  %v6788_v56 = vor.u32 %v6787_v34, %v6783_v41  ;;  %v16978_v50 = vadd.f32 %v16977_v60, %v16976_v2  ;;  %v16844_v18 = vpop.f32.mrb[91].mxu1  ;;  %v16980_v17 = vpop.f32.mrb[91].mxu0  ;;  %v5630_v40 = vld [vmem:[%s20303_s30 + $0x7c] sm:$0xf]  ;;  %v5631_v57 = vld [vmem:[%s20303_s30 + $0x80] sm:$0x1] }
 0x1de   : > { %v5761_v44 = vsel %vm19670_vm5, %v15270_v51, %v5760_v49  ;;  %v5762_v54 = vrot.slane %v5760_v49, 4  ;;  %v18489_v1 = vadd.f32 %v16842_v46, %v20574_v61  ;;  %v16845_v20 = vadd.f32 %v16844_v18, %v16843_v3  ;;  %v15429_v2 = vld [vmem:[%s20303_s30 + $0x4c] sm:$0xf]  ;;  %v5632_v46 = vld [vmem:[%s20303_s30 + $0x84] sm:$0xe] }
 0x1df   : > { %v6779_v29 = vrot.slane %v6778_v31, 4  ;;  %v6789_v37 = vrot.slane %v6788_v56, 4  ;;  %v16981_v34 = vadd.f32 %v16980_v17, %v16979_v27  ;;  %v15271_v49 = vrot.slane %v5629_v11, 9  ;;  %v15428_v31 = vld [vmem:[%s20303_s30 + $0x48] sm:$0xf]  ;;  %18055 = vmatpush3.bf16.msra.mxu1 %v19115_v48 }
 0x1e0   : > { %v5764_v63 = vsel %vm19670_vm5, %v5762_v54, %v5763_v32  ;;  %v16846_v32 = vpop.f32.mrb[92].mxu1  ;;  %v20990_v10 = vadd.f32 %v18489_v1, %v16978_v50  ;;  %v18507_v15 = vadd.f32 %v16845_v20, %v20583_v16  ;;  %v5767_v56 = vrot.slane %v5630_v40, 5  ;;  %v15430_v54 = vld [vmem:[%s20303_s30 + $0x50] sm:$0x1]  ;;  %v5633_v27 = vld [vmem:[%s20303_s30 + $0x88] sm:$0xf] }
 0x1e1   : > { %v6784_v51 = vsel %vm19552_vm2, %v6779_v29, %v6783_v41  ;;  %v15286_v53 = vcombine.low %v5761_v44, %v5764_v63  ;;  %v6794_v61 = vsel %vm19552_vm2, %v6789_v37, %v6793_v12  ;;  %v16982_v41 = vpop.f32.mrb[92].mxu0  ;;  %v5770_v60 = vrot.slane %v5631_v57, 5  ;;  %v16847_v18 = vpop.f32.mrb[93].mxu1  ;;  %v5634_v16 = vld [vmem:[%s20303_s30 + $0x8c] sm:$0x1] }
 0x1e2   : > { %v15465_v44 = vcombine.low %v6784_v51, %v6794_v61  ;;  %v6796_v3 = vshrl.u32 %v15428_v31, 16  ;;  %v6799_v29 = vshll.u32 %v15428_v31, 16  ;;  %v20996_v11 = vadd.f32 %v18507_v15, %v16981_v34  ;;  %v16983_v34 = vpop.f32.mrb[93].mxu0  ;;  %v16849_v48 = vpop.f32.mrb[94].mxu1 }
 0x1e3   : > { %18029 = vmatmul.mubr.bf16.gmra.mrb[32].mxu1 %v15286_v53  ;;  %v5768_v12 = vsel %vm19670_vm5, %v15271_v49, %v5767_v56  ;;  %v5769_v50 = vrot.slane %v5767_v56, 4  ;;  %v6805_v37 = vshll.u32 %v15429_v2, 16  ;;  %v6809_v20 = vshrl.u32 %v15429_v2, 16  ;;  %v16985_v56 = vpop.f32.mrb[94].mxu0 }
 0x1e4   : > { %7732 = vmatprep.mubr.bf16.mxu0 %v15465_v44  ;;  %v6798_v63 = vrot.slane %v6796_v3, 4  ;;  %v6801_v1 = vrot.slane %v6799_v29, 5  ;;  %v6815_v17 = vshll.u32 %v15430_v54, 16  ;;  %v15272_v51 = vrot.slane %v5632_v46, 9  ;;  %v16986_v46 = vpop.f32.mrb[95].mxu0 }
 0x1e5   : > { %7733 = vmatmul.mubr.bf16.gmra.mrb[192].mxu0 %v19110_v21  ;;  %v5771_v40 = vsel %vm19670_vm5, %v5769_v50, %v5770_v60  ;;  %v6807_v57 = vrot.slane %v6805_v37, 5  ;;  %v5774_v53 = vrot.slane %v5633_v27, 5  ;;  %v6811_v61 = vrot.slane %v6809_v20, 4  ;;  %v16850_v60 = vpop.f32.mrb[95].mxu1  ;;  %v5635_v3 = vld [vmem:[%s20303_s30 + $0x90] sm:$0xe] }
 0x1e6   : > { %v15287_v31 = vcombine.low %v5768_v12, %v5771_v40  ;;  %v6802_v49 = vor.u32 %v6801_v1, %v6798_v63  ;;  %v6817_v15 = vrot.slane %v6815_v17, 5  ;;  %v5777_v54 = vrot.slane %v5634_v16, 5  ;;  %v5636_v37 = vld [vmem:[%s20303_s30 + $0x94] sm:$0xf]  ;;  %v5637_v63 = vld [vmem:[%s20303_s30 + $0x98] sm:$0x1] }
 0x1e7   : > { %v5775_v2 = vsel %vm19670_vm5, %v15272_v51, %v5774_v53  ;;  %v5776_v21 = vrot.slane %v5774_v53, 4  ;;  %v16848_v44 = vadd.f32 %v16847_v18, %v16846_v32  ;;  %v6812_v27 = vor.u32 %v6811_v61, %v6807_v57  ;;  %v15431_v20 = vld [vmem:[%s20303_s30 + $0x54] sm:$0xf]  ;;  %v15432_v17 = vld [vmem:[%s20303_s30 + $0x58] sm:$0xf] }
 0x1e8   : > { %18032 = vmatprep.mubr.bf16.mxu1 %v15287_v31  ;;  %v6803_v29 = vrot.slane %v6802_v49, 4  ;;  %v16984_v12 = vadd.f32 %v16983_v34, %v16982_v41  ;;  %v16851_v50 = vadd.f32 %v16850_v60, %v16849_v48  ;;  %v16987_v32 = vadd.f32 %v16986_v46, %v16985_v56  ;;  %v19117_v40 = vld [vmem:[%s23359_s3 + $0x4d8] sm:$0xff]   ;;  %v19114_v34 = vld [vmem:[%s20303_s30 + $0x48] sm:$0xff]  }
 0x1e9   : > { %v5778_v1 = vsel %vm19670_vm5, %v5776_v21, %v5777_v54  ;;  %v18480_v16 = vadd.f32 %v16848_v44, %v20597_v22  ;;  %v15273_v18 = vrot.slane %v5635_v3, 9  ;;  %v6813_v51 = vrot.slane %v6812_v27, 4  ;;  %v15433_v49 = vld [vmem:[%s20303_s30 + $0x5c] sm:$0x1]  ;;  %v5638_v22 = vld [vmem:[%s20303_s30 + $0x9c] sm:$0xe]  ;;  %17450 = vmatprep.subr.bf16.mxu0 %v19117_v40 }
 0x1ea   : > { %v6808_v41 = vsel %vm19552_vm2, %v6803_v29, %v6807_v57  ;;  %v15288_v53 = vcombine.low %v5775_v2, %v5778_v1  ;;  %v18498_v31 = vadd.f32 %v16851_v50, %v20599_v26  ;;  %v19118_v61 = vld [vmem:[%s23359_s3 + $0x498] sm:$0xff]   ;;  %v5781_v56 = vrot.slane %v5636_v37, 5  ;;  %v5639_v44 = vld [vmem:[%s20303_s30 + $0xa0] sm:$0xf]  ;;  %v16852_v57 = vpop.f32.mrb[96].mxu1 }
 0x1eb   : > { %v21025_v48 = vadd.f32 %v18480_v16, %v16984_v12  ;;  %v5784_v21 = vrot.slane %v5637_v63, 5  ;;  %v6820_v54 = vshrl.u32 %v15431_v20, 16  ;;  %v6818_v2 = vsel %vm19552_vm2, %v6813_v51, %v6817_v15  ;;  %v5640_v3 = vld [vmem:[%s20303_s30 + $0xa4] sm:$0x1]  ;;  %17451 = vmatpush3.bf16.msra.mxu0 %v19118_v61  ;;  %v16988_v51 = vpop.f32.mrb[96].mxu0 }
 0x1ec   : > { %18033 = vmatmul.mubr.bf16.gmra.mrb[36].mxu1 %v15288_v53  ;;  %v21030_v26 = vadd.f32 %v18498_v31, %v16987_v32  ;;  %v6823_v60 = vshll.u32 %v15431_v20, 16  ;;  %v6829_v46 = vshll.u32 %v15432_v17, 16  ;;  %v15466_v29 = vcombine.low %v6808_v41, %v6818_v2  ;;  %v16989_v61 = vpop.f32.mrb[97].mxu0 }
 0x1ed   : > { %v5782_v27 = vsel %vm19670_vm5, %v15273_v18, %v5781_v56  ;;  %v5783_v12 = vrot.slane %v5781_v56, 4  ;;  %v6822_v50 = vrot.slane %v6820_v54, 4  ;;  %v6833_v1 = vshrl.u32 %v15432_v17, 16  ;;  %v16853_v18 = vpop.f32.mrb[97].mxu1 }
 0x1ee   : > { %v6825_v37 = vrot.slane %v6823_v60, 5  ;;  %v6831_v63 = vrot.slane %v6829_v46, 5  ;;  %v6839_v16 = vshll.u32 %v15433_v49, 16  ;;  %7740 = vmatprep.mubr.bf16.mxu0 %v15466_v29  ;;  %v15274_v32 = vrot.slane %v5638_v22, 9  ;;  %v19119_v22 = vld [vmem:[%s23359_s3 + $0x3b0] sm:$0xff]   ;;  %v16855_v2 = vpop.f32.mrb[98].mxu1 }
 0x1ef   : > { %v5785_v15 = vsel %vm19670_vm5, %v5783_v12, %v5784_v21  ;;  %v5788_v40 = vrot.slane %v5639_v44, 5  ;;  %v5791_v20 = vrot.slane %v5640_v3, 5  ;;  %7741 = vmatmul.mubr.bf16.gmra.mrb[196].mxu0 %v19114_v34  ;;  %v6835_v31 = vrot.slane %v6833_v1, 4  ;;  %v16991_v60 = vpop.f32.mrb[98].mxu0  ;;  %v5641_v46 = vld [vmem:[%s20303_s30 + $0xa8] sm:$0xe]  ;;  %18056 = vmatprep.subr.bf16.mxu1 %v19119_v22 }
 0x1f0   : > { %v15289_v53 = vcombine.low %v5782_v27, %v5785_v15  ;;  %v6826_v41 = vor.u32 %v6825_v37, %v6822_v50  ;;  %v16854_v49 = vadd.f32 %v16853_v18, %v16852_v57  ;;  %v16990_v54 = vadd.f32 %v16989_v61, %v16988_v51  ;;  %v16856_v29 = vpop.f32.mrb[99].mxu1  ;;  %v16992_v27 = vpop.f32.mrb[99].mxu0  ;;  %v5642_v12 = vld [vmem:[%s20303_s30 + $0xac] sm:$0xf]  ;;  %v5643_v50 = vld [vmem:[%s20303_s30 + $0xb0] sm:$0x1]  ;;  %18057 = vmatpush3.bf16.msra.mxu1 %v19119_v22 }
 0x1f1   : > { %v5789_v56 = vsel %vm19670_vm5, %v15274_v32, %v5788_v40  ;;  %v5790_v17 = vrot.slane %v5788_v40, 4  ;;  %v6836_v21 = vor.u32 %v6835_v31, %v6831_v63  ;;  %v6841_v44 = vrot.slane %v6839_v16, 5  ;;  %v19116_v15 = vld [vmem:[%s20303_s30 + $0x54] sm:$0xff]   ;;  %v15434_v40 = vld [vmem:[%s20303_s30 + $0x60] sm:$0xf] }
 0x1f2   : > { %18036 = vmatprep.mubr.bf16.mxu1 %v15289_v53  ;;  %v6827_v34 = vrot.slane %v6826_v41, 4  ;;  %v18525_v57 = vadd.f32 %v16854_v49, %v20202_v7  ;;  %v16857_v32 = vadd.f32 %v16856_v29, %v16855_v2  ;;  %v16858_v7 = vpop.f32.mrb[100].mxu1  ;;  %v16993_v53 = vadd.f32 %v16992_v27, %v16991_v60  ;;  %v15436_v18 = vld [vmem:[%s20303_s30 + $0x68] sm:$0x1]  ;;  %v5644_v61 = vld [vmem:[%s20303_s30 + $0xb4] sm:$0xe] }
 0x1f3   : > { %v5792_v3 = vsel %vm19670_vm5, %v5790_v17, %v5791_v20  ;;  %v6837_v1 = vrot.slane %v6836_v21, 4  ;;  %v15435_v20 = vld [vmem:[%s20303_s30 + $0x64] sm:$0xf]  ;;  %v15275_v41 = vrot.slane %v5641_v46, 9  ;;  %v5795_v31 = vrot.slane %v5642_v12, 5  ;;  %v16994_v27 = vpop.f32.mrb[100].mxu0 }
 0x1f4   : > { %v6832_v37 = vsel %vm19552_vm2, %v6827_v34, %v6831_v63  ;;  %v15290_v16 = vcombine.low %v5789_v56, %v5792_v3  ;;  %v21053_v51 = vadd.f32 %v18525_v57, %v16990_v54  ;;  %v18543_v56 = vadd.f32 %v16857_v32, %v20232_v28  ;;  %v5645_v22 = vld [vmem:[%s20303_s30 + $0xb8] sm:$0xf]  ;;  %v5646_v34 = vld [vmem:[%s20303_s30 + $0xbc] sm:$0x1] }
 0x1f5   : > { %v6842_v63 = vsel %vm19552_vm2, %v6837_v1, %v6841_v44  ;;  %v5798_v17 = vrot.slane %v5643_v50, 5  ;;  %v6844_v49 = vshrl.u32 %v15434_v40, 16  ;;  %v5796_v54 = vsel %vm19670_vm5, %v15275_v41, %v5795_v31  ;;  %v16859_v44 = vpop.f32.mrb[101].mxu1  ;;  %v19121_v28 = vld [vmem:[%s23359_s3 + $0x3b8] sm:$0xff]  }
 0x1f6   : > { %18037 = vmatmul.mubr.bf16.gmra.mrb[40].mxu1 %v15290_v16  ;;  %v15467_v21 = vcombine.low %v6832_v37, %v6842_v63  ;;  %v5797_v2 = vrot.slane %v5795_v31, 4  ;;  %v6847_v60 = vshll.u32 %v15434_v40, 16  ;;  %v21064_v46 = vadd.f32 %v18543_v56, %v16993_v53  ;;  %v16995_v16 = vpop.f32.mrb[101].mxu0  ;;  %18058 = vmatprep.subr.bf16.mxu1 %v19121_v28  ;;  %v16861_v41 = vpop.f32.mrb[102].mxu1 }
 0x1f7   : > { %v6846_v3 = vrot.slane %v6844_v49, 4  ;;  %v6853_v57 = vshll.u32 %v15435_v20, 16  ;;  %v6857_v29 = vshrl.u32 %v15435_v20, 16  ;;  %v6863_v37 = vshll.u32 %v15436_v18, 16  ;;  %18059 = vmatpush3.bf16.msra.mxu1 %v19121_v28  ;;  %v16862_v18 = vpop.f32.mrb[103].mxu1 }
 0x1f8   : > { %7748 = vmatprep.mubr.bf16.mxu0 %v15467_v21  ;;  %v5799_v12 = vsel %vm19670_vm5, %v5797_v2, %v5798_v17  ;;  %v6849_v50 = vrot.slane %v6847_v60, 5  ;;  %v15276_v1 = vrot.slane %v5644_v61, 9  ;;  %v5802_v20 = vrot.slane %v5645_v22, 5  ;;  %v16997_v21 = vpop.f32.mrb[102].mxu0  ;;  %v15437_v61 = vld [vmem:[%s20303_s30 + $0x6c] sm:$0xf] }
 0x1f9   : > { %7749 = vmatmul.mubr.bf16.gmra.mrb[200].mxu0 %v19116_v15  ;;  %v15291_v32 = vcombine.low %v5796_v54, %v5799_v12  ;;  %v6855_v40 = vrot.slane %v6853_v57, 5  ;;  %v6859_v53 = vrot.slane %v6857_v29, 4  ;;  %v6865_v63 = vrot.slane %v6863_v37, 5  ;;  %v16998_v2 = vpop.f32.mrb[103].mxu0  ;;  %v15438_v60 = vld [vmem:[%s20303_s30 + $0x70] sm:$0xf] }
 0x1fa   : > { %v6850_v31 = vor.u32 %v6849_v50, %v6846_v3  ;;  %v5805_v56 = vrot.slane %v5646_v34, 5  ;;  %v16860_v49 = vadd.f32 %v16859_v44, %v16858_v7  ;;  %v5803_v17 = vsel %vm19670_vm5, %v15276_v1, %v5802_v20  ;;  %v15439_v3 = vld [vmem:[%s20303_s30 + $0x74] sm:$0x1]  ;;  %v15477_v44 = vld [vmem:[%s20303_s30 + $0xc] sm:$0xe]  ;;  %v19120_v37 = vld [vmem:[%s20303_s30 + $0x60] sm:$0xff]  }
 0x1fb   : > { %18040 = vmatprep.mubr.bf16.mxu1 %v15291_v32  ;;  %v6860_v15 = vor.u32 %v6859_v53, %v6855_v40  ;;  %v5804_v22 = vrot.slane %v5802_v20, 4  ;;  %v16996_v54 = vadd.f32 %v16995_v16, %v16994_v27  ;;  %v16863_v57 = vadd.f32 %v16862_v18, %v16861_v41  ;;  %v15478_v28 = vld [vmem:[%s20303_s30 + $0x10] sm:$0xf]  ;;  %v15479_v27 = vld [vmem:[%s20303_s30 + $0x14] sm:$0x1]  ;;  %v19123_v16 = vld [vmem:[%s23359_s3 + $0x4e0] sm:$0xff]  }
 0x1fc   : > { %v6851_v34 = vrot.slane %v6850_v31, 4  ;;  %v18516_v7 = vadd.f32 %v16860_v49, %v20261_v24  ;;  %v16999_v29 = vadd.f32 %v16998_v2, %v16997_v21  ;;  %v6868_v1 = vshrl.u32 %v15437_v61, 16  ;;  %v15480_v31 = vld [vmem:[%s20303_s30 + $0x18] sm:$0xe]  ;;  %17452 = vmatprep.subr.bf16.mxu0 %v19123_v16 }
 0x1fd   : > { %v6861_v12 = vrot.slane %v6860_v15, 4  ;;  %v5806_v50 = vsel %vm19670_vm5, %v5804_v22, %v5805_v56  ;;  %v6871_v32 = vshll.u32 %v15437_v61, 16  ;;  %v18534_v41 = vadd.f32 %v16863_v57, %v20275_v43  ;;  %v15481_v61 = vld [vmem:[%s20303_s30 + $0x1c] sm:$0xf]  ;;  %v19124_v15 = vld [vmem:[%s23359_s3 + $0x4a0] sm:$0xff]   ;;  %v16864_v57 = vpop.f32.mrb[104].mxu1 }
 0x1fe   : > { %v6856_v24 = vsel %vm19552_vm2, %v6851_v34, %v6855_v40  ;;  %v15292_v53 = vcombine.low %v5803_v17, %v5806_v50  ;;  %v21088_v20 = vadd.f32 %v18516_v7, %v16996_v54  ;;  %v6870_v49 = vrot.slane %v6868_v1, 4  ;;  %v15482_v43 = vld [vmem:[%s20303_s30 + $0x20] sm:$0x1]  ;;  %17453 = vmatpush3.bf16.msra.mxu0 %v19124_v15 }
 0x1ff   : > { %v6866_v56 = vsel %vm19552_vm2, %v6861_v12, %v6865_v63  ;;  %v6873_v21 = vrot.slane %v6871_v32, 5  ;;  %v6877_v18 = vshll.u32 %v15438_v60, 16  ;;  %v21098_v17 = vadd.f32 %v18534_v41, %v16999_v29 }
 0x200   : > { %v15468_v40 = vcombine.low %v6856_v24, %v6866_v56  ;;  %18041 = vmatmul.mubr.bf16.gmra.mrb[44].mxu1 %v15292_v53  ;;  %v6881_v22 = vshrl.u32 %v15438_v60, 16  ;;  %v6887_v54 = vshll.u32 %v15439_v3, 16  ;;  %v15525_v7 = vrot.slane %v15477_v44, 9  ;;  %v17000_v3 = vpop.f32.mrb[104].mxu0  ;;  %v16865_v44 = vpop.f32.mrb[105].mxu1  ;;  %v19125_v56 = vld [vmem:[%s23359_s3 + $0x400] sm:$0xff]  }
 0x201   : > { %v6874_v2 = vor.u32 %v6873_v21, %v6870_v49  ;;  %v6879_v34 = vrot.slane %v6877_v18, 5  ;;  %v7237_v63 = vrot.slane %v15478_v28, 5  ;;  %v7240_v1 = vrot.slane %v15479_v27, 5  ;;  %v17001_v28 = vpop.f32.mrb[105].mxu0  ;;  %v16867_v21 = vpop.f32.mrb[106].mxu1  ;;  %17308 = vmatprep.subr.bf16.mxu1 %v19125_v56 }
 0x202   : > { %7756 = vmatprep.mubr.bf16.mxu0 %v15468_v40  ;;  %v6883_v12 = vrot.slane %v6881_v22, 4  ;;  %v6889_v50 = vrot.slane %v6887_v54, 5  ;;  %v15526_v32 = vrot.slane %v15480_v31, 9  ;;  %v7244_v60 = vrot.slane %v15481_v61, 5  ;;  %v17003_v18 = vpop.f32.mrb[106].mxu0  ;;  %v19122_v40 = vld [vmem:[%s20303_s30 + $0x6c] sm:$0xff]  }
 0x203   : > { %7757 = vmatmul.mubr.bf16.gmra.mrb[204].mxu0 %v19120_v37  ;;  %v6875_v16 = vrot.slane %v6874_v2, 4  ;;  %v7238_v29 = vsel %vm19670_vm5, %v15525_v7, %v7237_v63  ;;  %v7239_v24 = vrot.slane %v7237_v63, 4  ;;  %v7247_v41 = vrot.slane %v15482_v43, 5  ;;  %v16868_v43 = vpop.f32.mrb[107].mxu1  ;;  %v17004_v63 = vpop.f32.mrb[107].mxu0 }
 0x204   : > { %v6884_v53 = vor.u32 %v6883_v12, %v6879_v34  ;;  %v7245_v31 = vsel %vm19670_vm5, %v15526_v32, %v7244_v60  ;;  %v7246_v49 = vrot.slane %v7244_v60, 4  ;;  %v16866_v22 = vadd.f32 %v16865_v44, %v16864_v57  ;;  %v15440_v12 = vld [vmem:[%s20303_s30 + $0x78] sm:$0xf]  ;;  %v15483_v60 = vld [vmem:[%s20303_s30 + $0x24] sm:$0xe] }
 0x205   : > { %v6880_v27 = vsel %vm19552_vm2, %v6875_v16, %v6879_v34  ;;  %v7241_v37 = vsel %vm19670_vm5, %v7239_v24, %v7240_v1  ;;  %v17002_v54 = vadd.f32 %v17001_v28, %v17000_v3  ;;  %v19126_v34 = vld [vmem:[%s23359_s3 + $0x3c0] sm:$0xff]   ;;  %v16869_v7 = vadd.f32 %v16868_v43, %v16867_v21  ;;  %v15441_v1 = vld [vmem:[%s20303_s30 + $0x7c] sm:$0xf]  ;;  %v15484_v3 = vld [vmem:[%s20303_s30 + $0x28] sm:$0xf]  ;;  %v16870_v21 = vpop.f32.mrb[108].mxu1 }
 0x206   : > { %v6885_v61 = vrot.slane %v6884_v53, 4  ;;  %v15541_v15 = vcombine.low %v7238_v29, %v7241_v37  ;;  %v7248_v2 = vsel %vm19670_vm5, %v7246_v49, %v7247_v41  ;;  %v18561_v16 = vadd.f32 %v16866_v22, %v20305_v6  ;;  %v15442_v24 = vld [vmem:[%s20303_s30 + $0x80] sm:$0x1]  ;;  %v15485_v56 = vld [vmem:[%s20303_s30 + $0x2c] sm:$0x1] }
 0x207   : > { %v15542_v32 = vcombine.low %v7245_v31, %v7248_v2  ;;  %v17005_v29 = vadd.f32 %v17004_v63, %v17003_v18  ;;  %v18579_v41 = vadd.f32 %v16869_v7, %v20332_v5  ;;  %v6892_v44 = vshrl.u32 %v15440_v12, 16  ;;  %v15487_v7 = vld [vmem:[%s20303_s30 + $0x34] sm:$0xf] }
 0x208   : > { %v6890_v57 = vsel %vm19552_vm2, %v6885_v61, %v6889_v50  ;;  %18060 = vmatprep.mubr.bf16.mxu1 %v15541_v15  ;;  %v6895_v28 = vshll.u32 %v15440_v12, 16  ;;  %v21128_v37 = vadd.f32 %v18561_v16, %v17002_v54  ;;  %v6901_v49 = vshll.u32 %v15441_v1, 16  ;;  %v15486_v61 = vld [vmem:[%s20303_s30 + $0x30] sm:$0xe]  ;;  %v17006_v15 = vpop.f32.mrb[108].mxu0 }
 0x209   : > { %v15469_v53 = vcombine.low %v6880_v27, %v6890_v57  ;;  %18061 = vmatmul.mubr.bf16.vlgmr.msra.gmra.mrb[16].mxu1 %v15542_v32  ;;  %v6905_v50 = vshrl.u32 %v15441_v1, 16  ;;  %v6911_v31 = vshll.u32 %v15442_v24, 16  ;;  %v21130_v6 = vadd.f32 %v18579_v41, %v17005_v29  ;;  %v15488_v1 = vld [vmem:[%s20303_s30 + $0x38] sm:$0x1] }
 0x20a   : > { %17309 = vmatpush3.bf16.msra.mxu1 %v19126_v34  ;;  %v6894_v27 = vrot.slane %v6892_v44, 4  ;;  %v6897_v18 = vrot.slane %v6895_v28, 5  ;;  %v15527_v5 = vrot.slane %v15483_v60, 9  ;;  %v6903_v22 = vrot.slane %v6901_v49, 5  ;;  %v16871_v34 = vpop.f32.mrb[109].mxu1 }
 0x20b   : > { %7764 = vmatprep.mubr.bf16.mxu0 %v15469_v53  ;;  %v6907_v43 = vrot.slane %v6905_v50, 4  ;;  %v6913_v54 = vrot.slane %v6911_v31, 5  ;;  %v7251_v2 = vrot.slane %v15484_v3, 5  ;;  %v7254_v12 = vrot.slane %v15485_v56, 5  ;;  %v17007_v53 = vpop.f32.mrb[109].mxu0  ;;  %v16873_v56 = vpop.f32.mrb[110].mxu1 }
 0x20c   : > { %7765 = vmatmul.mubr.bf16.gmra.mrb[208].mxu0 %v19122_v40  ;;  %v6898_v63 = vor.u32 %v6897_v18, %v6894_v27  ;;  %v15528_v57 = vrot.slane %v15486_v61, 9  ;;  %v7258_v32 = vrot.slane %v15487_v7, 5  ;;  %v7261_v60 = vrot.slane %v15488_v1, 5  ;;  %v19128_v40 = vld [vmem:[%s23359_s3 + $0x408] sm:$0xff]   ;;  %v17009_v49 = vpop.f32.mrb[110].mxu0  ;;  %v19127_v27 = vld [vmem:[%s20303_s30 + $0x78] sm:$0xff]  }
 0x20d   : > { %v6908_v16 = vor.u32 %v6907_v43, %v6903_v22  ;;  %v7252_v29 = vsel %vm19670_vm5, %v15527_v5, %v7251_v2  ;;  %v7253_v24 = vrot.slane %v7251_v2, 4  ;;  %v16872_v28 = vadd.f32 %v16871_v34, %v16870_v21  ;;  %17310 = vmatprep.subr.bf16.mxu1 %v19128_v40  ;;  %v19129_v5 = vld [vmem:[%s23359_s3 + $0x3c8] sm:$0xff]   ;;  %v16874_v7 = vpop.f32.mrb[111].mxu1  ;;  %v15491_v40 = vld [vmem:[%s20303_s30 + $0x44] sm:$0x1] }
 0x20e   : > { %v6899_v3 = vrot.slane %v6898_v63, 4  ;;  %v7259_v41 = vsel %vm19670_vm5, %v15528_v57, %v7258_v32  ;;  %v7260_v44 = vrot.slane %v7258_v32, 4  ;;  %v17008_v18 = vadd.f32 %v17007_v53, %v17006_v15  ;;  %v17010_v63 = vpop.f32.mrb[111].mxu0  ;;  %v15443_v15 = vld [vmem:[%s20303_s30 + $0x84] sm:$0xf]  ;;  %17311 = vmatpush3.bf16.msra.mxu1 %v19129_v5 }
 0x20f   : > { %v6909_v50 = vrot.slane %v6908_v16, 4  ;;  %v7255_v31 = vsel %vm19670_vm5, %v7253_v24, %v7254_v12  ;;  %v18552_v2 = vadd.f32 %v16872_v28, %v20351_v30  ;;  %v15444_v12 = vld [vmem:[%s20303_s30 + $0x88] sm:$0xf]  ;;  %v16875_v32 = vadd.f32 %v16874_v7, %v16873_v56  ;;  %v15445_v16 = vld [vmem:[%s20303_s30 + $0x8c] sm:$0x1] }
 0x210   : > { %v6904_v21 = vsel %vm19552_vm2, %v6899_v3, %v6903_v22  ;;  %v15543_v61 = vcombine.low %v7252_v29, %v7255_v31  ;;  %v7262_v43 = vsel %vm19670_vm5, %v7260_v44, %v7261_v60  ;;  %v17011_v34 = vadd.f32 %v17010_v63, %v17009_v49  ;;  %v15489_v22 = vld [vmem:[%s20303_s30 + $0x3c] sm:$0xe]  ;;  %v15490_v29 = vld [vmem:[%s20303_s30 + $0x40] sm:$0xf]  ;;  %v15492_v31 = vld [vmem:[%s20303_s30 + $0x48] sm:$0xe] }
 0x211   : > { %v6914_v1 = vsel %vm19552_vm2, %v6909_v50, %v6913_v54  ;;  %v15544_v57 = vcombine.low %v7259_v41, %v7262_v43  ;;  %v21160_v60 = vadd.f32 %v18552_v2, %v17008_v18  ;;  %v6916_v30 = vshrl.u32 %v15443_v15, 16  ;;  %v15493_v43 = vld [vmem:[%s20303_s30 + $0x4c] sm:$0xf] }
 0x212   : > { %v15470_v24 = vcombine.low %v6904_v21, %v6914_v1  ;;  %18064 = vmatprep.mubr.bf16.mxu1 %v15543_v61  ;;  %v6919_v53 = vshll.u32 %v15443_v15, 16  ;;  %v18570_v3 = vadd.f32 %v16875_v32, %v20371_v9  ;;  %v6925_v54 = vshll.u32 %v15444_v12, 16  ;;  %v19131_v9 = vld [vmem:[%s23359_s3 + $0x4e8] sm:$0xff]  }
 0x213   : > { %18065 = vmatmul.mubr.bf16.gmra.mrb[20].mxu1 %v15544_v57  ;;  %v6929_v41 = vshrl.u32 %v15444_v12, 16  ;;  %v6935_v44 = vshll.u32 %v15445_v16, 16  ;;  %v6918_v28 = vrot.slane %v6916_v30, 4  ;;  %v15529_v49 = vrot.slane %v15489_v22, 9  ;;  %v15494_v12 = vld [vmem:[%s20303_s30 + $0x50] sm:$0x1]  ;;  %17454 = vmatprep.subr.bf16.mxu0 %v19131_v9 }
 0x214   : > { %7772 = vmatprep.mubr.bf16.mxu0 %v15470_v24  ;;  %v6921_v56 = vrot.slane %v6919_v53, 5  ;;  %v7265_v50 = vrot.slane %v15490_v29, 5  ;;  %v21165_v18 = vadd.f32 %v18570_v3, %v17011_v34  ;;  %v6927_v5 = vrot.slane %v6925_v54, 5  ;;  %v19132_v34 = vld [vmem:[%s23359_s3 + $0x4a8] sm:$0xff]   ;;  %v17052_v29 = vpop.f32.mrb[112].mxu0  ;;  %v19133_v54 = vld [vmem:[%s23359_s3 + $0x410] sm:$0xff]  }
 0x215   : > { %7773 = vmatmul.mubr.bf16.gmra.mrb[212].mxu0 %v19127_v27  ;;  %v6931_v21 = vrot.slane %v6929_v41, 4  ;;  %v6937_v61 = vrot.slane %v6935_v44, 5  ;;  %v7268_v15 = vrot.slane %v15491_v40, 5  ;;  %v15530_v57 = vrot.slane %v15492_v31, 9  ;;  %v17053_v3 = vpop.f32.mrb[113].mxu0  ;;  %17312 = vmatprep.subr.bf16.mxu1 %v19133_v54 }
 0x216   : > { %v6922_v2 = vor.u32 %v6921_v56, %v6918_v28  ;;  %v7266_v7 = vsel %vm19670_vm5, %v15529_v49, %v7265_v50  ;;  %v7267_v63 = vrot.slane %v7265_v50, 4  ;;  %v7272_v27 = vrot.slane %v15493_v43, 5  ;;  %17455 = vmatpush3.bf16.msra.mxu0 %v19132_v34  ;;  %v17055_v28 = vpop.f32.mrb[114].mxu0  ;;  %v19134_v56 = vld [vmem:[%s23359_s3 + $0x3d0] sm:$0xff]   ;;  %v19130_v50 = vld [vmem:[%s20303_s30 + $0x84] sm:$0xff]  }
 0x217   : > { %v6932_v1 = vor.u32 %v6931_v21, %v6927_v5  ;;  %v7275_v32 = vrot.slane %v15494_v12, 5  ;;  %v17054_v44 = vadd.f32 %v17053_v3, %v17052_v29  ;;  %v17056_v21 = vpop.f32.mrb[115].mxu0  ;;  %v15446_v43 = vld [vmem:[%s20303_s30 + $0x90] sm:$0xf]  ;;  %17313 = vmatpush3.bf16.msra.mxu1 %v19134_v56  ;;  %v15495_v34 = vld [vmem:[%s20303_s30 + $0x54] sm:$0xe] }
 0x218   : > { %v6923_v16 = vrot.slane %v6922_v2, 4  ;;  %v7269_v22 = vsel %vm19670_vm5, %v7267_v63, %v7268_v15  ;;  %v7273_v53 = vsel %vm19670_vm5, %v15530_v57, %v7272_v27  ;;  %v7274_v40 = vrot.slane %v7272_v27, 4  ;;  %v15448_v63 = vld [vmem:[%s20303_s30 + $0x98] sm:$0x1]  ;;  %v17058_v12 = vpop.f32.mrb[116].mxu0 }
 0x219   : > { %v6933_v24 = vrot.slane %v6932_v1, 4  ;;  %v15545_v30 = vcombine.low %v7266_v7, %v7269_v22  ;;  %v17057_v2 = vadd.f32 %v17056_v21, %v17055_v28  ;;  %v15447_v7 = vld [vmem:[%s20303_s30 + $0x94] sm:$0xf]  ;;  %v6940_v15 = vshrl.u32 %v15446_v43, 16  ;;  %v15497_v22 = vld [vmem:[%s20303_s30 + $0x5c] sm:$0x1] }
 0x21a   : > { %v6928_v41 = vsel %vm19552_vm2, %v6923_v16, %v6927_v5  ;;  %v7276_v31 = vsel %vm19670_vm5, %v7274_v40, %v7275_v32  ;;  %v6949_v1 = vshll.u32 %v15447_v7, 16  ;;  %v6953_v57 = vshrl.u32 %v15447_v7, 16  ;;  %v15496_v16 = vld [vmem:[%s20303_s30 + $0x58] sm:$0xf]  ;;  %v15498_v56 = vld [vmem:[%s20303_s30 + $0x60] sm:$0xe] }
 0x21b   : > { %v6938_v49 = vsel %vm19552_vm2, %v6933_v24, %v6937_v61  ;;  %18068 = vmatprep.mubr.bf16.mxu1 %v15545_v30  ;;  %v15546_v9 = vcombine.low %v7273_v53, %v7276_v31  ;;  %v6943_v61 = vshll.u32 %v15446_v43, 16  ;;  %v6959_v27 = vshll.u32 %v15448_v63, 16  ;;  %v15499_v21 = vld [vmem:[%s20303_s30 + $0x64] sm:$0xf]  ;;  %v15500_v43 = vld [vmem:[%s20303_s30 + $0x68] sm:$0x1] }
 0x21c   : > { %v15471_v5 = vcombine.low %v6928_v41, %v6938_v49  ;;  %v6942_v32 = vrot.slane %v6940_v15, 4  ;;  %v15531_v29 = vrot.slane %v15495_v34, 9  ;;  %v21201_v24 = vadd.f32 %v20648_v58, %v17054_v44  ;;  %v19135_v15 = vld [vmem:[%s20303_s30 + $0x90] sm:$0xff]  }
 0x21d   : > { %18069 = vmatmul.mubr.bf16.gmra.mrb[24].mxu1 %v15546_v9  ;;  %v21204_v30 = vadd.f32 %v20656_v55, %v17057_v2  ;;  %v6945_v53 = vrot.slane %v6943_v61, 5  ;;  %v6951_v40 = vrot.slane %v6949_v1, 5  ;;  %v6955_v3 = vrot.slane %v6953_v57, 4  ;;  %v17059_v9 = vpop.f32.mrb[117].mxu0  ;;  %v19136_v2 = vld [vmem:[%s23359_s3 + $0x418] sm:$0xff]  }
 0x21e   : > { %7780 = vmatprep.mubr.bf16.mxu0 %v15471_v5  ;;  %v6961_v54 = vrot.slane %v6959_v27, 5  ;;  %v7279_v41 = vrot.slane %v15496_v16, 5  ;;  %v7282_v28 = vrot.slane %v15497_v22, 5  ;;  %v15532_v5 = vrot.slane %v15498_v56, 9  ;;  %v17061_v1 = vpop.f32.mrb[118].mxu0  ;;  %v19137_v57 = vld [vmem:[%s23359_s3 + $0x3d8] sm:$0xff]   ;;  %17314 = vmatprep.subr.bf16.mxu1 %v19136_v2 }
 0x21f   : > { %7781 = vmatmul.mubr.bf16.gmra.mrb[216].mxu0 %v19130_v50  ;;  %v6946_v49 = vor.u32 %v6945_v53, %v6942_v32  ;;  %v6956_v31 = vor.u32 %v6955_v3, %v6951_v40  ;;  %v7286_v44 = vrot.slane %v15499_v21, 5  ;;  %v7289_v50 = vrot.slane %v15500_v43, 5  ;;  %v17062_v16 = vpop.f32.mrb[119].mxu0  ;;  %17315 = vmatpush3.bf16.msra.mxu1 %v19137_v57  ;;  %v15449_v3 = vld [vmem:[%s20303_s30 + $0x9c] sm:$0xf] }
 0x220   : > { %v7280_v58 = vsel %vm19670_vm5, %v15531_v29, %v7279_v41  ;;  %v7281_v55 = vrot.slane %v7279_v41, 4  ;;  %v17060_v61 = vadd.f32 %v17059_v9, %v17058_v12  ;;  %v17063_v53 = vadd.f32 %v17062_v16, %v17061_v1  ;;  %v15450_v41 = vld [vmem:[%s20303_s30 + $0xa0] sm:$0xf]  ;;  %v15501_v43 = vld [vmem:[%s20303_s30 + $0x6c] sm:$0xe] }
 0x221   : > { %v6947_v7 = vrot.slane %v6946_v49, 4  ;;  %v6957_v63 = vrot.slane %v6956_v31, 4  ;;  %v7287_v34 = vsel %vm19670_vm5, %v15532_v5, %v7286_v44  ;;  %v7288_v32 = vrot.slane %v7286_v44, 4  ;;  %v15502_v5 = vld [vmem:[%s20303_s30 + $0x70] sm:$0xf] }
 0x222   : > { %v7283_v27 = vsel %vm19670_vm5, %v7281_v55, %v7282_v28  ;;  %v15451_v28 = vld [vmem:[%s20303_s30 + $0xa4] sm:$0x1]  ;;  %v6964_v31 = vshrl.u32 %v15449_v3, 16  ;;  %v6967_v21 = vshll.u32 %v15449_v3, 16  ;;  %v6973_v9 = vshll.u32 %v15450_v41, 16 }
 0x223   : > { %v6952_v22 = vsel %vm19552_vm2, %v6947_v7, %v6951_v40  ;;  %v6962_v12 = vsel %vm19552_vm2, %v6957_v63, %v6961_v54  ;;  %v15547_v29 = vcombine.low %v7280_v58, %v7283_v27  ;;  %v7290_v49 = vsel %vm19670_vm5, %v7288_v32, %v7289_v50  ;;  %v15503_v58 = vld [vmem:[%s20303_s30 + $0x74] sm:$0x1] }
 0x224   : > { %v15472_v56 = vcombine.low %v6952_v22, %v6962_v12  ;;  %v15548_v40 = vcombine.low %v7287_v34, %v7290_v49  ;;  %v6977_v55 = vshrl.u32 %v15450_v41, 16  ;;  %v6983_v54 = vshll.u32 %v15451_v28, 16  ;;  %v15504_v22 = vld [vmem:[%s20303_s30 + $0x78] sm:$0xe]  ;;  %v15505_v12 = vld [vmem:[%s20303_s30 + $0x7c] sm:$0xf] }
 0x225   : > { %18072 = vmatprep.mubr.bf16.mxu1 %v15547_v29  ;;  %v6966_v44 = vrot.slane %v6964_v31, 4  ;;  %v6969_v2 = vrot.slane %v6967_v21, 5  ;;  %v15533_v7 = vrot.slane %v15501_v43, 9  ;;  %v7293_v63 = vrot.slane %v15502_v5, 5  ;;  %v19139_v29 = vld [vmem:[%s23359_s3 + $0x4f0] sm:$0xff]  }
 0x226   : > { %7788 = vmatprep.mubr.bf16.mxu0 %v15472_v56  ;;  %18073 = vmatmul.mubr.bf16.gmra.mrb[28].mxu1 %v15548_v40  ;;  %v6975_v50 = vrot.slane %v6973_v9, 5  ;;  %v6979_v1 = vrot.slane %v6977_v55, 4  ;;  %v6985_v57 = vrot.slane %v6983_v54, 5  ;;  %v7296_v27 = vrot.slane %v15503_v58, 5  ;;  %v15506_v41 = vld [vmem:[%s20303_s30 + $0x80] sm:$0x1] }
 0x227   : > { %7789 = vmatmul.mubr.bf16.gmra.mrb[220].mxu0 %v19135_v15  ;;  %v6970_v32 = vor.u32 %v6969_v2, %v6966_v44  ;;  %v7294_v34 = vsel %vm19670_vm5, %v15533_v7, %v7293_v63  ;;  %v7295_v16 = vrot.slane %v7293_v63, 4  ;;  %v21242_v3 = vadd.f32 %v20684_v62, %v17060_v61  ;;  %17456 = vmatprep.subr.bf16.mxu0 %v19139_v29  ;;  %v19138_v9 = vld [vmem:[%s20303_s30 + $0x9c] sm:$0xff]   ;;  %v19140_v55 = vld [vmem:[%s23359_s3 + $0x4b0] sm:$0xff]  }
 0x228   : > { %v6980_v15 = vor.u32 %v6979_v1, %v6975_v50  ;;  %v15534_v28 = vrot.slane %v15504_v22, 9  ;;  %v7300_v56 = vrot.slane %v15505_v12, 5  ;;  %v21246_v49 = vadd.f32 %v20690_v23, %v17063_v53  ;;  %v17064_v23 = vpop.f32.mrb[120].mxu0  ;;  %v19141_v58 = vld [vmem:[%s23359_s3 + $0x420] sm:$0xff]   ;;  %17457 = vmatpush3.bf16.msra.mxu0 %v19140_v55  ;;  %v15454_v22 = vld [vmem:[%s20303_s30 + $0xb0] sm:$0x1] }
 0x229   : > { %v6971_v31 = vrot.slane %v6970_v32, 4  ;;  %v7297_v21 = vsel %vm19670_vm5, %v7295_v16, %v7296_v27  ;;  %v7303_v43 = vrot.slane %v15506_v41, 5  ;;  %v17065_v54 = vpop.f32.mrb[121].mxu0  ;;  %17316 = vmatprep.subr.bf16.mxu1 %v19141_v58  ;;  %v15453_v16 = vld [vmem:[%s20303_s30 + $0xac] sm:$0xf] }
 0x22a   : > { %v6981_v5 = vrot.slane %v6980_v15, 4  ;;  %v15549_v40 = vcombine.low %v7294_v34, %v7297_v21  ;;  %v7301_v62 = vsel %vm19670_vm5, %v15534_v28, %v7300_v56  ;;  %v7302_v61 = vrot.slane %v7300_v56, 4  ;;  %v17067_v63 = vpop.f32.mrb[122].mxu0  ;;  %v15452_v34 = vld [vmem:[%s20303_s30 + $0xa8] sm:$0xf] }
 0x22b   : > { %v6976_v53 = vsel %vm19552_vm2, %v6971_v31, %v6975_v50  ;;  %v17066_v7 = vadd.f32 %v17065_v54, %v17064_v23  ;;  %v19142_v50 = vld [vmem:[%s23359_s3 + $0x3e0] sm:$0xff]   ;;  %v17068_v32 = vpop.f32.mrb[123].mxu0  ;;  %v6988_v12 = vshrl.u32 %v15452_v34, 16  ;;  %v6991_v29 = vshll.u32 %v15452_v34, 16  ;;  %v15508_v21 = vld [vmem:[%s20303_s30 + $0x88] sm:$0xf] }
 0x22c   : > { %v6986_v44 = vsel %vm19552_vm2, %v6981_v5, %v6985_v57  ;;  %18076 = vmatprep.mubr.bf16.mxu1 %v15549_v40  ;;  %v7304_v2 = vsel %vm19670_vm5, %v7302_v61, %v7303_v43  ;;  %17317 = vmatpush3.bf16.msra.mxu1 %v19142_v50  ;;  %v17069_v57 = vadd.f32 %v17068_v32, %v17067_v63  ;;  %v6997_v15 = vshll.u32 %v15453_v16, 16  ;;  %v17070_v41 = vpop.f32.mrb[124].mxu0  ;;  %v15507_v31 = vld [vmem:[%s20303_s30 + $0x84] sm:$0xe]  ;;  %v15509_v61 = vld [vmem:[%s20303_s30 + $0x8c] sm:$0x1] }
 0x22d   : > { %v15473_v1 = vcombine.low %v6976_v53, %v6986_v44  ;;  %v15550_v27 = vcombine.low %v7301_v62, %v7304_v2  ;;  %v7001_v28 = vshrl.u32 %v15453_v16, 16  ;;  %v7007_v56 = vshll.u32 %v15454_v22, 16  ;;  %v15510_v2 = vld [vmem:[%s20303_s30 + $0x90] sm:$0xe]  ;;  %v15511_v63 = vld [vmem:[%s20303_s30 + $0x94] sm:$0xf] }
 0x22e   : > { %v21274_v43 = vadd.f32 %v20712_v45, %v17066_v7  ;;  %v6990_v5 = vrot.slane %v6988_v12, 4  ;;  %v6993_v40 = vrot.slane %v6991_v29, 5  ;;  %v6999_v62 = vrot.slane %v6997_v15, 5  ;;  %v17071_v32 = vpop.f32.mrb[125].mxu0  ;;  %v19144_v34 = vld [vmem:[%s23359_s3 + $0x428] sm:$0xff]  }
 0x22f   : > { %7796 = vmatprep.mubr.bf16.mxu0 %v15473_v1  ;;  %18077 = vmatmul.mubr.bf16.gmra.mrb[32].mxu1 %v15550_v27  ;;  %v15535_v55 = vrot.slane %v15507_v31, 9  ;;  %v7003_v23 = vrot.slane %v7001_v28, 4  ;;  %v7009_v53 = vrot.slane %v7007_v56, 5  ;;  %v7307_v54 = vrot.slane %v15508_v21, 5  ;;  %v15512_v1 = vld [vmem:[%s20303_s30 + $0x98] sm:$0x1] }
 0x230   : > { %7797 = vmatmul.mubr.bf16.gmra.mrb[224].mxu0 %v19138_v9  ;;  %v7310_v58 = vrot.slane %v15509_v61, 5  ;;  %v6994_v44 = vor.u32 %v6993_v40, %v6990_v5  ;;  %v21280_v50 = vadd.f32 %v20724_v42, %v17069_v57  ;;  %v15536_v27 = vrot.slane %v15510_v2, 9  ;;  %v17073_v42 = vpop.f32.mrb[126].mxu0  ;;  %v19143_v28 = vld [vmem:[%s20303_s30 + $0xa8] sm:$0xff]   ;;  %17318 = vmatprep.subr.bf16.mxu1 %v19144_v34  ;;  %v15455_v61 = vld [vmem:[%s20303_s30 + $0xb4] sm:$0xf] }
 0x231   : > { %v7004_v45 = vor.u32 %v7003_v23, %v6999_v62  ;;  %v7308_v9 = vsel %vm19670_vm5, %v15535_v55, %v7307_v54  ;;  %v7309_v7 = vrot.slane %v7307_v54, 4  ;;  %v7314_v22 = vrot.slane %v15511_v63, 5  ;;  %v19145_v56 = vld [vmem:[%s23359_s3 + $0x3e8] sm:$0xff]   ;;  %v17074_v40 = vpop.f32.mrb[127].mxu0  ;;  %v15456_v54 = vld [vmem:[%s20303_s30 + $0xb8] sm:$0xf] }
 0x232   : > { %v6995_v16 = vrot.slane %v6994_v44, 4  ;;  %v7317_v12 = vrot.slane %v15512_v1, 5  ;;  %v17072_v29 = vadd.f32 %v17071_v32, %v17070_v41  ;;  %17319 = vmatpush3.bf16.msra.mxu1 %v19145_v56  ;;  %v17075_v23 = vadd.f32 %v17074_v40, %v17073_v42  ;;  %v15514_v1 = vld [vmem:[%s20303_s30 + $0xa0] sm:$0xf] }
 0x233   : > { %v7005_v57 = vrot.slane %v7004_v45, 4  ;;  %v7311_v15 = vsel %vm19670_vm5, %v7309_v7, %v7310_v58  ;;  %v7315_v41 = vsel %vm19670_vm5, %v15536_v27, %v7314_v22  ;;  %v7316_v5 = vrot.slane %v7314_v22, 4  ;;  %v15457_v58 = vld [vmem:[%s20303_s30 + $0xbc] sm:$0x1]  ;;  %v15513_v7 = vld [vmem:[%s20303_s30 + $0x9c] sm:$0xe] }
 0x234   : > { %v7000_v31 = vsel %vm19552_vm2, %v6995_v16, %v6999_v62  ;;  %v15551_v21 = vcombine.low %v7308_v9, %v7311_v15  ;;  %v7012_v44 = vshrl.u32 %v15455_v61, 16  ;;  %v7015_v2 = vshll.u32 %v15455_v61, 16  ;;  %v15515_v16 = vld [vmem:[%s20303_s30 + $0xa4] sm:$0x1] }
 0x235   : > { %v7010_v55 = vsel %vm19552_vm2, %v7005_v57, %v7009_v53  ;;  %v7318_v63 = vsel %vm19670_vm5, %v7316_v5, %v7317_v12  ;;  %v7021_v45 = vshll.u32 %v15456_v54, 16  ;;  %v7025_v9 = vshrl.u32 %v15456_v54, 16  ;;  %v15518_v54 = vld [vmem:[%s20303_s30 + $0xb0] sm:$0x1] }
 0x236   : > { %v15474_v62 = vcombine.low %v7000_v31, %v7010_v55  ;;  %18080 = vmatprep.mubr.bf16.mxu1 %v15551_v21  ;;  %v15552_v27 = vcombine.low %v7315_v41, %v7318_v63  ;;  %v7014_v32 = vrot.slane %v7012_v44, 4  ;;  %v7017_v53 = vrot.slane %v7015_v2, 5  ;;  %v15516_v21 = vld [vmem:[%s20303_s30 + $0xa8] sm:$0xe]  ;;  %v15517_v55 = vld [vmem:[%s20303_s30 + $0xac] sm:$0xf] }
 0x237   : > { %v7031_v34 = vshll.u32 %v15457_v58, 16  ;;  %v7023_v22 = vrot.slane %v7021_v45, 5  ;;  %v7027_v42 = vrot.slane %v7025_v9, 4  ;;  %v15537_v57 = vrot.slane %v15513_v7, 9  ;;  %v19146_v45 = vld [vmem:[%s20303_s30 + $0xb4] sm:$0xff]  }
 0x238   : > { %7804 = vmatprep.mubr.bf16.mxu0 %v15474_v62  ;;  %v7321_v15 = vrot.slane %v15514_v1, 5  ;;  %18081 = vmatmul.mubr.bf16.gmra.mrb[36].mxu1 %v15552_v27  ;;  %v7018_v12 = vor.u32 %v7017_v53, %v7014_v32  ;;  %v7324_v31 = vrot.slane %v15515_v16, 5  ;;  %v21310_v41 = vadd.f32 %v20747_v47, %v17072_v29  ;;  %v19147_v62 = vld [vmem:[%s23359_s3 + $0x4f8] sm:$0xff]  }
 0x239   : > { %7805 = vmatmul.mubr.bf16.gmra.mrb[228].mxu0 %v19143_v28  ;;  %v7033_v56 = vrot.slane %v7031_v34, 5  ;;  %v7028_v5 = vor.u32 %v7027_v42, %v7023_v22  ;;  %v15538_v58 = vrot.slane %v15516_v21, 9  ;;  %v7328_v2 = vrot.slane %v15517_v55, 5  ;;  %v19148_v9 = vld [vmem:[%s23359_s3 + $0x4b8] sm:$0xff]   ;;  %17458 = vmatprep.subr.bf16.mxu0 %v19147_v62  ;;  %v19149_v34 = vld [vmem:[%s23359_s3 + $0x430] sm:$0xff]  }
 0x23a   : > { %v7322_v40 = vsel %vm19670_vm5, %v15537_v57, %v7321_v15  ;;  %v7323_v61 = vrot.slane %v7321_v15, 4  ;;  %v7019_v44 = vrot.slane %v7018_v12, 4  ;;  %v7331_v28 = vrot.slane %v15518_v54, 5  ;;  %17459 = vmatpush3.bf16.msra.mxu0 %v19148_v9  ;;  %v19150_v15 = vld [vmem:[%s23359_s3 + $0x3f0] sm:$0xff]   ;;  %v15458_v12 = vld [vmem:[%s20303_s30 + $0xc0] sm:$0xf]  ;;  %17320 = vmatprep.subr.bf16.mxu1 %v19149_v34 }
 0x23b   : > { %v21320_v63 = vadd.f32 %v20758_v33, %v17075_v23  ;;  %v7029_v47 = vrot.slane %v7028_v5, 4  ;;  %v7329_v27 = vsel %vm19670_vm5, %v15538_v58, %v7328_v2  ;;  %v7330_v32 = vrot.slane %v7328_v2, 4  ;;  %v17076_v33 = vpop.f32.mrb[128].mxu0  ;;  %v15459_v21 = vld [vmem:[%s20303_s30 + $0xc4] sm:$0xf]  ;;  %17321 = vmatpush3.bf16.msra.mxu1 %v19150_v15 }
 0x23c   : > { %v7325_v29 = vsel %vm19670_vm5, %v7323_v61, %v7324_v31  ;;  %v7024_v7 = vsel %vm19552_vm2, %v7019_v44, %v7023_v22  ;;  %v17077_v53 = vpop.f32.mrb[129].mxu0  ;;  %v15460_v5 = vld [vmem:[%s20303_s30 + $0xc8] sm:$0x1]  ;;  %v7039_v55 = vshll.u32 %v15458_v12, 16  ;;  %v7045_v54 = vshll.u32 %v15459_v21, 16 }
 0x23d   : > { %v15553_v1 = vcombine.low %v7322_v40, %v7325_v29  ;;  %v7034_v23 = vsel %vm19552_vm2, %v7029_v47, %v7033_v56  ;;  %v7332_v22 = vsel %vm19670_vm5, %v7330_v32, %v7331_v28  ;;  %v17078_v42 = vadd.f32 %v17077_v53, %v17076_v33  ;;  %v17079_v57 = vpop.f32.mrb[130].mxu0  ;;  %v15519_v44 = vld [vmem:[%s20303_s30 + $0xb4] sm:$0xe]  ;;  %v15520_v62 = vld [vmem:[%s20303_s30 + $0xb8] sm:$0xf] }
 0x23e   : > { %v15475_v16 = vcombine.low %v7024_v7, %v7034_v23  ;;  %v15554_v56 = vcombine.low %v7329_v27, %v7332_v22  ;;  %v17080_v31 = vpop.f32.mrb[131].mxu0  ;;  %v7036_v40 = vshrl.u32 %v15458_v12, 16  ;;  %v7049_v58 = vshrl.u32 %v15459_v21, 16  ;;  %v15521_v47 = vld [vmem:[%s20303_s30 + $0xbc] sm:$0x1] }
 0x23f   : > { %18084 = vmatprep.mubr.bf16.mxu1 %v15553_v1  ;;  %v17081_v61 = vadd.f32 %v17080_v31, %v17079_v57  ;;  %v7055_v28 = vshll.u32 %v15460_v5, 16  ;;  %v21349_v29 = vadd.f32 %v20786_v19, %v17078_v42  ;;  %v7041_v9 = vrot.slane %v7039_v55, 5  ;;  %v15522_v22 = vld [vmem:[%s20303_s30 + $0xc0] sm:$0xe]  ;;  %v15523_v57 = vld [vmem:[%s20303_s30 + $0xc4] sm:$0xf] }
 0x240   : > { %7812 = vmatprep.mubr.bf16.mxu0 %v15475_v16  ;;  %18085 = vmatmul.mubr.bf16.gmra.mrb[40].mxu1 %v15554_v56  ;;  %v7038_v2 = vrot.slane %v7036_v40, 4  ;;  %v7047_v7 = vrot.slane %v7045_v54, 5  ;;  %v7051_v1 = vrot.slane %v7049_v58, 4  ;;  %v15539_v27 = vrot.slane %v15519_v44, 9  ;;  %v15524_v15 = vld [vmem:[%s20303_s30 + $0xc8] sm:$0x1] }
 0x241   : > { %7813 = vmatmul.mubr.bf16.gmra.mrb[232].mxu0 %v19146_v45  ;;  %v7057_v32 = vrot.slane %v7055_v28, 5  ;;  %v7335_v33 = vrot.slane %v15520_v62, 5  ;;  %v7338_v23 = vrot.slane %v15521_v47, 5  ;;  %v17082_v45 = vpop.f32.mrb[132].mxu0  ;;  %v21352_v53 = vadd.f32 %v20792_v8, %v17081_v61  ;;  %v19151_v40 = vld [vmem:[%s20303_s30 + $0xc0] sm:$0xff]   ;;  %v19152_v61 = vld [vmem:[%s23359_s3 + $0x438] sm:$0xff]  }
 0x242   : > { %v7042_v34 = vor.u32 %v7041_v9, %v7038_v2  ;;  %v7052_v16 = vor.u32 %v7051_v1, %v7047_v7  ;;  %v15540_v12 = vrot.slane %v15522_v22, 9  ;;  %v7342_v56 = vrot.slane %v15523_v57, 5  ;;  %v17083_v31 = vpop.f32.mrb[133].mxu0  ;;  %17322 = vmatprep.subr.bf16.mxu1 %v19152_v61  ;;  %v19153_v9 = vld [vmem:[%s23359_s3 + $0x3f8] sm:$0xff]  }
 0x243   : > { %v7336_v19 = vsel %vm19670_vm5, %v15539_v27, %v7335_v33  ;;  %v7337_v42 = vrot.slane %v7335_v33, 4  ;;  %v7345_v55 = vrot.slane %v15524_v15, 5  ;;  %v17084_v8 = vadd.f32 %v17083_v31, %v17082_v45  ;;  %v17085_v2 = vpop.f32.mrb[134].mxu0  ;;  %v15677_v27 = vld [vmem:[%s20303_s30 + $0x18] sm:$0xf]  ;;  %17323 = vmatpush3.bf16.msra.mxu1 %v19153_v9 }
 0x244   : > { %v7043_v21 = vrot.slane %v7042_v34, 4  ;;  %v7053_v5 = vrot.slane %v7052_v16, 4  ;;  %v7343_v58 = vsel %vm19670_vm5, %v15540_v12, %v7342_v56  ;;  %v7344_v44 = vrot.slane %v7342_v56, 4  ;;  %v17086_v1 = vpop.f32.mrb[135].mxu0  ;;  %v15678_v33 = vld [vmem:[%s20303_s30 + $0x1c] sm:$0xf] }
 0x245   : > { %v7339_v54 = vsel %vm19670_vm5, %v7337_v42, %v7338_v23  ;;  %v21377_v23 = vadd.f32 %v20818_v38, %v17084_v8  ;;  %v15679_v16 = vld [vmem:[%s20303_s30 + $0x20] sm:$0x1]  ;;  %v8216_v22 = vshrl.u32 %v15677_v27, 16  ;;  %v8219_v57 = vshll.u32 %v15677_v27, 16  ;;  %v15682_v9 = vld [vmem:[%s20303_s30 + $0x2c] sm:$0x1] }
 0x246   : > { %v7048_v28 = vsel %vm19552_vm2, %v7043_v21, %v7047_v7  ;;  %v7058_v62 = vsel %vm19552_vm2, %v7053_v5, %v7057_v32  ;;  %v15555_v47 = vcombine.low %v7336_v19, %v7339_v54  ;;  %v7346_v34 = vsel %vm19670_vm5, %v7344_v44, %v7345_v55  ;;  %v19156_v38 = vld [vmem:[%s23359_s3 + $0x580] sm:$0xff]   ;;  %v17088_v54 = vpop.f32.mrb[136].mxu0 }
 0x247   : > { %v15476_v45 = vcombine.low %v7048_v28, %v7058_v62  ;;  %v17087_v7 = vadd.f32 %v17086_v1, %v17085_v2  ;;  %v15556_v32 = vcombine.low %v7343_v58, %v7346_v34  ;;  %v8225_v15 = vshll.u32 %v15678_v33, 16  ;;  %17580 = vmatprep.subr.bf16.mxu0 %v19156_v38  ;;  %v17089_v58 = vpop.f32.mrb[137].mxu0  ;;  %v15680_v44 = vld [vmem:[%s20303_s30 + $0x24] sm:$0xf]  ;;  %v9708_v38 = vld [vmem:[%s21403_s19 + $0x8] sm:$0x1] }
 0x248   : > { %18088 = vmatprep.mubr.bf16.mxu1 %v15555_v47  ;;  %v8229_v19 = vshrl.u32 %v15678_v33, 16  ;;  %v8218_v42 = vrot.slane %v8216_v22, 4  ;;  %v8235_v12 = vshll.u32 %v15679_v16, 16  ;;  %v8221_v31 = vrot.slane %v8219_v57, 5  ;;  %v17091_v47 = vpop.f32.mrb[138].mxu0 }
 0x249   : > { %7820 = vmatprep.mubr.bf16.mxu0 %v15476_v45  ;;  %v21387_v56 = vadd.f32 %v20823_v39, %v17087_v7  ;;  %18089 = vmatmul.mubr.bf16.gmra.mrb[44].mxu1 %v15556_v32  ;;  %v8227_v21 = vrot.slane %v8225_v15, 5  ;;  %v19158_v39 = vld [vmem:[%s23359_s3 + $0x440] sm:$0xff]   ;;  %v17090_v62 = vadd.f32 %v17089_v58, %v17088_v54  ;;  %v8240_v1 = vshrl.u32 %v15680_v44, 16  ;;  %v17092_v27 = vpop.f32.mrb[139].mxu0  ;;  %v19154_v32 = vld [vmem:[%s20303_s30 + $0x18] sm:$0xff]  }
 0x24a   : > { %7821 = vmatmul.mubr.bf16.gmra.mrb[236].mxu0 %v19151_v40  ;;  %v8231_v5 = vrot.slane %v8229_v19, 4  ;;  %v8237_v55 = vrot.slane %v8235_v12, 5  ;;  %v8222_v8 = vor.u32 %v8221_v31, %v8218_v42  ;;  %v15681_v40 = vld [vmem:[%s20303_s30 + $0x28] sm:$0xf]  ;;  %18092 = vmatprep.subr.bf16.mxu1 %v19158_v39  ;;  %v8243_v33 = vshll.u32 %v15680_v44, 16 }
 0x24b   : > { %v8249_v45 = vshll.u32 %v15681_v40, 16  ;;  %v8253_v34 = vshrl.u32 %v15681_v40, 16  ;;  %v8259_v7 = vshll.u32 %v15682_v9, 16  ;;  %v17093_v57 = vadd.f32 %v17092_v27, %v17091_v47  ;;  %v9706_v42 = vld [vmem:[%s21403_s19] sm:$0xf]  ;;  %v23380_v31 = vld [vmem:[#allocation10_spill] sm:$0xff] }
 0x24c   : > { %v8232_v61 = vor.u32 %v8231_v5, %v8227_v21  ;;  %v8223_v2 = vrot.slane %v8222_v8, 4  ;;  %v8242_v15 = vrot.slane %v8240_v1, 4  ;;  %v9707_v12 = vld [vmem:[%s21403_s19 + $0x4] sm:$0xf]  ;;  %v9755_v5 = vshrl.u32 %v9706_v42, 16 }
 0x24d   : > { %v9764_v8 = vshll.u32 %v9707_v12, 16  ;;  %v9774_v54 = vshll.u32 %v9708_v38, 16  ;;  %v8245_v58 = vrot.slane %v8243_v33, 5  ;;  %v8251_v44 = vrot.slane %v8249_v45, 5  ;;  %v9711_v45 = vld [vmem:[%s21403_s19 + $0x14] sm:$0x1] }
 0x24e   : > { %v8233_v28 = vrot.slane %v8232_v61, 4  ;;  %v8228_v16 = vsel %vm19552_vm2, %v8223_v2, %v8227_v21  ;;  %v21410_v21 = vadd.f32 %v23380_v31, %v17090_v62  ;;  %v9768_v61 = vshrl.u32 %v9707_v12, 16  ;;  %v9709_v62 = vld [vmem:[%s21403_s19 + $0xc] sm:$0xf] }
 0x24f   : > { %v21413_v40 = vadd.f32 %v20860_v13, %v17093_v57  ;;  %v9757_v2 = vrot.slane %v9755_v5, 4  ;;  %v9766_v47 = vrot.slane %v9764_v8, 5  ;;  %v9776_v1 = vrot.slane %v9774_v54, 5 }
 0x250   : > { %v8238_v22 = vsel %vm19552_vm2, %v8233_v28, %v8237_v55  ;;  %23381 = vst [vmem:[#allocation10_spill] sm:$0xff] %v21410_v21  ;;  %v9758_v55 = vshll.u32 %v9706_v42, 16  ;;  %v9770_v9 = vrot.slane %v9768_v61, 4  ;;  %v8246_v27 = vor.u32 %v8245_v58, %v8242_v15  ;;  %v19157_v15 = vld [vmem:[%s23359_s3 + $0x540] sm:$0xff]  }
 0x251   : > { %v15725_v19 = vcombine.low %v8228_v16, %v8238_v22  ;;  %23382 = vst [vmem:[#allocation11_spill] sm:$0xff] %v21413_v40  ;;  %v8255_v16 = vrot.slane %v8253_v34, 4  ;;  %v8261_v22 = vrot.slane %v8259_v7, 5  ;;  %v9779_v12 = vshrl.u32 %v9709_v62, 16  ;;  %v19155_v7 = vld [vmem:[%s21403_s19] sm:$0xff]  }
 0x252   : > { %v9760_v28 = vrot.slane %v9758_v55, 5  ;;  %v9771_v33 = vor.u32 %v9770_v9, %v9766_v47  ;;  %v9782_v38 = vshll.u32 %v9709_v62, 16  ;;  %v8247_v13 = vrot.slane %v8246_v27, 4  ;;  %v17094_v55 = vpop.f32.mrb[140].mxu0  ;;  %v9712_v40 = vld [vmem:[%s21403_s19 + $0x18] sm:$0xf] }
 0x253   : > { %9240 = vmatprep.mubr.bf16.mxu1 %v15725_v19  ;;  %v9710_v19 = vld [vmem:[%s21403_s19 + $0x10] sm:$0xf]  ;;  %v8256_v57 = vor.u32 %v8255_v16, %v8251_v44  ;;  %v9781_v61 = vrot.slane %v9779_v12, 4  ;;  %v17095_v34 = vpop.f32.mrb[141].mxu0  ;;  %v15684_v12 = vld [vmem:[%s20303_s30 + $0x34] sm:$0xf] }
 0x254   : > { %9241 = vmatmul.mubr.bf16.vlgmr.msra.gmra.mrb[112].mxu1 %v19154_v32  ;;  %v9761_v42 = vor.u32 %v9760_v28, %v9757_v2  ;;  %v9788_v31 = vshll.u32 %v9710_v19, 16  ;;  %v9792_v5 = vshrl.u32 %v9710_v19, 16  ;;  %v9772_v32 = vrot.slane %v9771_v33, 4  ;;  %v17097_v9 = vpop.f32.mrb[142].mxu0  ;;  %v15683_v33 = vld [vmem:[%s20303_s30 + $0x30] sm:$0xf] }
 0x255   : > { %18093 = vmatpush3.bf16.msra.mxu1 %v19158_v39  ;;  %v9784_v39 = vrot.slane %v9782_v38, 5  ;;  %v8252_v54 = vsel %vm19552_vm2, %v8247_v13, %v8251_v44  ;;  %v8257_v58 = vrot.slane %v8256_v57, 4  ;;  %v9798_v19 = vshll.u32 %v9711_v45, 16  ;;  %v19159_v57 = vld [vmem:[%s20303_s30 + $0x24] sm:$0xff]  }
 0x256   : > { %v9762_v8 = vrot.slane %v9761_v42, 4  ;;  %v9790_v2 = vrot.slane %v9788_v31, 5  ;;  %v9794_v28 = vrot.slane %v9792_v5, 4  ;;  %v9777_v27 = vsel %vm19552_vm2, %v9772_v32, %v9776_v1  ;;  %v17098_v42 = vpop.f32.mrb[143].mxu0  ;;  %v15685_v5 = vld [vmem:[%s20303_s30 + $0x38] sm:$0x1] }
 0x257   : > { %v9785_v16 = vor.u32 %v9784_v39, %v9781_v61  ;;  %v8262_v44 = vsel %vm19552_vm2, %v8257_v58, %v8261_v22  ;;  %v17096_v31 = vadd.f32 %v17095_v34, %v17094_v55  ;;  %v9800_v21 = vrot.slane %v9798_v19, 5  ;;  %v9713_v32 = vld [vmem:[%s21403_s19 + $0x1c] sm:$0xf]  ;;  %v19160_v19 = vld [vmem:[%s21403_s19 + $0xc] sm:$0xff]  }
 0x258   : > { %v9767_v62 = vsel %vm19552_vm2, %v9762_v8, %v9766_v47  ;;  %v9795_v13 = vor.u32 %v9794_v28, %v9790_v2  ;;  %v15726_v47 = vcombine.low %v8252_v54, %v8262_v44  ;;  %v17099_v1 = vadd.f32 %v17098_v42, %v17097_v9 }
 0x259   : > { %v15909_v38 = vcombine.low %v9767_v62, %v9777_v27  ;;  %v9786_v8 = vrot.slane %v9785_v16, 4  ;;  %v8264_v61 = vshrl.u32 %v15683_v33, 16  ;;  %v8267_v39 = vshll.u32 %v15683_v33, 16  ;;  %v9714_v62 = vld [vmem:[%s21403_s19 + $0x20] sm:$0x1]  ;;  %v19163_v16 = vld [vmem:[%s23359_s3 + $0x588] sm:$0xff]  }
 0x25a   : > { %v9796_v45 = vrot.slane %v9795_v13, 4  ;;  %v8273_v25 = vshll.u32 %v15684_v12, 16  ;;  %9248 = vmatprep.mubr.bf16.mxu1 %v15726_v47  ;;  %v8277_v55 = vshrl.u32 %v15684_v12, 16  ;;  %v8283_v34 = vshll.u32 %v15685_v5, 16 }
 0x25b   : > { %10779 = vmatprep.mubr.bf16.mxu0 %v15909_v38  ;;  %v9791_v22 = vsel %vm19552_vm2, %v9786_v8, %v9790_v2  ;;  %v9803_v58 = vshrl.u32 %v9712_v40, 16  ;;  %v8266_v28 = vrot.slane %v8264_v61, 4  ;;  %v8269_v9 = vrot.slane %v8267_v39, 5 }
 0x25c   : > { %10780 = vmatmul.mubr.bf16.vlgmr.msra.gmra.mrb[240].mxu0 %v19155_v7  ;;  %v9801_v54 = vsel %vm19552_vm2, %v9796_v45, %v9800_v21  ;;  %9249 = vmatmul.mubr.bf16.gmra.mrb[116].mxu1 %v19159_v57  ;;  %v8275_v27 = vrot.slane %v8273_v25, 5  ;;  %v8279_v42 = vrot.slane %v8277_v55, 4  ;;  %v8285_v33 = vrot.slane %v8283_v34, 5  ;;  %v17100_v25 = vpop.f32.mrb[144].mxu0  ;;  %v19161_v55 = vld [vmem:[%s20303_s30 + $0x30] sm:$0xff]  }
 0x25d   : > { %17581 = vmatpush3.bf16.msra.mxu0 %v19157_v15  ;;  %v15910_v7 = vcombine.low %v9791_v22, %v9801_v54  ;;  %v9805_v2 = vrot.slane %v9803_v58, 4  ;;  %v19164_v15 = vld [vmem:[%s23359_s3 + $0x548] sm:$0xff]   ;;  %v8270_v12 = vor.u32 %v8269_v9, %v8266_v28  ;;  %v9806_v38 = vshll.u32 %v9712_v40, 16  ;;  %v17101_v5 = vpop.f32.mrb[145].mxu0  ;;  %v15687_v28 = vld [vmem:[%s20303_s30 + $0x40] sm:$0xf] }
 0x25e   : > { %v9812_v21 = vshll.u32 %v9713_v32, 16  ;;  %v9816_v44 = vshrl.u32 %v9713_v32, 16  ;;  %17582 = vmatprep.subr.bf16.mxu0 %v19163_v16  ;;  %v8280_v13 = vor.u32 %v8279_v42, %v8275_v27  ;;  %v9822_v57 = vshll.u32 %v9714_v62, 16  ;;  %v15688_v9 = vld [vmem:[%s20303_s30 + $0x44] sm:$0x1] }
 0x25f   : > { %10787 = vmatprep.mubr.bf16.mxu0 %v15910_v7  ;;  %v21449_v47 = vadd.f32 %v20883_v4, %v17096_v31  ;;  %v21452_v8 = vadd.f32 %v20894_v59, %v17099_v1  ;;  %v8271_v45 = vrot.slane %v8270_v12, 4  ;;  %v9808_v61 = vrot.slane %v9806_v38, 5  ;;  %v19165_v4 = vld [vmem:[%s23359_s3 + $0x448] sm:$0xff]   ;;  %v17103_v31 = vpop.f32.mrb[146].mxu0  ;;  %v15686_v59 = vld [vmem:[%s20303_s30 + $0x3c] sm:$0xf] }
 0x260   : > { %v9814_v40 = vrot.slane %v9812_v21, 5  ;;  %v9818_v32 = vrot.slane %v9816_v44, 4  ;;  %v8281_v39 = vrot.slane %v8280_v13, 4  ;;  %v9824_v22 = vrot.slane %v9822_v57, 5  ;;  %v17104_v54 = vpop.f32.mrb[147].mxu0  ;;  %18094 = vmatprep.subr.bf16.mxu1 %v19165_v4 }
 0x261   : > { %23383 = vst [vmem:[#allocation12_spill] sm:$0xff] %v21452_v8  ;;  %17583 = vmatpush3.bf16.msra.mxu0 %v19164_v15  ;;  %v21455_v34 = vadd.f32 %v17101_v5, %v17100_v25  ;;  %v8276_v1 = vsel %vm19552_vm2, %v8271_v45, %v8275_v27  ;;  %v9809_v62 = vor.u32 %v9808_v61, %v9805_v2  ;;  %v8288_v16 = vshrl.u32 %v15686_v59, 16  ;;  %v9715_v38 = vld [vmem:[%s21403_s19 + $0x24] sm:$0xf]  ;;  %v9716_v21 = vld [vmem:[%s21403_s19 + $0x28] sm:$0xf] }
 0x262   : > { %v9819_v58 = vor.u32 %v9818_v32, %v9814_v40  ;;  %v8286_v7 = vsel %vm19552_vm2, %v8281_v39, %v8285_v33  ;;  %v21467_v42 = vadd.f32 %v17104_v54, %v17103_v31  ;;  %v8291_v15 = vshll.u32 %v15686_v59, 16  ;;  %18095 = vmatpush3.bf16.msra.mxu1 %v19165_v4  ;;  %v9717_v13 = vld [vmem:[%s21403_s19 + $0x2c] sm:$0x1]  ;;  %v19162_v59 = vld [vmem:[%s21403_s19 + $0x18] sm:$0xff]  }
 0x263   : > { %v8297_v12 = vshll.u32 %v15687_v28, 16  ;;  %v15727_v44 = vcombine.low %v8276_v1, %v8286_v7  ;;  %v9810_v27 = vrot.slane %v9809_v62, 4  ;;  %v8290_v25 = vrot.slane %v8288_v16, 4 }
 0x264   : > { %10788 = vmatmul.mubr.bf16.gmra.mrb[244].mxu0 %v19160_v19  ;;  %v9820_v2 = vrot.slane %v9819_v58, 4  ;;  %v8293_v57 = vrot.slane %v8291_v15, 5  ;;  %v8301_v19 = vshrl.u32 %v15687_v28, 16  ;;  %v8307_v45 = vshll.u32 %v15688_v9, 16  ;;  %v17106_v58 = vpop.f32.mrb[148].mxu0 }
 0x265   : > { %v8299_v5 = vrot.slane %v8297_v12, 5  ;;  %9256 = vmatprep.mubr.bf16.mxu1 %v15727_v44  ;;  %v9815_v33 = vsel %vm19552_vm2, %v9810_v27, %v9814_v40  ;;  %v9827_v32 = vshrl.u32 %v9715_v38, 16  ;;  %v9830_v39 = vshll.u32 %v9715_v38, 16  ;;  %v17107_v7 = vpop.f32.mrb[149].mxu0  ;;  %v15689_v38 = vld [vmem:[%s20303_s30 + $0x48] sm:$0xf] }
 0x266   : > { %v9825_v61 = vsel %vm19552_vm2, %v9820_v2, %v9824_v22  ;;  %9257 = vmatmul.mubr.bf16.gmra.mrb[120].mxu1 %v19161_v55  ;;  %v8294_v4 = vor.u32 %v8293_v57, %v8290_v25  ;;  %v8303_v1 = vrot.slane %v8301_v19, 4  ;;  %v8309_v62 = vrot.slane %v8307_v45, 5  ;;  %v17109_v55 = vpop.f32.mrb[150].mxu0  ;;  %v15690_v57 = vld [vmem:[%s20303_s30 + $0x4c] sm:$0xf] }
 0x267   : > { %v15911_v31 = vcombine.low %v9815_v33, %v9825_v61  ;;  %v9829_v54 = vrot.slane %v9827_v32, 4  ;;  %v9832_v28 = vrot.slane %v9830_v39, 5  ;;  %v9836_v9 = vshll.u32 %v9716_v21, 16  ;;  %v17110_v25 = vpop.f32.mrb[151].mxu0  ;;  %v19166_v33 = vld [vmem:[%s20303_s30 + $0x3c] sm:$0xff]  }
 0x268   : > { %v9840_v16 = vshrl.u32 %v9716_v21, 16  ;;  %v8295_v40 = vrot.slane %v8294_v4, 4  ;;  %v8304_v22 = vor.u32 %v8303_v1, %v8299_v5  ;;  %v9846_v15 = vshll.u32 %v9717_v13, 16  ;;  %v15691_v32 = vld [vmem:[%s20303_s30 + $0x50] sm:$0x1]  ;;  %v17112_v8 = vpop.f32.mrb[152].mxu0 }
 0x269   : > { %10795 = vmatprep.mubr.bf16.mxu0 %v15911_v31  ;;  %v21477_v12 = vadd.f32 %v17107_v7, %v17106_v58  ;;  %v9833_v44 = vor.u32 %v9832_v28, %v9829_v54  ;;  %v9838_v27 = vrot.slane %v9836_v9, 5  ;;  %v8312_v19 = vshrl.u32 %v15689_v38, 16  ;;  %v9718_v39 = vld [vmem:[%s21403_s19 + $0x30] sm:$0xf]  ;;  %v9719_v54 = vld [vmem:[%s21403_s19 + $0x34] sm:$0xf] }
 0x26a   : > { %v9842_v2 = vrot.slane %v9840_v16, 4  ;;  %v8300_v21 = vsel %vm19552_vm2, %v8295_v40, %v8299_v5  ;;  %v8305_v45 = vrot.slane %v8304_v22, 4  ;;  %v9848_v13 = vrot.slane %v9846_v15, 5  ;;  %v9720_v7 = vld [vmem:[%s21403_s19 + $0x38] sm:$0x1]  ;;  %v19171_v40 = vld [vmem:[%s23359_s3 + $0x550] sm:$0xff]  }
 0x26b   : > { %v21484_v61 = vadd.f32 %v17110_v25, %v17109_v55  ;;  %v9834_v31 = vrot.slane %v9833_v44, 4  ;;  %v8314_v1 = vrot.slane %v8312_v19, 4  ;;  %v8315_v58 = vshll.u32 %v15689_v38, 16  ;;  %v19167_v38 = vld [vmem:[%s21403_s19 + $0x24] sm:$0xff]  }
 0x26c   : > { %10796 = vmatmul.mubr.bf16.gmra.mrb[248].mxu0 %v19162_v59  ;;  %v9843_v4 = vor.u32 %v9842_v2, %v9838_v27  ;;  %v19170_v59 = vld [vmem:[%s23359_s3 + $0x590] sm:$0xff]   ;;  %v8310_v5 = vsel %vm19552_vm2, %v8305_v45, %v8309_v62  ;;  %v8321_v28 = vshll.u32 %v15690_v57, 16  ;;  %v8325_v9 = vshrl.u32 %v15690_v57, 16 }
 0x26d   : > { %v8331_v16 = vshll.u32 %v15691_v32, 16  ;;  %v15728_v22 = vcombine.low %v8300_v21, %v8310_v5  ;;  %v9839_v15 = vsel %vm19552_vm2, %v9834_v31, %v9838_v27  ;;  %v8317_v44 = vrot.slane %v8315_v58, 5  ;;  %17584 = vmatprep.subr.bf16.mxu0 %v19170_v59 }
 0x26e   : > { %v9844_v55 = vrot.slane %v9843_v4, 4  ;;  %v8323_v2 = vrot.slane %v8321_v28, 5  ;;  %v8327_v25 = vrot.slane %v8325_v9, 4  ;;  %v9851_v62 = vshrl.u32 %v9718_v39, 16  ;;  %17585 = vmatpush3.bf16.msra.mxu0 %v19171_v40 }
 0x26f   : > { %v8333_v19 = vrot.slane %v8331_v16, 5  ;;  %9264 = vmatprep.mubr.bf16.mxu1 %v15728_v22  ;;  %v8318_v45 = vor.u32 %v8317_v44, %v8314_v1  ;;  %v9854_v32 = vshll.u32 %v9718_v39, 16  ;;  %v9860_v21 = vshll.u32 %v9719_v54, 16  ;;  %v19168_v22 = vld [vmem:[%s20303_s30 + $0x48] sm:$0xff]  }
 0x270   : > { %v9849_v57 = vsel %vm19552_vm2, %v9844_v55, %v9848_v13  ;;  %9265 = vmatmul.mubr.bf16.gmra.mrb[124].mxu1 %v19166_v33  ;;  %v8328_v27 = vor.u32 %v8327_v25, %v8323_v2  ;;  %v9853_v31 = vrot.slane %v9851_v62, 4  ;;  %v9864_v4 = vshrl.u32 %v9719_v54, 16  ;;  %v19172_v13 = vld [vmem:[%s23359_s3 + $0x450] sm:$0xff]  }
 0x271   : > { %v15912_v5 = vcombine.low %v9839_v15, %v9849_v57  ;;  %v8319_v58 = vrot.slane %v8318_v45, 4  ;;  %v9856_v59 = vrot.slane %v9854_v32, 5  ;;  %v9862_v28 = vrot.slane %v9860_v21, 5  ;;  %v17113_v15 = vpop.f32.mrb[153].mxu0  ;;  %v15692_v55 = vld [vmem:[%s20303_s30 + $0x54] sm:$0xf]  ;;  %18096 = vmatprep.subr.bf16.mxu1 %v19172_v13 }
 0x272   : > { %v9870_v9 = vshll.u32 %v9720_v7, 16  ;;  %v8329_v16 = vrot.slane %v8328_v27, 4  ;;  %v9866_v40 = vrot.slane %v9864_v4, 4  ;;  %v21509_v33 = vadd.f32 %v20916_v52, %v21455_v34  ;;  %18097 = vmatpush3.bf16.msra.mxu1 %v19172_v13  ;;  %v9721_v32 = vld [vmem:[%s21403_s19 + $0x3c] sm:$0xf]  ;;  %v19169_v4 = vld [vmem:[%s21403_s19 + $0x30] sm:$0xff]  }
 0x273   : > { %10803 = vmatprep.mubr.bf16.mxu0 %v15912_v5  ;;  %v21513_v39 = vadd.f32 %v20928_v14, %v21467_v42  ;;  %v8324_v1 = vsel %vm19552_vm2, %v8319_v58, %v8323_v2  ;;  %v9857_v54 = vor.u32 %v9856_v59, %v9853_v31  ;;  %v21520_v44 = vadd.f32 %v20951_v0, %v21477_v12  ;;  %v17115_v14 = vpop.f32.mrb[154].mxu0  ;;  %v15693_v42 = vld [vmem:[%s20303_s30 + $0x58] sm:$0xf]  ;;  %v9722_v27 = vld [vmem:[%s21403_s19 + $0x40] sm:$0xf] }
 0x274   : > { %10804 = vmatmul.mubr.bf16.gmra.mrb[252].mxu0 %v19167_v38  ;;  %v9872_v7 = vrot.slane %v9870_v9, 5  ;;  %v8334_v52 = vsel %vm19552_vm2, %v8329_v16, %v8333_v19  ;;  %v9867_v34 = vor.u32 %v9866_v40, %v9862_v28  ;;  %v21524_v25 = vadd.f32 %v17113_v15, %v17112_v8  ;;  %v15694_v38 = vld [vmem:[%s20303_s30 + $0x5c] sm:$0x1]  ;;  %v17116_v45 = vpop.f32.mrb[155].mxu0  ;;  %v9723_v16 = vld [vmem:[%s21403_s19 + $0x44] sm:$0x1] }
 0x275   : > { %v8336_v2 = vshrl.u32 %v15692_v55, 16  ;;  %v15729_v62 = vcombine.low %v8324_v1, %v8334_v52  ;;  %v9858_v57 = vrot.slane %v9857_v54, 4  ;;  %v8339_v0 = vshll.u32 %v15692_v55, 16  ;;  %v17118_v15 = vpop.f32.mrb[156].mxu0 }
 0x276   : > { %v8345_v12 = vshll.u32 %v15693_v42, 16  ;;  %v9868_v21 = vrot.slane %v9867_v34, 4  ;;  %v21529_v19 = vadd.f32 %v17116_v45, %v17115_v14  ;;  %v8349_v5 = vshrl.u32 %v15693_v42, 16 }
 0x277   : > { %v8338_v8 = vrot.slane %v8336_v2, 4  ;;  %9272 = vmatprep.mubr.bf16.mxu1 %v15729_v62  ;;  %v9863_v31 = vsel %vm19552_vm2, %v9858_v57, %v9862_v28  ;;  %v8341_v58 = vrot.slane %v8339_v0, 5  ;;  %v8355_v9 = vshll.u32 %v15694_v38, 16  ;;  %v17119_v38 = vpop.f32.mrb[157].mxu0 }
 0x278   : > { %v8347_v59 = vrot.slane %v8345_v12, 5  ;;  %v9873_v40 = vsel %vm19552_vm2, %v9868_v21, %v9872_v7  ;;  %9273 = vmatmul.mubr.bf16.gmra.mrb[128].mxu1 %v19168_v22  ;;  %v8351_v13 = vrot.slane %v8349_v5, 4  ;;  %v9875_v1 = vshrl.u32 %v9721_v32, 16  ;;  %v17121_v0 = vpop.f32.mrb[158].mxu0  ;;  %v15695_v12 = vld [vmem:[%s20303_s30 + $0x60] sm:$0xf] }
 0x279   : > { %v9878_v54 = vshll.u32 %v9721_v32, 16  ;;  %v15913_v55 = vcombine.low %v9863_v31, %v9873_v40  ;;  %v8342_v52 = vor.u32 %v8341_v58, %v8338_v8  ;;  %v8357_v34 = vrot.slane %v8355_v9, 5  ;;  %v17122_v5 = vpop.f32.mrb[159].mxu0  ;;  %v15696_v31 = vld [vmem:[%s20303_s30 + $0x64] sm:$0xf] }
 0x27a   : > { %v9884_v14 = vshll.u32 %v9722_v27, 16  ;;  %v8352_v42 = vor.u32 %v8351_v13, %v8347_v59  ;;  %v9877_v28 = vrot.slane %v9875_v1, 4  ;;  %v9888_v62 = vshrl.u32 %v9722_v27, 16  ;;  %v15697_v40 = vld [vmem:[%s20303_s30 + $0x68] sm:$0x1] }
 0x27b   : > { %v9880_v2 = vrot.slane %v9878_v54, 5  ;;  %10811 = vmatprep.mubr.bf16.mxu0 %v15913_v55  ;;  %v8343_v57 = vrot.slane %v8342_v52, 4  ;;  %v9894_v22 = vshll.u32 %v9723_v16, 16  ;;  %v21538_v45 = vadd.f32 %v17119_v38, %v17118_v15  ;;  %v9724_v1 = vld [vmem:[%s21403_s19 + $0x48] sm:$0xf]  ;;  %v19173_v55 = vld [vmem:[%s20303_s30 + $0x54] sm:$0xff]  }
 0x27c   : > { %v9886_v7 = vrot.slane %v9884_v14, 5  ;;  %10812 = vmatmul.mubr.bf16.gmra.mrb[0].mxu0 %v19169_v4  ;;  %v8353_v32 = vrot.slane %v8352_v42, 4  ;;  %v9890_v8 = vrot.slane %v9888_v62, 4  ;;  %v8360_v27 = vshrl.u32 %v15695_v12, 16  ;;  %v9725_v14 = vld [vmem:[%s21403_s19 + $0x4c] sm:$0xf] }
 0x27d   : > { %v9881_v21 = vor.u32 %v9880_v2, %v9877_v28  ;;  %v8348_v58 = vsel %vm19552_vm2, %v8343_v57, %v8347_v59  ;;  %v9896_v9 = vrot.slane %v9894_v22, 5  ;;  %v21544_v16 = vadd.f32 %v17122_v5, %v17121_v0  ;;  %v9726_v62 = vld [vmem:[%s21403_s19 + $0x50] sm:$0x1]  ;;  %v19174_v22 = vld [vmem:[%s21403_s19 + $0x3c] sm:$0xff]  }
 0x27e   : > { %v8363_v13 = vshll.u32 %v15695_v12, 16  ;;  %v8358_v4 = vsel %vm19552_vm2, %v8353_v32, %v8357_v34  ;;  %v9891_v15 = vor.u32 %v9890_v8, %v9886_v7  ;;  %v8362_v52 = vrot.slane %v8360_v27, 4  ;;  %v19177_v8 = vld [vmem:[%s23359_s3 + $0x598] sm:$0xff]  }
 0x27f   : > { %v9882_v54 = vrot.slane %v9881_v21, 4  ;;  %v15730_v42 = vcombine.low %v8348_v58, %v8358_v4  ;;  %v8369_v2 = vshll.u32 %v15696_v31, 16  ;;  %v8373_v59 = vshrl.u32 %v15696_v31, 16  ;;  %17586 = vmatprep.subr.bf16.mxu0 %v19177_v8 }
 0x280   : > { %v8365_v28 = vrot.slane %v8363_v13, 5  ;;  %v9892_v57 = vrot.slane %v9891_v15, 4  ;;  %v8379_v0 = vshll.u32 %v15697_v40, 16  ;;  %v9899_v12 = vshrl.u32 %v9724_v1, 16  ;;  %v19178_v40 = vld [vmem:[%s23359_s3 + $0x558] sm:$0xff]  }
 0x281   : > { %v9887_v38 = vsel %vm19552_vm2, %v9882_v54, %v9886_v7  ;;  %9280 = vmatprep.mubr.bf16.mxu1 %v15730_v42  ;;  %v8371_v34 = vrot.slane %v8369_v2, 5  ;;  %v8375_v32 = vrot.slane %v8373_v59, 4  ;;  %v9902_v21 = vshll.u32 %v9724_v1, 16  ;;  %17587 = vmatpush3.bf16.msra.mxu0 %v19178_v40 }
 0x282   : > { %v8366_v5 = vor.u32 %v8365_v28, %v8362_v52  ;;  %v9897_v31 = vsel %vm19552_vm2, %v9892_v57, %v9896_v9  ;;  %9281 = vmatmul.mubr.bf16.gmra.mrb[132].mxu1 %v19173_v55  ;;  %v8381_v27 = vrot.slane %v8379_v0, 5  ;;  %v9901_v58 = vrot.slane %v9899_v12, 4  ;;  %v17124_v28 = vpop.f32.mrb[160].mxu0 }
 0x283   : > { %v9908_v7 = vshll.u32 %v9725_v14, 16  ;;  %v15914_v13 = vcombine.low %v9887_v38, %v9897_v31  ;;  %v8376_v54 = vor.u32 %v8375_v32, %v8371_v34  ;;  %v9904_v1 = vrot.slane %v9902_v21, 5  ;;  %v19175_v38 = vld [vmem:[%s20303_s30 + $0x60] sm:$0xff]   ;;  %v17125_v57 = vpop.f32.mrb[161].mxu0  ;;  %v15699_v32 = vld [vmem:[%s20303_s30 + $0x70] sm:$0xf] }
 0x284   : > { %v8367_v4 = vrot.slane %v8366_v5, 4  ;;  %v9912_v52 = vshrl.u32 %v9725_v14, 16  ;;  %v9918_v42 = vshll.u32 %v9726_v62, 16  ;;  %v21566_v9 = vadd.f32 %v20962_v36, %v21484_v61  ;;  %v19179_v61 = vld [vmem:[%s23359_s3 + $0x458] sm:$0xff]   ;;  %v17127_v12 = vpop.f32.mrb[162].mxu0 }
 0x285   : > { %v9910_v15 = vrot.slane %v9908_v7, 5  ;;  %10819 = vmatprep.mubr.bf16.mxu0 %v15914_v13  ;;  %v8377_v2 = vrot.slane %v8376_v54, 4  ;;  %v9905_v59 = vor.u32 %v9904_v1, %v9901_v58  ;;  %v21573_v14 = vadd.f32 %v20990_v10, %v21524_v25  ;;  %18098 = vmatprep.subr.bf16.mxu1 %v19179_v61  ;;  %v9727_v7 = vld [vmem:[%s21403_s19 + $0x54] sm:$0xf] }
 0x286   : > { %v8372_v55 = vsel %vm19552_vm2, %v8367_v4, %v8371_v34  ;;  %10820 = vmatmul.mubr.bf16.gmra.mrb[4].mxu0 %v19174_v22  ;;  %v9914_v62 = vrot.slane %v9912_v52, 4  ;;  %v9920_v0 = vrot.slane %v9918_v42, 5  ;;  %v21575_v36 = vadd.f32 %v17125_v57, %v17124_v28  ;;  %v17128_v22 = vpop.f32.mrb[163].mxu0  ;;  %v15698_v34 = vld [vmem:[%s20303_s30 + $0x6c] sm:$0xf]  ;;  %18099 = vmatpush3.bf16.msra.mxu1 %v19179_v61 }
 0x287   : > { %v21582_v5 = vadd.f32 %v20996_v11, %v21529_v19  ;;  %v8382_v10 = vsel %vm19552_vm2, %v8377_v2, %v8381_v27  ;;  %v9906_v25 = vrot.slane %v9905_v59, 4  ;;  %v21590_v21 = vadd.f32 %v21025_v48, %v21538_v45  ;;  %v15700_v27 = vld [vmem:[%s20303_s30 + $0x74] sm:$0x1]  ;;  %v9728_v4 = vld [vmem:[%s21403_s19 + $0x58] sm:$0xf] }
 0x288   : > { %v21594_v8 = vadd.f32 %v21030_v26, %v21544_v16  ;;  %v15731_v31 = vcombine.low %v8372_v55, %v8382_v10  ;;  %v9915_v11 = vor.u32 %v9914_v62, %v9910_v15  ;;  %v21596_v19 = vadd.f32 %v17128_v22, %v17127_v12  ;;  %v19176_v16 = vld [vmem:[%s21403_s19 + $0x48] sm:$0xff]   ;;  %v9729_v52 = vld [vmem:[%s21403_s19 + $0x5c] sm:$0x1]  ;;  %v17130_v12 = vpop.f32.mrb[164].mxu0 }
 0x289   : > { %v8384_v58 = vshrl.u32 %v15698_v34, 16  ;;  %v9911_v40 = vsel %vm19552_vm2, %v9906_v25, %v9910_v15  ;;  %v8387_v48 = vshll.u32 %v15698_v34, 16  ;;  %v8393_v45 = vshll.u32 %v15699_v32, 16 }
 0x28a   : > { %v8397_v13 = vshrl.u32 %v15699_v32, 16  ;;  %9288 = vmatprep.mubr.bf16.mxu1 %v15731_v31  ;;  %v9916_v26 = vrot.slane %v9915_v11, 4  ;;  %v8403_v1 = vshll.u32 %v15700_v27, 16  ;;  %v9923_v42 = vshrl.u32 %v9727_v7, 16  ;;  %v17131_v32 = vpop.f32.mrb[165].mxu0 }
 0x28b   : > { %v8386_v54 = vrot.slane %v8384_v58, 4  ;;  %9289 = vmatmul.mubr.bf16.gmra.mrb[136].mxu1 %v19175_v38  ;;  %v8389_v28 = vrot.slane %v8387_v48, 5  ;;  %v8395_v55 = vrot.slane %v8393_v45, 5  ;;  %v9926_v59 = vshll.u32 %v9727_v7, 16  ;;  %v17133_v58 = vpop.f32.mrb[166].mxu0 }
 0x28c   : > { %v8399_v2 = vrot.slane %v8397_v13, 4  ;;  %v9921_v15 = vsel %vm19552_vm2, %v9916_v26, %v9920_v0  ;;  %v8405_v57 = vrot.slane %v8403_v1, 5  ;;  %v9925_v62 = vrot.slane %v9923_v42, 4  ;;  %v15701_v7 = vld [vmem:[%s20303_s30 + $0x78] sm:$0xf] }
 0x28d   : > { %v9932_v61 = vshll.u32 %v9728_v4, 16  ;;  %v15915_v10 = vcombine.low %v9911_v40, %v9921_v15  ;;  %v8390_v25 = vor.u32 %v8389_v28, %v8386_v54  ;;  %v9928_v34 = vrot.slane %v9926_v59, 5  ;;  %v17134_v40 = vpop.f32.mrb[167].mxu0  ;;  %v15702_v13 = vld [vmem:[%s20303_s30 + $0x7c] sm:$0xf] }
 0x28e   : > { %v8400_v22 = vor.u32 %v8399_v2, %v8395_v55  ;;  %v9936_v38 = vshrl.u32 %v9728_v4, 16  ;;  %v9942_v11 = vshll.u32 %v9729_v52, 16  ;;  %v21607_v27 = vadd.f32 %v17131_v32, %v17130_v12  ;;  %v19180_v4 = vld [vmem:[%s20303_s30 + $0x6c] sm:$0xff]   ;;  %v15703_v42 = vld [vmem:[%s20303_s30 + $0x80] sm:$0x1] }
 0x28f   : > { %v9934_v31 = vrot.slane %v9932_v61, 5  ;;  %10827 = vmatprep.mubr.bf16.mxu0 %v15915_v10  ;;  %v8391_v0 = vrot.slane %v8390_v25, 4  ;;  %v9929_v45 = vor.u32 %v9928_v34, %v9925_v62  ;;  %v8408_v26 = vshrl.u32 %v15701_v7, 16  ;;  %v9730_v61 = vld [vmem:[%s21403_s19 + $0x60] sm:$0xf] }
 0x290   : > { %v8401_v48 = vrot.slane %v8400_v22, 4  ;;  %10828 = vmatmul.mubr.bf16.gmra.mrb[8].mxu0 %v19176_v16  ;;  %v9938_v54 = vrot.slane %v9936_v38, 4  ;;  %v9944_v1 = vrot.slane %v9942_v11, 5  ;;  %v17135_v52 = vadd.f32 %v17134_v40, %v17133_v58  ;;  %v9731_v12 = vld [vmem:[%s21403_s19 + $0x64] sm:$0xf] }
 0x291   : > { %v8411_v28 = vshll.u32 %v15701_v7, 16  ;;  %v8396_v2 = vsel %vm19552_vm2, %v8391_v0, %v8395_v55  ;;  %v9930_v15 = vrot.slane %v9929_v45, 4  ;;  %v8410_v62 = vrot.slane %v8408_v26, 4  ;;  %v9732_v34 = vld [vmem:[%s21403_s19 + $0x68] sm:$0x1]  ;;  %v19181_v7 = vld [vmem:[%s21403_s19 + $0x54] sm:$0xff]  }
 0x292   : > { %v8406_v59 = vsel %vm19552_vm2, %v8401_v48, %v8405_v57  ;;  %v9939_v16 = vor.u32 %v9938_v54, %v9934_v31  ;;  %v8417_v22 = vshll.u32 %v15702_v13, 16  ;;  %v8421_v38 = vshrl.u32 %v15702_v13, 16  ;;  %v19184_v45 = vld [vmem:[%s23359_s3 + $0x5a0] sm:$0xff]  }
 0x293   : > { %v15732_v10 = vcombine.low %v8396_v2, %v8406_v59  ;;  %v8413_v25 = vrot.slane %v8411_v28, 5  ;;  %v9935_v32 = vsel %vm19552_vm2, %v9930_v15, %v9934_v31  ;;  %v8427_v11 = vshll.u32 %v15703_v42, 16  ;;  %17588 = vmatprep.subr.bf16.mxu0 %v19184_v45  ;;  %v19185_v59 = vld [vmem:[%s23359_s3 + $0x560] sm:$0xff]   ;;  %v15705_v45 = vld [vmem:[%s20303_s30 + $0x88] sm:$0xf] }
 0x294   : > { %v9947_v58 = vshrl.u32 %v9730_v61, 16  ;;  %v9940_v55 = vrot.slane %v9939_v16, 4  ;;  %v8419_v0 = vrot.slane %v8417_v22, 5  ;;  %v9950_v48 = vshll.u32 %v9730_v61, 16  ;;  %17589 = vmatpush3.bf16.msra.mxu0 %v19185_v59 }
 0x295   : > { %9296 = vmatprep.mubr.bf16.mxu1 %v15732_v10  ;;  %v8414_v57 = vor.u32 %v8413_v25, %v8410_v62  ;;  %v8423_v40 = vrot.slane %v8421_v38, 4  ;;  %v8429_v26 = vrot.slane %v8427_v11, 5  ;;  %v9956_v28 = vshll.u32 %v9731_v12, 16 }
 0x296   : > { %9297 = vmatmul.mubr.bf16.gmra.mrb[140].mxu1 %v19180_v4  ;;  %v9949_v54 = vrot.slane %v9947_v58, 4  ;;  %v9945_v31 = vsel %vm19552_vm2, %v9940_v55, %v9944_v1  ;;  %v9952_v42 = vrot.slane %v9950_v48, 5  ;;  %v9960_v2 = vshrl.u32 %v9731_v12, 16  ;;  %v17136_v1 = vpop.f32.mrb[168].mxu0  ;;  %v15704_v48 = vld [vmem:[%s20303_s30 + $0x84] sm:$0xf] }
 0x297   : > { %v8415_v13 = vrot.slane %v8414_v57, 4  ;;  %v15916_v15 = vcombine.low %v9935_v32, %v9945_v31  ;;  %v8424_v62 = vor.u32 %v8423_v40, %v8419_v0  ;;  %v9958_v61 = vrot.slane %v9956_v28, 5  ;;  %v19182_v32 = vld [vmem:[%s20303_s30 + $0x78] sm:$0xff]   ;;  %v17137_v11 = vpop.f32.mrb[169].mxu0 }
 0x298   : > { %v9966_v4 = vshll.u32 %v9732_v34, 16  ;;  %v9953_v16 = vor.u32 %v9952_v42, %v9949_v54  ;;  %v9962_v25 = vrot.slane %v9960_v2, 4  ;;  %v21635_v12 = vadd.f32 %v21053_v51, %v21575_v36  ;;  %v19186_v34 = vld [vmem:[%s23359_s3 + $0x460] sm:$0xff]  }
 0x299   : > { %v8420_v10 = vsel %vm19552_vm2, %v8415_v13, %v8419_v0  ;;  %10835 = vmatprep.mubr.bf16.mxu0 %v15916_v15  ;;  %v8425_v22 = vrot.slane %v8424_v62, 4  ;;  %v21643_v58 = vadd.f32 %v21064_v46, %v21596_v19  ;;  %v21647_v55 = vadd.f32 %v21088_v20, %v21607_v27  ;;  %v17139_v0 = vpop.f32.mrb[170].mxu0  ;;  %18100 = vmatprep.subr.bf16.mxu1 %v19186_v34  ;;  %v15706_v20 = vld [vmem:[%s20303_s30 + $0x8c] sm:$0x1]  ;;  %v9735_v62 = vld [vmem:[%s21403_s19 + $0x74] sm:$0x1] }
 0x29a   : > { %v9968_v38 = vrot.slane %v9966_v4, 5  ;;  %10836 = vmatmul.mubr.bf16.gmra.mrb[12].mxu0 %v19181_v7  ;;  %v9954_v51 = vrot.slane %v9953_v16, 4  ;;  %v9963_v36 = vor.u32 %v9962_v25, %v9958_v61  ;;  %v17138_v57 = vadd.f32 %v17137_v11, %v17136_v1  ;;  %v17140_v19 = vpop.f32.mrb[171].mxu0  ;;  %18101 = vmatpush3.bf16.msra.mxu1 %v19186_v34  ;;  %v19183_v16 = vld [vmem:[%s21403_s19 + $0x60] sm:$0xff]  }
 0x29b   : > { %v21652_v40 = vadd.f32 %v21098_v17, %v17135_v52  ;;  %v8430_v46 = vsel %vm19552_vm2, %v8425_v22, %v8429_v26  ;;  %v8432_v27 = vshrl.u32 %v15704_v48, 16  ;;  %v8435_v7 = vshll.u32 %v15704_v48, 16  ;;  %v9733_v17 = vld [vmem:[%s21403_s19 + $0x6c] sm:$0xf]  ;;  %v9734_v52 = vld [vmem:[%s21403_s19 + $0x70] sm:$0xf] }
 0x29c   : > { %v8441_v54 = vshll.u32 %v15705_v45, 16  ;;  %v15733_v28 = vcombine.low %v8420_v10, %v8430_v46  ;;  %v9959_v31 = vsel %vm19552_vm2, %v9954_v51, %v9958_v61  ;;  %v9964_v13 = vrot.slane %v9963_v36, 4 }
 0x29d   : > { %v17141_v42 = vadd.f32 %v17140_v19, %v17139_v0  ;;  %v8434_v2 = vrot.slane %v8432_v27, 4  ;;  %v8437_v59 = vrot.slane %v8435_v7, 5  ;;  %v8445_v15 = vshrl.u32 %v15705_v45, 16  ;;  %v15707_v27 = vld [vmem:[%s20303_s30 + $0x90] sm:$0xf] }
 0x29e   : > { %v8443_v26 = vrot.slane %v8441_v54, 5  ;;  %9304 = vmatprep.mubr.bf16.mxu1 %v15733_v28  ;;  %v9969_v4 = vsel %vm19552_vm2, %v9964_v13, %v9968_v38  ;;  %v8451_v25 = vshll.u32 %v15706_v20, 16  ;;  %v9971_v10 = vshrl.u32 %v9733_v17, 16  ;;  %v17142_v20 = vpop.f32.mrb[172].mxu0  ;;  %v15708_v28 = vld [vmem:[%s20303_s30 + $0x94] sm:$0xf] }
 0x29f   : > { %v9974_v1 = vshll.u32 %v9733_v17, 16  ;;  %v15917_v61 = vcombine.low %v9959_v31, %v9969_v4  ;;  %9305 = vmatmul.mubr.bf16.gmra.mrb[144].mxu1 %v19182_v32  ;;  %v8438_v22 = vor.u32 %v8437_v59, %v8434_v2  ;;  %v8447_v11 = vrot.slane %v8445_v15, 4  ;;  %v17143_v54 = vpop.f32.mrb[173].mxu0  ;;  %v19187_v59 = vld [vmem:[%s20303_s30 + $0x84] sm:$0xff]   ;;  %v15709_v4 = vld [vmem:[%s20303_s30 + $0x98] sm:$0x1] }
 0x2a0   : > { %v9980_v34 = vshll.u32 %v9734_v52, 16  ;;  %v8453_v51 = vrot.slane %v8451_v25, 5  ;;  %v9973_v36 = vrot.slane %v9971_v10, 4  ;;  %v9984_v48 = vshrl.u32 %v9734_v52, 16 }
 0x2a1   : > { %v9976_v0 = vrot.slane %v9974_v1, 5  ;;  %10843 = vmatprep.mubr.bf16.mxu0 %v15917_v61  ;;  %v8439_v45 = vrot.slane %v8438_v22, 4  ;;  %v8448_v46 = vor.u32 %v8447_v11, %v8443_v26  ;;  %v9990_v19 = vshll.u32 %v9735_v62, 16  ;;  %v17145_v62 = vpop.f32.mrb[174].mxu0  ;;  %v9737_v22 = vld [vmem:[%s21403_s19 + $0x7c] sm:$0xf] }
 0x2a2   : > { %v9982_v38 = vrot.slane %v9980_v34, 5  ;;  %10844 = vmatmul.mubr.bf16.gmra.mrb[16].mxu0 %v19183_v16  ;;  %v9986_v32 = vrot.slane %v9984_v48, 4  ;;  %v21668_v31 = vadd.f32 %v21128_v37, %v17138_v57  ;;  %v21671_v13 = vadd.f32 %v21130_v6, %v17141_v42  ;;  %v17146_v10 = vpop.f32.mrb[175].mxu0  ;;  %v9736_v57 = vld [vmem:[%s21403_s19 + $0x78] sm:$0xf] }
 0x2a3   : > { %v9977_v7 = vor.u32 %v9976_v0, %v9973_v36  ;;  %v8444_v17 = vsel %vm19552_vm2, %v8439_v45, %v8443_v26  ;;  %v8449_v52 = vrot.slane %v8448_v46, 4  ;;  %v9992_v2 = vrot.slane %v9990_v19, 5  ;;  %v9738_v48 = vld [vmem:[%s21403_s19 + $0x80] sm:$0x1] }
 0x2a4   : > { %v17144_v15 = vadd.f32 %v17143_v54, %v17142_v20  ;;  %v9987_v25 = vor.u32 %v9986_v32, %v9982_v38  ;;  %v8456_v1 = vshrl.u32 %v15707_v27, 16  ;;  %v8459_v37 = vshll.u32 %v15707_v27, 16  ;;  %v19188_v27 = vld [vmem:[%s21403_s19 + $0x6c] sm:$0xff]  }
 0x2a5   : > { %v9978_v16 = vrot.slane %v9977_v7, 4  ;;  %v8454_v6 = vsel %vm19552_vm2, %v8449_v52, %v8453_v51  ;;  %v17147_v42 = vadd.f32 %v17146_v10, %v17145_v62  ;;  %v8465_v26 = vshll.u32 %v15708_v28, 16  ;;  %v19191_v62 = vld [vmem:[%s23359_s3 + $0x5a8] sm:$0xff]  }
 0x2a6   : > { %v8469_v61 = vshrl.u32 %v15708_v28, 16  ;;  %v15734_v11 = vcombine.low %v8444_v17, %v8454_v6  ;;  %v9988_v36 = vrot.slane %v9987_v25, 4  ;;  %v8458_v0 = vrot.slane %v8456_v1, 4  ;;  %17590 = vmatprep.subr.bf16.mxu0 %v19191_v62  ;;  %v17188_v6 = vpop.f32.mrb[176].mxu0 }
 0x2a7   : > { %v9983_v34 = vsel %vm19552_vm2, %v9978_v16, %v9982_v38  ;;  %v8461_v45 = vrot.slane %v8459_v37, 5  ;;  %v8467_v46 = vrot.slane %v8465_v26, 5  ;;  %v8475_v20 = vshll.u32 %v15709_v4, 16  ;;  %v19193_v26 = vld [vmem:[%s23359_s3 + $0x468] sm:$0xff]  }
 0x2a8   : > { %v8471_v19 = vrot.slane %v8469_v61, 4  ;;  %9312 = vmatprep.mubr.bf16.mxu1 %v15734_v11  ;;  %v9993_v51 = vsel %vm19552_vm2, %v9988_v36, %v9992_v2  ;;  %v9995_v7 = vshrl.u32 %v9736_v57, 16  ;;  %v9998_v32 = vshll.u32 %v9736_v57, 16  ;;  %v19189_v57 = vld [vmem:[%s20303_s30 + $0x90] sm:$0xff]   ;;  %18102 = vmatprep.subr.bf16.mxu1 %v19193_v26 }
 0x2a9   : > { %v10004_v54 = vshll.u32 %v9737_v22, 16  ;;  %v15918_v28 = vcombine.low %v9983_v34, %v9993_v51  ;;  %9313 = vmatmul.mubr.bf16.gmra.mrb[148].mxu1 %v19187_v59  ;;  %v8462_v17 = vor.u32 %v8461_v45, %v8458_v0  ;;  %v8477_v52 = vrot.slane %v8475_v20, 5  ;;  %v19192_v59 = vld [vmem:[%s23359_s3 + $0x568] sm:$0xff]   ;;  %v17189_v34 = vpop.f32.mrb[177].mxu0  ;;  %v15711_v20 = vld [vmem:[%s20303_s30 + $0xa0] sm:$0xf] }
 0x2aa   : > { %v8472_v38 = vor.u32 %v8471_v19, %v8467_v46  ;;  %v9997_v16 = vrot.slane %v9995_v7, 4  ;;  %v10000_v4 = vrot.slane %v9998_v32, 5  ;;  %v10008_v10 = vshrl.u32 %v9737_v22, 16  ;;  %17591 = vmatpush3.bf16.msra.mxu0 %v19192_v59  ;;  %18103 = vmatpush3.bf16.msra.mxu1 %v19193_v26 }
 0x2ab   : > { %v10006_v25 = vrot.slane %v10004_v54, 5  ;;  %10851 = vmatprep.mubr.bf16.mxu0 %v15918_v28  ;;  %v8463_v2 = vrot.slane %v8462_v17, 4  ;;  %v10014_v37 = vshll.u32 %v9738_v48, 16  ;;  %v21698_v61 = vadd.f32 %v21160_v60, %v17144_v15  ;;  %v17191_v60 = vpop.f32.mrb[178].mxu0  ;;  %v15710_v15 = vld [vmem:[%s20303_s30 + $0x9c] sm:$0xf] }
 0x2ac   : > { %v8473_v1 = vrot.slane %v8472_v38, 4  ;;  %10852 = vmatmul.mubr.bf16.gmra.mrb[20].mxu0 %v19188_v27  ;;  %v10001_v22 = vor.u32 %v10000_v4, %v9997_v16  ;;  %v10010_v11 = vrot.slane %v10008_v10, 4  ;;  %v21701_v36 = vadd.f32 %v21165_v18, %v17147_v42  ;;  %v17192_v42 = vpop.f32.mrb[179].mxu0  ;;  %v9739_v38 = vld [vmem:[%s21403_s19 + $0x84] sm:$0xf]  ;;  %v19190_v4 = vld [vmem:[%s21403_s19 + $0x78] sm:$0xff]  }
 0x2ad   : > { %v8468_v0 = vsel %vm19552_vm2, %v8463_v2, %v8467_v46  ;;  %v10016_v45 = vrot.slane %v10014_v37, 5  ;;  %v17190_v19 = vadd.f32 %v17189_v34, %v17188_v6  ;;  %v15712_v46 = vld [vmem:[%s20303_s30 + $0xa4] sm:$0x1]  ;;  %v8480_v7 = vshrl.u32 %v15710_v15, 16  ;;  %v17194_v26 = vpop.f32.mrb[180].mxu0 }
 0x2ae   : > { %v8478_v48 = vsel %vm19552_vm2, %v8473_v1, %v8477_v52  ;;  %v10002_v27 = vrot.slane %v10001_v22, 4  ;;  %v10011_v18 = vor.u32 %v10010_v11, %v10006_v25  ;;  %v17193_v54 = vadd.f32 %v17192_v42, %v17191_v60  ;;  %v9740_v52 = vld [vmem:[%s21403_s19 + $0x88] sm:$0xf]  ;;  %v9741_v1 = vld [vmem:[%s21403_s19 + $0x8c] sm:$0x1] }
 0x2af   : > { %v15735_v51 = vcombine.low %v8468_v0, %v8478_v48  ;;  %v21711_v32 = vadd.f32 %v21201_v24, %v17190_v19  ;;  %v8483_v28 = vshll.u32 %v15710_v15, 16  ;;  %v8489_v17 = vshll.u32 %v15711_v20, 16  ;;  %v17195_v0 = vpop.f32.mrb[181].mxu0 }
 0x2b0   : > { %v10007_v62 = vsel %vm19552_vm2, %v10002_v27, %v10006_v25  ;;  %v10012_v16 = vrot.slane %v10011_v18, 4  ;;  %v8482_v10 = vrot.slane %v8480_v7, 4  ;;  %v8493_v2 = vshrl.u32 %v15711_v20, 16  ;;  %v17197_v27 = vpop.f32.mrb[182].mxu0  ;;  %v15713_v18 = vld [vmem:[%s20303_s30 + $0xa8] sm:$0xf] }
 0x2b1   : > { %9320 = vmatprep.mubr.bf16.mxu1 %v15735_v51  ;;  %v21720_v37 = vadd.f32 %v21204_v30, %v17193_v54  ;;  %v8485_v24 = vrot.slane %v8483_v28, 5  ;;  %v8491_v59 = vrot.slane %v8489_v17, 5  ;;  %v8499_v6 = vshll.u32 %v15712_v46, 16  ;;  %v17198_v54 = vpop.f32.mrb[183].mxu0 }
 0x2b2   : > { %9321 = vmatmul.mubr.bf16.gmra.mrb[152].mxu1 %v19189_v57  ;;  %v10017_v22 = vsel %vm19552_vm2, %v10012_v16, %v10016_v45  ;;  %v8495_v11 = vrot.slane %v8493_v2, 4  ;;  %v10019_v34 = vshrl.u32 %v9739_v38, 16  ;;  %v10022_v25 = vshll.u32 %v9739_v38, 16  ;;  %v15714_v16 = vld [vmem:[%s20303_s30 + $0xac] sm:$0xf] }
 0x2b3   : > { %v15919_v48 = vcombine.low %v10007_v62, %v10017_v22  ;;  %v8486_v19 = vor.u32 %v8485_v24, %v8482_v10  ;;  %v8501_v60 = vrot.slane %v8499_v6, 5  ;;  %v10028_v15 = vshll.u32 %v9740_v52, 16  ;;  %v15715_v10 = vld [vmem:[%s20303_s30 + $0xb0] sm:$0x1] }
 0x2b4   : > { %v8496_v57 = vor.u32 %v8495_v11, %v8491_v59  ;;  %v10021_v20 = vrot.slane %v10019_v34, 4  ;;  %v10024_v30 = vrot.slane %v10022_v25, 5  ;;  %v10032_v51 = vshrl.u32 %v9740_v52, 16  ;;  %v9742_v6 = vld [vmem:[%s21403_s19 + $0x90] sm:$0xf]  ;;  %v19194_v34 = vld [vmem:[%s20303_s30 + $0x9c] sm:$0xff]  }
 0x2b5   : > { %10859 = vmatprep.mubr.bf16.mxu0 %v15919_v48  ;;  %v8487_v42 = vrot.slane %v8486_v19, 4  ;;  %v10030_v45 = vrot.slane %v10028_v15, 5  ;;  %v10038_v46 = vshll.u32 %v9741_v1, 16  ;;  %v17196_v7 = vadd.f32 %v17195_v0, %v17194_v26  ;;  %v9743_v26 = vld [vmem:[%s21403_s19 + $0x94] sm:$0xf] }
 0x2b6   : > { %10860 = vmatmul.mubr.bf16.gmra.mrb[24].mxu0 %v19190_v4  ;;  %v8497_v28 = vrot.slane %v8496_v57, 4  ;;  %v10025_v17 = vor.u32 %v10024_v30, %v10021_v20  ;;  %v10034_v38 = vrot.slane %v10032_v51, 4  ;;  %v17199_v62 = vadd.f32 %v17198_v54, %v17197_v27  ;;  %v9744_v15 = vld [vmem:[%s21403_s19 + $0x98] sm:$0x1]  ;;  %v19195_v20 = vld [vmem:[%s21403_s19 + $0x84] sm:$0xff]  }
 0x2b7   : > { %v8492_v52 = vsel %vm19552_vm2, %v8487_v42, %v8491_v59  ;;  %v10040_v2 = vrot.slane %v10038_v46, 5  ;;  %v21730_v24 = vadd.f32 %v21242_v3, %v17196_v7  ;;  %v8504_v1 = vshrl.u32 %v15713_v18, 16 }
 0x2b8   : > { %v8502_v4 = vsel %vm19552_vm2, %v8497_v28, %v8501_v60  ;;  %v10026_v22 = vrot.slane %v10025_v17, 4  ;;  %v10035_v11 = vor.u32 %v10034_v38, %v10030_v45  ;;  %v21738_v25 = vadd.f32 %v21246_v49, %v17199_v62  ;;  %v19198_v60 = vld [vmem:[%s23359_s3 + $0x5b0] sm:$0xff]  }
 0x2b9   : > { %v15736_v0 = vcombine.low %v8492_v52, %v8502_v4  ;;  %v8506_v48 = vrot.slane %v8504_v1, 4  ;;  %v8507_v59 = vshll.u32 %v15713_v18, 16  ;;  %v8513_v19 = vshll.u32 %v15714_v16, 16  ;;  %17592 = vmatprep.subr.bf16.mxu0 %v19198_v60  ;;  %v19199_v28 = vld [vmem:[%s23359_s3 + $0x570] sm:$0xff]  }
 0x2ba   : > { %v10031_v3 = vsel %vm19552_vm2, %v10026_v22, %v10030_v45  ;;  %v10036_v57 = vrot.slane %v10035_v11, 4  ;;  %v8517_v30 = vshrl.u32 %v15714_v16, 16  ;;  %v8523_v51 = vshll.u32 %v15715_v10, 16  ;;  %17593 = vmatpush3.bf16.msra.mxu0 %v19199_v28 }
 0x2bb   : > { %9328 = vmatprep.mubr.bf16.mxu1 %v15736_v0  ;;  %v8509_v27 = vrot.slane %v8507_v59, 5  ;;  %v8515_v49 = vrot.slane %v8513_v19, 5  ;;  %v10043_v42 = vshrl.u32 %v9742_v6, 16  ;;  %v10046_v46 = vshll.u32 %v9742_v6, 16  ;;  %v15716_v19 = vld [vmem:[%s20303_s30 + $0xb4] sm:$0xf] }
 0x2bc   : > { %v10041_v18 = vsel %vm19552_vm2, %v10036_v57, %v10040_v2  ;;  %9329 = vmatmul.mubr.bf16.gmra.mrb[156].mxu1 %v19194_v34  ;;  %v8519_v7 = vrot.slane %v8517_v30, 4  ;;  %v8525_v54 = vrot.slane %v8523_v51, 5  ;;  %v10052_v45 = vshll.u32 %v9743_v26, 16  ;;  %v17200_v2 = vpop.f32.mrb[184].mxu0  ;;  %v19200_v34 = vld [vmem:[%s23359_s3 + $0x470] sm:$0xff]  }
 0x2bd   : > { %v15920_v17 = vcombine.low %v10031_v3, %v10041_v18  ;;  %v8510_v38 = vor.u32 %v8509_v27, %v8506_v48  ;;  %v10045_v62 = vrot.slane %v10043_v42, 4  ;;  %v10048_v16 = vrot.slane %v10046_v46, 5  ;;  %v17201_v11 = vpop.f32.mrb[185].mxu0  ;;  %18104 = vmatprep.subr.bf16.mxu1 %v19200_v34  ;;  %v15717_v51 = vld [vmem:[%s20303_s30 + $0xb8] sm:$0xf]  ;;  %v19196_v27 = vld [vmem:[%s20303_s30 + $0xa8] sm:$0xff]  }
 0x2be   : > { %v8520_v10 = vor.u32 %v8519_v7, %v8515_v49  ;;  %v10054_v52 = vrot.slane %v10052_v45, 5  ;;  %v10056_v1 = vshrl.u32 %v9743_v26, 16  ;;  %v10062_v6 = vshll.u32 %v9744_v15, 16  ;;  %v17203_v26 = vpop.f32.mrb[186].mxu0  ;;  %18105 = vmatpush3.bf16.msra.mxu1 %v19200_v34  ;;  %v15718_v18 = vld [vmem:[%s20303_s30 + $0xbc] sm:$0x1] }
 0x2bf   : > { %10867 = vmatprep.mubr.bf16.mxu0 %v15920_v17  ;;  %v8511_v4 = vrot.slane %v8510_v38, 4  ;;  %v10049_v22 = vor.u32 %v10048_v16, %v10045_v62  ;;  %v17202_v59 = vadd.f32 %v17201_v11, %v17200_v2  ;;  %v17204_v30 = vpop.f32.mrb[187].mxu0  ;;  %v8528_v28 = vshrl.u32 %v15716_v19, 16  ;;  %v9746_v38 = vld [vmem:[%s21403_s19 + $0xa0] sm:$0xf]  ;;  %v19197_v16 = vld [vmem:[%s21403_s19 + $0x90] sm:$0xff]  }
 0x2c0   : > { %10868 = vmatmul.mubr.bf16.gmra.mrb[28].mxu0 %v19195_v20  ;;  %v8521_v0 = vrot.slane %v8520_v10, 4  ;;  %v10058_v48 = vrot.slane %v10056_v1, 4  ;;  %v10064_v57 = vrot.slane %v10062_v6, 5  ;;  %v17205_v46 = vadd.f32 %v17204_v30, %v17203_v26  ;;  %v9747_v1 = vld [vmem:[%s21403_s19 + $0xa4] sm:$0x1] }
 0x2c1   : > { %v8516_v15 = vsel %vm19552_vm2, %v8511_v4, %v8515_v49  ;;  %v10050_v3 = vrot.slane %v10049_v22, 4  ;;  %v21763_v42 = vadd.f32 %v21274_v43, %v17202_v59  ;;  %v9745_v49 = vld [vmem:[%s21403_s19 + $0x9c] sm:$0xf]  ;;  %v8531_v17 = vshll.u32 %v15716_v19, 16  ;;  %v15719_v59 = vld [vmem:[%s20303_s30 + $0xc0] sm:$0xf] }
 0x2c2   : > { %v8526_v20 = vsel %vm19552_vm2, %v8521_v0, %v8525_v54  ;;  %v10059_v60 = vor.u32 %v10058_v48, %v10054_v52  ;;  %v21772_v54 = vadd.f32 %v21280_v50, %v17205_v46  ;;  %v8537_v10 = vshll.u32 %v15717_v51, 16  ;;  %v17206_v48 = vpop.f32.mrb[188].mxu0 }
 0x2c3   : > { %v15737_v7 = vcombine.low %v8516_v15, %v8526_v20  ;;  %v10055_v45 = vsel %vm19552_vm2, %v10050_v3, %v10054_v52  ;;  %v8541_v43 = vshrl.u32 %v15717_v51, 16  ;;  %v8530_v6 = vrot.slane %v8528_v28, 4  ;;  %v17207_v3 = vpop.f32.mrb[189].mxu0 }
 0x2c4   : > { %v10060_v62 = vrot.slane %v10059_v60, 4  ;;  %v8533_v2 = vrot.slane %v8531_v17, 5  ;;  %v8547_v4 = vshll.u32 %v15718_v18, 16  ;;  %v10067_v22 = vshrl.u32 %v9745_v49, 16 }
 0x2c5   : > { %9336 = vmatprep.mubr.bf16.mxu1 %v15737_v7  ;;  %v8539_v11 = vrot.slane %v8537_v10, 5  ;;  %v8543_v34 = vrot.slane %v8541_v43, 4  ;;  %v10070_v0 = vshll.u32 %v9745_v49, 16  ;;  %v10076_v20 = vshll.u32 %v9746_v38, 16 }
 0x2c6   : > { %v10065_v52 = vsel %vm19552_vm2, %v10060_v62, %v10064_v57  ;;  %9337 = vmatmul.mubr.bf16.gmra.mrb[160].mxu1 %v19196_v27  ;;  %v8534_v26 = vor.u32 %v8533_v2, %v8530_v6  ;;  %v8549_v19 = vrot.slane %v8547_v4, 5  ;;  %v10069_v15 = vrot.slane %v10067_v22, 4  ;;  %v17209_v57 = vpop.f32.mrb[190].mxu0  ;;  %v15720_v27 = vld [vmem:[%s20303_s30 + $0xc4] sm:$0xf]  ;;  %v19201_v6 = vld [vmem:[%s20303_s30 + $0xb4] sm:$0xff]  }
 0x2c7   : > { %v15921_v50 = vcombine.low %v10055_v45, %v10065_v52  ;;  %v8544_v30 = vor.u32 %v8543_v34, %v8539_v11  ;;  %v10072_v51 = vrot.slane %v10070_v0, 5  ;;  %v10080_v60 = vshrl.u32 %v9746_v38, 16  ;;  %v17210_v7 = vpop.f32.mrb[191].mxu0  ;;  %v15721_v45 = vld [vmem:[%s20303_s30 + $0xc8] sm:$0x1] }
 0x2c8   : > { %v8535_v46 = vrot.slane %v8534_v26, 4  ;;  %v10086_v18 = vshll.u32 %v9747_v1, 16  ;;  %v17208_v49 = vadd.f32 %v17207_v3, %v17206_v48  ;;  %v8552_v28 = vshrl.u32 %v15719_v59, 16  ;;  %v9748_v2 = vld [vmem:[%s21403_s19 + $0xa8] sm:$0xf] }
 0x2c9   : > { %10875 = vmatprep.mubr.bf16.mxu0 %v15921_v50  ;;  %v8545_v17 = vrot.slane %v8544_v30, 4  ;;  %v10073_v62 = vor.u32 %v10072_v51, %v10069_v15  ;;  %v10078_v10 = vrot.slane %v10076_v20, 5  ;;  %v10082_v43 = vrot.slane %v10080_v60, 4  ;;  %v9749_v52 = vld [vmem:[%s21403_s19 + $0xac] sm:$0xf]  ;;  %v19202_v20 = vld [vmem:[%s21403_s19 + $0x9c] sm:$0xff]  }
 0x2ca   : > { %10876 = vmatmul.mubr.bf16.gmra.mrb[32].mxu0 %v19197_v16  ;;  %v8540_v38 = vsel %vm19552_vm2, %v8535_v46, %v8539_v11  ;;  %v10088_v4 = vrot.slane %v10086_v18, 5  ;;  %v21785_v22 = vadd.f32 %v21310_v41, %v17208_v49  ;;  %v17211_v1 = vadd.f32 %v17210_v7, %v17209_v57  ;;  %v19205_v16 = vld [vmem:[%s23359_s3 + $0x5b8] sm:$0xff]   ;;  %v9750_v3 = vld [vmem:[%s21403_s19 + $0xb0] sm:$0x1] }
 0x2cb   : > { %v8550_v34 = vsel %vm19552_vm2, %v8545_v17, %v8549_v19  ;;  %v10074_v0 = vrot.slane %v10073_v62, 4  ;;  %v10083_v48 = vor.u32 %v10082_v43, %v10078_v10  ;;  %v8554_v50 = vrot.slane %v8552_v28, 4  ;;  %17594 = vmatprep.subr.bf16.mxu0 %v19205_v16  ;;  %v19206_v19 = vld [vmem:[%s23359_s3 + $0x578] sm:$0xff]   ;;  %v17212_v62 = vpop.f32.mrb[192].mxu0 }
 0x2cc   : > { %v15738_v26 = vcombine.low %v8540_v38, %v8550_v34  ;;  %v21794_v11 = vadd.f32 %v21320_v63, %v17211_v1  ;;  %v8555_v15 = vshll.u32 %v15719_v59, 16  ;;  %v8561_v41 = vshll.u32 %v15720_v27, 16  ;;  %17595 = vmatpush3.bf16.msra.mxu0 %v19206_v19  ;;  %v17213_v38 = vpop.f32.mrb[193].mxu0  ;;  %v19207_v1 = vld [vmem:[%s23359_s3 + $0x478] sm:$0xff]  }
 0x2cd   : > { %v10079_v30 = vsel %vm19552_vm2, %v10074_v0, %v10078_v10  ;;  %v10084_v51 = vrot.slane %v10083_v48, 4  ;;  %v8565_v60 = vshrl.u32 %v15720_v27, 16  ;;  %v8571_v57 = vshll.u32 %v15721_v45, 16  ;;  %18106 = vmatprep.subr.bf16.mxu1 %v19207_v1 }
 0x2ce   : > { %9344 = vmatprep.mubr.bf16.mxu1 %v15738_v26  ;;  %v8557_v46 = vrot.slane %v8555_v15, 5  ;;  %v8563_v18 = vrot.slane %v8561_v41, 5  ;;  %v10091_v63 = vshrl.u32 %v9748_v2, 16  ;;  %v10094_v49 = vshll.u32 %v9748_v2, 16  ;;  %v15722_v15 = vld [vmem:[%s20303_s30 + $0xcc] sm:$0xf]  ;;  %18107 = vmatpush3.bf16.msra.mxu1 %v19207_v1 }
 0x2cf   : > { %v10089_v59 = vsel %vm19552_vm2, %v10084_v51, %v10088_v4  ;;  %9345 = vmatmul.mubr.bf16.gmra.mrb[164].mxu1 %v19201_v6  ;;  %v8567_v7 = vrot.slane %v8565_v60, 4  ;;  %v8573_v28 = vrot.slane %v8571_v57, 5  ;;  %v10100_v17 = vshll.u32 %v9749_v52, 16  ;;  %v17215_v4 = vpop.f32.mrb[194].mxu0  ;;  %v15723_v60 = vld [vmem:[%s20303_s30 + $0xd0] sm:$0xf] }
 0x2d0   : > { %v15922_v27 = vcombine.low %v10079_v30, %v10089_v59  ;;  %v8558_v45 = vor.u32 %v8557_v46, %v8554_v50  ;;  %v10093_v10 = vrot.slane %v10091_v63, 4  ;;  %v10096_v43 = vrot.slane %v10094_v49, 5  ;;  %v17216_v50 = vpop.f32.mrb[195].mxu0  ;;  %v15724_v46 = vld [vmem:[%s20303_s30 + $0xd4] sm:$0x1] }
 0x2d1   : > { %v8568_v2 = vor.u32 %v8567_v7, %v8563_v18  ;;  %v10102_v16 = vrot.slane %v10100_v17, 5  ;;  %v10104_v34 = vshrl.u32 %v9749_v52, 16  ;;  %v10110_v6 = vshll.u32 %v9750_v3, 16  ;;  %v9751_v49 = vld [vmem:[%s21403_s19 + $0xb4] sm:$0xf]  ;;  %v19203_v7 = vld [vmem:[%s20303_s30 + $0xc0] sm:$0xff]  }
 0x2d2   : > { %10883 = vmatprep.mubr.bf16.mxu0 %v15922_v27  ;;  %v8559_v0 = vrot.slane %v8558_v45, 4  ;;  %v10097_v48 = vor.u32 %v10096_v43, %v10093_v10  ;;  %v17214_v26 = vadd.f32 %v17213_v38, %v17212_v62  ;;  %v17217_v52 = vadd.f32 %v17216_v50, %v17215_v4  ;;  %v9752_v27 = vld [vmem:[%s21403_s19 + $0xb8] sm:$0xf]  ;;  %v9753_v43 = vld [vmem:[%s21403_s19 + $0xbc] sm:$0x1] }
 0x2d3   : > { %10884 = vmatmul.mubr.bf16.gmra.mrb[36].mxu0 %v19202_v20  ;;  %v8569_v41 = vrot.slane %v8568_v2, 4  ;;  %v10106_v30 = vrot.slane %v10104_v34, 4  ;;  %v10112_v51 = vrot.slane %v10110_v6, 5  ;;  %v8576_v63 = vshrl.u32 %v15722_v15, 16  ;;  %v19204_v34 = vld [vmem:[%s21403_s19 + $0xa8] sm:$0xff]  }
 0x2d4   : > { %v8564_v3 = vsel %vm19552_vm2, %v8559_v0, %v8563_v18  ;;  %v10098_v57 = vrot.slane %v10097_v48, 4  ;;  %v21813_v19 = vadd.f32 %v21349_v29, %v17214_v26  ;;  %v21821_v17 = vadd.f32 %v21352_v53, %v17217_v52  ;;  %v17218_v48 = vpop.f32.mrb[196].mxu0  ;;  %v19211_v52 = vld [vmem:[%s23359_s3 + $0x640] sm:$0xff]  }
 0x2d5   : > { %v8574_v20 = vsel %vm19552_vm2, %v8569_v41, %v8573_v28  ;;  %v10107_v59 = vor.u32 %v10106_v30, %v10102_v16  ;;  %v8579_v62 = vshll.u32 %v15722_v15, 16  ;;  %v8578_v29 = vrot.slane %v8576_v63, 4  ;;  %v17219_v41 = vpop.f32.mrb[197].mxu0  ;;  %v15741_v30 = vld [vmem:[%s20303_s30 + $0x18] sm:$0xe]  ;;  %17716 = vmatprep.subr.bf16.mxu0 %v19211_v52 }
 0x2d6   : > { %v15739_v18 = vcombine.low %v8564_v3, %v8574_v20  ;;  %v10103_v45 = vsel %vm19552_vm2, %v10098_v57, %v10102_v16  ;;  %v8585_v10 = vshll.u32 %v15723_v60, 16  ;;  %v8589_v2 = vshrl.u32 %v15723_v60, 16  ;;  %v17221_v63 = vpop.f32.mrb[198].mxu0 }
 0x2d7   : > { %v10108_v38 = vrot.slane %v10107_v59, 4  ;;  %v8581_v1 = vrot.slane %v8579_v62, 5  ;;  %v8595_v28 = vshll.u32 %v15724_v46, 16  ;;  %v10115_v4 = vshrl.u32 %v9751_v49, 16  ;;  %v15742_v62 = vld [vmem:[%s20303_s30 + $0x1c] sm:$0xf] }
 0x2d8   : > { %9352 = vmatprep.mubr.bf16.mxu1 %v15739_v18  ;;  %v8587_v6 = vrot.slane %v8585_v10, 5  ;;  %v10118_v53 = vshll.u32 %v9751_v49, 16  ;;  %v10124_v0 = vshll.u32 %v9752_v27, 16  ;;  %v8591_v50 = vrot.slane %v8589_v2, 4 }
 0x2d9   : > { %v10113_v26 = vsel %vm19552_vm2, %v10108_v38, %v10112_v51  ;;  %9353 = vmatmul.mubr.bf16.gmra.mrb[168].mxu1 %v19203_v7  ;;  %v8582_v16 = vor.u32 %v8581_v1, %v8578_v29  ;;  %v8597_v15 = vrot.slane %v8595_v28, 5  ;;  %v10117_v3 = vrot.slane %v10115_v4, 4  ;;  %v17222_v7 = vpop.f32.mrb[199].mxu0  ;;  %v16077_v1 = vld [vmem:[%s21403_s19 + $0xc] sm:$0xf] }
 0x2da   : > { %v15923_v60 = vcombine.low %v10103_v45, %v10113_v26  ;;  %v10120_v57 = vrot.slane %v10118_v53, 5  ;;  %v10126_v46 = vrot.slane %v10124_v0, 5  ;;  %v8592_v51 = vor.u32 %v8591_v50, %v8587_v6  ;;  %v15743_v45 = vld [vmem:[%s20303_s30 + $0x20] sm:$0x1]  ;;  %v19208_v4 = vld [vmem:[%s20303_s30 + $0xcc] sm:$0xff]   ;;  %v17224_v0 = vpop.f32.mrb[200].mxu0 }
 0x2db   : > { %v8583_v49 = vrot.slane %v8582_v16, 4  ;;  %v10128_v20 = vshrl.u32 %v9752_v27, 16  ;;  %v10134_v59 = vshll.u32 %v9753_v43, 16  ;;  %v17220_v29 = vadd.f32 %v17219_v41, %v17218_v48  ;;  %v16078_v53 = vld [vmem:[%s21403_s19 + $0x10] sm:$0xf] }
 0x2dc   : > { %10891 = vmatprep.mubr.bf16.mxu0 %v15923_v60  ;;  %v10121_v18 = vor.u32 %v10120_v57, %v10117_v3  ;;  %v17223_v10 = vadd.f32 %v17222_v7, %v17221_v63  ;;  %v15789_v38 = vrot.slane %v15741_v30, 9  ;;  %v8593_v27 = vrot.slane %v8592_v51, 4  ;;  %v16079_v50 = vld [vmem:[%s21403_s19 + $0x14] sm:$0x1]  ;;  %v15744_v41 = vld [vmem:[%s20303_s30 + $0x24] sm:$0xe] }
 0x2dd   : > { %10892 = vmatmul.mubr.bf16.gmra.mrb[40].mxu0 %v19204_v34  ;;  %v8588_v2 = vsel %vm19552_vm2, %v8583_v49, %v8587_v6  ;;  %v10130_v43 = vrot.slane %v10128_v20, 4  ;;  %v10136_v28 = vrot.slane %v10134_v59, 5  ;;  %v21842_v48 = vadd.f32 %v21377_v23, %v17220_v29  ;;  %v15745_v3 = vld [vmem:[%s20303_s30 + $0x28] sm:$0xf]  ;;  %v15746_v51 = vld [vmem:[%s20303_s30 + $0x2c] sm:$0x1] }
 0x2de   : > { %v10122_v26 = vrot.slane %v10121_v18, 4  ;;  %v21845_v16 = vadd.f32 %v21387_v56, %v17223_v10  ;;  %v8777_v34 = vrot.slane %v15742_v62, 5  ;;  %v8598_v6 = vsel %vm19552_vm2, %v8593_v27, %v8597_v15  ;;  %v17225_v20 = vpop.f32.mrb[201].mxu0  ;;  %v19209_v7 = vld [vmem:[%s21403_s19 + $0xb4] sm:$0xff]  }
 0x2df   : > { %v10131_v30 = vor.u32 %v10130_v43, %v10126_v46  ;;  %v8780_v52 = vrot.slane %v15743_v45, 5  ;;  %v11295_v60 = vshrl.u32 %v16077_v1, 16  ;;  %v15740_v57 = vcombine.low %v8588_v2, %v8598_v6 }
 0x2e0   : > { %v10127_v63 = vsel %vm19552_vm2, %v10122_v26, %v10126_v46  ;;  %v8778_v49 = vsel %vm19670_vm5, %v15789_v38, %v8777_v34  ;;  %v8779_v56 = vrot.slane %v8777_v34, 4  ;;  %v11298_v18 = vshll.u32 %v16077_v1, 16  ;;  %v19213_v46 = vld [vmem:[%s23359_s3 + $0x500] sm:$0xff]  }
 0x2e1   : > { %v10132_v59 = vrot.slane %v10131_v30, 4  ;;  %v11297_v62 = vrot.slane %v11295_v60, 4  ;;  %v11304_v29 = vshll.u32 %v16078_v53, 16  ;;  %9360 = vmatprep.mubr.bf16.mxu1 %v15740_v57  ;;  %v11308_v10 = vshrl.u32 %v16078_v53, 16  ;;  %18140 = vmatprep.subr.bf16.mxu1 %v19213_v46  ;;  %v15747_v60 = vld [vmem:[%s20303_s30 + $0x30] sm:$0xe] }
 0x2e2   : > { %v8781_v15 = vsel %vm19670_vm5, %v8779_v56, %v8780_v52  ;;  %v11314_v45 = vshll.u32 %v16079_v50, 16  ;;  %v15790_v2 = vrot.slane %v15744_v41, 9  ;;  %9361 = vmatmul.mubr.bf16.gmra.mrb[172].mxu1 %v19208_v4  ;;  %v11300_v1 = vrot.slane %v11298_v18, 5  ;;  %v17227_v50 = vpop.f32.mrb[202].mxu0  ;;  %v15748_v4 = vld [vmem:[%s20303_s30 + $0x34] sm:$0xf] }
 0x2e3   : > { %v10137_v38 = vsel %vm19552_vm2, %v10132_v59, %v10136_v28  ;;  %v15805_v27 = vcombine.low %v8778_v49, %v8781_v15  ;;  %v11306_v43 = vrot.slane %v11304_v29, 5  ;;  %v11310_v34 = vrot.slane %v11308_v10, 4  ;;  %v17228_v28 = vpop.f32.mrb[203].mxu0  ;;  %v15749_v56 = vld [vmem:[%s20303_s30 + $0x38] sm:$0x1] }
 0x2e4   : > { %v15924_v26 = vcombine.low %v10127_v63, %v10137_v38  ;;  %v11316_v6 = vrot.slane %v11314_v45, 5  ;;  %v8784_v53 = vrot.slane %v15745_v3, 5  ;;  %v11301_v41 = vor.u32 %v11300_v1, %v11297_v62  ;;  %v16080_v59 = vld [vmem:[%s21403_s19 + $0x18] sm:$0xf]  ;;  %v16081_v29 = vld [vmem:[%s21403_s19 + $0x1c] sm:$0xf] }
 0x2e5   : > { %18108 = vmatprep.mubr.bf16.mxu1 %v15805_v27  ;;  %v8787_v30 = vrot.slane %v15746_v51, 5  ;;  %v17226_v52 = vadd.f32 %v17225_v20, %v17224_v0  ;;  %v11311_v57 = vor.u32 %v11310_v34, %v11306_v43  ;;  %v17229_v3 = vadd.f32 %v17228_v28, %v17227_v50  ;;  %v23385_v51 = vld [vmem:[#allocation10_spill] sm:$0xff]  ;;  %v17230_v15 = vpop.f32.mrb[204].mxu0  ;;  %v16082_v1 = vld [vmem:[%s21403_s19 + $0x20] sm:$0x1] }
 0x2e6   : > { %10899 = vmatprep.mubr.bf16.mxu0 %v15924_v26  ;;  %v8785_v63 = vsel %vm19670_vm5, %v15790_v2, %v8784_v53  ;;  %v8786_v49 = vrot.slane %v8784_v53, 4  ;;  %v11302_v62 = vrot.slane %v11301_v41, 4  ;;  %v15791_v20 = vrot.slane %v15747_v60, 9  ;;  %v23386_v2 = vld [vmem:[#allocation11_spill] sm:$0xff]  ;;  %v15752_v28 = vld [vmem:[%s20303_s30 + $0x44] sm:$0x1] }
 0x2e7   : > { %10900 = vmatmul.mubr.bf16.gmra.mrb[44].mxu0 %v19209_v7  ;;  %v21872_v0 = vadd.f32 %v23385_v51, %v17226_v52  ;;  %v8791_v18 = vrot.slane %v15748_v4, 5  ;;  %v11312_v10 = vrot.slane %v11311_v57, 4  ;;  %v21878_v38 = vadd.f32 %v23386_v2, %v17229_v3  ;;  %v15750_v7 = vld [vmem:[%s20303_s30 + $0x3c] sm:$0xe]  ;;  %v19210_v53 = vld [vmem:[%s21403_s19 + $0xc] sm:$0xff]   ;;  %v17231_v60 = vpop.f32.mrb[205].mxu0 }
 0x2e8   : > { %v8788_v45 = vsel %vm19670_vm5, %v8786_v49, %v8787_v30  ;;  %v8794_v27 = vrot.slane %v15749_v56, 5  ;;  %v11307_v26 = vsel %vm19552_vm2, %v11302_v62, %v11306_v43  ;;  %v15751_v52 = vld [vmem:[%s20303_s30 + $0x40] sm:$0xf]  ;;  %v11319_v57 = vshrl.u32 %v16080_v59, 16  ;;  %v19215_v43 = vld [vmem:[%s23359_s3 + $0x508] sm:$0xff]  }
 0x2e9   : > { %23387 = vst [vmem:[#allocation9_spill] sm:$0xff] %v21878_v38  ;;  %v15806_v34 = vcombine.low %v8785_v63, %v8788_v45  ;;  %v8792_v50 = vsel %vm19670_vm5, %v15791_v20, %v8791_v18  ;;  %v8793_v41 = vrot.slane %v8791_v18, 4  ;;  %v11317_v30 = vsel %vm19552_vm2, %v11312_v10, %v11316_v6  ;;  %v19212_v4 = vld [vmem:[%s23359_s3 + $0x600] sm:$0xff]  }
 0x2ea   : > { %v11322_v49 = vshll.u32 %v16080_v59, 16  ;;  %v11328_v3 = vshll.u32 %v16081_v29, 16  ;;  %v16125_v63 = vcombine.low %v11307_v26, %v11317_v30  ;;  %v11332_v62 = vshrl.u32 %v16081_v29, 16  ;;  %v17233_v59 = vpop.f32.mrb[206].mxu0  ;;  %v19217_v30 = vld [vmem:[%s23359_s3 + $0x648] sm:$0xff]  }
 0x2eb   : > { %18109 = vmatmul.mubr.bf16.vlgmr.msra.gmra.mrb[16].mxu1 %v15806_v34  ;;  %v8795_v56 = vsel %vm19670_vm5, %v8793_v41, %v8794_v27  ;;  %v11338_v51 = vshll.u32 %v16082_v1, 16  ;;  %v11321_v20 = vrot.slane %v11319_v57, 4  ;;  %v15792_v38 = vrot.slane %v15750_v7, 9  ;;  %v17234_v34 = vpop.f32.mrb[207].mxu0  ;;  %v15754_v41 = vld [vmem:[%s20303_s30 + $0x4c] sm:$0xf] }
 0x2ec   : > { %18141 = vmatpush3.bf16.msra.mxu1 %v19213_v46  ;;  %v15807_v6 = vcombine.low %v8792_v50, %v8795_v56  ;;  %v11324_v18 = vrot.slane %v11322_v49, 5  ;;  %v11330_v10 = vrot.slane %v11328_v3, 5  ;;  %12319 = vmatprep.mubr.bf16.mxu0 %v16125_v63  ;;  %v11334_v45 = vrot.slane %v11332_v62, 4  ;;  %v15753_v50 = vld [vmem:[%s20303_s30 + $0x48] sm:$0xe]  ;;  %v23388_v63 = vld [vmem:[#allocation12_spill] sm:$0xff] }
 0x2ed   : > { %v11340_v2 = vrot.slane %v11338_v51, 5  ;;  %v8798_v26 = vrot.slane %v15751_v52, 5  ;;  %18142 = vmatprep.subr.bf16.mxu1 %v19215_v43  ;;  %v8801_v27 = vrot.slane %v15752_v28, 5  ;;  %v17232_v46 = vadd.f32 %v17231_v60, %v17230_v15  ;;  %v15755_v49 = vld [vmem:[%s20303_s30 + $0x50] sm:$0x1] }
 0x2ee   : > { %18112 = vmatprep.mubr.bf16.mxu1 %v15807_v6  ;;  %v11325_v29 = vor.u32 %v11324_v18, %v11321_v20  ;;  %v17235_v1 = vadd.f32 %v17234_v34, %v17233_v59  ;;  %v11335_v7 = vor.u32 %v11334_v45, %v11330_v10  ;;  %v15793_v28 = vrot.slane %v15753_v50, 9  ;;  %v16083_v15 = vld [vmem:[%s21403_s19 + $0x24] sm:$0xf]  ;;  %v16084_v62 = vld [vmem:[%s21403_s19 + $0x28] sm:$0xf]  ;;  %v19214_v20 = vld [vmem:[%s21403_s19 + $0x18] sm:$0xff]  }
 0x2ef   : > { %12320 = vmatmul.mubr.bf16.vlgmr.msra.gmra.mrb[48].mxu0 %v19210_v53  ;;  %v8799_v52 = vsel %vm19670_vm5, %v15792_v38, %v8798_v26  ;;  %v8800_v57 = vrot.slane %v8798_v26, 4  ;;  %v21909_v3 = vadd.f32 %v21449_v47, %v17232_v46  ;;  %v8805_v53 = vrot.slane %v15754_v41, 5  ;;  %v16085_v51 = vld [vmem:[%s21403_s19 + $0x2c] sm:$0x1]  ;;  %v15756_v59 = vld [vmem:[%s20303_s30 + $0x54] sm:$0xe] }
 0x2f0   : > { %17717 = vmatpush3.bf16.msra.mxu0 %v19212_v4  ;;  %v11326_v60 = vrot.slane %v11325_v29, 4  ;;  %18143 = vmatpush3.bf16.msra.mxu1 %v19215_v43  ;;  %v21912_v56 = vadd.f32 %v23388_v63, %v17235_v1  ;;  %v11336_v38 = vrot.slane %v11335_v7, 4  ;;  %v8808_v18 = vrot.slane %v15755_v49, 5  ;;  %v19218_v47 = vld [vmem:[%s23359_s3 + $0x608] sm:$0xff]   ;;  %v15757_v29 = vld [vmem:[%s20303_s30 + $0x58] sm:$0xf] }
 0x2f1   : > { %v8802_v6 = vsel %vm19670_vm5, %v8800_v57, %v8801_v27  ;;  %v11343_v4 = vshrl.u32 %v16083_v15, 16  ;;  %17718 = vmatprep.subr.bf16.mxu0 %v19217_v30  ;;  %v8806_v26 = vsel %vm19670_vm5, %v15793_v28, %v8805_v53  ;;  %v8807_v34 = vrot.slane %v8805_v53, 4  ;;  %v15758_v46 = vld [vmem:[%s20303_s30 + $0x5c] sm:$0x1]  ;;  %v17236_v27 = vpop.f32.mrb[208].mxu0 }
 0x2f2   : > { %v11331_v43 = vsel %vm19552_vm2, %v11326_v60, %v11330_v10  ;;  %v15808_v45 = vcombine.low %v8799_v52, %v8802_v6  ;;  %v11341_v1 = vsel %vm19552_vm2, %v11336_v38, %v11340_v2  ;;  %v11346_v41 = vshll.u32 %v16083_v15, 16  ;;  %v17237_v7 = vpop.f32.mrb[209].mxu0  ;;  %v19219_v2 = vld [vmem:[%s23359_s3 + $0x510] sm:$0xff]  }
 0x2f3   : > { %v11345_v50 = vrot.slane %v11343_v4, 4  ;;  %v11352_v30 = vshll.u32 %v16084_v62, 16  ;;  %v16126_v57 = vcombine.low %v11331_v43, %v11341_v1  ;;  %v8809_v10 = vsel %vm19670_vm5, %v8807_v34, %v8808_v18  ;;  %18144 = vmatprep.subr.bf16.mxu1 %v19219_v2  ;;  %v17239_v43 = vpop.f32.mrb[210].mxu0 }
 0x2f4   : > { %18113 = vmatmul.mubr.bf16.gmra.mrb[20].mxu1 %v15808_v45  ;;  %v11356_v52 = vshrl.u32 %v16084_v62, 16  ;;  %v11362_v49 = vshll.u32 %v16085_v51, 16  ;;  %17719 = vmatpush3.bf16.msra.mxu0 %v19218_v47  ;;  %v15809_v28 = vcombine.low %v8806_v26, %v8809_v10  ;;  %v11348_v60 = vrot.slane %v11346_v41, 5  ;;  %v15759_v45 = vld [vmem:[%s20303_s30 + $0x60] sm:$0xe] }
 0x2f5   : > { %v11354_v63 = vrot.slane %v11352_v30, 5  ;;  %v15794_v53 = vrot.slane %v15756_v59, 9  ;;  %12327 = vmatprep.mubr.bf16.mxu0 %v16126_v57  ;;  %v8812_v6 = vrot.slane %v15757_v29, 5  ;;  %v8815_v4 = vrot.slane %v15758_v46, 5  ;;  %v15760_v26 = vld [vmem:[%s20303_s30 + $0x64] sm:$0xf]  ;;  %18145 = vmatpush3.bf16.msra.mxu1 %v19219_v2 }
 0x2f6   : > { %v11358_v15 = vrot.slane %v11356_v52, 4  ;;  %v11364_v38 = vrot.slane %v11362_v49, 5  ;;  %18116 = vmatprep.mubr.bf16.mxu1 %v15809_v28  ;;  %v11349_v62 = vor.u32 %v11348_v60, %v11345_v50  ;;  %v17238_v51 = vadd.f32 %v17237_v7, %v17236_v27  ;;  %v15761_v46 = vld [vmem:[%s20303_s30 + $0x68] sm:$0x1]  ;;  %v16086_v57 = vld [vmem:[%s21403_s19 + $0x30] sm:$0xf] }
 0x2f7   : > { %12328 = vmatmul.mubr.bf16.gmra.mrb[52].mxu0 %v19214_v20  ;;  %v8813_v59 = vsel %vm19670_vm5, %v15794_v53, %v8812_v6  ;;  %v8814_v47 = vrot.slane %v8812_v6, 4  ;;  %v17240_v20 = vpop.f32.mrb[211].mxu0  ;;  %v15795_v27 = vrot.slane %v15759_v45, 9  ;;  %v8819_v1 = vrot.slane %v15760_v26, 5  ;;  %v16087_v10 = vld [vmem:[%s21403_s19 + $0x34] sm:$0xf] }
 0x2f8   : > { %v11359_v18 = vor.u32 %v11358_v15, %v11354_v63  ;;  %v11350_v34 = vrot.slane %v11349_v62, 4  ;;  %v21941_v29 = vadd.f32 %v21509_v33, %v17238_v51  ;;  %v17241_v30 = vadd.f32 %v17240_v20, %v17239_v43  ;;  %v19216_v49 = vld [vmem:[%s21403_s19 + $0x24] sm:$0xff]   ;;  %v16088_v53 = vld [vmem:[%s21403_s19 + $0x38] sm:$0x1]  ;;  %v15762_v2 = vld [vmem:[%s20303_s30 + $0x6c] sm:$0xe] }
 0x2f9   : > { %v8816_v41 = vsel %vm19670_vm5, %v8814_v47, %v8815_v4  ;;  %v8822_v7 = vrot.slane %v15761_v46, 5  ;;  %v8820_v28 = vsel %vm19670_vm5, %v15795_v27, %v8819_v1  ;;  %v8821_v60 = vrot.slane %v8819_v1, 4  ;;  %v15763_v51 = vld [vmem:[%s20303_s30 + $0x70] sm:$0xf]  ;;  %v17242_v46 = vpop.f32.mrb[212].mxu0 }
 0x2fa   : > { %v11360_v50 = vrot.slane %v11359_v18, 4  ;;  %v11355_v33 = vsel %vm19552_vm2, %v11350_v34, %v11354_v63  ;;  %v15810_v52 = vcombine.low %v8813_v59, %v8816_v41  ;;  %v21958_v6 = vadd.f32 %v21513_v39, %v17241_v30  ;;  %v15764_v18 = vld [vmem:[%s20303_s30 + $0x74] sm:$0x1]  ;;  %v19221_v41 = vld [vmem:[%s23359_s3 + $0x518] sm:$0xff]  }
 0x2fb   : > { %v11367_v4 = vshrl.u32 %v16086_v57, 16  ;;  %v11370_v62 = vshll.u32 %v16086_v57, 16  ;;  %v8823_v63 = vsel %vm19670_vm5, %v8821_v60, %v8822_v7  ;;  %v11376_v59 = vshll.u32 %v16087_v10, 16  ;;  %18146 = vmatprep.subr.bf16.mxu1 %v19221_v41 }
 0x2fc   : > { %v11365_v15 = vsel %vm19552_vm2, %v11360_v50, %v11364_v38  ;;  %18117 = vmatmul.mubr.bf16.gmra.mrb[24].mxu1 %v15810_v52  ;;  %v11380_v43 = vshrl.u32 %v16087_v10, 16  ;;  %v15811_v45 = vcombine.low %v8820_v28, %v8823_v63  ;;  %v11386_v20 = vshll.u32 %v16088_v53, 16  ;;  %v17243_v50 = vpop.f32.mrb[213].mxu0 }
 0x2fd   : > { %v16127_v47 = vcombine.low %v11355_v33, %v11365_v15  ;;  %v11369_v26 = vrot.slane %v11367_v4, 4  ;;  %v11372_v34 = vrot.slane %v11370_v62, 5  ;;  %v11378_v38 = vrot.slane %v11376_v59, 5  ;;  %v17245_v33 = vpop.f32.mrb[214].mxu0  ;;  %v15766_v15 = vld [vmem:[%s20303_s30 + $0x7c] sm:$0xf]  ;;  %18147 = vmatpush3.bf16.msra.mxu1 %v19221_v41 }
 0x2fe   : > { %v11382_v39 = vrot.slane %v11380_v43, 4  ;;  %v15796_v27 = vrot.slane %v15762_v2, 9  ;;  %v8826_v1 = vrot.slane %v15763_v51, 5  ;;  %18120 = vmatprep.mubr.bf16.mxu1 %v15811_v45  ;;  %v11388_v7 = vrot.slane %v11386_v20, 5  ;;  %v17246_v53 = vpop.f32.mrb[215].mxu0  ;;  %v19220_v43 = vld [vmem:[%s21403_s19 + $0x30] sm:$0xff]  }
 0x2ff   : > { %12335 = vmatprep.mubr.bf16.mxu0 %v16127_v47  ;;  %v11373_v30 = vor.u32 %v11372_v34, %v11369_v26  ;;  %v8829_v57 = vrot.slane %v15764_v18, 5  ;;  %v17244_v10 = vadd.f32 %v17243_v50, %v17242_v46  ;;  %v15765_v2 = vld [vmem:[%s20303_s30 + $0x78] sm:$0xe]  ;;  %v17247_v62 = vadd.f32 %v17246_v53, %v17245_v33  ;;  %v15767_v51 = vld [vmem:[%s20303_s30 + $0x80] sm:$0x1]  ;;  %v19224_v41 = vld [vmem:[%s23359_s3 + $0x610] sm:$0xff]  }
 0x300   : > { %12336 = vmatmul.mubr.bf16.gmra.mrb[56].mxu0 %v19216_v49  ;;  %v11383_v52 = vor.u32 %v11382_v39, %v11378_v38  ;;  %v8827_v28 = vsel %vm19670_vm5, %v15796_v27, %v8826_v1  ;;  %v8828_v60 = vrot.slane %v8826_v1, 4  ;;  %v15797_v18 = vrot.slane %v15765_v2, 9  ;;  %v16089_v47 = vld [vmem:[%s21403_s19 + $0x3c] sm:$0xf]  ;;  %v16090_v34 = vld [vmem:[%s21403_s19 + $0x40] sm:$0xf] }
 0x301   : > { %v11374_v49 = vrot.slane %v11373_v30, 4  ;;  %v21972_v4 = vadd.f32 %v21520_v44, %v17244_v10  ;;  %v8833_v45 = vrot.slane %v15766_v15, 5  ;;  %v8836_v26 = vrot.slane %v15767_v51, 5  ;;  %v19223_v44 = vld [vmem:[%s23359_s3 + $0x650] sm:$0xff]   ;;  %v16091_v27 = vld [vmem:[%s21403_s19 + $0x44] sm:$0x1] }
 0x302   : > { %v11384_v63 = vrot.slane %v11383_v52, 4  ;;  %v8830_v59 = vsel %vm19670_vm5, %v8828_v60, %v8829_v57  ;;  %v21986_v39 = vadd.f32 %v21566_v9, %v17247_v62  ;;  %v11391_v1 = vshrl.u32 %v16089_v47, 16  ;;  %v15768_v50 = vld [vmem:[%s20303_s30 + $0x84] sm:$0xe]  ;;  %v15770_v52 = vld [vmem:[%s20303_s30 + $0x8c] sm:$0x1]  ;;  %17720 = vmatprep.subr.bf16.mxu0 %v19223_v44 }
 0x303   : > { %v11379_v20 = vsel %vm19552_vm2, %v11374_v49, %v11378_v38  ;;  %v15812_v46 = vcombine.low %v8827_v28, %v8830_v59  ;;  %v8834_v57 = vsel %vm19670_vm5, %v15797_v18, %v8833_v45  ;;  %v8835_v10 = vrot.slane %v8833_v45, 4  ;;  %v15769_v38 = vld [vmem:[%s20303_s30 + $0x88] sm:$0xf]  ;;  %17721 = vmatpush3.bf16.msra.mxu0 %v19224_v41  ;;  %v17248_v2 = vpop.f32.mrb[216].mxu0  ;;  %v19225_v45 = vld [vmem:[%s23359_s3 + $0x520] sm:$0xff]  }
 0x304   : > { %v11389_v30 = vsel %vm19552_vm2, %v11384_v63, %v11388_v7  ;;  %v11394_v33 = vshll.u32 %v16089_v47, 16  ;;  %v11393_v28 = vrot.slane %v11391_v1, 4  ;;  %v11400_v60 = vshll.u32 %v16090_v34, 16  ;;  %v17249_v51 = vpop.f32.mrb[217].mxu0  ;;  %18148 = vmatprep.subr.bf16.mxu1 %v19225_v45 }
 0x305   : > { %v16128_v9 = vcombine.low %v11379_v20, %v11389_v30  ;;  %18121 = vmatmul.mubr.bf16.gmra.mrb[28].mxu1 %v15812_v46  ;;  %v11404_v53 = vshrl.u32 %v16090_v34, 16  ;;  %v8837_v15 = vsel %vm19670_vm5, %v8835_v10, %v8836_v26  ;;  %v11410_v7 = vshll.u32 %v16091_v27, 16 }
 0x306   : > { %v11396_v49 = vrot.slane %v11394_v33, 5  ;;  %v15798_v62 = vrot.slane %v15768_v50, 9  ;;  %v15813_v18 = vcombine.low %v8834_v57, %v8837_v15  ;;  %v11402_v47 = vrot.slane %v11400_v60, 5  ;;  %v17251_v50 = vpop.f32.mrb[218].mxu0  ;;  %18149 = vmatpush3.bf16.msra.mxu1 %v19225_v45  ;;  %v15771_v57 = vld [vmem:[%s20303_s30 + $0x90] sm:$0xe] }
 0x307   : > { %12343 = vmatprep.mubr.bf16.mxu0 %v16128_v9  ;;  %v11406_v63 = vrot.slane %v11404_v53, 4  ;;  %v8840_v59 = vrot.slane %v15769_v38, 5  ;;  %v11412_v44 = vrot.slane %v11410_v7, 5  ;;  %v8843_v20 = vrot.slane %v15770_v52, 5  ;;  %v19222_v38 = vld [vmem:[%s21403_s19 + $0x3c] sm:$0xff]  }
 0x308   : > { %12344 = vmatmul.mubr.bf16.gmra.mrb[60].mxu0 %v19220_v43  ;;  %v11397_v34 = vor.u32 %v11396_v49, %v11393_v28  ;;  %v17250_v26 = vadd.f32 %v17249_v51, %v17248_v2  ;;  %18124 = vmatprep.mubr.bf16.mxu1 %v15813_v18  ;;  %v17252_v43 = vpop.f32.mrb[219].mxu0  ;;  %v15772_v9 = vld [vmem:[%s20303_s30 + $0x94] sm:$0xf]  ;;  %v15773_v28 = vld [vmem:[%s20303_s30 + $0x98] sm:$0x1]  ;;  %v15799_v60 = vrot.slane %v15771_v57, 9 }
 0x309   : > { %v11407_v46 = vor.u32 %v11406_v63, %v11402_v47  ;;  %v8841_v27 = vsel %vm19670_vm5, %v15798_v62, %v8840_v59  ;;  %v8842_v1 = vrot.slane %v8840_v59, 4  ;;  %v17253_v52 = vadd.f32 %v17252_v43, %v17251_v50  ;;  %v16092_v49 = vld [vmem:[%s21403_s19 + $0x48] sm:$0xf]  ;;  %v16093_v7 = vld [vmem:[%s21403_s19 + $0x4c] sm:$0xf] }
 0x30a   : > { %v11398_v41 = vrot.slane %v11397_v34, 4  ;;  %v22007_v30 = vadd.f32 %v21573_v14, %v17250_v26  ;;  %v8847_v2 = vrot.slane %v15772_v9, 5  ;;  %v8850_v15 = vrot.slane %v15773_v28, 5  ;;  %v16094_v18 = vld [vmem:[%s21403_s19 + $0x50] sm:$0x1]  ;;  %v17254_v28 = vpop.f32.mrb[220].mxu0 }
 0x30b   : > { %v11408_v10 = vrot.slane %v11407_v46, 4  ;;  %v8844_v33 = vsel %vm19670_vm5, %v8842_v1, %v8843_v20  ;;  %v22022_v51 = vadd.f32 %v21582_v5, %v17253_v52  ;;  %v11415_v63 = vshrl.u32 %v16092_v49, 16  ;;  %v15774_v45 = vld [vmem:[%s20303_s30 + $0x9c] sm:$0xe]  ;;  %v15775_v46 = vld [vmem:[%s20303_s30 + $0xa0] sm:$0xf] }
 0x30c   : > { %v11403_v53 = vsel %vm19552_vm2, %v11398_v41, %v11402_v47  ;;  %v15814_v14 = vcombine.low %v8841_v27, %v8844_v33  ;;  %v11418_v59 = vshll.u32 %v16092_v49, 16  ;;  %v8848_v47 = vsel %vm19670_vm5, %v15799_v60, %v8847_v2  ;;  %v15776_v27 = vld [vmem:[%s20303_s30 + $0xa4] sm:$0x1]  ;;  %v19227_v60 = vld [vmem:[%s23359_s3 + $0x528] sm:$0xff]   ;;  %v17255_v49 = vpop.f32.mrb[221].mxu0 }
 0x30d   : > { %v11413_v62 = vsel %vm19552_vm2, %v11408_v10, %v11412_v44  ;;  %v8849_v20 = vrot.slane %v8847_v2, 4  ;;  %v11424_v26 = vshll.u32 %v16093_v7, 16  ;;  %v11417_v1 = vrot.slane %v11415_v63, 4  ;;  %18150 = vmatprep.subr.bf16.mxu1 %v19227_v60  ;;  %v15777_v63 = vld [vmem:[%s20303_s30 + $0xa8] sm:$0xe] }
 0x30e   : > { %v16129_v34 = vcombine.low %v11403_v53, %v11413_v62  ;;  %18125 = vmatmul.mubr.bf16.gmra.mrb[32].mxu1 %v15814_v14  ;;  %v11420_v50 = vrot.slane %v11418_v59, 5  ;;  %v11428_v41 = vshrl.u32 %v16093_v7, 16  ;;  %v11434_v44 = vshll.u32 %v16094_v18, 16  ;;  %v17257_v18 = vpop.f32.mrb[222].mxu0  ;;  %v15778_v59 = vld [vmem:[%s20303_s30 + $0xac] sm:$0xf] }
 0x30f   : > { %v8851_v5 = vsel %vm19670_vm5, %v8849_v20, %v8850_v15  ;;  %v11426_v43 = vrot.slane %v11424_v26, 5  ;;  %v15800_v57 = vrot.slane %v15774_v45, 9  ;;  %v8854_v10 = vrot.slane %v15775_v46, 5  ;;  %18151 = vmatpush3.bf16.msra.mxu1 %v19227_v60  ;;  %v19229_v46 = vld [vmem:[%s23359_s3 + $0x658] sm:$0xff]   ;;  %v15780_v60 = vld [vmem:[%s20303_s30 + $0xb4] sm:$0xe] }
 0x310   : > { %12351 = vmatprep.mubr.bf16.mxu0 %v16129_v34  ;;  %v15815_v33 = vcombine.low %v8848_v47, %v8851_v5  ;;  %v11421_v52 = vor.u32 %v11420_v50, %v11417_v1  ;;  %v11430_v9 = vrot.slane %v11428_v41, 4  ;;  %v11436_v53 = vrot.slane %v11434_v44, 5  ;;  %v17258_v34 = vpop.f32.mrb[223].mxu0  ;;  %v15779_v47 = vld [vmem:[%s20303_s30 + $0xb0] sm:$0x1]  ;;  %v19226_v41 = vld [vmem:[%s21403_s19 + $0x48] sm:$0xff]   ;;  %17722 = vmatprep.subr.bf16.mxu0 %v19229_v46 }
 0x311   : > { %12352 = vmatmul.mubr.bf16.gmra.mrb[64].mxu0 %v19222_v38  ;;  %v8855_v14 = vsel %vm19670_vm5, %v15800_v57, %v8854_v10  ;;  %v8856_v2 = vrot.slane %v8854_v10, 4  ;;  %v8857_v15 = vrot.slane %v15776_v27, 5  ;;  %v17256_v62 = vadd.f32 %v17255_v49, %v17254_v28  ;;  %v16095_v5 = vld [vmem:[%s21403_s19 + $0x54] sm:$0xf]  ;;  %v16096_v57 = vld [vmem:[%s21403_s19 + $0x58] sm:$0xf] }
 0x312   : > { %18128 = vmatprep.mubr.bf16.mxu1 %v15815_v33  ;;  %v11422_v38 = vrot.slane %v11421_v52, 4  ;;  %v11431_v7 = vor.u32 %v11430_v9, %v11426_v43  ;;  %v15801_v20 = vrot.slane %v15777_v63, 9  ;;  %v8861_v26 = vrot.slane %v15778_v59, 5  ;;  %v19230_v10 = vld [vmem:[%s23359_s3 + $0x618] sm:$0xff]  }
 0x313   : > { %v8858_v45 = vsel %vm19670_vm5, %v8856_v2, %v8857_v15  ;;  %v22049_v44 = vadd.f32 %v21590_v21, %v17256_v62  ;;  %v17259_v33 = vadd.f32 %v17258_v34, %v17257_v18  ;;  %v8864_v28 = vrot.slane %v15779_v47, 5  ;;  %v15781_v49 = vld [vmem:[%s20303_s30 + $0xb8] sm:$0xf]  ;;  %17723 = vmatpush3.bf16.msra.mxu0 %v19230_v10  ;;  %v15782_v59 = vld [vmem:[%s20303_s30 + $0xbc] sm:$0x1] }
 0x314   : > { %v11427_v27 = vsel %vm19552_vm2, %v11422_v38, %v11426_v43  ;;  %v11432_v1 = vrot.slane %v11431_v7, 4  ;;  %v15816_v50 = vcombine.low %v8855_v14, %v8858_v45  ;;  %v8862_v52 = vsel %vm19670_vm5, %v15801_v20, %v8861_v26  ;;  %v16097_v43 = vld [vmem:[%s21403_s19 + $0x5c] sm:$0x1]  ;;  %v17260_v38 = vpop.f32.mrb[224].mxu0 }
 0x315   : > { %v8863_v9 = vrot.slane %v8861_v26, 4  ;;  %v11439_v14 = vshrl.u32 %v16095_v5, 16  ;;  %v11442_v2 = vshll.u32 %v16095_v5, 16  ;;  %v11448_v15 = vshll.u32 %v16096_v57, 16  ;;  %v17261_v45 = vpop.f32.mrb[225].mxu0  ;;  %v19231_v26 = vld [vmem:[%s23359_s3 + $0x530] sm:$0xff]  }
 0x316   : > { %v11437_v21 = vsel %vm19552_vm2, %v11432_v1, %v11436_v53  ;;  %18129 = vmatmul.mubr.bf16.gmra.mrb[36].mxu1 %v15816_v50  ;;  %v22064_v62 = vadd.f32 %v21594_v8, %v17259_v33  ;;  %v11452_v63 = vshrl.u32 %v16096_v57, 16  ;;  %v15802_v1 = vrot.slane %v15780_v60, 9  ;;  %v17263_v10 = vpop.f32.mrb[226].mxu0  ;;  %18152 = vmatprep.subr.bf16.mxu1 %v19231_v26 }
 0x317   : > { %v16130_v7 = vcombine.low %v11427_v27, %v11437_v21  ;;  %v8865_v18 = vsel %vm19670_vm5, %v8863_v9, %v8864_v28  ;;  %v11441_v47 = vrot.slane %v11439_v14, 4  ;;  %v11444_v53 = vrot.slane %v11442_v2, 5  ;;  %18153 = vmatpush3.bf16.msra.mxu1 %v19231_v26  ;;  %v15783_v21 = vld [vmem:[%s20303_s30 + $0xc0] sm:$0xe] }
 0x318   : > { %v15817_v34 = vcombine.low %v8862_v52, %v8865_v18  ;;  %v11450_v20 = vrot.slane %v11448_v15, 5  ;;  %v11454_v46 = vrot.slane %v11452_v63, 4  ;;  %v11458_v27 = vshll.u32 %v16097_v43, 16  ;;  %v19228_v15 = vld [vmem:[%s21403_s19 + $0x54] sm:$0xff]  }
 0x319   : > { %12359 = vmatprep.mubr.bf16.mxu0 %v16130_v7  ;;  %v8868_v8 = vrot.slane %v15781_v49, 5  ;;  %v11445_v50 = vor.u32 %v11444_v53, %v11441_v47  ;;  %v8871_v5 = vrot.slane %v15782_v59, 5  ;;  %v17262_v57 = vadd.f32 %v17261_v45, %v17260_v38  ;;  %v15784_v38 = vld [vmem:[%s20303_s30 + $0xc4] sm:$0xf]  ;;  %v15785_v7 = vld [vmem:[%s20303_s30 + $0xc8] sm:$0x1] }
 0x31a   : > { %12360 = vmatmul.mubr.bf16.gmra.mrb[68].mxu0 %v19226_v41  ;;  %18132 = vmatprep.mubr.bf16.mxu1 %v15817_v34  ;;  %v11455_v33 = vor.u32 %v11454_v46, %v11450_v20  ;;  %v11460_v52 = vrot.slane %v11458_v27, 5  ;;  %v17264_v41 = vpop.f32.mrb[227].mxu0  ;;  %v15803_v18 = vrot.slane %v15783_v21, 9  ;;  %v8875_v59 = vrot.slane %v15784_v38, 5  ;;  %v16098_v34 = vld [vmem:[%s21403_s19 + $0x60] sm:$0xf] }
 0x31b   : > { %v8869_v9 = vsel %vm19670_vm5, %v15802_v1, %v8868_v8  ;;  %v8870_v28 = vrot.slane %v8868_v8, 4  ;;  %v11446_v43 = vrot.slane %v11445_v50, 4  ;;  %v22075_v60 = vadd.f32 %v21635_v12, %v17262_v57  ;;  %v16099_v47 = vld [vmem:[%s21403_s19 + $0x64] sm:$0xf]  ;;  %v16100_v46 = vld [vmem:[%s21403_s19 + $0x68] sm:$0x1] }
 0x31c   : > { %v11456_v14 = vrot.slane %v11455_v33, 4  ;;  %v17265_v49 = vadd.f32 %v17264_v41, %v17263_v10  ;;  %v8878_v45 = vrot.slane %v15785_v7, 5  ;;  %v11463_v27 = vshrl.u32 %v16098_v34, 16  ;;  %v15786_v8 = vld [vmem:[%s20303_s30 + $0xcc] sm:$0xe]  ;;  %v17266_v7 = vpop.f32.mrb[228].mxu0 }
 0x31d   : > { %v8872_v2 = vsel %vm19670_vm5, %v8870_v28, %v8871_v5  ;;  %v11451_v63 = vsel %vm19552_vm2, %v11446_v43, %v11450_v20  ;;  %v11466_v1 = vshll.u32 %v16098_v34, 16  ;;  %v8876_v20 = vsel %vm19670_vm5, %v15803_v18, %v8875_v59  ;;  %v15787_v10 = vld [vmem:[%s20303_s30 + $0xd0] sm:$0xf]  ;;  %v15788_v33 = vld [vmem:[%s20303_s30 + $0xd4] sm:$0x1]  ;;  %v19233_v18 = vld [vmem:[%s23359_s3 + $0x538] sm:$0xff]  }
 0x31e   : > { %v15818_v12 = vcombine.low %v8869_v9, %v8872_v2  ;;  %v11461_v53 = vsel %vm19552_vm2, %v11456_v14, %v11460_v52  ;;  %v22090_v26 = vadd.f32 %v21643_v58, %v17265_v49  ;;  %v8877_v5 = vrot.slane %v8875_v59, 4  ;;  %v17267_v34 = vpop.f32.mrb[229].mxu0  ;;  %18154 = vmatprep.subr.bf16.mxu1 %v19233_v18  ;;  %s19288_s30 = scalar_lea.vmem %s19287_s8, 4096 }
 0x31f   : > { %v16131_v50 = vcombine.low %v11451_v63, %v11461_v53  ;;  %v11472_v57 = vshll.u32 %v16099_v47, 16  ;;  %v11465_v9 = vrot.slane %v11463_v27, 4  ;;  %v11468_v28 = vrot.slane %v11466_v1, 5  ;;  %v10218_v27 = vld [vmem:[%s21403_s19] sm:$0xe]  ;;  %18155 = vmatpush3.bf16.msra.mxu1 %v19233_v18 }
 0x320   : > { %18133 = vmatmul.mubr.bf16.gmra.mrb[40].mxu1 %v15818_v12  ;;  %v11476_v43 = vshrl.u32 %v16099_v47, 16  ;;  %v11482_v52 = vshll.u32 %v16100_v46, 16  ;;  %v8879_v58 = vsel %vm19670_vm5, %v8877_v5, %v8878_v45  ;;  %v15804_v21 = vrot.slane %v15786_v8, 9  ;;  %v17269_v46 = vpop.f32.mrb[230].mxu0  ;;  %v10219_v1 = vld [vmem:[%s21403_s19 + $0x4] sm:$0xf] }
 0x321   : > { %12367 = vmatprep.mubr.bf16.mxu0 %v16131_v50  ;;  %v11474_v41 = vrot.slane %v11472_v57, 5  ;;  %v8882_v14 = vrot.slane %v15787_v10, 5  ;;  %v15819_v2 = vcombine.low %v8876_v20, %v8879_v58  ;;  %v11469_v49 = vor.u32 %v11468_v28, %v11465_v9  ;;  %v17270_v50 = vpop.f32.mrb[231].mxu0  ;;  %v10220_v20 = vld [vmem:[%s21403_s19 + $0x8] sm:$0x1]  ;;  %v19235_v10 = vld [vmem:[%s23359_s3 + $0x660] sm:$0xff]  }
 0x322   : > { %12368 = vmatmul.mubr.bf16.gmra.mrb[72].mxu0 %v19228_v15  ;;  %v11478_v38 = vrot.slane %v11476_v43, 4  ;;  %v11484_v63 = vrot.slane %v11482_v52, 5  ;;  %v8885_v45 = vrot.slane %v15788_v33, 5  ;;  %v17268_v53 = vadd.f32 %v17267_v34, %v17266_v7  ;;  %v19232_v43 = vld [vmem:[%s21403_s19 + $0x60] sm:$0xff]   ;;  %v16101_v58 = vld [vmem:[%s21403_s19 + $0x6c] sm:$0xf]  ;;  %17724 = vmatprep.subr.bf16.mxu0 %v19235_v10 }
 0x323   : > { %v8883_v12 = vsel %vm19670_vm5, %v15804_v21, %v8882_v14  ;;  %v8884_v59 = vrot.slane %v8882_v14, 4  ;;  %18136 = vmatprep.mubr.bf16.mxu1 %v15819_v2  ;;  %v11470_v15 = vrot.slane %v11469_v49, 4  ;;  %v15925_v5 = vrot.slane %v10218_v27, 9  ;;  %v16102_v21 = vld [vmem:[%s21403_s19 + $0x70] sm:$0xf]  ;;  %v19236_v14 = vld [vmem:[%s23359_s3 + $0x620] sm:$0xff]  }
 0x324   : > { %v11479_v47 = vor.u32 %v11478_v38, %v11474_v41  ;;  %v10316_v57 = vrot.slane %v10219_v1, 5  ;;  %v22117_v52 = vadd.f32 %v21647_v55, %v17268_v53  ;;  %v17271_v2 = vadd.f32 %v17270_v50, %v17269_v46  ;;  %v10221_v18 = vld [vmem:[%s21403_s19 + $0xc] sm:$0xe]  ;;  %v10222_v34 = vld [vmem:[%s21403_s19 + $0x10] sm:$0xf]  ;;  %17725 = vmatpush3.bf16.msra.mxu0 %v19236_v14 }
 0x325   : > { %v8886_v8 = vsel %vm19670_vm5, %v8884_v59, %v8885_v45  ;;  %v11475_v33 = vsel %vm19552_vm2, %v11470_v15, %v11474_v41  ;;  %v10319_v7 = vrot.slane %v10220_v20, 5  ;;  %v16103_v41 = vld [vmem:[%s21403_s19 + $0x74] sm:$0x1]  ;;  %v11490_v59 = vshll.u32 %v16101_v58, 16  ;;  %v17272_v15 = vpop.f32.mrb[232].mxu0 }
 0x326   : > { %v11480_v9 = vrot.slane %v11479_v47, 4  ;;  %v15820_v28 = vcombine.low %v8883_v12, %v8886_v8  ;;  %v10317_v49 = vsel %vm19670_vm5, %v15925_v5, %v10316_v57  ;;  %v10318_v38 = vrot.slane %v10316_v57, 4  ;;  %v10223_v1 = vld [vmem:[%s21403_s19 + $0x14] sm:$0x1]  ;;  %v17273_v8 = vpop.f32.mrb[233].mxu0  ;;  %v19237_v57 = vld [vmem:[%s23359_s3 + $0x5c0] sm:$0xff]  }
 0x327   : > { %v11487_v12 = vshrl.u32 %v16101_v58, 16  ;;  %v11496_v45 = vshll.u32 %v16102_v21, 16  ;;  %v22132_v53 = vadd.f32 %v21652_v40, %v17271_v2  ;;  %v11500_v27 = vshrl.u32 %v16102_v21, 16  ;;  %v17275_v14 = vpop.f32.mrb[234].mxu0  ;;  %18188 = vmatprep.subr.bf16.mxu1 %v19237_v57 }
 0x328   : > { %v11485_v55 = vsel %vm19552_vm2, %v11480_v9, %v11484_v63  ;;  %18137 = vmatmul.mubr.bf16.gmra.mrb[44].mxu1 %v15820_v28  ;;  %v10320_v46 = vsel %vm19670_vm5, %v10318_v38, %v10319_v7  ;;  %v11492_v63 = vrot.slane %v11490_v59, 5  ;;  %v15926_v9 = vrot.slane %v10221_v18, 9  ;;  %v17276_v18 = vpop.f32.mrb[235].mxu0 }
 0x329   : > { %v16132_v47 = vcombine.low %v11475_v33, %v11485_v55  ;;  %v15941_v50 = vcombine.low %v10317_v49, %v10320_v46  ;;  %v11489_v20 = vrot.slane %v11487_v12, 4  ;;  %v11498_v5 = vrot.slane %v11496_v45, 5  ;;  %v10224_v55 = vld [vmem:[%s21403_s19 + $0x18] sm:$0xe]  ;;  %v19234_v45 = vld [vmem:[%s21403_s19 + $0x6c] sm:$0xff]  }
 0x32a   : > { %v11502_v10 = vrot.slane %v11500_v27, 4  ;;  %v11506_v33 = vshll.u32 %v16103_v41, 16  ;;  %v10323_v40 = vrot.slane %v10222_v34, 5  ;;  %v10326_v58 = vrot.slane %v10223_v1, 5 }
 0x32b   : > { %12375 = vmatprep.mubr.bf16.mxu0 %v16132_v47  ;;  %18156 = vmatprep.mubr.bf16.mxu1 %v15941_v50  ;;  %v11493_v28 = vor.u32 %v11492_v63, %v11489_v20  ;;  %v17274_v21 = vadd.f32 %v17273_v8, %v17272_v15  ;;  %v17277_v34 = vadd.f32 %v17276_v18, %v17275_v14  ;;  %v10225_v15 = vld [vmem:[%s21403_s19 + $0x1c] sm:$0xf]  ;;  %v10226_v47 = vld [vmem:[%s21403_s19 + $0x20] sm:$0x1]  ;;  %v15927_v46 = vrot.slane %v10224_v55, 9 }
 0x32c   : > { %12376 = vmatmul.mubr.bf16.gmra.mrb[76].mxu0 %v19232_v43  ;;  %v11503_v2 = vor.u32 %v11502_v10, %v11498_v5  ;;  %v11508_v49 = vrot.slane %v11506_v33, 5  ;;  %v10324_v38 = vsel %vm19670_vm5, %v15926_v9, %v10323_v40  ;;  %v10325_v7 = vrot.slane %v10323_v40, 4  ;;  %v16104_v50 = vld [vmem:[%s21403_s19 + $0x78] sm:$0xf]  ;;  %v16105_v20 = vld [vmem:[%s21403_s19 + $0x7c] sm:$0xf] }
 0x32d   : > { %v11494_v41 = vrot.slane %v11493_v28, 4  ;;  %v22143_v43 = vadd.f32 %v21668_v31, %v17274_v21  ;;  %v10330_v31 = vrot.slane %v10225_v15, 5  ;;  %v10333_v8 = vrot.slane %v10226_v47, 5  ;;  %v16106_v33 = vld [vmem:[%s21403_s19 + $0x80] sm:$0x1] }
 0x32e   : > { %v11504_v12 = vrot.slane %v11503_v2, 4  ;;  %v10327_v59 = vsel %vm19670_vm5, %v10325_v7, %v10326_v58  ;;  %v22158_v10 = vadd.f32 %v21671_v13, %v17277_v34  ;;  %v11511_v9 = vshrl.u32 %v16104_v50, 16  ;;  %v10227_v28 = vld [vmem:[%s21403_s19 + $0x24] sm:$0xe]  ;;  %v10228_v2 = vld [vmem:[%s21403_s19 + $0x28] sm:$0xf] }
 0x32f   : > { %v11499_v27 = vsel %vm19552_vm2, %v11494_v41, %v11498_v5  ;;  %v15942_v1 = vcombine.low %v10324_v38, %v10327_v59  ;;  %v11514_v40 = vshll.u32 %v16104_v50, 16  ;;  %v10331_v5 = vsel %vm19670_vm5, %v15927_v46, %v10330_v31  ;;  %v10229_v38 = vld [vmem:[%s21403_s19 + $0x2c] sm:$0x1]  ;;  %v17278_v46 = vpop.f32.mrb[236].mxu0 }
 0x330   : > { %v11509_v63 = vsel %vm19552_vm2, %v11504_v12, %v11508_v49  ;;  %v10332_v21 = vrot.slane %v10330_v31, 4  ;;  %v11520_v14 = vshll.u32 %v16105_v20, 16  ;;  %v11513_v7 = vrot.slane %v11511_v9, 4  ;;  %v17279_v50 = vpop.f32.mrb[237].mxu0  ;;  %v10230_v9 = vld [vmem:[%s21403_s19 + $0x30] sm:$0xe] }
 0x331   : > { %v16133_v58 = vcombine.low %v11499_v27, %v11509_v63  ;;  %18157 = vmatmul.mubr.bf16.vlgmr.msra.gmra.mrb[16].mxu1 %v15942_v1  ;;  %v11516_v41 = vrot.slane %v11514_v40, 5  ;;  %v11524_v49 = vshrl.u32 %v16105_v20, 16  ;;  %v11530_v18 = vshll.u32 %v16106_v33, 16  ;;  %v17281_v33 = vpop.f32.mrb[238].mxu0  ;;  %v10231_v40 = vld [vmem:[%s21403_s19 + $0x34] sm:$0xf] }
 0x332   : > { %18189 = vmatpush3.bf16.msra.mxu1 %v19237_v57  ;;  %v10334_v13 = vsel %vm19670_vm5, %v10332_v21, %v10333_v8  ;;  %v11522_v55 = vrot.slane %v11520_v14, 5  ;;  %v15928_v12 = vrot.slane %v10227_v28, 9  ;;  %v10337_v59 = vrot.slane %v10228_v2, 5  ;;  %v19239_v57 = vld [vmem:[%s23359_s3 + $0x5c8] sm:$0xff]  }
 0x333   : > { %12383 = vmatprep.mubr.bf16.mxu0 %v16133_v58  ;;  %v15943_v34 = vcombine.low %v10331_v5, %v10334_v13  ;;  %v11517_v15 = vor.u32 %v11516_v41, %v11513_v7  ;;  %v11526_v47 = vrot.slane %v11524_v49, 4  ;;  %v11532_v27 = vrot.slane %v11530_v18, 5  ;;  %18190 = vmatprep.subr.bf16.mxu1 %v19239_v57  ;;  %v17282_v58 = vpop.f32.mrb[239].mxu0  ;;  %v10232_v5 = vld [vmem:[%s21403_s19 + $0x38] sm:$0x1]  ;;  %v19241_v2 = vld [vmem:[%s23359_s3 + $0x668] sm:$0xff]  }
 0x334   : > { %12384 = vmatmul.mubr.bf16.gmra.mrb[80].mxu0 %v19234_v45  ;;  %v10338_v1 = vsel %vm19670_vm5, %v15928_v12, %v10337_v59  ;;  %v10339_v31 = vrot.slane %v10337_v59, 4  ;;  %v10340_v8 = vrot.slane %v10229_v38, 5  ;;  %v17280_v63 = vadd.f32 %v17279_v50, %v17278_v46  ;;  %v19238_v49 = vld [vmem:[%s21403_s19 + $0x78] sm:$0xff]   ;;  %v16107_v13 = vld [vmem:[%s21403_s19 + $0x84] sm:$0xf]  ;;  %v19242_v59 = vld [vmem:[%s23359_s3 + $0x628] sm:$0xff]   ;;  %17726 = vmatprep.subr.bf16.mxu0 %v19241_v2 }
 0x335   : > { %18160 = vmatprep.mubr.bf16.mxu1 %v15943_v34  ;;  %v11518_v45 = vrot.slane %v11517_v15, 4  ;;  %v11527_v20 = vor.u32 %v11526_v47, %v11522_v55  ;;  %v15929_v21 = vrot.slane %v10230_v9, 9  ;;  %v10344_v14 = vrot.slane %v10231_v40, 5  ;;  %v16108_v12 = vld [vmem:[%s21403_s19 + $0x88] sm:$0xf]  ;;  %17727 = vmatpush3.bf16.msra.mxu0 %v19242_v59 }
 0x336   : > { %v10341_v28 = vsel %vm19670_vm5, %v10339_v31, %v10340_v8  ;;  %18191 = vmatpush3.bf16.msra.mxu1 %v19239_v57  ;;  %v22185_v18 = vadd.f32 %v21698_v61, %v17280_v63  ;;  %v17283_v34 = vadd.f32 %v17282_v58, %v17281_v33  ;;  %v10347_v46 = vrot.slane %v10232_v5, 5  ;;  %v10233_v57 = vld [vmem:[%s21403_s19 + $0x3c] sm:$0xe]  ;;  %v10234_v50 = vld [vmem:[%s21403_s19 + $0x40] sm:$0xf] }
 0x337   : > { %v11523_v38 = vsel %vm19552_vm2, %v11518_v45, %v11522_v55  ;;  %v11528_v7 = vrot.slane %v11527_v20, 4  ;;  %v15944_v41 = vcombine.low %v10338_v1, %v10341_v28  ;;  %v10345_v15 = vsel %vm19670_vm5, %v15929_v21, %v10344_v14  ;;  %v16109_v55 = vld [vmem:[%s21403_s19 + $0x8c] sm:$0x1]  ;;  %v17324_v45 = vpop.f32.mrb[112].mxu1  ;;  %v10235_v40 = vld [vmem:[%s21403_s19 + $0x44] sm:$0x1] }
 0x338   : > { %v10346_v47 = vrot.slane %v10344_v14, 4  ;;  %v11535_v1 = vshrl.u32 %v16107_v13, 16  ;;  %v11538_v31 = vshll.u32 %v16107_v13, 16  ;;  %v11544_v8 = vshll.u32 %v16108_v12, 16  ;;  %v17460_v28 = vpop.f32.mrb[240].mxu0  ;;  %v17325_v14 = vpop.f32.mrb[113].mxu1 }
 0x339   : > { %v11533_v61 = vsel %vm19552_vm2, %v11528_v7, %v11532_v27  ;;  %18161 = vmatmul.mubr.bf16.gmra.mrb[20].mxu1 %v15944_v41  ;;  %v22200_v63 = vadd.f32 %v21701_v36, %v17283_v34  ;;  %v11548_v9 = vshrl.u32 %v16108_v12, 16  ;;  %v11554_v7 = vshll.u32 %v16109_v55, 16  ;;  %v17461_v34 = vpop.f32.mrb[241].mxu0 }
 0x33a   : > { %v16134_v20 = vcombine.low %v11523_v38, %v11533_v61  ;;  %v10348_v33 = vsel %vm19670_vm5, %v10346_v47, %v10347_v46  ;;  %v11537_v5 = vrot.slane %v11535_v1, 4  ;;  %v11540_v27 = vrot.slane %v11538_v31, 5  ;;  %v17463_v31 = vpop.f32.mrb[242].mxu0 }
 0x33b   : > { %v15945_v58 = vcombine.low %v10345_v15, %v10348_v33  ;;  %v11546_v21 = vrot.slane %v11544_v8, 5  ;;  %v11550_v2 = vrot.slane %v11548_v9, 4  ;;  %v15930_v41 = vrot.slane %v10233_v57, 9  ;;  %v17327_v57 = vpop.f32.mrb[114].mxu1  ;;  %v17464_v33 = vpop.f32.mrb[243].mxu0 }
 0x33c   : > { %12391 = vmatprep.mubr.bf16.mxu0 %v16134_v20  ;;  %v10351_v13 = vrot.slane %v10234_v50, 5  ;;  %v11541_v36 = vor.u32 %v11540_v27, %v11537_v5  ;;  %v10354_v38 = vrot.slane %v10235_v40, 5  ;;  %v17326_v59 = vadd.f32 %v17325_v14, %v17324_v45  ;;  %v19240_v45 = vld [vmem:[%s21403_s19 + $0x84] sm:$0xff]   ;;  %v17328_v20 = vpop.f32.mrb[115].mxu1  ;;  %v10237_v5 = vld [vmem:[%s21403_s19 + $0x4c] sm:$0xf] }
 0x33d   : > { %12392 = vmatmul.mubr.bf16.gmra.mrb[84].mxu0 %v19238_v49  ;;  %18164 = vmatprep.mubr.bf16.mxu1 %v15945_v58  ;;  %v11551_v12 = vor.u32 %v11550_v2, %v11546_v21  ;;  %v11556_v47 = vrot.slane %v11554_v7, 5  ;;  %v17462_v55 = vadd.f32 %v17461_v34, %v17460_v28  ;;  %v19243_v49 = vld [vmem:[%s23359_s3 + $0x5d0] sm:$0xff]   ;;  %v17329_v58 = vadd.f32 %v17328_v20, %v17327_v57  ;;  %v17330_v57 = vpop.f32.mrb[116].mxu1 }
 0x33e   : > { %v10352_v15 = vsel %vm19670_vm5, %v15930_v41, %v10351_v13  ;;  %v10353_v46 = vrot.slane %v10351_v13, 4  ;;  %v11542_v61 = vrot.slane %v11541_v36, 4  ;;  %v18313_v1 = vadd.f32 %v21711_v32, %v17326_v59  ;;  %v10236_v32 = vld [vmem:[%s21403_s19 + $0x48] sm:$0xe]  ;;  %18192 = vmatprep.subr.bf16.mxu1 %v19243_v49  ;;  %v10238_v27 = vld [vmem:[%s21403_s19 + $0x50] sm:$0x1] }
 0x33f   : > { %v11552_v8 = vrot.slane %v11551_v12, 4  ;;  %v16110_v14 = vld [vmem:[%s21403_s19 + $0x90] sm:$0xf]  ;;  %18193 = vmatpush3.bf16.msra.mxu1 %v19243_v49  ;;  %v17465_v7 = vadd.f32 %v17464_v33, %v17463_v31  ;;  %v15931_v41 = vrot.slane %v10236_v32, 9  ;;  %v10358_v13 = vrot.slane %v10237_v5, 5  ;;  %v17466_v33 = vpop.f32.mrb[244].mxu0 }
 0x340   : > { %v10355_v50 = vsel %vm19670_vm5, %v10353_v46, %v10354_v38  ;;  %v11547_v9 = vsel %vm19552_vm2, %v11542_v61, %v11546_v21  ;;  %v22217_v28 = vadd.f32 %v18313_v1, %v17462_v55  ;;  %v16111_v36 = vld [vmem:[%s21403_s19 + $0x94] sm:$0xf]  ;;  %v16112_v21 = vld [vmem:[%s21403_s19 + $0x98] sm:$0x1]  ;;  %v18331_v59 = vadd.f32 %v21720_v37, %v17329_v58  ;;  %v10241_v49 = vld [vmem:[%s21403_s19 + $0x5c] sm:$0x1] }
 0x341   : > { %v15946_v40 = vcombine.low %v10352_v15, %v10355_v50  ;;  %v11557_v2 = vsel %vm19552_vm2, %v11552_v8, %v11556_v47  ;;  %v10361_v34 = vrot.slane %v10238_v27, 5  ;;  %v11559_v12 = vshrl.u32 %v16110_v14, 16  ;;  %v10239_v15 = vld [vmem:[%s21403_s19 + $0x54] sm:$0xe]  ;;  %v10240_v46 = vld [vmem:[%s21403_s19 + $0x58] sm:$0xf] }
 0x342   : > { %v16135_v38 = vcombine.low %v11547_v9, %v11557_v2  ;;  %v10359_v61 = vsel %vm19670_vm5, %v15931_v41, %v10358_v13  ;;  %v10360_v1 = vrot.slane %v10358_v13, 4  ;;  %v11562_v47 = vshll.u32 %v16110_v14, 16  ;;  %v17331_v58 = vpop.f32.mrb[117].mxu1  ;;  %v17467_v2 = vpop.f32.mrb[245].mxu0 }
 0x343   : > { %18165 = vmatmul.mubr.bf16.gmra.mrb[24].mxu1 %v15946_v40  ;;  %v11568_v55 = vshll.u32 %v16111_v36, 16  ;;  %v22232_v31 = vadd.f32 %v18331_v59, %v17465_v7  ;;  %v11561_v8 = vrot.slane %v11559_v12, 4  ;;  %v11572_v50 = vshrl.u32 %v16111_v36, 16  ;;  %v17333_v36 = vpop.f32.mrb[118].mxu1 }
 0x344   : > { %12399 = vmatprep.mubr.bf16.mxu0 %v16135_v38  ;;  %v11578_v20 = vshll.u32 %v16112_v21, 16  ;;  %v10362_v37 = vsel %vm19670_vm5, %v10360_v1, %v10361_v34  ;;  %v11564_v32 = vrot.slane %v11562_v47, 5  ;;  %v15932_v40 = vrot.slane %v10239_v15, 9  ;;  %v17469_v21 = vpop.f32.mrb[246].mxu0  ;;  %v10242_v1 = vld [vmem:[%s21403_s19 + $0x60] sm:$0xe] }
 0x345   : > { %12400 = vmatmul.mubr.bf16.gmra.mrb[88].mxu0 %v19240_v45  ;;  %v11570_v9 = vrot.slane %v11568_v55, 5  ;;  %v15947_v5 = vcombine.low %v10359_v61, %v10362_v37  ;;  %v11574_v27 = vrot.slane %v11572_v50, 4  ;;  %v10365_v14 = vrot.slane %v10240_v46, 5  ;;  %v19245_v45 = vld [vmem:[%s23359_s3 + $0x5d8] sm:$0xff]   ;;  %v17334_v46 = vpop.f32.mrb[119].mxu1  ;;  %v17470_v61 = vpop.f32.mrb[247].mxu0 }
 0x346   : > { %v11565_v41 = vor.u32 %v11564_v32, %v11561_v8  ;;  %v10368_v7 = vrot.slane %v10241_v49, 5  ;;  %v17332_v13 = vadd.f32 %v17331_v58, %v17330_v57  ;;  %v17468_v38 = vadd.f32 %v17467_v2, %v17466_v33  ;;  %18194 = vmatprep.subr.bf16.mxu1 %v19245_v45  ;;  %v10243_v8 = vld [vmem:[%s21403_s19 + $0x64] sm:$0xf]  ;;  %v10244_v50 = vld [vmem:[%s21403_s19 + $0x68] sm:$0x1]  ;;  %v19244_v32 = vld [vmem:[%s21403_s19 + $0x90] sm:$0xff]  }
 0x347   : > { %18168 = vmatprep.mubr.bf16.mxu1 %v15947_v5  ;;  %v11575_v59 = vor.u32 %v11574_v27, %v11570_v9  ;;  %v11580_v34 = vrot.slane %v11578_v20, 5  ;;  %v10366_v12 = vsel %vm19670_vm5, %v15932_v40, %v10365_v14  ;;  %v10367_v15 = vrot.slane %v10365_v14, 4  ;;  %v19247_v20 = vld [vmem:[%s23359_s3 + $0x670] sm:$0xff]   ;;  %18195 = vmatpush3.bf16.msra.mxu1 %v19245_v45  ;;  %v16113_v58 = vld [vmem:[%s21403_s19 + $0x9c] sm:$0xf] }
 0x348   : > { %v11566_v47 = vrot.slane %v11565_v41, 4  ;;  %v18304_v55 = vadd.f32 %v21730_v24, %v17332_v13  ;;  %v17335_v49 = vadd.f32 %v17334_v46, %v17333_v36  ;;  %v17471_v57 = vadd.f32 %v17470_v61, %v17469_v21  ;;  %v19248_v5 = vld [vmem:[%s23359_s3 + $0x630] sm:$0xff]   ;;  %v16115_v13 = vld [vmem:[%s21403_s19 + $0xa4] sm:$0x1]  ;;  %v10245_v45 = vld [vmem:[%s21403_s19 + $0x6c] sm:$0xe]  ;;  %17728 = vmatprep.subr.bf16.mxu0 %v19247_v20 }
 0x349   : > { %v11576_v33 = vrot.slane %v11575_v59, 4  ;;  %v10369_v37 = vsel %vm19670_vm5, %v10367_v15, %v10368_v7  ;;  %v15933_v40 = vrot.slane %v10242_v1, 9  ;;  %v10372_v24 = vrot.slane %v10243_v8, 5  ;;  %v16114_v7 = vld [vmem:[%s21403_s19 + $0xa0] sm:$0xf]  ;;  %17729 = vmatpush3.bf16.msra.mxu0 %v19248_v5 }
 0x34a   : > { %v11571_v27 = vsel %vm19552_vm2, %v11566_v47, %v11570_v9  ;;  %v15948_v14 = vcombine.low %v10366_v12, %v10369_v37  ;;  %v22257_v2 = vadd.f32 %v18304_v55, %v17468_v38  ;;  %v18322_v41 = vadd.f32 %v21738_v25, %v17335_v49  ;;  %v10246_v46 = vld [vmem:[%s21403_s19 + $0x70] sm:$0xf]  ;;  %v10247_v61 = vld [vmem:[%s21403_s19 + $0x74] sm:$0x1]  ;;  %v17336_v49 = vpop.f32.mrb[120].mxu1  ;;  %v17472_v37 = vpop.f32.mrb[248].mxu0 }
 0x34b   : > { %v11581_v36 = vsel %vm19552_vm2, %v11576_v33, %v11580_v34  ;;  %v10373_v21 = vsel %vm19670_vm5, %v15933_v40, %v10372_v24  ;;  %v10374_v59 = vrot.slane %v10372_v24, 4  ;;  %v10375_v15 = vrot.slane %v10244_v50, 5 }
 0x34c   : > { %v16136_v9 = vcombine.low %v11571_v27, %v11581_v36  ;;  %18169 = vmatmul.mubr.bf16.gmra.mrb[28].mxu1 %v15948_v14  ;;  %v22269_v38 = vadd.f32 %v18322_v41, %v17471_v57  ;;  %v11583_v25 = vshrl.u32 %v16113_v58, 16  ;;  %v11586_v12 = vshll.u32 %v16113_v58, 16  ;;  %v17337_v14 = vpop.f32.mrb[121].mxu1  ;;  %v17473_v41 = vpop.f32.mrb[249].mxu0 }
 0x34d   : > { %v10376_v1 = vsel %vm19670_vm5, %v10374_v59, %v10375_v15  ;;  %v11592_v47 = vshll.u32 %v16114_v7, 16  ;;  %v11596_v55 = vshrl.u32 %v16114_v7, 16  ;;  %v11602_v34 = vshll.u32 %v16115_v13, 16  ;;  %v19249_v7 = vld [vmem:[%s23359_s3 + $0x5e0] sm:$0xff]  }
 0x34e   : > { %12407 = vmatprep.mubr.bf16.mxu0 %v16136_v9  ;;  %v15949_v8 = vcombine.low %v10373_v21, %v10376_v1  ;;  %v11585_v20 = vrot.slane %v11583_v25, 4  ;;  %v11588_v50 = vrot.slane %v11586_v12, 5  ;;  %v15934_v33 = vrot.slane %v10245_v45, 9  ;;  %v17339_v21 = vpop.f32.mrb[122].mxu1  ;;  %18196 = vmatprep.subr.bf16.mxu1 %v19249_v7  ;;  %v10248_v9 = vld [vmem:[%s21403_s19 + $0x78] sm:$0xe] }
 0x34f   : > { %12408 = vmatmul.mubr.bf16.gmra.mrb[92].mxu0 %v19244_v32  ;;  %v11594_v40 = vrot.slane %v11592_v47, 5  ;;  %v11598_v24 = vrot.slane %v11596_v55, 4  ;;  %v11604_v57 = vrot.slane %v11602_v34, 5  ;;  %v10379_v5 = vrot.slane %v10246_v46, 5  ;;  %v17475_v46 = vpop.f32.mrb[250].mxu0  ;;  %v19246_v1 = vld [vmem:[%s21403_s19 + $0x9c] sm:$0xff]   ;;  %18197 = vmatpush3.bf16.msra.mxu1 %v19249_v7 }
 0x350   : > { %18172 = vmatprep.mubr.bf16.mxu1 %v15949_v8  ;;  %v11589_v58 = vor.u32 %v11588_v50, %v11585_v20  ;;  %v10382_v27 = vrot.slane %v10247_v61, 5  ;;  %v17338_v36 = vadd.f32 %v17337_v14, %v17336_v49  ;;  %v17474_v15 = vadd.f32 %v17473_v41, %v17472_v37  ;;  %v17340_v61 = vpop.f32.mrb[123].mxu1  ;;  %v17476_v34 = vpop.f32.mrb[251].mxu0  ;;  %v10249_v49 = vld [vmem:[%s21403_s19 + $0x7c] sm:$0xf] }
 0x351   : > { %v11599_v13 = vor.u32 %v11598_v24, %v11594_v40  ;;  %v10380_v45 = vsel %vm19670_vm5, %v15934_v33, %v10379_v5  ;;  %v10381_v32 = vrot.slane %v10379_v5, 4  ;;  %v17341_v55 = vadd.f32 %v17340_v61, %v17339_v21  ;;  %v10250_v8 = vld [vmem:[%s21403_s19 + $0x80] sm:$0x1]  ;;  %v16116_v24 = vld [vmem:[%s21403_s19 + $0xa8] sm:$0xf] }
 0x352   : > { %v11590_v59 = vrot.slane %v11589_v58, 4  ;;  %v18349_v47 = vadd.f32 %v21763_v42, %v17338_v36  ;;  %v17477_v33 = vadd.f32 %v17476_v34, %v17475_v46  ;;  %v15935_v37 = vrot.slane %v10248_v9, 9  ;;  %v16117_v5 = vld [vmem:[%s21403_s19 + $0xac] sm:$0xf]  ;;  %v17342_v58 = vpop.f32.mrb[124].mxu1 }
 0x353   : > { %v11600_v25 = vrot.slane %v11599_v13, 4  ;;  %v10383_v12 = vsel %vm19670_vm5, %v10381_v32, %v10382_v27  ;;  %v18367_v14 = vadd.f32 %v21772_v54, %v17341_v55  ;;  %v10386_v41 = vrot.slane %v10249_v49, 5  ;;  %v16118_v7 = vld [vmem:[%s21403_s19 + $0xb0] sm:$0x1]  ;;  %v10251_v13 = vld [vmem:[%s21403_s19 + $0x84] sm:$0xe] }
 0x354   : > { %v11595_v20 = vsel %vm19552_vm2, %v11590_v59, %v11594_v40  ;;  %v15950_v50 = vcombine.low %v10380_v45, %v10383_v12  ;;  %v22291_v27 = vadd.f32 %v18349_v47, %v17474_v15  ;;  %v17478_v32 = vpop.f32.mrb[252].mxu0  ;;  %v10389_v45 = vrot.slane %v10250_v8, 5  ;;  %v10252_v59 = vld [vmem:[%s21403_s19 + $0x88] sm:$0xf]  ;;  %v17343_v46 = vpop.f32.mrb[125].mxu1 }
 0x355   : > { %v11605_v42 = vsel %vm19552_vm2, %v11600_v25, %v11604_v57  ;;  %v11607_v36 = vshrl.u32 %v16116_v24, 16  ;;  %v11610_v21 = vshll.u32 %v16116_v24, 16  ;;  %v22297_v61 = vadd.f32 %v18367_v14, %v17477_v33  ;;  %v10253_v54 = vld [vmem:[%s21403_s19 + $0x8c] sm:$0x1] }
 0x356   : > { %v16137_v40 = vcombine.low %v11595_v20, %v11605_v42  ;;  %18173 = vmatmul.mubr.bf16.gmra.mrb[32].mxu1 %v15950_v50  ;;  %v10387_v57 = vsel %vm19670_vm5, %v15935_v37, %v10386_v41  ;;  %v10388_v15 = vrot.slane %v10386_v41, 4  ;;  %v11616_v9 = vshll.u32 %v16117_v5, 16  ;;  %v17479_v50 = vpop.f32.mrb[253].mxu0  ;;  %v19251_v14 = vld [vmem:[%s23359_s3 + $0x5e8] sm:$0xff]  }
 0x357   : > { %v11609_v25 = vrot.slane %v11607_v36, 4  ;;  %v11612_v12 = vrot.slane %v11610_v21, 5  ;;  %v11620_v47 = vshrl.u32 %v16117_v5, 16  ;;  %v11626_v55 = vshll.u32 %v16118_v7, 16  ;;  %v17345_v5 = vpop.f32.mrb[126].mxu1  ;;  %18198 = vmatprep.subr.bf16.mxu1 %v19251_v14 }
 0x358   : > { %12415 = vmatprep.mubr.bf16.mxu0 %v16137_v40  ;;  %v10390_v34 = vsel %vm19670_vm5, %v10388_v15, %v10389_v45  ;;  %v11618_v49 = vrot.slane %v11616_v9, 5  ;;  %v15936_v8 = vrot.slane %v10251_v13, 9  ;;  %v10393_v20 = vrot.slane %v10252_v59, 5  ;;  %v17481_v13 = vpop.f32.mrb[254].mxu0  ;;  %v17346_v45 = vpop.f32.mrb[127].mxu1  ;;  %18199 = vmatpush3.bf16.msra.mxu1 %v19251_v14 }
 0x359   : > { %12416 = vmatmul.mubr.bf16.gmra.mrb[96].mxu0 %v19246_v1  ;;  %v15951_v33 = vcombine.low %v10387_v57, %v10390_v34  ;;  %v11613_v24 = vor.u32 %v11612_v12, %v11609_v25  ;;  %v11622_v37 = vrot.slane %v11620_v47, 4  ;;  %v11628_v42 = vrot.slane %v11626_v55, 5  ;;  %v10254_v36 = vld [vmem:[%s21403_s19 + $0x90] sm:$0xe]  ;;  %v17482_v9 = vpop.f32.mrb[255].mxu0 }
 0x35a   : > { %v10394_v1 = vsel %vm19670_vm5, %v15936_v8, %v10393_v20  ;;  %v10395_v41 = vrot.slane %v10393_v20, 4  ;;  %v10396_v7 = vrot.slane %v10253_v54, 5  ;;  %v17344_v40 = vadd.f32 %v17343_v46, %v17342_v58  ;;  %v10255_v25 = vld [vmem:[%s21403_s19 + $0x94] sm:$0xf]  ;;  %v10256_v12 = vld [vmem:[%s21403_s19 + $0x98] sm:$0x1] }
 0x35b   : > { %18176 = vmatprep.mubr.bf16.mxu1 %v15951_v33  ;;  %v11614_v21 = vrot.slane %v11613_v24, 4  ;;  %v11623_v59 = vor.u32 %v11622_v37, %v11618_v49  ;;  %v17480_v57 = vadd.f32 %v17479_v50, %v17478_v32  ;;  %v17347_v15 = vadd.f32 %v17346_v45, %v17345_v5  ;;  %v16119_v55 = vld [vmem:[%s21403_s19 + $0xb4] sm:$0xf]  ;;  %v16120_v34 = vld [vmem:[%s21403_s19 + $0xb8] sm:$0xf]  ;;  %v19250_v50 = vld [vmem:[%s21403_s19 + $0xa8] sm:$0xff]  }
 0x35c   : > { %v10397_v58 = vsel %vm19670_vm5, %v10395_v41, %v10396_v7  ;;  %v18340_v46 = vadd.f32 %v21785_v22, %v17344_v40  ;;  %v17483_v54 = vadd.f32 %v17482_v9, %v17481_v13  ;;  %v15937_v47 = vrot.slane %v10254_v36, 9  ;;  %v16121_v24 = vld [vmem:[%s21403_s19 + $0xbc] sm:$0x1]  ;;  %v10257_v37 = vld [vmem:[%s21403_s19 + $0x9c] sm:$0xe] }
 0x35d   : > { %v11619_v32 = vsel %vm19552_vm2, %v11614_v21, %v11618_v49  ;;  %v11624_v8 = vrot.slane %v11623_v59, 4  ;;  %v15952_v20 = vcombine.low %v10394_v1, %v10397_v58  ;;  %v18358_v33 = vadd.f32 %v21794_v11, %v17347_v15  ;;  %v19253_v22 = vld [vmem:[%s23359_s3 + $0x678] sm:$0xff]   ;;  %v10258_v40 = vld [vmem:[%s21403_s19 + $0xa0] sm:$0xf]  ;;  %v10259_v36 = vld [vmem:[%s21403_s19 + $0xa4] sm:$0x1] }
 0x35e   : > { %v22326_v14 = vadd.f32 %v18340_v46, %v17480_v57  ;;  %v10400_v5 = vrot.slane %v10255_v25, 5  ;;  %v10403_v41 = vrot.slane %v10256_v12, 5  ;;  %v11631_v7 = vshrl.u32 %v16119_v55, 16  ;;  %v19254_v49 = vld [vmem:[%s23359_s3 + $0x638] sm:$0xff]   ;;  %17730 = vmatprep.subr.bf16.mxu0 %v19253_v22  ;;  %v17484_v22 = vpop.f32.mrb[0].mxu0 }
 0x35f   : > { %v11629_v1 = vsel %vm19552_vm2, %v11624_v8, %v11628_v42  ;;  %18177 = vmatmul.mubr.bf16.gmra.mrb[36].mxu1 %v15952_v20  ;;  %v22334_v11 = vadd.f32 %v18358_v33, %v17483_v54  ;;  %v11634_v13 = vshll.u32 %v16119_v55, 16  ;;  %v11640_v45 = vshll.u32 %v16120_v34, 16  ;;  %17731 = vmatpush3.bf16.msra.mxu0 %v19254_v49  ;;  %v17348_v8 = vpop.f32.mrb[128].mxu1  ;;  %v19255_v49 = vld [vmem:[%s23359_s3 + $0x5f0] sm:$0xff]  }
 0x360   : > { %v16138_v21 = vcombine.low %v11619_v32, %v11629_v1  ;;  %v10401_v59 = vsel %vm19670_vm5, %v15937_v47, %v10400_v5  ;;  %v10402_v57 = vrot.slane %v10400_v5, 4  ;;  %v11633_v15 = vrot.slane %v11631_v7, 4  ;;  %v17349_v5 = vpop.f32.mrb[129].mxu1  ;;  %18200 = vmatprep.subr.bf16.mxu1 %v19255_v49 }
 0x361   : > { %v11636_v9 = vrot.slane %v11634_v13, 5  ;;  %v11642_v25 = vrot.slane %v11640_v45, 5  ;;  %v11644_v12 = vshrl.u32 %v16120_v34, 16  ;;  %v11650_v58 = vshll.u32 %v16121_v24, 16  ;;  %v17351_v1 = vpop.f32.mrb[130].mxu1  ;;  %18201 = vmatpush3.bf16.msra.mxu1 %v19255_v49 }
 0x362   : > { %12423 = vmatprep.mubr.bf16.mxu0 %v16138_v21  ;;  %v10404_v42 = vsel %vm19670_vm5, %v10402_v57, %v10403_v41  ;;  %v15938_v46 = vrot.slane %v10257_v37, 9  ;;  %v10407_v54 = vrot.slane %v10258_v40, 5  ;;  %v10410_v55 = vrot.slane %v10259_v36, 5  ;;  %v17485_v41 = vpop.f32.mrb[1].mxu0  ;;  %v10260_v45 = vld [vmem:[%s21403_s19 + $0xa8] sm:$0xe] }
 0x363   : > { %12424 = vmatmul.mubr.bf16.gmra.mrb[100].mxu0 %v19250_v50  ;;  %v15953_v32 = vcombine.low %v10401_v59, %v10404_v42  ;;  %v11637_v20 = vor.u32 %v11636_v9, %v11633_v15  ;;  %v11646_v47 = vrot.slane %v11644_v12, 4  ;;  %v11652_v33 = vrot.slane %v11650_v58, 5  ;;  %v17487_v13 = vpop.f32.mrb[2].mxu0  ;;  %v17352_v59 = vpop.f32.mrb[131].mxu1  ;;  %v10261_v15 = vld [vmem:[%s21403_s19 + $0xac] sm:$0xf] }
 0x364   : > { %v10408_v34 = vsel %vm19670_vm5, %v15938_v46, %v10407_v54  ;;  %v10409_v24 = vrot.slane %v10407_v54, 4  ;;  %v17350_v7 = vadd.f32 %v17349_v5, %v17348_v8  ;;  %v17486_v50 = vadd.f32 %v17485_v41, %v17484_v22  ;;  %v17488_v57 = vpop.f32.mrb[3].mxu0  ;;  %v10262_v9 = vld [vmem:[%s21403_s19 + $0xb0] sm:$0x1]  ;;  %v19252_v46 = vld [vmem:[%s21403_s19 + $0xb4] sm:$0xff]  }
 0x365   : > { %18180 = vmatprep.mubr.bf16.mxu1 %v15953_v32  ;;  %v11638_v37 = vrot.slane %v11637_v20, 4  ;;  %v11647_v40 = vor.u32 %v11646_v47, %v11642_v25  ;;  %v17353_v54 = vadd.f32 %v17352_v59, %v17351_v1  ;;  %v16122_v8 = vld [vmem:[%s21403_s19 + $0xc0] sm:$0xf]  ;;  %v15939_v20 = vrot.slane %v10260_v45, 9  ;;  %v16124_v22 = vld [vmem:[%s21403_s19 + $0xc8] sm:$0x1] }
 0x366   : > { %v10411_v36 = vsel %vm19670_vm5, %v10409_v24, %v10410_v55  ;;  %v18385_v21 = vadd.f32 %v21813_v19, %v17350_v7  ;;  %v16123_v55 = vld [vmem:[%s21403_s19 + $0xc4] sm:$0xf]  ;;  %v17489_v19 = vadd.f32 %v17488_v57, %v17487_v13  ;;  %v10414_v47 = vrot.slane %v10261_v15, 5  ;;  %v10263_v5 = vld [vmem:[%s21403_s19 + $0xb4] sm:$0xe]  ;;  %v17354_v59 = vpop.f32.mrb[132].mxu1 }
 0x367   : > { %v11643_v12 = vsel %vm19552_vm2, %v11638_v37, %v11642_v25  ;;  %v11648_v58 = vrot.slane %v11647_v40, 4  ;;  %v15954_v42 = vcombine.low %v10408_v34, %v10411_v36  ;;  %v18403_v34 = vadd.f32 %v21821_v17, %v17353_v54  ;;  %v10264_v41 = vld [vmem:[%s21403_s19 + $0xb8] sm:$0xf]  ;;  %v10265_v37 = vld [vmem:[%s21403_s19 + $0xbc] sm:$0x1] }
 0x368   : > { %v22357_v32 = vadd.f32 %v18385_v21, %v17486_v50  ;;  %v10417_v24 = vrot.slane %v10262_v9, 5  ;;  %v11655_v7 = vshrl.u32 %v16122_v8, 16  ;;  %v10415_v50 = vsel %vm19670_vm5, %v15939_v20, %v10414_v47  ;;  %v19257_v17 = vld [vmem:[%s23359_s3 + $0x5f8] sm:$0xff]  }
 0x369   : > { %v11653_v25 = vsel %vm19552_vm2, %v11648_v58, %v11652_v33  ;;  %18181 = vmatmul.mubr.bf16.gmra.mrb[40].mxu1 %v15954_v42  ;;  %v10416_v49 = vrot.slane %v10414_v47, 4  ;;  %v11658_v1 = vshll.u32 %v16122_v8, 16  ;;  %v22368_v13 = vadd.f32 %v18403_v34, %v17489_v19  ;;  %v17490_v33 = vpop.f32.mrb[4].mxu0  ;;  %v17355_v58 = vpop.f32.mrb[133].mxu1  ;;  %18202 = vmatprep.subr.bf16.mxu1 %v19257_v17 }
 0x36a   : > { %v16139_v40 = vcombine.low %v11643_v12, %v11653_v25  ;;  %v11657_v45 = vrot.slane %v11655_v7, 4  ;;  %v11664_v36 = vshll.u32 %v16123_v55, 16  ;;  %v11668_v21 = vshrl.u32 %v16123_v55, 16  ;;  %v17491_v42 = vpop.f32.mrb[5].mxu0  ;;  %v17357_v20 = vpop.f32.mrb[134].mxu1  ;;  %18203 = vmatpush3.bf16.msra.mxu1 %v19257_v17 }
 0x36b   : > { %v10418_v57 = vsel %vm19670_vm5, %v10416_v49, %v10417_v24  ;;  %v11660_v15 = vrot.slane %v11658_v1, 5  ;;  %v11674_v9 = vshll.u32 %v16124_v22, 16  ;;  %v15940_v12 = vrot.slane %v10263_v5, 9  ;;  %v17493_v24 = vpop.f32.mrb[6].mxu0  ;;  %v17358_v22 = vpop.f32.mrb[135].mxu1 }
 0x36c   : > { %12431 = vmatprep.mubr.bf16.mxu0 %v16139_v40  ;;  %v15955_v54 = vcombine.low %v10415_v50, %v10418_v57  ;;  %v11666_v8 = vrot.slane %v11664_v36, 5  ;;  %v11670_v19 = vrot.slane %v11668_v21, 4  ;;  %v10421_v55 = vrot.slane %v10264_v41, 5  ;;  %v17494_v50 = vpop.f32.mrb[7].mxu0  ;;  %v16141_v49 = vld [vmem:[%s21403_s19 + $0xc] sm:$0xe] }
 0x36d   : > { %12432 = vmatmul.mubr.bf16.gmra.mrb[104].mxu0 %v19252_v46  ;;  %v11661_v47 = vor.u32 %v11660_v15, %v11657_v45  ;;  %v11676_v25 = vrot.slane %v11674_v9, 5  ;;  %v10424_v34 = vrot.slane %v10265_v37, 5  ;;  %v17356_v7 = vadd.f32 %v17355_v58, %v17354_v59  ;;  %v16142_v1 = vld [vmem:[%s21403_s19 + $0x10] sm:$0xf]  ;;  %v16143_v59 = vld [vmem:[%s21403_s19 + $0x14] sm:$0x1] }
 0x36e   : > { %18184 = vmatprep.mubr.bf16.mxu1 %v15955_v54  ;;  %v11671_v5 = vor.u32 %v11670_v19, %v11666_v8  ;;  %v10422_v46 = vsel %vm19670_vm5, %v15940_v12, %v10421_v55  ;;  %v10423_v41 = vrot.slane %v10421_v55, 4  ;;  %v17492_v40 = vadd.f32 %v17491_v42, %v17490_v33  ;;  %v16341_v17 = vld [vmem:[%s21403_s19 + $0x18] sm:$0xf]  ;;  %v17360_v57 = vpop.f32.mrb[136].mxu1  ;;  %v19256_v33 = vld [vmem:[%s21403_s19 + $0xc0] sm:$0xff]   ;;  %v17496_v54 = vpop.f32.mrb[8].mxu0 }
 0x36f   : > { %v11662_v45 = vrot.slane %v11661_v47, 4  ;;  %v18376_v37 = vadd.f32 %v21842_v48, %v17356_v7  ;;  %v17359_v36 = vadd.f32 %v17358_v22, %v17357_v20  ;;  %v17495_v21 = vadd.f32 %v17494_v50, %v17493_v24  ;;  %v16342_v42 = vld [vmem:[%s21403_s19 + $0x1c] sm:$0xf]  ;;  %v16343_v47 = vld [vmem:[%s21403_s19 + $0x20] sm:$0x1] }
 0x370   : > { %v11672_v15 = vrot.slane %v11671_v5, 4  ;;  %v10425_v9 = vsel %vm19670_vm5, %v10423_v41, %v10424_v34  ;;  %v16189_v12 = vrot.slane %v16141_v49, 9  ;;  %v11856_v58 = vrot.slane %v16142_v1, 5  ;;  %v16144_v7 = vld [vmem:[%s21403_s19 + $0x18] sm:$0xe]  ;;  %v17361_v1 = vpop.f32.mrb[137].mxu1 }
 0x371   : > { %v11667_v48 = vsel %vm19552_vm2, %v11662_v45, %v11666_v8  ;;  %v15956_v19 = vcombine.low %v10422_v46, %v10425_v9  ;;  %v22388_v55 = vadd.f32 %v18376_v37, %v17492_v40  ;;  %v18394_v20 = vadd.f32 %v21845_v16, %v17359_v36  ;;  %v16145_v24 = vld [vmem:[%s21403_s19 + $0x1c] sm:$0xf]  ;;  %v16146_v50 = vld [vmem:[%s21403_s19 + $0x20] sm:$0x1]  ;;  %v17497_v16 = vpop.f32.mrb[9].mxu0 }
 0x372   : > { %v11677_v34 = vsel %vm19552_vm2, %v11672_v15, %v11676_v25  ;;  %v11857_v22 = vsel %vm19670_vm5, %v16189_v12, %v11856_v58  ;;  %v11858_v5 = vrot.slane %v11856_v58, 4  ;;  %v11859_v41 = vrot.slane %v16143_v59, 5  ;;  %v19259_v15 = vld [vmem:[%s23359_s3 + $0x680] sm:$0xff]   ;;  %v17363_v58 = vpop.f32.mrb[138].mxu1 }
 0x373   : > { %v16140_v49 = vcombine.low %v11667_v48, %v11677_v34  ;;  %18185 = vmatmul.mubr.bf16.gmra.mrb[44].mxu1 %v15956_v19  ;;  %v22399_v8 = vadd.f32 %v18394_v20, %v17495_v21  ;;  %v12835_v46 = vshrl.u32 %v16341_v17, 16  ;;  %v12838_v40 = vshll.u32 %v16341_v17, 16  ;;  %18236 = vmatprep.subr.bf16.mxu1 %v19259_v15 }
 0x374   : > { %v11860_v45 = vsel %vm19670_vm5, %v11858_v5, %v11859_v41  ;;  %v12844_v37 = vshll.u32 %v16342_v42, 16  ;;  %v12848_v36 = vshrl.u32 %v16342_v42, 16  ;;  %v12854_v25 = vshll.u32 %v16343_v47, 16  ;;  %v17499_v42 = vpop.f32.mrb[10].mxu0  ;;  %v17364_v47 = vpop.f32.mrb[139].mxu1 }
 0x375   : > { %12439 = vmatprep.mubr.bf16.mxu0 %v16140_v49  ;;  %v16205_v59 = vcombine.low %v11857_v22, %v11860_v45  ;;  %v12837_v9 = vrot.slane %v12835_v46, 4  ;;  %v12840_v12 = vrot.slane %v12838_v40, 5  ;;  %v16190_v21 = vrot.slane %v16144_v7, 9  ;;  %v17500_v7 = vpop.f32.mrb[11].mxu0  ;;  %v16147_v49 = vld [vmem:[%s21403_s19 + $0x24] sm:$0xe] }
 0x376   : > { %12440 = vmatmul.mubr.bf16.gmra.mrb[108].mxu0 %v19256_v33  ;;  %v12846_v17 = vrot.slane %v12844_v37, 5  ;;  %v12850_v48 = vrot.slane %v12848_v36, 4  ;;  %v12856_v19 = vrot.slane %v12854_v25, 5  ;;  %v11863_v20 = vrot.slane %v16145_v24, 5  ;;  %v16148_v46 = vld [vmem:[%s21403_s19 + $0x28] sm:$0xf] }
 0x377   : > { %18204 = vmatprep.mubr.bf16.mxu1 %v16205_v59  ;;  %v12841_v34 = vor.u32 %v12840_v12, %v12837_v9  ;;  %v11866_v5 = vrot.slane %v16146_v50, 5  ;;  %v17362_v22 = vadd.f32 %v17361_v1, %v17360_v57  ;;  %v17498_v41 = vadd.f32 %v17497_v16, %v17496_v54  ;;  %v16149_v37 = vld [vmem:[%s21403_s19 + $0x2c] sm:$0x1]  ;;  %v16344_v54 = vld [vmem:[%s21403_s19 + $0x24] sm:$0xf]  ;;  %v19258_v9 = vld [vmem:[%s21403_s19 + $0x18] sm:$0xff]  }
 0x378   : > { %v12851_v33 = vor.u32 %v12850_v48, %v12846_v17  ;;  %v11864_v24 = vsel %vm19670_vm5, %v16190_v21, %v11863_v20  ;;  %v11865_v40 = vrot.slane %v11863_v20, 4  ;;  %v17365_v45 = vadd.f32 %v17364_v47, %v17363_v58  ;;  %v16345_v1 = vld [vmem:[%s21403_s19 + $0x28] sm:$0xf]  ;;  %v23389_v12 = vld [vmem:[#allocation9_spill] sm:$0xff]  ;;  %v16346_v20 = vld [vmem:[%s21403_s19 + $0x2c] sm:$0x1] }
 0x379   : > { %v12842_v36 = vrot.slane %v12841_v34, 4  ;;  %v18421_v25 = vadd.f32 %v21872_v0, %v17362_v22  ;;  %v17501_v50 = vadd.f32 %v17500_v7, %v17499_v42  ;;  %v16191_v57 = vrot.slane %v16147_v49, 9  ;;  %v16150_v58 = vld [vmem:[%s21403_s19 + $0x30] sm:$0xe]  ;;  %v16151_v22 = vld [vmem:[%s21403_s19 + $0x34] sm:$0xf] }
 0x37a   : > { %v12852_v16 = vrot.slane %v12851_v33, 4  ;;  %v11867_v59 = vsel %vm19670_vm5, %v11865_v40, %v11866_v5  ;;  %v18439_v21 = vadd.f32 %v23389_v12, %v17365_v45  ;;  %v11870_v48 = vrot.slane %v16148_v46, 5  ;;  %v16152_v7 = vld [vmem:[%s21403_s19 + $0x38] sm:$0x1]  ;;  %v17366_v49 = vpop.f32.mrb[140].mxu1  ;;  %v17502_v45 = vpop.f32.mrb[12].mxu0 }
 0x37b   : > { %v12847_v47 = vsel %vm19552_vm2, %v12842_v36, %v12846_v17  ;;  %v16206_v0 = vcombine.low %v11864_v24, %v11867_v59  ;;  %v22422_v34 = vadd.f32 %v18421_v25, %v17498_v41  ;;  %v11873_v42 = vrot.slane %v16149_v37, 5  ;;  %v17367_v12 = vpop.f32.mrb[141].mxu1  ;;  %v19261_v17 = vld [vmem:[%s23359_s3 + $0x688] sm:$0xff]   ;;  %v17503_v25 = vpop.f32.mrb[13].mxu0 }
 0x37c   : > { %v12857_v33 = vsel %vm19552_vm2, %v12852_v16, %v12856_v19  ;;  %v22428_v5 = vadd.f32 %v18439_v21, %v17501_v50  ;;  %v11871_v46 = vsel %vm19670_vm5, %v16191_v57, %v11870_v48  ;;  %v11872_v40 = vrot.slane %v11870_v48, 4  ;;  %v17369_v59 = vpop.f32.mrb[142].mxu1 }
 0x37d   : > { %23390 = vst [vmem:[#allocation10_spill] sm:$0xff] %v22422_v34  ;;  %v16389_v41 = vcombine.low %v12847_v47, %v12857_v33  ;;  %18205 = vmatmul.mubr.bf16.vlgmr.msra.gmra.mrb[16].mxu1 %v16206_v0  ;;  %v12859_v24 = vshrl.u32 %v16344_v54, 16  ;;  %v12862_v37 = vshll.u32 %v16344_v54, 16  ;;  %v12868_v36 = vshll.u32 %v16345_v1, 16  ;;  %v17505_v47 = vpop.f32.mrb[14].mxu0  ;;  %v17370_v54 = vpop.f32.mrb[143].mxu1 }
 0x37e   : > { %23391 = vst [vmem:[#allocation11_spill] sm:$0xff] %v22428_v5  ;;  %18237 = vmatpush3.bf16.msra.mxu1 %v19259_v15  ;;  %v11874_v19 = vsel %vm19670_vm5, %v11872_v40, %v11873_v42  ;;  %v12872_v50 = vshrl.u32 %v16345_v1, 16  ;;  %v12878_v16 = vshll.u32 %v16346_v20, 16  ;;  %v16192_v57 = vrot.slane %v16150_v58, 9  ;;  %v17506_v1 = vpop.f32.mrb[15].mxu0  ;;  %v22437_v20 = vpop.f32.mrb[144].mxu1 }
 0x37f   : > { %13859 = vmatprep.mubr.bf16.mxu0 %v16389_v41  ;;  %v16207_v21 = vcombine.low %v11871_v46, %v11874_v19  ;;  %v12861_v48 = vrot.slane %v12859_v24, 4  ;;  %v12864_v5 = vrot.slane %v12862_v37, 5  ;;  %v12870_v34 = vrot.slane %v12868_v36, 5  ;;  %18238 = vmatprep.subr.bf16.mxu1 %v19261_v17  ;;  %v16153_v24 = vld [vmem:[%s21403_s19 + $0x3c] sm:$0xe] }
 0x380   : > { %13860 = vmatmul.mubr.bf16.vlgmr.msra.gmra.mrb[112].mxu0 %v19258_v9  ;;  %v12874_v15 = vrot.slane %v12872_v50, 4  ;;  %v12880_v0 = vrot.slane %v12878_v16, 5  ;;  %v11877_v33 = vrot.slane %v16151_v22, 5  ;;  %v11880_v42 = vrot.slane %v16152_v7, 5  ;;  %v16154_v37 = vld [vmem:[%s21403_s19 + $0x40] sm:$0xf] }
 0x381   : > { %18208 = vmatprep.mubr.bf16.mxu1 %v16207_v21  ;;  %v12865_v58 = vor.u32 %v12864_v5, %v12861_v48  ;;  %v17368_v46 = vadd.f32 %v17367_v12, %v17366_v49  ;;  %v17504_v40 = vadd.f32 %v17503_v25, %v17502_v45  ;;  %v17371_v41 = vadd.f32 %v17370_v54, %v17369_v59  ;;  %v16155_v36 = vld [vmem:[%s21403_s19 + $0x44] sm:$0x1]  ;;  %v16347_v50 = vld [vmem:[%s21403_s19 + $0x30] sm:$0xf]  ;;  %v17508_v16 = vpop.f32.mrb[16].mxu0 }
 0x382   : > { %v12875_v9 = vor.u32 %v12874_v15, %v12870_v34  ;;  %v11878_v22 = vsel %vm19670_vm5, %v16192_v57, %v11877_v33  ;;  %v11879_v7 = vrot.slane %v11877_v33, 4  ;;  %18239 = vmatpush3.bf16.msra.mxu1 %v19261_v17  ;;  %v17507_v19 = vadd.f32 %v17506_v1, %v17505_v47  ;;  %v16348_v25 = vld [vmem:[%s21403_s19 + $0x34] sm:$0xf]  ;;  %v16349_v59 = vld [vmem:[%s21403_s19 + $0x38] sm:$0x1]  ;;  %v19260_v48 = vld [vmem:[%s21403_s19 + $0x24] sm:$0xff]  }
 0x383   : > { %v12866_v5 = vrot.slane %v12865_v58, 4  ;;  %v18412_v49 = vadd.f32 %v21909_v3, %v17368_v46  ;;  %v18430_v45 = vadd.f32 %v21912_v56, %v17371_v41  ;;  %v16193_v12 = vrot.slane %v16153_v24, 9  ;;  %v16156_v47 = vld [vmem:[%s21403_s19 + $0x48] sm:$0xe]  ;;  %v17373_v15 = vpop.f32.mrb[145].mxu1 }
 0x384   : > { %v12876_v21 = vrot.slane %v12875_v9, 4  ;;  %v11881_v57 = vsel %vm19670_vm5, %v11879_v7, %v11880_v42  ;;  %v11884_v54 = vrot.slane %v16154_v37, 5  ;;  %v11887_v17 = vrot.slane %v16155_v36, 5  ;;  %v16157_v58 = vld [vmem:[%s21403_s19 + $0x4c] sm:$0xf]  ;;  %v17509_v36 = vpop.f32.mrb[17].mxu0 }
 0x385   : > { %v12871_v33 = vsel %vm19552_vm2, %v12866_v5, %v12870_v34  ;;  %v16208_v3 = vcombine.low %v11878_v22, %v11881_v57  ;;  %v22455_v1 = vadd.f32 %v18412_v49, %v17504_v40  ;;  %v22457_v56 = vadd.f32 %v18430_v45, %v17507_v19  ;;  %v16158_v46 = vld [vmem:[%s21403_s19 + $0x50] sm:$0x1]  ;;  %v17375_v19 = vpop.f32.mrb[146].mxu1 }
 0x386   : > { %v12881_v41 = vsel %vm19552_vm2, %v12876_v21, %v12880_v0  ;;  %v11885_v42 = vsel %vm19670_vm5, %v16193_v12, %v11884_v54  ;;  %v11886_v24 = vrot.slane %v11884_v54, 4  ;;  %v12883_v37 = vshrl.u32 %v16347_v50, 16  ;;  %v19263_v34 = vld [vmem:[%s23359_s3 + $0x690] sm:$0xff]   ;;  %v17511_v12 = vpop.f32.mrb[18].mxu0  ;;  %v17376_v21 = vpop.f32.mrb[147].mxu1 }
 0x387   : > { %23392 = vst [vmem:[#allocation12_spill] sm:$0xff] %v22455_v1  ;;  %23393 = vst [vmem:[#allocation9_spill] sm:$0xff] %v22457_v56  ;;  %v16390_v9 = vcombine.low %v12871_v33, %v12881_v41  ;;  %18209 = vmatmul.mubr.bf16.gmra.mrb[20].mxu1 %v16208_v3  ;;  %v12886_v40 = vshll.u32 %v16347_v50, 16  ;;  %v12892_v22 = vshll.u32 %v16348_v25, 16  ;;  %v12896_v7 = vshrl.u32 %v16348_v25, 16  ;;  %18240 = vmatprep.subr.bf16.mxu1 %v19263_v34  ;;  %v17512_v50 = vpop.f32.mrb[19].mxu0 }
 0x388   : > { %v11888_v5 = vsel %vm19670_vm5, %v11886_v24, %v11887_v17  ;;  %v12885_v0 = vrot.slane %v12883_v37, 4  ;;  %v12902_v49 = vshll.u32 %v16349_v59, 16  ;;  %v16194_v45 = vrot.slane %v16156_v47, 9  ;;  %18241 = vmatpush3.bf16.msra.mxu1 %v19263_v34  ;;  %v16159_v47 = vld [vmem:[%s21403_s19 + $0x54] sm:$0xe]  ;;  %v22472_v41 = vpop.f32.mrb[148].mxu1 }
 0x389   : > { %13867 = vmatprep.mubr.bf16.mxu0 %v16390_v9  ;;  %v16209_v57 = vcombine.low %v11885_v42, %v11888_v5  ;;  %v12888_v54 = vrot.slane %v12886_v40, 5  ;;  %v12894_v56 = vrot.slane %v12892_v22, 5  ;;  %v12898_v33 = vrot.slane %v12896_v7, 4  ;;  %v16160_v34 = vld [vmem:[%s21403_s19 + $0x58] sm:$0xf]  ;;  %v17514_v5 = vpop.f32.mrb[20].mxu0 }
 0x38a   : > { %13868 = vmatmul.mubr.bf16.gmra.mrb[116].mxu0 %v19260_v48  ;;  %v12904_v25 = vrot.slane %v12902_v49, 5  ;;  %v11891_v17 = vrot.slane %v16157_v58, 5  ;;  %v11894_v3 = vrot.slane %v16158_v46, 5  ;;  %v17374_v59 = vadd.f32 %v17373_v15, %v22437_v20  ;;  %v16161_v40 = vld [vmem:[%s21403_s19 + $0x5c] sm:$0x1] }
 0x38b   : > { %18212 = vmatprep.mubr.bf16.mxu1 %v16209_v57  ;;  %v12889_v42 = vor.u32 %v12888_v54, %v12885_v0  ;;  %v12899_v24 = vor.u32 %v12898_v33, %v12894_v56  ;;  %v17510_v37 = vadd.f32 %v17509_v36, %v17508_v16  ;;  %v17377_v9 = vadd.f32 %v17376_v21, %v17375_v19  ;;  %v16350_v48 = vld [vmem:[%s21403_s19 + $0x3c] sm:$0xf]  ;;  %v16351_v22 = vld [vmem:[%s21403_s19 + $0x40] sm:$0xf]  ;;  %v16352_v7 = vld [vmem:[%s21403_s19 + $0x44] sm:$0x1] }
 0x38c   : > { %v11892_v58 = vsel %vm19670_vm5, %v16194_v45, %v11891_v17  ;;  %v11893_v46 = vrot.slane %v11891_v17, 4  ;;  %v18457_v20 = vadd.f32 %v21941_v29, %v17374_v59  ;;  %v17513_v15 = vadd.f32 %v17512_v50, %v17511_v12  ;;  %v19262_v16 = vld [vmem:[%s21403_s19 + $0x30] sm:$0xff]   ;;  %v16162_v21 = vld [vmem:[%s21403_s19 + $0x60] sm:$0xe]  ;;  %v17379_v57 = vpop.f32.mrb[149].mxu1 }
 0x38d   : > { %v12890_v0 = vrot.slane %v12889_v42, 4  ;;  %v12900_v49 = vrot.slane %v12899_v24, 4  ;;  %v18475_v36 = vadd.f32 %v21958_v6, %v17377_v9  ;;  %v16195_v19 = vrot.slane %v16159_v47, 9  ;;  %v16163_v12 = vld [vmem:[%s21403_s19 + $0x64] sm:$0xf]  ;;  %v17515_v47 = vpop.f32.mrb[21].mxu0 }
 0x38e   : > { %v11895_v45 = vsel %vm19670_vm5, %v11893_v46, %v11894_v3  ;;  %v22487_v54 = vadd.f32 %v18457_v20, %v17510_v37  ;;  %v11898_v29 = vrot.slane %v16160_v34, 5  ;;  %v11901_v33 = vrot.slane %v16161_v40, 5  ;;  %v16164_v6 = vld [vmem:[%s21403_s19 + $0x68] sm:$0x1]  ;;  %v19265_v3 = vld [vmem:[%s23359_s3 + $0x698] sm:$0xff]   ;;  %v17381_v40 = vpop.f32.mrb[150].mxu1 }
 0x38f   : > { %v12895_v50 = vsel %vm19552_vm2, %v12890_v0, %v12894_v56  ;;  %v12905_v17 = vsel %vm19552_vm2, %v12900_v49, %v12904_v25  ;;  %v16210_v59 = vcombine.low %v11892_v58, %v11895_v45  ;;  %v22494_v42 = vadd.f32 %v18475_v36, %v17513_v15  ;;  %v17517_v56 = vpop.f32.mrb[22].mxu0  ;;  %18242 = vmatprep.subr.bf16.mxu1 %v19265_v3  ;;  %v17382_v15 = vpop.f32.mrb[151].mxu1  ;;  %v23403_v35 = vld [vmem:[#allocation12_spill] sm:$0xff] }
 0x390   : > { %23394 = vst [vmem:[#allocation13_spill] sm:$0xff] %v22487_v54  ;;  %v16391_v24 = vcombine.low %v12895_v50, %v12905_v17  ;;  %v11899_v37 = vsel %vm19670_vm5, %v16195_v19, %v11898_v29  ;;  %v11900_v9 = vrot.slane %v11898_v29, 4  ;;  %v12907_v34 = vshrl.u32 %v16350_v48, 16  ;;  %v17518_v0 = vpop.f32.mrb[23].mxu0  ;;  %18243 = vmatpush3.bf16.msra.mxu1 %v19265_v3  ;;  %v22505_v17 = vpop.f32.mrb[152].mxu1 }
 0x391   : > { %23395 = vst [vmem:[#allocation14_spill] sm:$0xff] %v22494_v42  ;;  %18213 = vmatmul.mubr.bf16.gmra.mrb[24].mxu1 %v16210_v59  ;;  %v12910_v46 = vshll.u32 %v16350_v48, 16  ;;  %v12916_v25 = vshll.u32 %v16351_v22, 16  ;;  %v12920_v58 = vshrl.u32 %v16351_v22, 16  ;;  %v12926_v20 = vshll.u32 %v16352_v7, 16 }
 0x392   : > { %13875 = vmatprep.mubr.bf16.mxu0 %v16391_v24  ;;  %v11902_v49 = vsel %vm19670_vm5, %v11900_v9, %v11901_v33  ;;  %v12909_v36 = vrot.slane %v12907_v34, 4  ;;  %v16196_v45 = vrot.slane %v16162_v21, 9  ;;  %v11905_v19 = vrot.slane %v16163_v12, 5  ;;  %v16165_v7 = vld [vmem:[%s21403_s19 + $0x6c] sm:$0xe]  ;;  %v22509_v12 = vpop.f32.mrb[24].mxu0 }
 0x393   : > { %13876 = vmatmul.mubr.bf16.gmra.mrb[120].mxu0 %v19262_v16  ;;  %v16211_v29 = vcombine.low %v11899_v37, %v11902_v49  ;;  %v12912_v50 = vrot.slane %v12910_v46, 5  ;;  %v12918_v48 = vrot.slane %v12916_v25, 5  ;;  %v12922_v22 = vrot.slane %v12920_v58, 4  ;;  %v16166_v34 = vld [vmem:[%s21403_s19 + $0x70] sm:$0xf] }
 0x394   : > { %v12928_v59 = vrot.slane %v12926_v20, 5  ;;  %v11906_v24 = vsel %vm19670_vm5, %v16196_v45, %v11905_v19  ;;  %v11907_v33 = vrot.slane %v11905_v19, 4  ;;  %v11908_v21 = vrot.slane %v16164_v6, 5  ;;  %v16167_v46 = vld [vmem:[%s21403_s19 + $0x74] sm:$0x1]  ;;  %v17385_v19 = vpop.f32.mrb[153].mxu1 }
 0x395   : > { %18216 = vmatprep.mubr.bf16.mxu1 %v16211_v29  ;;  %v12913_v16 = vor.u32 %v12912_v50, %v12909_v36  ;;  %v12923_v3 = vor.u32 %v12922_v22, %v12918_v48  ;;  %v17380_v37 = vadd.f32 %v17379_v57, %v22472_v41  ;;  %v17516_v9 = vadd.f32 %v17515_v47, %v17514_v5  ;;  %v16353_v25 = vld [vmem:[%s21403_s19 + $0x48] sm:$0xf]  ;;  %v16354_v45 = vld [vmem:[%s21403_s19 + $0x4c] sm:$0xf]  ;;  %v19264_v22 = vld [vmem:[%s21403_s19 + $0x3c] sm:$0xff]  }
 0x396   : > { %v11909_v58 = vsel %vm19670_vm5, %v11907_v33, %v11908_v21  ;;  %v17383_v20 = vadd.f32 %v17382_v15, %v17381_v40  ;;  %v17519_v6 = vadd.f32 %v17518_v0, %v17517_v56  ;;  %v16197_v49 = vrot.slane %v16165_v7, 9  ;;  %v16355_v5 = vld [vmem:[%s21403_s19 + $0x50] sm:$0x1]  ;;  %v16168_v57 = vld [vmem:[%s21403_s19 + $0x78] sm:$0xe]  ;;  %v17521_v40 = vpop.f32.mrb[25].mxu0 }
 0x397   : > { %v12914_v36 = vrot.slane %v12913_v16, 4  ;;  %v12924_v29 = vrot.slane %v12923_v3, 4  ;;  %v16212_v50 = vcombine.low %v11906_v24, %v11909_v58  ;;  %v18448_v41 = vadd.f32 %v21972_v4, %v17380_v37  ;;  %v16169_v47 = vld [vmem:[%s21403_s19 + $0x7c] sm:$0xf]  ;;  %v19267_v7 = vld [vmem:[%s23359_s3 + $0x6a0] sm:$0xff]   ;;  %v17523_v37 = vpop.f32.mrb[26].mxu0 }
 0x398   : > { %v18466_v42 = vadd.f32 %v21986_v39, %v17383_v20  ;;  %v11912_v54 = vrot.slane %v16166_v34, 5  ;;  %v11915_v1 = vrot.slane %v16167_v46, 5  ;;  %v12931_v33 = vshrl.u32 %v16353_v25, 16  ;;  %v16170_v3 = vld [vmem:[%s21403_s19 + $0x80] sm:$0x1]  ;;  %18244 = vmatprep.subr.bf16.mxu1 %v19267_v7  ;;  %v17524_v58 = vpop.f32.mrb[27].mxu0 }
 0x399   : > { %v12919_v56 = vsel %vm19552_vm2, %v12914_v36, %v12918_v48  ;;  %v12929_v15 = vsel %vm19552_vm2, %v12924_v29, %v12928_v59  ;;  %18217 = vmatmul.mubr.bf16.gmra.mrb[28].mxu1 %v16212_v50  ;;  %v22528_v0 = vadd.f32 %v18448_v41, %v17516_v9  ;;  %v12934_v4 = vshll.u32 %v16353_v25, 16  ;;  %v17387_v48 = vpop.f32.mrb[154].mxu1  ;;  %v16171_v41 = vld [vmem:[%s21403_s19 + $0x84] sm:$0xe] }
 0x39a   : > { %v16392_v24 = vcombine.low %v12919_v56, %v12929_v15  ;;  %v22533_v39 = vadd.f32 %v18466_v42, %v17519_v6  ;;  %v11913_v21 = vsel %vm19670_vm5, %v16197_v49, %v11912_v54  ;;  %v11914_v16 = vrot.slane %v11912_v54, 4  ;;  %v17388_v25 = vpop.f32.mrb[155].mxu1  ;;  %18245 = vmatpush3.bf16.msra.mxu1 %v19267_v7 }
 0x39b   : > { %v12933_v34 = vrot.slane %v12931_v33, 4  ;;  %v12936_v59 = vrot.slane %v12934_v4, 5  ;;  %v12940_v46 = vshll.u32 %v16354_v45, 16  ;;  %v12944_v9 = vshrl.u32 %v16354_v45, 16  ;;  %v22540_v54 = vpop.f32.mrb[156].mxu1 }
 0x39c   : > { %13883 = vmatprep.mubr.bf16.mxu0 %v16392_v24  ;;  %v11916_v42 = vsel %vm19670_vm5, %v11914_v16, %v11915_v1  ;;  %v12950_v20 = vshll.u32 %v16355_v5, 16  ;;  %v16198_v6 = vrot.slane %v16168_v57, 9  ;;  %v11919_v49 = vrot.slane %v16169_v47, 5  ;;  %v16172_v57 = vld [vmem:[%s21403_s19 + $0x88] sm:$0xf]  ;;  %v22546_v47 = vpop.f32.mrb[28].mxu0 }
 0x39d   : > { %13884 = vmatmul.mubr.bf16.gmra.mrb[124].mxu0 %v19264_v22  ;;  %v16213_v36 = vcombine.low %v11913_v21, %v11916_v42  ;;  %v12937_v29 = vor.u32 %v12936_v59, %v12933_v34  ;;  %v12942_v45 = vrot.slane %v12940_v46, 5  ;;  %v12946_v50 = vrot.slane %v12944_v9, 4  ;;  %v16173_v24 = vld [vmem:[%s21403_s19 + $0x8c] sm:$0x1]  ;;  %v16356_v21 = vld [vmem:[%s21403_s19 + $0x54] sm:$0xf] }
 0x39e   : > { %v12952_v33 = vrot.slane %v12950_v20, 5  ;;  %v11920_v56 = vsel %vm19670_vm5, %v16198_v6, %v11919_v49  ;;  %v11921_v1 = vrot.slane %v11919_v49, 4  ;;  %v11922_v5 = vrot.slane %v16170_v3, 5  ;;  %v17391_v16 = vpop.f32.mrb[157].mxu1  ;;  %v16357_v9 = vld [vmem:[%s21403_s19 + $0x58] sm:$0xf] }
 0x39f   : > { %18220 = vmatprep.mubr.bf16.mxu1 %v16213_v36  ;;  %v12938_v15 = vrot.slane %v12937_v29, 4  ;;  %v12947_v22 = vor.u32 %v12946_v50, %v12942_v45  ;;  %v17386_v4 = vadd.f32 %v17385_v19, %v22505_v17  ;;  %v17522_v7 = vadd.f32 %v17521_v40, %v22509_v12  ;;  %v17527_v42 = vpop.f32.mrb[29].mxu0  ;;  %v19266_v6 = vld [vmem:[%s21403_s19 + $0x48] sm:$0xff]   ;;  %v16358_v40 = vld [vmem:[%s21403_s19 + $0x5c] sm:$0x1]  ;;  %v17393_v50 = vpop.f32.mrb[158].mxu1 }
 0x3a0   : > { %v11923_v3 = vsel %vm19670_vm5, %v11921_v1, %v11922_v5  ;;  %v17389_v34 = vadd.f32 %v17388_v25, %v17387_v48  ;;  %v17525_v59 = vadd.f32 %v17524_v58, %v17523_v37  ;;  %v16199_v46 = vrot.slane %v16171_v41, 9  ;;  %v16174_v49 = vld [vmem:[%s21403_s19 + $0x90] sm:$0xe]  ;;  %v16175_v36 = vld [vmem:[%s21403_s19 + $0x94] sm:$0xf]  ;;  %v19269_v29 = vld [vmem:[%s23359_s3 + $0x6a8] sm:$0xff]  }
 0x3a1   : > { %v12943_v20 = vsel %vm19552_vm2, %v12938_v15, %v12942_v45  ;;  %v12948_v17 = vrot.slane %v12947_v22, 4  ;;  %v16214_v19 = vcombine.low %v11920_v56, %v11923_v3  ;;  %v18493_v12 = vadd.f32 %v22007_v30, %v17386_v4  ;;  %18246 = vmatprep.subr.bf16.mxu1 %v19269_v29  ;;  %v17529_v1 = vpop.f32.mrb[30].mxu0  ;;  %v17394_v5 = vpop.f32.mrb[159].mxu1  ;;  %v16176_v4 = vld [vmem:[%s21403_s19 + $0x98] sm:$0x1] }
 0x3a2   : > { %v18511_v48 = vadd.f32 %v22022_v51, %v17389_v34  ;;  %v11926_v37 = vrot.slane %v16172_v57, 5  ;;  %v11929_v25 = vrot.slane %v16173_v24, 5  ;;  %v12955_v58 = vshrl.u32 %v16356_v21, 16  ;;  %18247 = vmatpush3.bf16.msra.mxu1 %v19269_v29  ;;  %v17530_v24 = vpop.f32.mrb[31].mxu0 }
 0x3a3   : > { %v12953_v45 = vsel %vm19552_vm2, %v12948_v17, %v12952_v33  ;;  %18221 = vmatmul.mubr.bf16.gmra.mrb[32].mxu1 %v16214_v19  ;;  %v22568_v41 = vadd.f32 %v18493_v12, %v17522_v7  ;;  %v12958_v30 = vshll.u32 %v16356_v21, 16  ;;  %v12964_v56 = vshll.u32 %v16357_v9, 16 }
 0x3a4   : > { %v16393_v15 = vcombine.low %v12943_v20, %v12953_v45  ;;  %v22570_v22 = vadd.f32 %v18511_v48, %v17525_v59  ;;  %v11927_v51 = vsel %vm19670_vm5, %v16199_v46, %v11926_v37  ;;  %v11928_v57 = vrot.slane %v11926_v37, 4  ;;  %v16177_v48 = vld [vmem:[%s21403_s19 + $0x9c] sm:$0xe]  ;;  %v16178_v37 = vld [vmem:[%s21403_s19 + $0xa0] sm:$0xf] }
 0x3a5   : > { %v12957_v33 = vrot.slane %v12955_v58, 4  ;;  %v12960_v7 = vrot.slane %v12958_v30, 5  ;;  %v12966_v3 = vrot.slane %v12964_v56, 5  ;;  %v12968_v21 = vshrl.u32 %v16357_v9, 16  ;;  %v16179_v30 = vld [vmem:[%s21403_s19 + $0xa4] sm:$0x1] }
 0x3a6   : > { %13891 = vmatprep.mubr.bf16.mxu0 %v16393_v15  ;;  %v11930_v34 = vsel %vm19670_vm5, %v11928_v57, %v11929_v25  ;;  %v12974_v59 = vshll.u32 %v16358_v40, 16  ;;  %v16200_v20 = vrot.slane %v16174_v49, 9  ;;  %v11933_v17 = vrot.slane %v16175_v36, 5  ;;  %v16359_v40 = vld [vmem:[%s21403_s19 + $0x60] sm:$0xf] }
 0x3a7   : > { %13892 = vmatmul.mubr.bf16.gmra.mrb[128].mxu0 %v19266_v6  ;;  %v16215_v46 = vcombine.low %v11927_v51, %v11930_v34  ;;  %v12961_v19 = vor.u32 %v12960_v7, %v12957_v33  ;;  %v12970_v12 = vrot.slane %v12968_v21, 4  ;;  %v11936_v29 = vrot.slane %v16176_v4, 5  ;;  %v16360_v15 = vld [vmem:[%s21403_s19 + $0x64] sm:$0xf]  ;;  %v17396_v51 = vpop.f32.mrb[160].mxu1  ;;  %v17532_v7 = vpop.f32.mrb[32].mxu0 }
 0x3a8   : > { %v12976_v58 = vrot.slane %v12974_v59, 5  ;;  %v11934_v9 = vsel %vm19670_vm5, %v16200_v20, %v11933_v17  ;;  %v11935_v45 = vrot.slane %v11933_v17, 4  ;;  %v17392_v25 = vadd.f32 %v17391_v16, %v22540_v54  ;;  %v16361_v16 = vld [vmem:[%s21403_s19 + $0x68] sm:$0x1]  ;;  %v17397_v21 = vpop.f32.mrb[161].mxu1 }
 0x3a9   : > { %18224 = vmatprep.mubr.bf16.mxu1 %v16215_v46  ;;  %v12962_v49 = vrot.slane %v12961_v19, 4  ;;  %v12971_v6 = vor.u32 %v12970_v12, %v12966_v3  ;;  %v17528_v36 = vadd.f32 %v17527_v42, %v22546_v47  ;;  %v17395_v56 = vadd.f32 %v17394_v5, %v17393_v50  ;;  %v19271_v47 = vld [vmem:[%s23359_s3 + $0x6b0] sm:$0xff]   ;;  %v16180_v59 = vld [vmem:[%s21403_s19 + $0xa8] sm:$0xe]  ;;  %v16181_v20 = vld [vmem:[%s21403_s19 + $0xac] sm:$0xf] }
 0x3aa   : > { %v11937_v57 = vsel %vm19670_vm5, %v11935_v45, %v11936_v29  ;;  %v18484_v4 = vadd.f32 %v22049_v44, %v17392_v25  ;;  %v17531_v33 = vadd.f32 %v17530_v24, %v17529_v1  ;;  %v16201_v54 = vrot.slane %v16177_v48, 9  ;;  %v17533_v44 = vpop.f32.mrb[33].mxu0  ;;  %v19268_v1 = vld [vmem:[%s21403_s19 + $0x54] sm:$0xff]   ;;  %18248 = vmatprep.subr.bf16.mxu1 %v19271_v47  ;;  %v17399_v12 = vpop.f32.mrb[162].mxu1  ;;  %v16182_v45 = vld [vmem:[%s21403_s19 + $0xb0] sm:$0x1] }
 0x3ab   : > { %v12967_v42 = vsel %vm19552_vm2, %v12962_v49, %v12966_v3  ;;  %v12972_v50 = vrot.slane %v12971_v6, 4  ;;  %v16216_v5 = vcombine.low %v11934_v9, %v11937_v57  ;;  %v18502_v34 = vadd.f32 %v22064_v62, %v17395_v56  ;;  %v17535_v29 = vpop.f32.mrb[34].mxu0  ;;  %v17400_v25 = vpop.f32.mrb[163].mxu1  ;;  %18249 = vmatpush3.bf16.msra.mxu1 %v19271_v47 }
 0x3ac   : > { %v22599_v24 = vadd.f32 %v18484_v4, %v17528_v36  ;;  %v11940_v17 = vrot.slane %v16178_v37, 5  ;;  %v11943_v46 = vrot.slane %v16179_v30, 5  ;;  %v12979_v19 = vshrl.u32 %v16359_v40, 16  ;;  %v17536_v49 = vpop.f32.mrb[35].mxu0 }
 0x3ad   : > { %v12977_v3 = vsel %vm19552_vm2, %v12972_v50, %v12976_v58  ;;  %18225 = vmatmul.mubr.bf16.gmra.mrb[36].mxu1 %v16216_v5  ;;  %v22603_v48 = vadd.f32 %v18502_v34, %v17531_v33  ;;  %v12982_v62 = vshll.u32 %v16359_v40, 16  ;;  %v12988_v9 = vshll.u32 %v16360_v15, 16  ;;  %v22610_v5 = vpop.f32.mrb[164].mxu1 }
 0x3ae   : > { %v16394_v6 = vcombine.low %v12967_v42, %v12977_v3  ;;  %v11941_v37 = vsel %vm19670_vm5, %v16201_v54, %v11940_v17  ;;  %v11942_v30 = vrot.slane %v11940_v17, 4  ;;  %v12981_v36 = vrot.slane %v12979_v19, 4  ;;  %v16183_v19 = vld [vmem:[%s21403_s19 + $0xb4] sm:$0xe] }
 0x3af   : > { %v12984_v56 = vrot.slane %v12982_v62, 5  ;;  %v12990_v57 = vrot.slane %v12988_v9, 5  ;;  %v12992_v58 = vshrl.u32 %v16360_v15, 16  ;;  %v12998_v4 = vshll.u32 %v16361_v16, 16  ;;  %v16184_v15 = vld [vmem:[%s21403_s19 + $0xb8] sm:$0xf] }
 0x3b0   : > { %13899 = vmatprep.mubr.bf16.mxu0 %v16394_v6  ;;  %v11944_v40 = vsel %vm19670_vm5, %v11942_v30, %v11943_v46  ;;  %v16202_v33 = vrot.slane %v16180_v59, 9  ;;  %v11947_v42 = vrot.slane %v16181_v20, 5  ;;  %v11950_v50 = vrot.slane %v16182_v45, 5  ;;  %v16185_v59 = vld [vmem:[%s21403_s19 + $0xbc] sm:$0x1]  ;;  %v17538_v20 = vpop.f32.mrb[36].mxu0 }
 0x3b1   : > { %13900 = vmatmul.mubr.bf16.gmra.mrb[132].mxu0 %v19268_v1  ;;  %v16217_v54 = vcombine.low %v11941_v37, %v11944_v40  ;;  %v12985_v47 = vor.u32 %v12984_v56, %v12981_v36  ;;  %v12994_v34 = vrot.slane %v12992_v58, 4  ;;  %v13000_v17 = vrot.slane %v12998_v4, 5  ;;  %v16362_v9 = vld [vmem:[%s21403_s19 + $0x6c] sm:$0xf]  ;;  %v16363_v30 = vld [vmem:[%s21403_s19 + $0x70] sm:$0xf] }
 0x3b2   : > { %v11948_v16 = vsel %vm19670_vm5, %v16202_v33, %v11947_v42  ;;  %v11949_v3 = vrot.slane %v11947_v42, 4  ;;  %v17398_v46 = vadd.f32 %v17397_v21, %v17396_v51  ;;  %v17534_v62 = vadd.f32 %v17533_v44, %v17532_v7  ;;  %v17403_v36 = vpop.f32.mrb[165].mxu1  ;;  %v17539_v7 = vpop.f32.mrb[37].mxu0  ;;  %v19273_v21 = vld [vmem:[%s23359_s3 + $0x6b8] sm:$0xff]  }
 0x3b3   : > { %18228 = vmatprep.mubr.bf16.mxu1 %v16217_v54  ;;  %v12986_v45 = vrot.slane %v12985_v47, 4  ;;  %v12995_v1 = vor.u32 %v12994_v34, %v12990_v57  ;;  %v17401_v6 = vadd.f32 %v17400_v25, %v17399_v12  ;;  %v17537_v37 = vadd.f32 %v17536_v49, %v17535_v29  ;;  %v19270_v25 = vld [vmem:[%s21403_s19 + $0x60] sm:$0xff]   ;;  %v17405_v40 = vpop.f32.mrb[166].mxu1  ;;  %v16364_v47 = vld [vmem:[%s21403_s19 + $0x74] sm:$0x1]  ;;  %18250 = vmatprep.subr.bf16.mxu1 %v19273_v21 }
 0x3b4   : > { %v11951_v56 = vsel %vm19670_vm5, %v11949_v3, %v11950_v50  ;;  %v18529_v58 = vadd.f32 %v22075_v60, %v17398_v46  ;;  %v16203_v4 = vrot.slane %v16183_v19, 9  ;;  %v11954_v51 = vrot.slane %v16184_v15, 5  ;;  %v17541_v60 = vpop.f32.mrb[38].mxu0  ;;  %v16186_v3 = vld [vmem:[%s21403_s19 + $0xc0] sm:$0xe]  ;;  %18251 = vmatpush3.bf16.msra.mxu1 %v19273_v21 }
 0x3b5   : > { %v12991_v44 = vsel %vm19552_vm2, %v12986_v45, %v12990_v57  ;;  %v12996_v12 = vrot.slane %v12995_v1, 4  ;;  %v16218_v29 = vcombine.low %v11948_v16, %v11951_v56  ;;  %v18547_v49 = vadd.f32 %v22090_v26, %v17401_v6  ;;  %v17406_v57 = vpop.f32.mrb[167].mxu1  ;;  %v17542_v34 = vpop.f32.mrb[39].mxu0  ;;  %v16187_v46 = vld [vmem:[%s21403_s19 + $0xc4] sm:$0xf] }
 0x3b6   : > { %v22629_v33 = vadd.f32 %v18529_v58, %v17534_v62  ;;  %v11955_v42 = vsel %vm19670_vm5, %v16203_v4, %v11954_v51  ;;  %v11956_v50 = vrot.slane %v11954_v51, 4  ;;  %v11957_v54 = vrot.slane %v16185_v59, 5  ;;  %v16188_v6 = vld [vmem:[%s21403_s19 + $0xc8] sm:$0x1]  ;;  %v22643_v51 = vpop.f32.mrb[168].mxu1 }
 0x3b7   : > { %v13001_v19 = vsel %vm19552_vm2, %v12996_v12, %v13000_v17  ;;  %18229 = vmatmul.mubr.bf16.gmra.mrb[40].mxu1 %v16218_v29  ;;  %v22636_v26 = vadd.f32 %v18547_v49, %v17537_v37  ;;  %v13003_v15 = vshrl.u32 %v16362_v9, 16  ;;  %v13006_v16 = vshll.u32 %v16362_v9, 16 }
 0x3b8   : > { %v16395_v62 = vcombine.low %v12991_v44, %v13001_v19  ;;  %v11958_v45 = vsel %vm19670_vm5, %v11956_v50, %v11957_v54  ;;  %v13012_v59 = vshll.u32 %v16363_v30, 16  ;;  %v13016_v1 = vshrl.u32 %v16363_v30, 16 }
 0x3b9   : > { %23396 = vst [vmem:[#allocation15_spill] sm:$0xff] %v22636_v26  ;;  %v16219_v56 = vcombine.low %v11955_v42, %v11958_v45  ;;  %v13005_v58 = vrot.slane %v13003_v15, 4  ;;  %v13008_v4 = vrot.slane %v13006_v16, 5  ;;  %v13022_v17 = vshll.u32 %v16364_v47, 16  ;;  %v16365_v42 = vld [vmem:[%s21403_s19 + $0x78] sm:$0xf] }
 0x3ba   : > { %13907 = vmatprep.mubr.bf16.mxu0 %v16395_v62  ;;  %v13014_v9 = vrot.slane %v13012_v59, 5  ;;  %v13018_v37 = vrot.slane %v13016_v1, 4  ;;  %v16204_v44 = vrot.slane %v16186_v3, 9  ;;  %v11961_v12 = vrot.slane %v16187_v46, 5  ;;  %v16366_v15 = vld [vmem:[%s21403_s19 + $0x7c] sm:$0xf] }
 0x3bb   : > { %13908 = vmatmul.mubr.bf16.gmra.mrb[136].mxu0 %v19270_v25  ;;  %18232 = vmatprep.mubr.bf16.mxu1 %v16219_v56  ;;  %v13009_v29 = vor.u32 %v13008_v4, %v13005_v58  ;;  %v13024_v30 = vrot.slane %v13022_v17, 5  ;;  %v11964_v21 = vrot.slane %v16188_v6, 5  ;;  %v17404_v49 = vadd.f32 %v17403_v36, %v22610_v5  ;;  %v16367_v16 = vld [vmem:[%s21403_s19 + $0x80] sm:$0x1]  ;;  %v17544_v3 = vpop.f32.mrb[40].mxu0  ;;  %v17409_v5 = vpop.f32.mrb[169].mxu1 }
 0x3bc   : > { %v13019_v50 = vor.u32 %v13018_v37, %v13014_v9  ;;  %v11962_v54 = vsel %vm19670_vm5, %v16204_v44, %v11961_v12  ;;  %v11963_v47 = vrot.slane %v11961_v12, 4  ;;  %v17540_v19 = vadd.f32 %v17539_v7, %v17538_v20  ;;  %v16405_v59 = vld [vmem:[%s21403_s19 + $0x18] sm:$0xe]  ;;  %v17545_v36 = vpop.f32.mrb[41].mxu0  ;;  %v19272_v56 = vld [vmem:[%s21403_s19 + $0x6c] sm:$0xff]   ;;  %v17411_v7 = vpop.f32.mrb[170].mxu1 }
 0x3bd   : > { %v13010_v46 = vrot.slane %v13009_v29, 4  ;;  %v18520_v25 = vadd.f32 %v22117_v52, %v17404_v49  ;;  %v17407_v62 = vadd.f32 %v17406_v57, %v17405_v40  ;;  %v17543_v45 = vadd.f32 %v17542_v34, %v17541_v60  ;;  %v17547_v4 = vpop.f32.mrb[42].mxu0  ;;  %v16406_v34 = vld [vmem:[%s21403_s19 + $0x1c] sm:$0xf]  ;;  %v16407_v17 = vld [vmem:[%s21403_s19 + $0x20] sm:$0x1] }
 0x3be   : > { %v13020_v1 = vrot.slane %v13019_v50, 4  ;;  %v11965_v6 = vsel %vm19670_vm5, %v11963_v47, %v11964_v21  ;;  %v13027_v58 = vshrl.u32 %v16365_v42, 16  ;;  %v13030_v20 = vshll.u32 %v16365_v42, 16  ;;  %v17412_v37 = vpop.f32.mrb[171].mxu1  ;;  %v17548_v44 = vpop.f32.mrb[43].mxu0 }
 0x3bf   : > { %v13015_v52 = vsel %vm19552_vm2, %v13010_v46, %v13014_v9  ;;  %v16220_v40 = vcombine.low %v11962_v54, %v11965_v6  ;;  %v22658_v57 = vadd.f32 %v18520_v25, %v17540_v19  ;;  %v18538_v60 = vadd.f32 %v22132_v53, %v17407_v62  ;;  %v16408_v42 = vld [vmem:[%s21403_s19 + $0x24] sm:$0xe]  ;;  %v22666_v50 = vpop.f32.mrb[172].mxu1  ;;  %v16409_v19 = vld [vmem:[%s21403_s19 + $0x28] sm:$0xf]  ;;  %v22672_v26 = vpop.f32.mrb[44].mxu0 }
 0x3c0   : > { %v13025_v12 = vsel %vm19552_vm2, %v13020_v1, %v13024_v30  ;;  %v13029_v29 = vrot.slane %v13027_v58, 4  ;;  %v13032_v21 = vrot.slane %v13030_v20, 5  ;;  %v13036_v49 = vshll.u32 %v16366_v15, 16  ;;  %v16410_v46 = vld [vmem:[%s21403_s19 + $0x2c] sm:$0x1] }
 0x3c1   : > { %23397 = vst [vmem:[#allocation16_spill] sm:$0xff] %v22658_v57  ;;  %v16396_v9 = vcombine.low %v13015_v52, %v13025_v12  ;;  %18233 = vmatmul.mubr.bf16.gmra.mrb[44].mxu1 %v16220_v40  ;;  %v22668_v54 = vadd.f32 %v18538_v60, %v17543_v45  ;;  %v13040_v53 = vshrl.u32 %v16366_v15, 16  ;;  %v13046_v47 = vshll.u32 %v16367_v16, 16  ;;  %v22676_v40 = vpop.f32.mrb[173].mxu1 }
 0x3c2   : > { %v13033_v25 = vor.u32 %v13032_v21, %v13029_v29  ;;  %v13038_v62 = vrot.slane %v13036_v49, 5  ;;  %v16453_v6 = vrot.slane %v16405_v59, 9  ;;  %v13396_v57 = vrot.slane %v16406_v34, 5  ;;  %v16368_v29 = vld [vmem:[%s21403_s19 + $0x84] sm:$0xf]  ;;  %v22681_v21 = vpop.f32.mrb[45].mxu0 }
 0x3c3   : > { %13915 = vmatprep.mubr.bf16.mxu0 %v16396_v9  ;;  %v13042_v30 = vrot.slane %v13040_v53, 4  ;;  %v13048_v1 = vrot.slane %v13046_v47, 5  ;;  %v13399_v58 = vrot.slane %v16407_v17, 5  ;;  %v16454_v20 = vrot.slane %v16408_v42, 9  ;;  %v16369_v17 = vld [vmem:[%s21403_s19 + $0x88] sm:$0xf] }
 0x3c4   : > { %13916 = vmatmul.mubr.bf16.gmra.mrb[140].mxu0 %v19272_v56  ;;  %v13034_v45 = vrot.slane %v13033_v25, 4  ;;  %v13397_v15 = vsel %vm19670_vm5, %v16453_v6, %v13396_v57  ;;  %v13398_v16 = vrot.slane %v13396_v57, 4  ;;  %v13403_v52 = vrot.slane %v16409_v19, 5  ;;  %v16370_v9 = vld [vmem:[%s21403_s19 + $0x8c] sm:$0x1]  ;;  %v19274_v53 = vld [vmem:[%s21403_s19 + $0x78] sm:$0xff]  }
 0x3c5   : > { %v13043_v59 = vor.u32 %v13042_v30, %v13038_v62  ;;  %v13406_v60 = vrot.slane %v16410_v46, 5  ;;  %v17410_v34 = vadd.f32 %v17409_v5, %v22643_v51  ;;  %v17546_v12 = vadd.f32 %v17545_v36, %v17544_v3  ;;  %v17417_v51 = vpop.f32.mrb[174].mxu1  ;;  %v22690_v3 = vpop.f32.mrb[46].mxu0  ;;  %v16411_v46 = vld [vmem:[%s21403_s19 + $0x30] sm:$0xe] }
 0x3c6   : > { %v13039_v56 = vsel %vm19552_vm2, %v13034_v45, %v13038_v62  ;;  %v13400_v57 = vsel %vm19670_vm5, %v13398_v16, %v13399_v58  ;;  %v13404_v49 = vsel %vm19670_vm5, %v16454_v20, %v13403_v52  ;;  %v13405_v42 = vrot.slane %v13403_v52, 4  ;;  %v17418_v25 = vpop.f32.mrb[175].mxu1  ;;  %v17554_v62 = vpop.f32.mrb[47].mxu0  ;;  %v16412_v45 = vld [vmem:[%s21403_s19 + $0x34] sm:$0xf] }
 0x3c7   : > { %v13044_v5 = vrot.slane %v13043_v59, 4  ;;  %v16469_v36 = vcombine.low %v13397_v15, %v13400_v57  ;;  %v18565_v47 = vadd.f32 %v22143_v43, %v17410_v34  ;;  %v17413_v19 = vadd.f32 %v17412_v37, %v17411_v7  ;;  %v16413_v16 = vld [vmem:[%s21403_s19 + $0x38] sm:$0x1]  ;;  %v16414_v37 = vld [vmem:[%s21403_s19 + $0x3c] sm:$0xe] }
 0x3c8   : > { %v13407_v6 = vsel %vm19670_vm5, %v13405_v42, %v13406_v60  ;;  %v17549_v30 = vadd.f32 %v17548_v44, %v17547_v4  ;;  %v13051_v58 = vshrl.u32 %v16368_v29, 16  ;;  %v13054_v20 = vshll.u32 %v16368_v29, 16  ;;  %v16415_v59 = vld [vmem:[%s21403_s19 + $0x40] sm:$0xf]  ;;  %v22706_v44 = vpop.f32.mrb[48].mxu0 }
 0x3c9   : > { %v13049_v15 = vsel %vm19552_vm2, %v13044_v5, %v13048_v1  ;;  %18252 = vmatprep.mubr.bf16.mxu1 %v16469_v36  ;;  %v16470_v43 = vcombine.low %v13404_v49, %v13407_v6  ;;  %v22701_v52 = vadd.f32 %v18565_v47, %v17546_v12  ;;  %v18583_v7 = vadd.f32 %v22158_v10, %v17413_v19  ;;  %v16416_v36 = vld [vmem:[%s21403_s19 + $0x44] sm:$0x1]  ;;  %v22711_v49 = vpop.f32.mrb[49].mxu0 }
 0x3ca   : > { %v16397_v34 = vcombine.low %v13039_v56, %v13049_v15  ;;  %v13053_v57 = vrot.slane %v13051_v58, 4  ;;  %v13056_v60 = vrot.slane %v13054_v20, 5  ;;  %v13060_v4 = vshll.u32 %v16369_v17, 16  ;;  %v22713_v56 = vpop.f32.mrb[50].mxu0 }
 0x3cb   : > { %18253 = vmatmul.mubr.bf16.vlgmr.msra.gmra.mrb[16].mxu1 %v16470_v43  ;;  %v22708_v29 = vadd.f32 %v18583_v7, %v17549_v30  ;;  %v13064_v42 = vshrl.u32 %v16369_v17, 16  ;;  %v13070_v1 = vshll.u32 %v16370_v9, 16  ;;  %v16455_v5 = vrot.slane %v16411_v46, 9  ;;  %v22717_v43 = vpop.f32.mrb[51].mxu0 }
 0x3cc   : > { %13923 = vmatprep.mubr.bf16.mxu0 %v16397_v34  ;;  %v13057_v12 = vor.u32 %v13056_v60, %v13053_v57  ;;  %v13062_v10 = vrot.slane %v13060_v4, 5  ;;  %v13410_v47 = vrot.slane %v16412_v45, 5  ;;  %v13413_v19 = vrot.slane %v16413_v16, 5 }
 0x3cd   : > { %13924 = vmatmul.mubr.bf16.gmra.mrb[144].mxu0 %v19274_v53  ;;  %v13066_v6 = vrot.slane %v13064_v42, 4  ;;  %v13072_v58 = vrot.slane %v13070_v1, 5  ;;  %v16456_v20 = vrot.slane %v16414_v37, 9  ;;  %v13417_v30 = vrot.slane %v16415_v59, 5  ;;  %v16371_v37 = vld [vmem:[%s21403_s19 + $0x90] sm:$0xf] }
 0x3ce   : > { %v13058_v17 = vrot.slane %v13057_v12, 4  ;;  %v13411_v9 = vsel %vm19670_vm5, %v16455_v5, %v13410_v47  ;;  %v13412_v46 = vrot.slane %v13410_v47, 4  ;;  %v13420_v15 = vrot.slane %v16416_v36, 5  ;;  %v22724_v59 = vpop.f32.mrb[52].mxu0  ;;  %v16372_v42 = vld [vmem:[%s21403_s19 + $0x94] sm:$0xf] }
 0x3cf   : > { %v13067_v45 = vor.u32 %v13066_v6, %v13062_v10  ;;  %v13418_v16 = vsel %vm19670_vm5, %v16456_v20, %v13417_v30  ;;  %v13419_v53 = vrot.slane %v13417_v30, 4  ;;  %v17416_v7 = vadd.f32 %v22676_v40, %v22666_v50  ;;  %v16373_v1 = vld [vmem:[%s21403_s19 + $0x98] sm:$0x1]  ;;  %v16417_v5 = vld [vmem:[%s21403_s19 + $0x48] sm:$0xe] }
 0x3d0   : > { %v13063_v34 = vsel %vm19552_vm2, %v13058_v17, %v13062_v10  ;;  %v13414_v57 = vsel %vm19670_vm5, %v13412_v46, %v13413_v19  ;;  %v17552_v60 = vadd.f32 %v22681_v21, %v22672_v26  ;;  %v17419_v4 = vadd.f32 %v17418_v25, %v17417_v51  ;;  %v22738_v10 = vpop.f32.mrb[53].mxu0  ;;  %v16418_v51 = vld [vmem:[%s21403_s19 + $0x4c] sm:$0xf]  ;;  %v16419_v25 = vld [vmem:[%s21403_s19 + $0x50] sm:$0x1]  ;;  %v19275_v30 = vld [vmem:[%s21403_s19 + $0x84] sm:$0xff]  }
 0x3d1   : > { %v13068_v50 = vrot.slane %v13067_v45, 4  ;;  %v16471_v40 = vcombine.low %v13411_v9, %v13414_v57  ;;  %v13421_v36 = vsel %vm19670_vm5, %v13419_v53, %v13420_v15  ;;  %v18556_v12 = vadd.f32 %v22185_v18, %v17416_v7  ;;  %v22744_v6 = vpop.f32.mrb[54].mxu0  ;;  %v16420_v46 = vld [vmem:[%s21403_s19 + $0x54] sm:$0xe]  ;;  %v16422_v53 = vld [vmem:[%s21403_s19 + $0x5c] sm:$0x1] }
 0x3d2   : > { %v16472_v47 = vcombine.low %v13418_v16, %v13421_v36  ;;  %v18574_v19 = vadd.f32 %v22200_v63, %v17419_v4  ;;  %v17555_v26 = vadd.f32 %v17554_v62, %v22690_v3  ;;  %v13075_v21 = vshrl.u32 %v16371_v37, 16  ;;  %v22752_v63 = vpop.f32.mrb[55].mxu0  ;;  %v16421_v16 = vld [vmem:[%s21403_s19 + $0x58] sm:$0xf] }
 0x3d3   : > { %v13073_v20 = vsel %vm19552_vm2, %v13068_v50, %v13072_v58  ;;  %18256 = vmatprep.mubr.bf16.mxu1 %v16471_v40  ;;  %v22749_v18 = vadd.f32 %v18556_v12, %v17552_v60  ;;  %v13078_v17 = vshll.u32 %v16371_v37, 16  ;;  %v13084_v9 = vshll.u32 %v16372_v42, 16 }
 0x3d4   : > { %v16398_v3 = vcombine.low %v13063_v34, %v13073_v20  ;;  %18257 = vmatmul.mubr.bf16.gmra.mrb[20].mxu1 %v16472_v47  ;;  %v22754_v62 = vadd.f32 %v18574_v19, %v17555_v26  ;;  %v13077_v15 = vrot.slane %v13075_v21, 4  ;;  %v13088_v45 = vshrl.u32 %v16372_v42, 16  ;;  %v16374_v42 = vld [vmem:[%s21403_s19 + $0x9c] sm:$0xf]  ;;  %v22759_v19 = vpop.f32.mrb[56].mxu0 }
 0x3d5   : > { %v13080_v7 = vrot.slane %v13078_v17, 5  ;;  %v13086_v58 = vrot.slane %v13084_v9, 5  ;;  %v13094_v57 = vshll.u32 %v16373_v1, 16  ;;  %v16457_v4 = vrot.slane %v16417_v5, 9  ;;  %v16375_v9 = vld [vmem:[%s21403_s19 + $0xa0] sm:$0xf] }
 0x3d6   : > { %13931 = vmatprep.mubr.bf16.mxu0 %v16398_v3  ;;  %v13090_v60 = vrot.slane %v13088_v45, 4  ;;  %v13424_v37 = vrot.slane %v16418_v51, 5  ;;  %v13427_v50 = vrot.slane %v16419_v25, 5  ;;  %v16458_v40 = vrot.slane %v16420_v46, 9  ;;  %v22765_v51 = vpop.f32.mrb[57].mxu0 }
 0x3d7   : > { %13932 = vmatmul.mubr.bf16.gmra.mrb[148].mxu0 %v19275_v30  ;;  %v13081_v34 = vor.u32 %v13080_v7, %v13077_v15  ;;  %v13096_v36 = vrot.slane %v13094_v57, 5  ;;  %v13431_v12 = vrot.slane %v16421_v16, 5  ;;  %v13434_v47 = vrot.slane %v16422_v53, 5  ;;  %v16423_v45 = vld [vmem:[%s21403_s19 + $0x60] sm:$0xe] }
 0x3d8   : > { %v13091_v26 = vor.u32 %v13090_v60, %v13086_v58  ;;  %v13425_v1 = vsel %vm19670_vm5, %v16457_v4, %v13424_v37  ;;  %v13426_v5 = vrot.slane %v13424_v37, 4  ;;  %v17598_v21 = vadd.f32 %v22711_v49, %v22706_v44  ;;  %v16376_v49 = vld [vmem:[%s21403_s19 + $0xa4] sm:$0x1]  ;;  %v16425_v57 = vld [vmem:[%s21403_s19 + $0x68] sm:$0x1]  ;;  %v22788_v4 = vpop.f32.mrb[58].mxu0 }
 0x3d9   : > { %v13082_v25 = vrot.slane %v13081_v34, 4  ;;  %v13432_v20 = vsel %vm19670_vm5, %v16458_v40, %v13431_v12  ;;  %v13433_v30 = vrot.slane %v13431_v12, 4  ;;  %v17601_v17 = vadd.f32 %v22717_v43, %v22713_v56  ;;  %v16424_v7 = vld [vmem:[%s21403_s19 + $0x64] sm:$0xf]  ;;  %v19276_v60 = vld [vmem:[%s21403_s19 + $0x90] sm:$0xff]   ;;  %v22794_v34 = vpop.f32.mrb[59].mxu0 }
 0x3da   : > { %v13092_v46 = vrot.slane %v13091_v26, 4  ;;  %v13428_v3 = vsel %vm19670_vm5, %v13426_v5, %v13427_v50  ;;  %v22775_v44 = vadd.f32 %v22217_v28, %v17598_v21  ;;  %v13099_v15 = vshrl.u32 %v16374_v42, 16  ;;  %v16426_v40 = vld [vmem:[%s21403_s19 + $0x6c] sm:$0xe] }
 0x3db   : > { %v13087_v16 = vsel %vm19552_vm2, %v13082_v25, %v13086_v58  ;;  %v16473_v53 = vcombine.low %v13425_v1, %v13428_v3  ;;  %v13435_v56 = vsel %vm19670_vm5, %v13433_v30, %v13434_v47  ;;  %v22784_v43 = vadd.f32 %v22232_v31, %v17601_v17  ;;  %v16427_v1 = vld [vmem:[%s21403_s19 + $0x70] sm:$0xf]  ;;  %v22797_v5 = vpop.f32.mrb[60].mxu0 }
 0x3dc   : > { %v13097_v28 = vsel %vm19552_vm2, %v13092_v46, %v13096_v36  ;;  %v16474_v37 = vcombine.low %v13432_v20, %v13435_v56  ;;  %v13101_v50 = vrot.slane %v13099_v15, 4  ;;  %v13102_v58 = vshll.u32 %v16374_v42, 16  ;;  %v16428_v20 = vld [vmem:[%s21403_s19 + $0x74] sm:$0x1] }
 0x3dd   : > { %v16399_v12 = vcombine.low %v13087_v16, %v13097_v28  ;;  %18260 = vmatprep.mubr.bf16.mxu1 %v16473_v53  ;;  %v13108_v31 = vshll.u32 %v16375_v9, 16  ;;  %v13112_v47 = vshrl.u32 %v16375_v9, 16  ;;  %v13118_v26 = vshll.u32 %v16376_v49, 16  ;;  %v16378_v28 = vld [vmem:[%s21403_s19 + $0xac] sm:$0xf] }
 0x3de   : > { %18261 = vmatmul.mubr.bf16.gmra.mrb[24].mxu1 %v16474_v37  ;;  %v13104_v21 = vrot.slane %v13102_v58, 5  ;;  %v16459_v25 = vrot.slane %v16423_v45, 9  ;;  %v13438_v36 = vrot.slane %v16424_v7, 5  ;;  %v13441_v30 = vrot.slane %v16425_v57, 5  ;;  %v16377_v57 = vld [vmem:[%s21403_s19 + $0xa8] sm:$0xf] }
 0x3df   : > { %13939 = vmatprep.mubr.bf16.mxu0 %v16399_v12  ;;  %v13110_v42 = vrot.slane %v13108_v31, 5  ;;  %v13114_v17 = vrot.slane %v13112_v47, 4  ;;  %v13120_v46 = vrot.slane %v13118_v26, 5  ;;  %v16460_v3 = vrot.slane %v16426_v40, 9  ;;  %v16429_v26 = vld [vmem:[%s21403_s19 + $0x78] sm:$0xe] }
 0x3e0   : > { %13940 = vmatmul.mubr.bf16.gmra.mrb[152].mxu0 %v19276_v60  ;;  %v13105_v9 = vor.u32 %v13104_v21, %v13101_v50  ;;  %v13439_v49 = vsel %vm19670_vm5, %v16459_v25, %v13438_v36  ;;  %v13440_v15 = vrot.slane %v13438_v36, 4  ;;  %v13445_v16 = vrot.slane %v16427_v1, 5  ;;  %v22808_v60 = vpop.f32.mrb[61].mxu0  ;;  %v16430_v1 = vld [vmem:[%s21403_s19 + $0x7c] sm:$0xf] }
 0x3e1   : > { %v13115_v45 = vor.u32 %v13114_v17, %v13110_v42  ;;  %v13448_v53 = vrot.slane %v16428_v20, 5  ;;  %v17604_v56 = vadd.f32 %v22738_v10, %v22724_v59  ;;  %v17607_v7 = vadd.f32 %v22752_v63, %v22744_v6  ;;  %v16379_v59 = vld [vmem:[%s21403_s19 + $0xb0] sm:$0x1]  ;;  %v22815_v10 = vpop.f32.mrb[62].mxu0  ;;  %v19277_v63 = vld [vmem:[%s21403_s19 + $0x9c] sm:$0xff]  }
 0x3e2   : > { %v13106_v37 = vrot.slane %v13105_v9, 4  ;;  %v13442_v50 = vsel %vm19670_vm5, %v13440_v15, %v13441_v30  ;;  %v13446_v58 = vsel %vm19670_vm5, %v16460_v3, %v13445_v16  ;;  %v13447_v40 = vrot.slane %v13445_v16, 4  ;;  %v22826_v21 = vpop.f32.mrb[63].mxu0  ;;  %v16431_v17 = vld [vmem:[%s21403_s19 + $0x80] sm:$0x1] }
 0x3e3   : > { %v13116_v12 = vrot.slane %v13115_v45, 4  ;;  %v16475_v6 = vcombine.low %v13439_v49, %v13442_v50  ;;  %v22819_v31 = vadd.f32 %v22257_v2, %v17604_v56  ;;  %v22822_v47 = vadd.f32 %v22269_v38, %v17607_v7  ;;  %v16432_v2 = vld [vmem:[%s21403_s19 + $0x84] sm:$0xe]  ;;  %v16433_v15 = vld [vmem:[%s21403_s19 + $0x88] sm:$0xf] }
 0x3e4   : > { %v13111_v25 = vsel %vm19552_vm2, %v13106_v37, %v13110_v42  ;;  %v13449_v36 = vsel %vm19670_vm5, %v13447_v40, %v13448_v53  ;;  %v13123_v30 = vshrl.u32 %v16377_v57, 16  ;;  %v13126_v20 = vshll.u32 %v16377_v57, 16  ;;  %v16434_v16 = vld [vmem:[%s21403_s19 + $0x8c] sm:$0x1]  ;;  %v22838_v37 = vpop.f32.mrb[64].mxu0 }
 0x3e5   : > { %v13121_v3 = vsel %vm19552_vm2, %v13116_v12, %v13120_v46  ;;  %18264 = vmatprep.mubr.bf16.mxu1 %v16475_v6  ;;  %v16476_v38 = vcombine.low %v13446_v58, %v13449_v36  ;;  %v13132_v9 = vshll.u32 %v16378_v28, 16  ;;  %v13136_v49 = vshrl.u32 %v16378_v28, 16  ;;  %v22840_v6 = vpop.f32.mrb[65].mxu0 }
 0x3e6   : > { %v16400_v45 = vcombine.low %v13111_v25, %v13121_v3  ;;  %v13125_v56 = vrot.slane %v13123_v30, 4  ;;  %v13128_v7 = vrot.slane %v13126_v20, 5  ;;  %v13142_v42 = vshll.u32 %v16379_v59, 16  ;;  %v16380_v20 = vld [vmem:[%s21403_s19 + $0xb4] sm:$0xf] }
 0x3e7   : > { %18265 = vmatmul.mubr.bf16.gmra.mrb[28].mxu1 %v16476_v38  ;;  %v13134_v53 = vrot.slane %v13132_v9, 5  ;;  %v13138_v57 = vrot.slane %v13136_v49, 4  ;;  %v16461_v50 = vrot.slane %v16429_v26, 9  ;;  %v13452_v40 = vrot.slane %v16430_v1, 5  ;;  %v19278_v49 = vld [vmem:[%s21403_s19 + $0xa8] sm:$0xff]  }
 0x3e8   : > { %13947 = vmatprep.mubr.bf16.mxu0 %v16400_v45  ;;  %v13129_v46 = vor.u32 %v13128_v7, %v13125_v56  ;;  %v13144_v58 = vrot.slane %v13142_v42, 5  ;;  %v13455_v12 = vrot.slane %v16431_v17, 5  ;;  %v16462_v28 = vrot.slane %v16432_v2, 9  ;;  %v22850_v2 = vpop.f32.mrb[66].mxu0  ;;  %v16382_v45 = vld [vmem:[%s21403_s19 + $0xbc] sm:$0x1] }
 0x3e9   : > { %13948 = vmatmul.mubr.bf16.gmra.mrb[156].mxu0 %v19277_v63  ;;  %v13139_v25 = vor.u32 %v13138_v57, %v13134_v53  ;;  %v13453_v59 = vsel %vm19670_vm5, %v16461_v50, %v13452_v40  ;;  %v13454_v36 = vrot.slane %v13452_v40, 4  ;;  %v13459_v30 = vrot.slane %v16433_v15, 5  ;;  %v16381_v63 = vld [vmem:[%s21403_s19 + $0xb8] sm:$0xf]  ;;  %v16435_v7 = vld [vmem:[%s21403_s19 + $0x90] sm:$0xe] }
 0x3ea   : > { %v13130_v26 = vrot.slane %v13129_v46, 4  ;;  %v13462_v1 = vrot.slane %v16434_v16, 5  ;;  %v17610_v3 = vadd.f32 %v22765_v51, %v22759_v19  ;;  %v17613_v17 = vadd.f32 %v22794_v34, %v22788_v4  ;;  %v22858_v19 = vpop.f32.mrb[67].mxu0  ;;  %v16436_v42 = vld [vmem:[%s21403_s19 + $0x94] sm:$0xf] }
 0x3eb   : > { %v13140_v38 = vrot.slane %v13139_v25, 4  ;;  %v13456_v9 = vsel %vm19670_vm5, %v13454_v36, %v13455_v12  ;;  %v13460_v15 = vsel %vm19670_vm5, %v16462_v28, %v13459_v30  ;;  %v13461_v16 = vrot.slane %v13459_v30, 4  ;;  %v16437_v57 = vld [vmem:[%s21403_s19 + $0x98] sm:$0x1]  ;;  %v16438_v12 = vld [vmem:[%s21403_s19 + $0x9c] sm:$0xe] }
 0x3ec   : > { %v13135_v51 = vsel %vm19552_vm2, %v13130_v26, %v13134_v53  ;;  %v16477_v4 = vcombine.low %v13453_v59, %v13456_v9  ;;  %v22863_v34 = vadd.f32 %v22291_v27, %v17610_v3  ;;  %v22866_v56 = vadd.f32 %v22297_v61, %v17613_v17  ;;  %v16439_v61 = vld [vmem:[%s21403_s19 + $0xa0] sm:$0xf]  ;;  %v16440_v17 = vld [vmem:[%s21403_s19 + $0xa4] sm:$0x1] }
 0x3ed   : > { %v13145_v50 = vsel %vm19552_vm2, %v13140_v38, %v13144_v58  ;;  %v13463_v40 = vsel %vm19670_vm5, %v13461_v16, %v13462_v1  ;;  %v13147_v46 = vshrl.u32 %v16380_v20, 16  ;;  %v13150_v53 = vshll.u32 %v16380_v20, 16 }
 0x3ee   : > { %v16401_v28 = vcombine.low %v13135_v51, %v13145_v50  ;;  %18268 = vmatprep.mubr.bf16.mxu1 %v16477_v4  ;;  %v16478_v27 = vcombine.low %v13460_v15, %v13463_v40  ;;  %v13156_v25 = vshll.u32 %v16381_v63, 16  ;;  %v13160_v59 = vshrl.u32 %v16381_v63, 16  ;;  %v16383_v51 = vld [vmem:[%s21403_s19 + $0xc0] sm:$0xf]  ;;  %v22879_v4 = vpop.f32.mrb[68].mxu0 }
 0x3ef   : > { %v13149_v36 = vrot.slane %v13147_v46, 4  ;;  %v13152_v30 = vrot.slane %v13150_v53, 5  ;;  %v13166_v26 = vshll.u32 %v16382_v45, 16  ;;  %v16463_v3 = vrot.slane %v16435_v7, 9  ;;  %v16384_v46 = vld [vmem:[%s21403_s19 + $0xc4] sm:$0xf] }
 0x3f0   : > { %13955 = vmatprep.mubr.bf16.mxu0 %v16401_v28  ;;  %18269 = vmatmul.mubr.bf16.gmra.mrb[32].mxu1 %v16478_v27  ;;  %v13158_v58 = vrot.slane %v13156_v25, 5  ;;  %v13162_v1 = vrot.slane %v13160_v59, 4  ;;  %v13466_v38 = vrot.slane %v16436_v42, 5  ;;  %v13469_v20 = vrot.slane %v16437_v57, 5  ;;  %v22884_v42 = vpop.f32.mrb[69].mxu0 }
 0x3f1   : > { %13956 = vmatmul.mubr.bf16.gmra.mrb[160].mxu0 %v19278_v49  ;;  %v13153_v9 = vor.u32 %v13152_v30, %v13149_v36  ;;  %v13168_v15 = vrot.slane %v13166_v26, 5  ;;  %v16464_v16 = vrot.slane %v16438_v12, 9  ;;  %v13473_v63 = vrot.slane %v16439_v61, 5  ;;  %v16385_v28 = vld [vmem:[%s21403_s19 + $0xc8] sm:$0x1]  ;;  %v22891_v27 = vpop.f32.mrb[70].mxu0 }
 0x3f2   : > { %v13163_v50 = vor.u32 %v13162_v1, %v13158_v58  ;;  %v13467_v45 = vsel %vm19670_vm5, %v16463_v3, %v13466_v38  ;;  %v13468_v7 = vrot.slane %v13466_v38, 4  ;;  %v13476_v40 = vrot.slane %v16440_v17, 5  ;;  %v16441_v30 = vld [vmem:[%s21403_s19 + $0xa8] sm:$0xe]  ;;  %v22898_v26 = vpop.f32.mrb[71].mxu0 }
 0x3f3   : > { %v13154_v49 = vrot.slane %v13153_v9, 4  ;;  %v13474_v57 = vsel %vm19670_vm5, %v16464_v16, %v13473_v63  ;;  %v13475_v53 = vrot.slane %v13473_v63, 4  ;;  %v17616_v12 = vadd.f32 %v22808_v60, %v22797_v5  ;;  %v19279_v60 = vld [vmem:[%s21403_s19 + $0xb4] sm:$0xff]   ;;  %v16442_v38 = vld [vmem:[%s21403_s19 + $0xac] sm:$0xf] }
 0x3f4   : > { %v13164_v25 = vrot.slane %v13163_v50, 4  ;;  %v13470_v59 = vsel %vm19670_vm5, %v13468_v7, %v13469_v20  ;;  %v17619_v61 = vadd.f32 %v22826_v21, %v22815_v10  ;;  %v13171_v36 = vshrl.u32 %v16383_v51, 16  ;;  %v16443_v10 = vld [vmem:[%s21403_s19 + $0xb0] sm:$0x1]  ;;  %v16444_v63 = vld [vmem:[%s21403_s19 + $0xb4] sm:$0xe] }
 0x3f5   : > { %v13159_v3 = vsel %vm19552_vm2, %v13154_v49, %v13158_v58  ;;  %v16479_v5 = vcombine.low %v13467_v45, %v13470_v59  ;;  %v13477_v17 = vsel %vm19670_vm5, %v13475_v53, %v13476_v40  ;;  %v22906_v1 = vadd.f32 %v22326_v14, %v17616_v12  ;;  %v22910_v21 = vpop.f32.mrb[72].mxu0  ;;  %v16445_v50 = vld [vmem:[%s21403_s19 + $0xb8] sm:$0xf]  ;;  %v16446_v53 = vld [vmem:[%s21403_s19 + $0xbc] sm:$0x1] }
 0x3f6   : > { %v13169_v20 = vsel %vm19552_vm2, %v13164_v25, %v13168_v15  ;;  %v16480_v9 = vcombine.low %v13474_v57, %v13477_v17  ;;  %v22915_v16 = vadd.f32 %v22334_v11, %v17619_v61  ;;  %v13173_v58 = vrot.slane %v13171_v36, 4  ;;  %v22919_v45 = vpop.f32.mrb[73].mxu0 }
 0x3f7   : > { %v16402_v7 = vcombine.low %v13159_v3, %v13169_v20  ;;  %18272 = vmatprep.mubr.bf16.mxu1 %v16479_v5  ;;  %v13174_v14 = vshll.u32 %v16383_v51, 16  ;;  %v13180_v40 = vshll.u32 %v16384_v46, 16  ;;  %v13184_v49 = vshrl.u32 %v16384_v46, 16  ;;  %v22922_v12 = vpop.f32.mrb[74].mxu0 }
 0x3f8   : > { %23398 = vst [vmem:[#allocation17_spill] sm:$0xff] %v22915_v16  ;;  %18273 = vmatmul.mubr.bf16.gmra.mrb[36].mxu1 %v16480_v9  ;;  %v13190_v59 = vshll.u32 %v16385_v28, 16  ;;  %v16465_v15 = vrot.slane %v16441_v30, 9  ;;  %v13480_v57 = vrot.slane %v16442_v38, 5  ;;  %v13483_v25 = vrot.slane %v16443_v10, 5  ;;  %v22924_v11 = vpop.f32.mrb[75].mxu0 }
 0x3f9   : > { %13963 = vmatprep.mubr.bf16.mxu0 %v16402_v7  ;;  %v13176_v61 = vrot.slane %v13174_v14, 5  ;;  %v13182_v36 = vrot.slane %v13180_v40, 5  ;;  %v13186_v17 = vrot.slane %v13184_v49, 4  ;;  %v16466_v3 = vrot.slane %v16444_v63, 9  ;;  %v16386_v63 = vld [vmem:[%s21403_s19 + $0xcc] sm:$0xf] }
 0x3fa   : > { %13964 = vmatmul.mubr.bf16.gmra.mrb[164].mxu0 %v19279_v60  ;;  %v13192_v51 = vrot.slane %v13190_v59, 5  ;;  %v13481_v46 = vsel %vm19670_vm5, %v16465_v15, %v13480_v57  ;;  %v13482_v28 = vrot.slane %v13480_v57, 4  ;;  %v13487_v30 = vrot.slane %v16445_v50, 5  ;;  %v16387_v49 = vld [vmem:[%s21403_s19 + $0xd0] sm:$0xf] }
 0x3fb   : > { %v13177_v10 = vor.u32 %v13176_v61, %v13173_v58  ;;  %v13187_v20 = vor.u32 %v13186_v17, %v13182_v36  ;;  %v13490_v9 = vrot.slane %v16446_v53, 5  ;;  %v17622_v7 = vadd.f32 %v22840_v6, %v22838_v37  ;;  %v16388_v57 = vld [vmem:[%s21403_s19 + $0xd4] sm:$0x1]  ;;  %v16447_v17 = vld [vmem:[%s21403_s19 + $0xc0] sm:$0xe] }
 0x3fc   : > { %v13484_v60 = vsel %vm19670_vm5, %v13482_v28, %v13483_v25  ;;  %v13488_v50 = vsel %vm19670_vm5, %v16466_v3, %v13487_v30  ;;  %v13489_v40 = vrot.slane %v13487_v30, 4  ;;  %v17625_v58 = vadd.f32 %v22858_v19, %v22850_v2  ;;  %v16448_v3 = vld [vmem:[%s21403_s19 + $0xc4] sm:$0xf] }
 0x3fd   : > { %v13178_v37 = vrot.slane %v13177_v10, 4  ;;  %v13188_v6 = vrot.slane %v13187_v20, 4  ;;  %v16481_v59 = vcombine.low %v13481_v46, %v13484_v60  ;;  %v22947_v15 = vadd.f32 %v22357_v32, %v17622_v7  ;;  %v19280_v32 = vld [vmem:[%s21403_s19 + $0xc0] sm:$0xff]   ;;  %v16449_v20 = vld [vmem:[%s21403_s19 + $0xc8] sm:$0x1] }
 0x3fe   : > { %v13491_v25 = vsel %vm19670_vm5, %v13489_v40, %v13490_v9  ;;  %v22953_v61 = vadd.f32 %v22368_v13, %v17625_v58  ;;  %v13195_v2 = vshrl.u32 %v16386_v63, 16  ;;  %v13198_v19 = vshll.u32 %v16386_v63, 16  ;;  %v16450_v9 = vld [vmem:[%s21403_s19 + $0xcc] sm:$0xe]  ;;  %v16451_v63 = vld [vmem:[%s21403_s19 + $0xd0] sm:$0xf] }
 0x3ff   : > { %v22926_v5 = vpop.f32.mrb[76].mxu0  ;;  %23399 = vst [vmem:[#allocation18_spill] sm:$0xff] %v22947_v15  ;;  %v13183_v28 = vsel %vm19552_vm2, %v13178_v37, %v13182_v36  ;;  %v13193_v46 = vsel %vm19552_vm2, %v13188_v6, %v13192_v51  ;;  %18276 = vmatprep.mubr.bf16.mxu1 %v16481_v59  ;;  %v16482_v30 = vcombine.low %v13488_v50, %v13491_v25  ;;  %v13204_v10 = vshll.u32 %v16387_v49, 16  ;;  %v16452_v37 = vld [vmem:[%s21403_s19 + $0xd4] sm:$0x1] }
 0x400   : > { %v22930_v38 = vpop.f32.mrb[77].mxu0  ;;  %23400 = vst [vmem:[#allocation19_spill] sm:$0xff] %v22953_v61  ;;  %v16403_v13 = vcombine.low %v13183_v28, %v13193_v46  ;;  %v13197_v7 = vrot.slane %v13195_v2, 4  ;;  %v13200_v60 = vrot.slane %v13198_v19, 5  ;;  %v13208_v40 = vshrl.u32 %v16387_v49, 16 }
 0x401   : > { %v22935_v14 = vpop.f32.mrb[78].mxu0  ;;  %18277 = vmatmul.mubr.bf16.gmra.mrb[40].mxu1 %v16482_v30  ;;  %v13206_v58 = vrot.slane %v13204_v10, 5  ;;  %v13214_v61 = vshll.u32 %v16388_v57, 16  ;;  %v16467_v15 = vrot.slane %v16447_v17, 9  ;;  %v13494_v36 = vrot.slane %v16448_v3, 5 }
 0x402   : > { %v22944_v53 = vpop.f32.mrb[79].mxu0  ;;  %13971 = vmatprep.mubr.bf16.mxu0 %v16403_v13  ;;  %v13201_v51 = vor.u32 %v13200_v60, %v13197_v7  ;;  %v13210_v6 = vrot.slane %v13208_v40, 4  ;;  %v13497_v59 = vrot.slane %v16449_v20, 5  ;;  %v16468_v16 = vrot.slane %v16450_v9, 9  ;;  %v19281_v40 = vld [vmem:[%s21403_s19 + $0xcc] sm:$0xff]   ;;  %s19282_s19 = scalar_lea.vmem %s23296_s25, 2048 }
 0x403   : > { %13972 = vmatmul.mubr.bf16.gmra.mrb[168].mxu0 %v19280_v32  ;;  %v13216_v25 = vrot.slane %v13214_v61, 5  ;;  %v13495_v2 = vsel %vm19670_vm5, %v16467_v15, %v13494_v36  ;;  %v13496_v19 = vrot.slane %v13494_v36, 4  ;;  %v13501_v49 = vrot.slane %v16451_v63, 5  ;;  %p19283_p2 = scmp.ne.s32.totalorder %s23296_s25, %s19282_s19  ;;  %p19290_p7 = scmp.lt.s32.totalorder %s19288_s30, %s19282_s19 }
 0x404   : > { %v13202_v46 = vrot.slane %v13201_v51, 4  ;;  %v13211_v30 = vor.u32 %v13210_v6, %v13206_v58  ;;  %v13504_v57 = vrot.slane %v16452_v37, 5  ;;  %v17628_v17 = vadd.f32 %v22884_v42, %v22879_v4  ;;  %v23404_v37 = vld [vmem:[#allocation9_spill] sm:$0xff] }
 0x405   : > { %v13498_v10 = vsel %vm19670_vm5, %v13496_v19, %v13497_v59  ;;  %v13502_v61 = vsel %vm19670_vm5, %v16468_v16, %v13501_v49  ;;  %v13503_v32 = vrot.slane %v13501_v49, 4  ;;  %v17631_v15 = vadd.f32 %v22898_v26, %v22891_v27  ;;  %p19284_p4 = pnand %p19283_p2, %p19467_p3  ;;  %p19291_p9 = por %p19290_p7, %p19289_p6 }
 0x406   : > { %v13207_v9 = vsel %vm19552_vm2, %v13202_v46, %v13206_v58  ;;  %v13212_v13 = vrot.slane %v13211_v30, 4  ;;  %v16483_v7 = vcombine.low %v13495_v2, %v13498_v10  ;;  %v22979_v4 = vadd.f32 %v22388_v55, %v17628_v17  ;;  %v23401_v58 = vld [vmem:[#allocation10_spill] sm:$0xff] }
 0x407   : > { %v17644_v50 = vpop.f32.mrb[80].mxu0  ;;  %v13505_v42 = vsel %vm19670_vm5, %v13503_v32, %v13504_v57  ;;  %v22984_v60 = vadd.f32 %v22399_v8, %v17631_v15  ;;  %v17634_v16 = vadd.f32 %v22919_v45, %v22910_v21  ;;  %v17637_v27 = vadd.f32 %v22924_v11, %v22922_v12  ;;  %v23402_v21 = vld [vmem:[#allocation11_spill] sm:$0xff]  ;;  %p19285_p5 = pneg %p19284_p4 }
 0x408   : > { %v17645_v28 = vpop.f32.mrb[81].mxu0  ;;  %v13217_v26 = vsel %vm19552_vm2, %v13212_v13, %v13216_v25  ;;  %18280 = vmatprep.mubr.bf16.mxu1 %v16483_v7  ;;  %v16484_v63 = vcombine.low %v13502_v61, %v13505_v42  ;;  %v17640_v55 = vadd.f32 %v22930_v38, %v22926_v5  ;;  %v17643_v23 = vadd.f32 %v22944_v53, %v22935_v14  ;;  %v23405_v5 = vld [vmem:[#allocation13_spill] sm:$0xff]  ;;  %v23406_v14 = vld [vmem:[#allocation14_spill] sm:$0xff] }
 0x409   : > { %v17647_v3 = vpop.f32.mrb[82].mxu0  ;;  %v16404_v8 = vcombine.low %v13207_v9, %v13217_v26  ;;  %v22998_v36 = vadd.f32 %v23401_v58, %v17634_v16  ;;  %v23001_v45 = vadd.f32 %v23402_v21, %v17637_v27  ;;  %v17646_v12 = vadd.f32 %v17645_v28, %v17644_v50  ;;  %p19292_p10 = pnand %p19291_p9, %p19285_p5 }
 0x40a   : > { %v17648_v20 = vpop.f32.mrb[83].mxu0  ;;  %18281 = vmatmul.mubr.bf16.gmra.mrb[44].mxu1 %v16484_v63  ;;  %v23004_v11 = vadd.f32 %v23403_v35, %v17640_v55  ;;  %v23007_v51 = vadd.f32 %v23404_v37, %v17643_v23  ;;  %v23407_v23 = vld [vmem:[#allocation15_spill] sm:$0xff]  ;;  %v23408_v37 = vld [vmem:[#allocation16_spill] sm:$0xff] }
 0x40b   : > { %v17649_v6 = vadd.f32 %v17648_v20, %v17647_v3  ;;  %13979 = vmatprep.mubr.bf16.mxu0 %v16404_v8  ;;  %v23010_v38 = vadd.f32 %v23405_v5, %v17646_v12 }
 0x40c   : > { %13980 = vmatmul.mubr.bf16.gmra.mrb[172].mxu0 %v19281_v40 }
 0x40d   : > { %v23013_v53 = vadd.f32 %v23406_v14, %v17649_v6 }
 0x410   : > { %v17650_v59 = vpop.f32.mrb[84].mxu0 }
 0x411   : > { %v17651_v25 = vpop.f32.mrb[85].mxu0 }
 0x412   : > { %v17652_v2 = vadd.f32 %v17651_v25, %v17650_v59  ;;  %v17653_v50 = vpop.f32.mrb[86].mxu0 }
 0x413   : > { %v17654_v19 = vpop.f32.mrb[87].mxu0 }
 0x414   : > { %v23016_v49 = vadd.f32 %v22528_v0, %v17652_v2  ;;  %v17655_v28 = vadd.f32 %v17654_v19, %v17653_v50 }
 0x416   : > { %v23019_v46 = vadd.f32 %v22533_v39, %v17655_v28 }
 0x418   : > { %v17656_v30 = vpop.f32.mrb[88].mxu0 }
 0x419   : > { %v17657_v57 = vpop.f32.mrb[89].mxu0 }
 0x41a   : > { %v17658_v17 = vadd.f32 %v17657_v57, %v17656_v30  ;;  %v17659_v3 = vpop.f32.mrb[90].mxu0 }
 0x41b   : > { %v17660_v10 = vpop.f32.mrb[91].mxu0 }
 0x41c   : > { %v23022_v61 = vadd.f32 %v22568_v41, %v17658_v17  ;;  %v17661_v32 = vadd.f32 %v17660_v10, %v17659_v3 }
 0x41e   : > { %v23025_v15 = vadd.f32 %v22570_v22, %v17661_v32 }
 0x422   : > { %v17662_v20 = vpop.f32.mrb[92].mxu0 }
 0x423   : > { %v17663_v9 = vpop.f32.mrb[93].mxu0 }
 0x424   : > { %v17664_v0 = vadd.f32 %v17663_v9, %v17662_v20  ;;  %v17665_v13 = vpop.f32.mrb[94].mxu0 }
 0x425   : > { %v17666_v7 = vpop.f32.mrb[95].mxu0 }
 0x426   : > { %v23028_v39 = vadd.f32 %v22599_v24, %v17664_v0  ;;  %v17667_v42 = vadd.f32 %v17666_v7, %v17665_v13 }
 0x428   : > { %v23031_v16 = vadd.f32 %v22603_v48, %v17667_v42 }
 0x42c   : > { %v17668_v27 = vpop.f32.mrb[96].mxu0 }
 0x42d   : > { %v17669_v26 = vpop.f32.mrb[97].mxu0 }
 0x42e   : > { %v17670_v41 = vadd.f32 %v17669_v26, %v17668_v27  ;;  %v17671_v40 = vpop.f32.mrb[98].mxu0 }
 0x42f   : > { %v17672_v63 = vpop.f32.mrb[99].mxu0 }
 0x430   : > { %v23034_v22 = vadd.f32 %v22629_v33, %v17670_v41  ;;  %v17673_v55 = vadd.f32 %v17672_v63, %v17671_v40 }
 0x432   : > { %v23037_v8 = vadd.f32 %v23407_v23, %v17673_v55 }
 0x436   : > { %v17674_v58 = vpop.f32.mrb[100].mxu0 }
 0x437   : > { %v17675_v21 = vpop.f32.mrb[101].mxu0 }
 0x438   : > { %v17676_v24 = vadd.f32 %v17675_v21, %v17674_v58  ;;  %v17677_v12 = vpop.f32.mrb[102].mxu0 }
 0x439   : > { %v17678_v35 = vpop.f32.mrb[103].mxu0 }
 0x43a   : > { %v23040_v48 = vadd.f32 %v23408_v37, %v17676_v24  ;;  %v17679_v6 = vadd.f32 %v17678_v35, %v17677_v12 }
 0x43c   : > { %v23043_v5 = vadd.f32 %v22668_v54, %v17679_v6 }
 0x440   : > { %v17680_v14 = vpop.f32.mrb[104].mxu0 }
 0x441   : > { %v17681_v59 = vpop.f32.mrb[105].mxu0 }
 0x442   : > { %v17682_v33 = vadd.f32 %v17681_v59, %v17680_v14  ;;  %v17683_v25 = vpop.f32.mrb[106].mxu0 }
 0x443   : > { %v17684_v2 = vpop.f32.mrb[107].mxu0 }
 0x444   : > { %v23046_v50 = vadd.f32 %v22701_v52, %v17682_v33  ;;  %v17685_v19 = vadd.f32 %v17684_v2, %v17683_v25  ;;  %v23409_v2 = vld [vmem:[#allocation17_spill] sm:$0xff] }
 0x446   : > { %v23049_v28 = vadd.f32 %v22708_v29, %v17685_v19 }
 0x449   : > { %v17686_v30 = vpop.f32.mrb[108].mxu0 }
 0x44a   : > { %v17687_v57 = vpop.f32.mrb[109].mxu0 }
 0x44b   : > { %v17688_v17 = vadd.f32 %v17687_v57, %v17686_v30  ;;  %v17689_v3 = vpop.f32.mrb[110].mxu0 }
 0x44c   : > { %v17690_v10 = vpop.f32.mrb[111].mxu0 }
 0x44d   : > { %v23052_v54 = vadd.f32 %v22749_v18, %v17688_v17  ;;  %v17691_v32 = vadd.f32 %v17690_v10, %v17689_v3 }
 0x44f   : > { %v23055_v20 = vadd.f32 %v22754_v62, %v17691_v32 }
 0x453   : > { %v17732_v9 = vpop.f32.mrb[112].mxu0 }
 0x454   : > { %v17733_v0 = vpop.f32.mrb[113].mxu0 }
 0x455   : > { %v17734_v52 = vadd.f32 %v17733_v0, %v17732_v9  ;;  %v17735_v13 = vpop.f32.mrb[114].mxu0  ;;  %v23411_v9 = vld [vmem:[#allocation19_spill] sm:$0xff] }
 0x456   : > { %v17736_v7 = vpop.f32.mrb[115].mxu0 }
 0x457   : > { %v17737_v42 = vadd.f32 %v17736_v7, %v17735_v13  ;;  %v23058_v29 = vadd.f32 %v22775_v44, %v17734_v52 }
 0x459   : > { %v23061_v27 = vadd.f32 %v22784_v43, %v17737_v42 }
 0x45d   : > { %v17738_v26 = vpop.f32.mrb[116].mxu0 }
 0x45e   : > { %v17739_v41 = vpop.f32.mrb[117].mxu0 }
 0x45f   : > { %v17740_v18 = vadd.f32 %v17739_v41, %v17738_v26  ;;  %v17741_v40 = vpop.f32.mrb[118].mxu0 }
 0x460   : > { %v17742_v63 = vpop.f32.mrb[119].mxu0 }
 0x461   : > { %v17743_v55 = vadd.f32 %v17742_v63, %v17741_v40  ;;  %v18307_v62 = vadd.f32 %v22819_v31, %v17740_v18 }
 0x463   : > { %v18325_v23 = vadd.f32 %v22822_v47, %v17743_v55 }
 0x466   : > { %v17744_v58 = vpop.f32.mrb[120].mxu0 }
 0x467   : > { %v17745_v21 = vpop.f32.mrb[121].mxu0 }
 0x468   : > { %v17746_v24 = vadd.f32 %v17745_v21, %v17744_v58  ;;  %v17747_v12 = vpop.f32.mrb[122].mxu0 }
 0x469   : > { %v17748_v35 = vpop.f32.mrb[123].mxu0 }
 0x46a   : > { %v17749_v44 = vadd.f32 %v17748_v35, %v17747_v12  ;;  %v23066_v37 = vadd.f32 %v22863_v34, %v17746_v24 }
 0x46c   : > { %v23069_v43 = vadd.f32 %v22866_v56, %v17749_v44  ;;  %v23410_v56 = vld [vmem:[#allocation18_spill] sm:$0xff] }
 0x470   : > { %v17750_v6 = vpop.f32.mrb[124].mxu0 }
 0x471   : > { %v17751_v14 = vpop.f32.mrb[125].mxu0 }
 0x472   : > { %v17752_v59 = vadd.f32 %v17751_v14, %v17750_v6  ;;  %v17753_v33 = vpop.f32.mrb[126].mxu0 }
 0x473   : > { %v17754_v25 = vpop.f32.mrb[127].mxu0 }
 0x474   : > { %v17755_v31 = vadd.f32 %v17754_v25, %v17753_v33  ;;  %v23072_v47 = vadd.f32 %v22906_v1, %v17752_v59 }
 0x476   : > { %v23075_v19 = vadd.f32 %v23409_v2, %v17755_v31 }
 0x47a   : > { %v17756_v30 = vpop.f32.mrb[128].mxu0 }
 0x47b   : > { %v17757_v57 = vpop.f32.mrb[129].mxu0 }
 0x47c   : > { %v17758_v17 = vadd.f32 %v17757_v57, %v17756_v30  ;;  %v17759_v34 = vpop.f32.mrb[130].mxu0  ;;  %v23110_v57 = vld [vmem:[%s23361_s5] ss:$0 sm:$0xff] }
 0x47d   : > { %v17760_v3 = vpop.f32.mrb[131].mxu0 }
 0x47e   : > { %v17761_v10 = vadd.f32 %v17760_v3, %v17759_v34  ;;  %v23078_v32 = vadd.f32 %v23410_v56, %v17758_v17 }
 0x480   : > { %v23081_v0 = vadd.f32 %v23411_v9, %v17761_v10 }
 0x484   : > { %v17762_v52 = vpop.f32.mrb[132].mxu0 }
 0x485   : > { %v17763_v13 = vpop.f32.mrb[133].mxu0 }
 0x486   : > { %v17764_v7 = vadd.f32 %v17763_v13, %v17762_v52  ;;  %v17765_v1 = vpop.f32.mrb[134].mxu0 }
 0x487   : > { %v17766_v42 = vpop.f32.mrb[135].mxu0 }
 0x488   : > { %v17767_v26 = vadd.f32 %v17766_v42, %v17765_v1  ;;  %v23084_v41 = vadd.f32 %v22979_v4, %v17764_v7 }
 0x48a   : > { %v23087_v18 = vadd.f32 %v22984_v60, %v17767_v26 }
 0x48e   : > { %v17768_v40 = vpop.f32.mrb[136].mxu0 }
 0x48f   : > { %v17769_v63 = vpop.f32.mrb[137].mxu0 }
 0x490   : > { %v17770_v55 = vadd.f32 %v17769_v63, %v17768_v40  ;;  %v17771_v58 = vpop.f32.mrb[138].mxu0 }
 0x491   : > { %v17772_v21 = vpop.f32.mrb[139].mxu0 }
 0x492   : > { %v17773_v24 = vadd.f32 %v17772_v21, %v17771_v58  ;;  %v23090_v12 = vadd.f32 %v22998_v36, %v17770_v55  ;;  %v23104_v36 = vld [vmem:[%s23360_s4] ss:$0 sm:$0xff] }
 0x494   : > { %v23093_v35 = vadd.f32 %v23001_v45, %v17773_v24 }
 0x497   : > { %v17774_v44 = vpop.f32.mrb[140].mxu0 }
 0x498   : > { %v17775_v6 = vpop.f32.mrb[141].mxu0 }
 0x499   : > { %v17776_v4 = vadd.f32 %v17775_v6, %v17774_v44  ;;  %v17777_v14 = vpop.f32.mrb[142].mxu0 }
 0x49a   : > { %v17778_v59 = vpop.f32.mrb[143].mxu0 }
 0x49b   : > { %v17779_v60 = vadd.f32 %v17778_v59, %v17777_v14  ;;  %v23096_v33 = vadd.f32 %v23004_v11, %v17776_v4 }
 0x49d   : > { %v23099_v25 = vadd.f32 %v23007_v51, %v17779_v60 }
 0x49e   : > { %v18254_v31 = vpop.f32.mrb[16].mxu1 }
 0x49f   : > { %v18308_v45 = vadd.f32 %v18307_v62, %v18254_v31  ;;  %v14022_v2 = vpop.f32.mrb[17].mxu1 }
 0x4a0   : > { %v17780_v30 = vpop.f32.mrb[144].mxu0  ;;  %v18317_v11 = vadd.f32 %v23058_v29, %v14022_v2  ;;  %v18255_v51 = vpop.f32.mrb[18].mxu1 }
 0x4a1   : > { %v14190_v17 = vmul.f32 %v18308_v45, %v23104_v36  ;;  %v17781_v34 = vpop.f32.mrb[145].mxu0  ;;  %v18326_v3 = vadd.f32 %v18325_v23, %v18255_v51  ;;  %v14025_v10 = vpop.f32.mrb[19].mxu1 }
 0x4a2   : > { %v17782_v56 = vadd.f32 %v17781_v34, %v17780_v30  ;;  %v14188_v9 = vmul.f32 %v18317_v11, %v23104_v36  ;;  %v17783_v62 = vpop.f32.mrb[146].mxu0  ;;  %v18335_v52 = vadd.f32 %v23061_v27, %v14025_v10 }
 0x4a3   : > { %v14229_v13 = vadd.f32 %v23110_v57, %v14190_v17  ;;  %v14191_v7 = vmul.f32 %v18326_v3, %v23104_v36  ;;  %v17784_v1 = vpop.f32.mrb[147].mxu0 }
 0x4a4   : > { %v14227_v29 = vadd.f32 %v23110_v57, %v14188_v9  ;;  %v17785_v42 = vadd.f32 %v17784_v1, %v17783_v62  ;;  %v14189_v26 = vmul.f32 %v18335_v52, %v23104_v36  ;;  %v23123_v23 = vadd.f32 %v23010_v38, %v17782_v56 }
 0x4a5   : > { %v14261_v40 = vmax.f32 %v14229_v13, 0.0  ;;  %v14230_v63 = vadd.f32 %v23110_v57, %v14191_v7 }
 0x4a6   : > { %v14259_v27 = vmax.f32 %v14227_v29, 0.0  ;;  %v14228_v55 = vadd.f32 %v23110_v57, %v14189_v26  ;;  %v23128_v58 = vadd.f32 %v23013_v53, %v17785_v42 }
 0x4a7   : > { %v16598_v21 = vpack.c.bf16 %v14261_v40, %v14261_v40  ;;  %v14262_v24 = vmax.f32 %v14230_v63, 0.0  ;;  %v18258_v44 = vpop.f32.mrb[20].mxu1 }
 0x4a8   : > { %v16596_v6 = vpack.c.bf16 %v14259_v27, %v14259_v27  ;;  %v14260_v4 = vmax.f32 %v14228_v55, 0.0  ;;  %v18344_v14 = vadd.f32 %v23072_v47, %v18258_v44  ;;  %v14038_v59 = vpop.f32.mrb[21].mxu1 }
 0x4a9   : > { %14422 = vst.msk [vmem:[%s23131_s7 + $0x8] sm:$0xf] %vm14419_vm6, %v16598_v21  ;;  %v16599_v38 = vpack.c.bf16 %v14262_v24, %v14262_v24  ;;  %v18353_v53 = vadd.f32 %v23066_v37, %v14038_v59  ;;  %v18259_v60 = vpop.f32.mrb[22].mxu1 }
 0x4aa   : > { %14420 = vst.msk [vmem:[%s23131_s7] sm:$0xf] %vm14419_vm6, %v16596_v6  ;;  %v16597_v31 = vpack.c.bf16 %v14260_v4, %v14260_v4  ;;  %v17786_v45 = vpop.f32.mrb[148].mxu0  ;;  %v14194_v2 = vmul.f32 %v18344_v14, %v23104_v36  ;;  %v18362_v47 = vadd.f32 %v23075_v19, %v18259_v60  ;;  %v14041_v30 = vpop.f32.mrb[23].mxu1 }
 0x4ab   : > { %14423 = vst.msk [vmem:[%s23131_s7 + $0xc] sm:$0xf] %vm14419_vm6, %v16599_v38  ;;  %v17787_v11 = vpop.f32.mrb[149].mxu0  ;;  %v14192_v51 = vmul.f32 %v18353_v53, %v23104_v36  ;;  %v18371_v17 = vadd.f32 %v23069_v43, %v14041_v30 }
 0x4ac   : > { %14421 = vst.msk [vmem:[%s23131_s7 + $0x4] sm:$0xf] %vm14419_vm6, %v16597_v31  ;;  %v14233_v37 = vadd.f32 %v23110_v57, %v14194_v2  ;;  %v17788_v34 = vadd.f32 %v17787_v11, %v17786_v45  ;;  %v17789_v3 = vpop.f32.mrb[150].mxu0  ;;  %v14195_v10 = vmul.f32 %v18362_v47, %v23104_v36 }
 0x4ad   : > { %v14231_v56 = vadd.f32 %v23110_v57, %v14192_v51  ;;  %v17790_v19 = vpop.f32.mrb[151].mxu0  ;;  %v14193_v9 = vmul.f32 %v18371_v17, %v23104_v36 }
 0x4ae   : > { %v14265_v62 = vmax.f32 %v14233_v37, 0.0  ;;  %v14234_v52 = vadd.f32 %v23110_v57, %v14195_v10  ;;  %v17791_v13 = vadd.f32 %v17790_v19, %v17789_v3  ;;  %v23152_v43 = vadd.f32 %v23016_v49, %v17788_v34 }
 0x4af   : > { %v14263_v7 = vmax.f32 %v14231_v56, 0.0  ;;  %v14232_v1 = vadd.f32 %v23110_v57, %v14193_v9 }
 0x4b0   : > { %v16602_v29 = vpack.c.bf16 %v14265_v62, %v14265_v62  ;;  %v14266_v42 = vmax.f32 %v14234_v52, 0.0  ;;  %v23156_v26 = vadd.f32 %v23019_v46, %v17791_v13 }
 0x4b1   : > { %v16600_v40 = vpack.c.bf16 %v14263_v7, %v14263_v7  ;;  %v14264_v63 = vmax.f32 %v14232_v1, 0.0  ;;  %v18262_v27 = vpop.f32.mrb[24].mxu1 }
 0x4b2   : > { %14426 = vst.msk [vmem:[%s23131_s7 + $0x18] sm:$0xf] %vm14419_vm6, %v16602_v29  ;;  %v16603_v55 = vpack.c.bf16 %v14266_v42, %v14266_v42  ;;  %v18380_v21 = vadd.f32 %v23084_v41, %v18262_v27  ;;  %v14054_v49 = vpop.f32.mrb[25].mxu1 }
 0x4b3   : > { %14424 = vst.msk [vmem:[%s23131_s7 + $0x10] sm:$0xf] %vm14419_vm6, %v16600_v40  ;;  %v16601_v24 = vpack.c.bf16 %v14264_v63, %v14264_v63  ;;  %v17792_v44 = vpop.f32.mrb[152].mxu0  ;;  %v18389_v6 = vadd.f32 %v23078_v32, %v14054_v49  ;;  %v18263_v4 = vpop.f32.mrb[26].mxu1 }
 0x4b4   : > { %14427 = vst.msk [vmem:[%s23131_s7 + $0x1c] sm:$0xf] %vm14419_vm6, %v16603_v55  ;;  %v14198_v46 = vmul.f32 %v18380_v21, %v23104_v36  ;;  %v17793_v14 = vpop.f32.mrb[153].mxu0  ;;  %v18398_v59 = vadd.f32 %v23087_v18, %v18263_v4  ;;  %v14057_v38 = vpop.f32.mrb[27].mxu1 }
 0x4b5   : > { %14425 = vst.msk [vmem:[%s23131_s7 + $0x14] sm:$0xf] %vm14419_vm6, %v16601_v24  ;;  %v17794_v53 = vadd.f32 %v17793_v14, %v17792_v44  ;;  %v14196_v41 = vmul.f32 %v18389_v6, %v23104_v36  ;;  %v17795_v60 = vpop.f32.mrb[154].mxu0  ;;  %v18407_v31 = vadd.f32 %v23081_v0, %v14057_v38 }
 0x4b6   : > { %v14237_v45 = vadd.f32 %v23110_v57, %v14198_v46  ;;  %v14199_v32 = vmul.f32 %v18398_v59, %v23104_v36  ;;  %v17796_v2 = vpop.f32.mrb[155].mxu0 }
 0x4b7   : > { %v14235_v47 = vadd.f32 %v23110_v57, %v14196_v41  ;;  %v17797_v30 = vadd.f32 %v17796_v2, %v17795_v60  ;;  %v14197_v18 = vmul.f32 %v18407_v31, %v23104_v36  ;;  %v23177_v11 = vadd.f32 %v23022_v61, %v17794_v53 }
 0x4b8   : > { %v14269_v51 = vmax.f32 %v14237_v45, 0.0  ;;  %v14238_v17 = vadd.f32 %v23110_v57, %v14199_v32 }
 0x4b9   : > { %v14267_v37 = vmax.f32 %v14235_v47, 0.0  ;;  %v14236_v0 = vadd.f32 %v23110_v57, %v14197_v18  ;;  %v23182_v34 = vadd.f32 %v23025_v15, %v17797_v30 }
 0x4ba   : > { %v16606_v3 = vpack.c.bf16 %v14269_v51, %v14269_v51  ;;  %v14270_v10 = vmax.f32 %v14238_v17, 0.0  ;;  %v18266_v56 = vpop.f32.mrb[28].mxu1 }
 0x4bb   : > { %v16604_v19 = vpack.c.bf16 %v14267_v37, %v14267_v37  ;;  %v14268_v9 = vmax.f32 %v14236_v0, 0.0  ;;  %v18416_v62 = vadd.f32 %v23096_v33, %v18266_v56  ;;  %v14070_v61 = vpop.f32.mrb[29].mxu1 }
 0x4bc   : > { %14430 = vst.msk [vmem:[%s23131_s7 + $0x28] sm:$0xf] %vm14419_vm6, %v16606_v3  ;;  %v16607_v52 = vpack.c.bf16 %v14270_v10, %v14270_v10  ;;  %v17798_v13 = vpop.f32.mrb[156].mxu0  ;;  %v18425_v7 = vadd.f32 %v23090_v12, %v14070_v61  ;;  %v18267_v1 = vpop.f32.mrb[30].mxu1 }
 0x4bd   : > { %14428 = vst.msk [vmem:[%s23131_s7 + $0x20] sm:$0xf] %vm14419_vm6, %v16604_v19  ;;  %v16605_v15 = vpack.c.bf16 %v14268_v9, %v14268_v9  ;;  %v14202_v29 = vmul.f32 %v18416_v62, %v23104_v36  ;;  %v17799_v42 = vpop.f32.mrb[157].mxu0  ;;  %v18434_v40 = vadd.f32 %v23099_v25, %v18267_v1  ;;  %v14073_v63 = vpop.f32.mrb[31].mxu1 }
 0x4be   : > { %14431 = vst.msk [vmem:[%s23131_s7 + $0x2c] sm:$0xf] %vm14419_vm6, %v16607_v52  ;;  %v17800_v33 = vadd.f32 %v17799_v42, %v17798_v13  ;;  %v14200_v27 = vmul.f32 %v18425_v7, %v23104_v36  ;;  %v17801_v55 = vpop.f32.mrb[158].mxu0  ;;  %v18443_v21 = vadd.f32 %v23093_v35, %v14073_v63 }
 0x4bf   : > { %14429 = vst.msk [vmem:[%s23131_s7 + $0x24] sm:$0xf] %vm14419_vm6, %v16605_v15  ;;  %v14241_v12 = vadd.f32 %v23110_v57, %v14202_v29  ;;  %v14203_v49 = vmul.f32 %v18434_v40, %v23104_v36  ;;  %v17802_v24 = vpop.f32.mrb[159].mxu0 }
 0x4c0   : > { %v14239_v44 = vadd.f32 %v23110_v57, %v14200_v27  ;;  %v17803_v6 = vadd.f32 %v17802_v24, %v17801_v55  ;;  %v14201_v25 = vmul.f32 %v18443_v21, %v23104_v36  ;;  %v18487_v4 = vadd.f32 %v23028_v39, %v17800_v33 }
 0x4c1   : > { %v14273_v46 = vmax.f32 %v14241_v12, 0.0  ;;  %v14242_v14 = vadd.f32 %v23110_v57, %v14203_v49 }
 0x4c2   : > { %v14271_v59 = vmax.f32 %v14239_v44, 0.0  ;;  %v14240_v35 = vadd.f32 %v23110_v57, %v14201_v25  ;;  %v18505_v38 = vadd.f32 %v23031_v16, %v17803_v6 }
 0x4c3   : > { %v16610_v53 = vpack.c.bf16 %v14273_v46, %v14273_v46  ;;  %v14274_v41 = vmax.f32 %v14242_v14, 0.0  ;;  %v18270_v60 = vpop.f32.mrb[32].mxu1 }
 0x4c4   : > { %v16608_v31 = vpack.c.bf16 %v14271_v59, %v14271_v59  ;;  %v14272_v45 = vmax.f32 %v14240_v35, 0.0  ;;  %v17804_v32 = vpop.f32.mrb[160].mxu0  ;;  %v18452_v2 = vadd.f32 %v23152_v43, %v18270_v60  ;;  %v14086_v47 = vpop.f32.mrb[33].mxu1 }
 0x4c5   : > { %14434 = vst.msk [vmem:[%s23131_s7 + $0x38] sm:$0xf] %vm14419_vm6, %v16610_v53  ;;  %v16611_v39 = vpack.c.bf16 %v14274_v41, %v14274_v41  ;;  %v17805_v30 = vpop.f32.mrb[161].mxu0  ;;  %v18461_v18 = vadd.f32 %v23123_v23, %v14086_v47  ;;  %v18271_v51 = vpop.f32.mrb[34].mxu1 }
 0x4c6   : > { %14432 = vst.msk [vmem:[%s23131_s7 + $0x30] sm:$0xf] %vm14419_vm6, %v16608_v31  ;;  %v16609_v16 = vpack.c.bf16 %v14272_v45, %v14272_v45  ;;  %v14206_v17 = vmul.f32 %v18452_v2, %v23104_v36  ;;  %v17806_v37 = vadd.f32 %v17805_v30, %v17804_v32  ;;  %v17807_v0 = vpop.f32.mrb[162].mxu0  ;;  %v18470_v3 = vadd.f32 %v23156_v26, %v18271_v51  ;;  %v14089_v10 = vpop.f32.mrb[35].mxu1 }
 0x4c7   : > { %14435 = vst.msk [vmem:[%s23131_s7 + $0x3c] sm:$0xf] %vm14419_vm6, %v16611_v39  ;;  %v14204_v43 = vmul.f32 %v18461_v18, %v23104_v36  ;;  %v17808_v56 = vpop.f32.mrb[163].mxu0  ;;  %v18479_v19 = vadd.f32 %v23128_v58, %v14089_v10 }
 0x4c8   : > { %14433 = vst.msk [vmem:[%s23131_s7 + $0x34] sm:$0xf] %vm14419_vm6, %v16609_v16  ;;  %v14245_v23 = vadd.f32 %v23110_v57, %v14206_v17  ;;  %v14207_v9 = vmul.f32 %v18470_v3, %v23104_v36  ;;  %v17809_v62 = vadd.f32 %v17808_v56, %v17807_v0  ;;  %v18532_v61 = vadd.f32 %v23034_v22, %v17806_v37 }
 0x4c9   : > { %v14243_v52 = vadd.f32 %v23110_v57, %v14204_v43  ;;  %v14205_v26 = vmul.f32 %v18479_v19, %v23104_v36 }
 0x4ca   : > { %v14277_v13 = vmax.f32 %v14245_v23, 0.0  ;;  %v14246_v7 = vadd.f32 %v23110_v57, %v14207_v9  ;;  %v18550_v1 = vadd.f32 %v23037_v8, %v17809_v62 }
 0x4cb   : > { %v14275_v58 = vmax.f32 %v14243_v52, 0.0  ;;  %v14244_v15 = vadd.f32 %v23110_v57, %v14205_v26  ;;  %v18274_v29 = vpop.f32.mrb[36].mxu1 }
 0x4cc   : > { %v16614_v42 = vpack.c.bf16 %v14277_v13, %v14277_v13  ;;  %v14278_v40 = vmax.f32 %v14246_v7, 0.0  ;;  %v18488_v63 = vadd.f32 %v18487_v4, %v18274_v29  ;;  %v14102_v33 = vpop.f32.mrb[37].mxu1 }
 0x4cd   : > { %v16612_v22 = vpack.c.bf16 %v14275_v58, %v14275_v58  ;;  %v14276_v27 = vmax.f32 %v14244_v15, 0.0  ;;  %v17810_v55 = vpop.f32.mrb[164].mxu0  ;;  %v18497_v21 = vadd.f32 %v23177_v11, %v14102_v33  ;;  %v18275_v12 = vpop.f32.mrb[38].mxu1 }
 0x4ce   : > { %14438 = vst.msk [vmem:[%s23131_s7 + $0x48] sm:$0xf] %vm14419_vm6, %v16614_v42  ;;  %v16615_v8 = vpack.c.bf16 %v14278_v40, %v14278_v40  ;;  %v14210_v49 = vmul.f32 %v18488_v63, %v23104_v36  ;;  %v17811_v24 = vpop.f32.mrb[165].mxu0  ;;  %v18506_v44 = vadd.f32 %v18505_v38, %v18275_v12  ;;  %v14105_v6 = vpop.f32.mrb[39].mxu1 }
 0x4cf   : > { %14436 = vst.msk [vmem:[%s23131_s7 + $0x40] sm:$0xf] %vm14419_vm6, %v16612_v22  ;;  %v16613_v25 = vpack.c.bf16 %v14276_v27, %v14276_v27  ;;  %v17812_v4 = vadd.f32 %v17811_v24, %v17810_v55  ;;  %v14208_v46 = vmul.f32 %v18497_v21, %v23104_v36  ;;  %v17813_v14 = vpop.f32.mrb[166].mxu0  ;;  %v18515_v59 = vadd.f32 %v23182_v34, %v14105_v6 }
 0x4d0   : > { %14439 = vst.msk [vmem:[%s23131_s7 + $0x4c] sm:$0xf] %vm14419_vm6, %v16615_v8  ;;  %v14249_v11 = vadd.f32 %v23110_v57, %v14210_v49  ;;  %v14211_v35 = vmul.f32 %v18506_v44, %v23104_v36  ;;  %v17814_v53 = vpop.f32.mrb[167].mxu0 }
 0x4d1   : > { %14437 = vst.msk [vmem:[%s23131_s7 + $0x44] sm:$0xf] %vm14419_vm6, %v16613_v25  ;;  %v14247_v38 = vadd.f32 %v23110_v57, %v14208_v46  ;;  %v17815_v41 = vadd.f32 %v17814_v53, %v17813_v14  ;;  %v14209_v60 = vmul.f32 %v18515_v59, %v23104_v36  ;;  %v18523_v31 = vadd.f32 %v23040_v48, %v17812_v4 }
 0x4d2   : > { %v14281_v45 = vmax.f32 %v14249_v11, 0.0  ;;  %v14250_v34 = vadd.f32 %v23110_v57, %v14211_v35 }
 0x4d3   : > { %v14279_v32 = vmax.f32 %v14247_v38, 0.0  ;;  %v14248_v2 = vadd.f32 %v23110_v57, %v14209_v60  ;;  %v18541_v47 = vadd.f32 %v23043_v5, %v17815_v41 }
 0x4d4   : > { %v16618_v39 = vpack.c.bf16 %v14281_v45, %v14281_v45  ;;  %v14282_v30 = vmax.f32 %v14250_v34, 0.0  ;;  %v18278_v18 = vpop.f32.mrb[40].mxu1 }
 0x4d5   : > { %v16616_v51 = vpack.c.bf16 %v14279_v32, %v14279_v32  ;;  %v14280_v16 = vmax.f32 %v14248_v2, 0.0  ;;  %v18524_v17 = vadd.f32 %v18523_v31, %v18278_v18  ;;  %v14118_v37 = vpop.f32.mrb[41].mxu1 }
 0x4d6   : > { %14442 = vst.msk [vmem:[%s23131_s7 + $0x58] sm:$0xf] %vm14419_vm6, %v16618_v39  ;;  %v16619_v48 = vpack.c.bf16 %v14282_v30, %v14282_v30  ;;  %v17816_v0 = vpop.f32.mrb[168].mxu0  ;;  %v18533_v3 = vadd.f32 %v18532_v61, %v14118_v37  ;;  %v18279_v10 = vpop.f32.mrb[42].mxu1 }
 0x4d7   : > { %14440 = vst.msk [vmem:[%s23131_s7 + $0x50] sm:$0xf] %vm14419_vm6, %v16616_v51  ;;  %v16617_v43 = vpack.c.bf16 %v14280_v16, %v14280_v16  ;;  %v14214_v5 = vmul.f32 %v18524_v17, %v23104_v36  ;;  %v17817_v56 = vpop.f32.mrb[169].mxu0  ;;  %v18542_v19 = vadd.f32 %v18541_v47, %v18279_v10  ;;  %v14121_v23 = vpop.f32.mrb[43].mxu1 }
 0x4d8   : > { %14443 = vst.msk [vmem:[%s23131_s7 + $0x5c] sm:$0xf] %vm14419_vm6, %v16619_v48  ;;  %v17818_v9 = vadd.f32 %v17817_v56, %v17816_v0  ;;  %v14212_v62 = vmul.f32 %v18533_v3, %v23104_v36  ;;  %v17819_v52 = vpop.f32.mrb[170].mxu0  ;;  %v18551_v26 = vadd.f32 %v18550_v1, %v14121_v23 }
 0x4d9   : > { %14441 = vst.msk [vmem:[%s23131_s7 + $0x54] sm:$0xf] %vm14419_vm6, %v16617_v43  ;;  %v14253_v61 = vadd.f32 %v23110_v57, %v14214_v5  ;;  %v14215_v13 = vmul.f32 %v18542_v19, %v23104_v36  ;;  %v17820_v7 = vpop.f32.mrb[171].mxu0 }
 0x4da   : > { %v14251_v58 = vadd.f32 %v23110_v57, %v14212_v62  ;;  %v17821_v15 = vadd.f32 %v17820_v7, %v17819_v52  ;;  %v14213_v29 = vmul.f32 %v18551_v26, %v23104_v36  ;;  %v18568_v42 = vadd.f32 %v23046_v50, %v17818_v9 }
 0x4db   : > { %v14285_v40 = vmax.f32 %v14253_v61, 0.0  ;;  %v14254_v63 = vadd.f32 %v23110_v57, %v14215_v13 }
 0x4dc   : > { %v14283_v1 = vmax.f32 %v14251_v58, 0.0  ;;  %v14252_v33 = vadd.f32 %v23110_v57, %v14213_v29  ;;  %v18586_v22 = vadd.f32 %v23049_v28, %v17821_v15 }
 0x4dd   : > { %v16622_v27 = vpack.c.bf16 %v14285_v40, %v14285_v40  ;;  %v14286_v55 = vmax.f32 %v14254_v63, 0.0  ;;  %v18282_v21 = vpop.f32.mrb[44].mxu1 }
 0x4de   : > { %v16620_v12 = vpack.c.bf16 %v14283_v1, %v14283_v1  ;;  %v14284_v8 = vmax.f32 %v14252_v33, 0.0  ;;  %v14134_v49 = vpop.f32.mrb[45].mxu1 }
 0x4df   : > { %14446 = vst.msk [vmem:[%s23131_s7 + $0x68] sm:$0xf] %vm14419_vm6, %v16622_v27  ;;  %v16623_v50 = vpack.c.bf16 %v14286_v55, %v14286_v55  ;;  %v17822_v24 = vpop.f32.mrb[172].mxu0  ;;  %v18569_v44 = vadd.f32 %v18568_v42, %v14134_v49  ;;  %v18283_v6 = vpop.f32.mrb[46].mxu1 }
 0x4e0   : > { %14444 = vst.msk [vmem:[%s23131_s7 + $0x60] sm:$0xf] %vm14419_vm6, %v16620_v12  ;;  %v16621_v25 = vpack.c.bf16 %v14284_v8, %v14284_v8  ;;  %v17823_v4 = vpop.f32.mrb[173].mxu0  ;;  %v14137_v28 = vpop.f32.mrb[47].mxu1 }
 0x4e1   : > { %14447 = vst.msk [vmem:[%s23131_s7 + $0x6c] sm:$0xf] %vm14419_vm6, %v16623_v50  ;;  %v17824_v46 = vadd.f32 %v17823_v4, %v17822_v24  ;;  %v14216_v14 = vmul.f32 %v18569_v44, %v23104_v36  ;;  %v17825_v59 = vpop.f32.mrb[174].mxu0  ;;  %v18587_v11 = vadd.f32 %v18586_v22, %v14137_v28 }
 0x4e2   : > { %14445 = vst.msk [vmem:[%s23131_s7 + $0x64] sm:$0xf] %vm14419_vm6, %v16621_v25  ;;  %v17826_v35 = vpop.f32.mrb[175].mxu0 }
 0x4e3   : > { %v18559_v53 = vadd.f32 %v23052_v54, %v17824_v46  ;;  %v14255_v38 = vadd.f32 %v23110_v57, %v14216_v14  ;;  %v17827_v41 = vadd.f32 %v17826_v35, %v17825_v59  ;;  %v14217_v60 = vmul.f32 %v18587_v11, %v23104_v36 }
 0x4e5   : > { %v18560_v31 = vadd.f32 %v18559_v53, %v18282_v21  ;;  %v14287_v45 = vmax.f32 %v14255_v38, 0.0  ;;  %v18577_v34 = vadd.f32 %v23055_v20, %v17827_v41  ;;  %v14256_v32 = vadd.f32 %v23110_v57, %v14217_v60 }
 0x4e7   : > { %v14218_v2 = vmul.f32 %v18560_v31, %v23104_v36  ;;  %v16624_v47 = vpack.c.bf16 %v14287_v45, %v14287_v45  ;;  %v18578_v54 = vadd.f32 %v18577_v34, %v18283_v6  ;;  %v14288_v39 = vmax.f32 %v14256_v32, 0.0 }
 0x4e9   : > { %v14257_v30 = vadd.f32 %v23110_v57, %v14218_v2  ;;  %14448 = vst.msk [vmem:[%s23131_s7 + $0x70] sm:$0xf] %vm14419_vm6, %v16624_v47  ;;  %v14219_v18 = vmul.f32 %v18578_v54, %v23104_v36  ;;  %v16625_v20 = vpack.c.bf16 %v14288_v39, %v14288_v39 }
 0x4eb   : > { %v14289_v51 = vmax.f32 %v14257_v30, 0.0  ;;  %v14258_v16 = vadd.f32 %v23110_v57, %v14219_v18  ;;  %14449 = vst.msk [vmem:[%s23131_s7 + $0x74] sm:$0xf] %vm14419_vm6, %v16625_v20 }
 0x4ed   : > { %v16626_v17 = vpack.c.bf16 %v14289_v51, %v14289_v51  ;;  %v14290_v37 = vmax.f32 %v14258_v16, 0.0 }
 0x4ef   : > { %14450 = vst.msk [vmem:[%s23131_s7 + $0x78] sm:$0xf] %vm14419_vm6, %v16626_v17  ;;  %v16627_v36 = vpack.c.bf16 %v14290_v37, %v14290_v37 }
 0x4f1   : > { %14451 = vst.msk [vmem:[%s23131_s7 + $0x7c] sm:$0xf] %vm14419_vm6, %v16627_v36 }
 0x4f2   : > { %19295 = shalt.err (!%p19292_p10)
}
 0x4f3   : > { %s19296_s20 = scalar_lea.hbm %s23294_s29, 2048  ;;  %s19300_s18 = scalar_lea.hbm %s23362_s6, 24576 }
 0x4f4   : > { %p19297_p11 = scmp.ne.s32.totalorder %s23294_s29, %s19296_s20  ;;  %p19301_p0 = scmp.lt.u32.totalorder %s23294_s29, %s23362_s6 }
 0x4f5   : > { %p19302_p1 = scmp.lt.u32.totalorder %s19300_s18, %s19296_s20  ;;  %p19304_p4 = scmp.lt.u32.totalorder %s19296_s20, %s23294_s29 }
 0x4f6   : > { %p19298_p12 = pnand %p19297_p11, %p19467_p3 }
 0x4f7   : > { %p19303_p2 = por %p19302_p1, %p19301_p0 }
 0x4f8   : > { %p19299_p13 = pneg %p19298_p12 }
 0x4f9   : > { %p19305_p5 = por %p19304_p4, %p19303_p2 }
 0x4fb   : > { %p19306_p6 = pnand %p19305_p5, %p19299_p13 }
 0x4fd   : > { %19309 = shalt.err (!%p19306_p6)
}
 0x4fe   : > { %s19379_s24 = smov 64   ;;  %s19380_s16 = smov 4  }
 0x4ff   : > { %18849 = dma.vmem_to_hbm [thread:$0]  (%p19467_p3), %s23296_s25, 2048, %s23294_s29, %s23304_s27, %s19379_s24, %s19379_s24, %s19380_s16  }
 0x500 PF: > { %p18855_p7 = scmp.ge.s32.totalorder %s19376_s28, 2  ;;  %s14483_s17 = sand.u32 1, %s19348_s21  }
 0x501   : > { %s14484_s19 = scalar_lea.sflag [#allocation4], %s14483_s17 }
 0x502   : > { %p18852_p9 = pnand %p18855_p7, %p19476_p8 }
 0x504   : > { %19343 = dma.done.wait (!%p18852_p9), %s14484_s19, 2048  }
 0x505   : > { %19345 = vsyncadd (!%p18852_p9), %s14484_s19, 4294965248  ;;  %s19_s28 = sadd.s32 1, %s19376_s28   ;;  %s23412_s25 = sld [smem:[#allocation6_spill]] }
 0x506   : > { %p16_p10 = scmp.ge.s32.totalorder %s19_s28, 14   ;;  %s23413_s10 = sld [smem:[#allocation7_spill]] }
 0x507   : > { %s23414_s27 = sld [smem:[#allocation8_spill]]  ;;  %s23415_s21 = smov %s19352_s22 }
 0x508   : > { %s23416_s22 = smov %s19356_s23  ;;  %s23417_s23 = smov %s19485_s15 }
 0x509   : > { %s23418_s24 = smov %s19368_s26  ;;  %18 = sbr.rel (!%p16_p10) target bundleno = 5 (0x5), region = 100 }
 0x50c   : > { %s23419_s26 = smov %s23413_s10 }
 0x510   :  { %14489 = vsyncpa [#allocation4], 1 }
 0x511   :  { %14491 = vsyncpa [#allocation4 + $0x1], 1 }

</bundles_post_ra>
